<compile_context>
chip_gen: v5e
topology: v5e:2x2
jax: 0.10.0
libtpu: 0.0.40
codegen_flags: <defaults>
</compile_context>

<pallas_src>
import functools

import jax
import jax.numpy as jnp
from jax.experimental import pallas as pl
from jax.experimental.pallas import tpu as pltpu

EPS = 1e-5  # nn.LayerNorm default eps

# Order of the (pre-fused / packed) parameter tensors handed to the kernel.
PARAM_ORDER = [
    "attn_w",   # [L*2, D, D]   bf16  per layer: (seq_to_graph fused, graph_to_seq fused)
    "ffn_w1",   # [L*2, D, 4D]  bf16  per layer: (seq_ffn, graph_ffn)
    "ffn_w2",   # [L*2, 4D, D]  bf16
    "gate_w",   # [2D, D]       bf16  fusion_gate Linear(2D->D), rows = [seq half; graph half]
    "proj_w",   # [D, D]        bf16  output_proj Linear
    "vec",      # [12L+4, D]    f32   packed: attn_b | ln_w | ln_b | ffn_b2 | (gate_b, proj_b, proj_ln_w, proj_ln_b)
    "ffn_b1",   # [L*2, 4D]     f32
]


def _layernorm(x, w, b):
    # PyTorch LayerNorm: biased variance over last dim, two-pass form (f32).
    mean = jnp.mean(x, axis=-1, keepdims=True)
    c = x - mean
    var = jnp.mean(c * c, axis=-1, keepdims=True)
    return c * jax.lax.rsqrt(var + EPS) * w + b


def _mm(x, w):
    # bf16 MXU inputs, f32 accumulation.
    return jnp.dot(x.astype(w.dtype), w, preferred_element_type=jnp.float32)


def fusion_kernel(seq_ref, graph_ref,
                  attn_w_ref, ffn_w1_ref, ffn_w2_ref,
                  gate_w_ref, proj_w_ref,
                  vec_ref, ffn_b1_ref,
                  out_ref,
                  *, num_layers):
    f32 = jnp.float32
    L = num_layers
    seq = seq_ref[...].astype(f32)
    graph = graph_ref[...].astype(f32)
    seq_orig = seq
    graph_orig = graph

    # TODO(synk): dropout layers are identity (eval mode); no RNG masking emitted.
    for l in range(L):                       # num_layers is static -> unrolled
        a = 2 * l                            # attention / ffn weight row base
        ab = a                               # attn_b rows in the packed vec table
        lw = 2 * L + 4 * l                   # ln_w rows (graph1, seq1, seq2, graph2)
        lb = 6 * L + 4 * l                   # ln_b rows
        f2 = 10 * L + a                      # ffn_b2 rows

        # --- seq_to_graph attention (kv len == 1): single fused affine map ---
        graph_attn = _mm(seq, attn_w_ref[a]) + vec_ref[ab:ab + 1]
        graph_res = _layernorm(graph + graph_attn, vec_ref[lw:lw + 1], vec_ref[lb:lb + 1])

        # --- graph_to_seq attention ---
        seq_attn = _mm(graph, attn_w_ref[a + 1]) + vec_ref[ab + 1:ab + 2]
        seq_res = _layernorm(seq + seq_attn, vec_ref[lw + 1:lw + 2], vec_ref[lb + 1:lb + 2])

        # --- seq FFN (Linear -> GELU(tanh approx, EUP) -> Linear) + residual + LN ---
        h = jax.nn.gelu(_mm(seq_res, ffn_w1_ref[a]) + ffn_b1_ref[a:a + 1], approximate=True)
        ff = _mm(h, ffn_w2_ref[a]) + vec_ref[f2:f2 + 1]
        seq = _layernorm(seq_res + ff, vec_ref[lw + 2:lw + 3], vec_ref[lb + 2:lb + 3])

        # --- graph FFN ---
        hg = jax.nn.gelu(_mm(graph_res, ffn_w1_ref[a + 1]) + ffn_b1_ref[a + 1:a + 2],
                         approximate=True)
        ffg = _mm(hg, ffn_w2_ref[a + 1]) + vec_ref[f2 + 1:f2 + 2]
        graph = _layernorm(graph_res + ffg, vec_ref[lw + 3:lw + 4], vec_ref[lb + 3:lb + 4])

    t = 12 * L  # tail rows: gate_b, proj_b, proj_ln_w, proj_ln_b
    # global residuals
    seq = seq + seq_orig
    graph = graph + graph_orig

    # fusion gate: one K=2D matmul (full 256-wide MXU fill on v6e/v7x)
    cat = jnp.concatenate([seq, graph], axis=-1)
    gate = jax.nn.sigmoid(_mm(cat, gate_w_ref[...]) + vec_ref[t:t + 1])
    fused = gate * seq + (1.0 - gate) * graph

    # output projection: Linear + LayerNorm
    proj = _mm(fused, proj_w_ref[...]) + vec_ref[t + 1:t + 2]
    out = _layernorm(proj, vec_ref[t + 2:t + 3], vec_ref[t + 3:t + 4])
    out_ref[...] = out.astype(out_ref.dtype)


def _pick_block_b(B):
    """Single grid step for small/medium B; 256-row tiles (multiple of 16, never 8)
    only when B is large enough that per-core tiles stay MXU-filling (dual-TC v7x)."""
    if B <= 256:
        return B
    return 256


def prepare_params(p, *, weight_dtype=jnp.bfloat16):
    """Fuse v_proj/out_proj offline, pack all small f32 vectors into one [R, D]
    table, cast matmul weights to the MXU dtype."""
    L, D, _ = p["sg_v_w"].shape
    H = p["ffn_w1"].shape[-1]

    # out_proj(v_proj(x)) == x @ (Wv @ Wo) + (bv @ Wo + bo)   (softmax == 1 exactly)
    sg_w = jnp.einsum("lij,ljk->lik", p["sg_v_w"], p["sg_o_w"])
    sg_b = jnp.einsum("lj,ljk->lk", p["sg_v_b"], p["sg_o_w"]) + p["sg_o_b"]
    gs_w = jnp.einsum("lij,ljk->lik", p["gs_v_w"], p["gs_o_w"])
    gs_b = jnp.einsum("lj,ljk->lk", p["gs_v_b"], p["gs_o_w"]) + p["gs_o_b"]

    attn_w = jnp.stack([sg_w, gs_w], axis=1).reshape(2 * L, D, D)
    attn_b = jnp.stack([sg_b, gs_b], axis=1).reshape(2 * L, D)

    vec = jnp.concatenate([
        attn_b,                                   # rows [0, 2L)
        p["ln_w"].reshape(4 * L, D),              # rows [2L, 6L)
        p["ln_b"].reshape(4 * L, D),              # rows [6L, 10L)
        p["ffn_b2"].reshape(2 * L, D),            # rows [10L, 12L)
        jnp.stack([p["gate_b"], p["proj_b"],
                   p["proj_ln_w"], p["proj_ln_b"]], axis=0),  # rows [12L, 12L+4)
    ], axis=0).astype(jnp.float32)

    wd = weight_dtype
    # TODO(synk): int8 (v5e/v6e) or fp8-e4m3 (v7x) weight quantization with per-channel
    # scales would halve the dominant weight-DMA cost at production D; bf16 kept here.
    return dict(
        attn_w=attn_w.astype(wd),
        ffn_w1=p["ffn_w1"].reshape(2 * L, D, H).astype(wd),
        ffn_w2=p["ffn_w2"].reshape(2 * L, H, D).astype(wd),
        gate_w=p["gate_w"].reshape(2 * D, D).astype(wd),
        proj_w=p["proj_w"].astype(wd),
        vec=vec,
        ffn_b1=p["ffn_b1"].reshape(2 * L, H).astype(jnp.float32),
    )


def cross_attention_fusion(seq, graph, raw_params, *, num_layers, block_b=None,
                           weight_dtype=jnp.bfloat16, vmem_limit_bytes=None):
    B, D = seq.shape
    if block_b is None:
        block_b = _pick_block_b(B)
    grid = (pl.cdiv(B, block_b),)

    prepared = prepare_params(raw_params, weight_dtype=weight_dtype)
    kernel_args = [prepared[k] for k in PARAM_ORDER]

    if vmem_limit_bytes is None:
        # 1x weights (single-buffered) + double-buffered batch IO tiles + f32
        # activation-intermediate headroom; never below the v5e scoped default
        # (16 MiB), capped at 48 MiB to leave Mosaic scratch room on v7x (64 MiB).
        param_bytes = sum(int(a.size) * a.dtype.itemsize for a in kernel_args)
        io_bytes = 2 * 3 * block_b * D * seq.dtype.itemsize
        act_bytes = 12 * block_b * 4 * D * 4
        vmem_limit_bytes = int(min(max(param_bytes + io_bytes + act_bytes, 16 << 20),
                                   48 << 20))

    batch_spec = lambda: pl.BlockSpec((block_b, D), lambda i: (i, 0))
    kernel = functools.partial(fusion_kernel, num_layers=num_layers)
    out_shape = jax.ShapeDtypeStruct((B, D), seq.dtype)
    cparams = pltpu.CompilerParams(dimension_semantics=("parallel",),
                                   vmem_limit_bytes=vmem_limit_bytes)

    def build(single_buffer_weights):
        def full_spec(arr):
            zeros = (0,) * arr.ndim
            # Constant block index across the grid -> DMA'd once by the pipeline.
            if single_buffer_weights:
                return pl.BlockSpec(arr.shape, lambda i, z=zeros: z,
                                    pipeline_mode=pl.Buffered(1))
            return pl.BlockSpec(arr.shape, lambda i, z=zeros: z)

        # TODO(synk): for very large D (e.g. D>=1024 on v7x) the all-weights-resident
        # design should switch to memory_space=pl.ANY + per-layer streamed FFN weights
        # (pltpu.emit_pipeline) since (18L+3)*D^2*2 bytes no longer fits VMEM.
        in_specs = [batch_spec(), batch_spec()] + [full_spec(a) for a in kernel_args]
        return pl.pallas_call(
            kernel,
            out_shape=out_shape,
            grid=grid,
            in_specs=in_specs,
            out_specs=batch_spec(),
            compiler_params=cparams)

    try:
        return build(True)(seq, graph, *kernel_args)
    except Exception:
        # Fallback for JAX builds that reject single-buffered (Buffered(1)) BlockSpecs.
        return build(False)(seq, graph, *kernel_args)


def init_params(key, D, num_layers):
    """Raw (unfused, f32) parameters mirroring the PyTorch module (eval mode).

    Only the v_proj / out_proj slices of each MultiheadAttention are materialized:
    with kv-length 1 the q/k projections cannot affect the output (softmax == 1).
    """
    H = 4 * D
    L = num_layers
    ks = jax.random.split(key, 20)
    w = lambda k, shape, s=0.05: jax.random.normal(k, shape, jnp.float32) * s
    return dict(
        sg_v_w=w(ks[0], (L, D, D)), sg_v_b=w(ks[1], (L, D)),
        sg_o_w=w(ks[2], (L, D, D)), sg_o_b=w(ks[3], (L, D)),
        gs_v_w=w(ks[4], (L, D, D)), gs_v_b=w(ks[5], (L, D)),
        gs_o_w=w(ks[6], (L, D, D)), gs_o_b=w(ks[7], (L, D)),
        ln_w=1.0 + w(ks[8], (L, 4, D)), ln_b=w(ks[9], (L, 4, D)),
        ffn_w1=w(ks[10], (L, 2, D, H)), ffn_b1=w(ks[11], (L, 2, H)),
        ffn_w2=w(ks[12], (L, 2, H, D)), ffn_b2=w(ks[13], (L, 2, D)),
        gate_w=w(ks[14], (2, D, D)), gate_b=w(ks[15], (D,)),
        proj_w=w(ks[16], (D, D)), proj_b=w(ks[17], (D,)),
        proj_ln_w=jnp.ones((D,), jnp.float32), proj_ln_b=jnp.zeros((D,), jnp.float32),
    )


def reference_forward(seq, graph, p, num_layers):
    """Pure-JAX f32 reference mirroring the PyTorch forward (eval mode, exact GELU)."""
    def ln(x, w, b):
        m = jnp.mean(x, -1, keepdims=True)
        v = jnp.mean((x - m) ** 2, -1, keepdims=True)
        return (x - m) * jax.lax.rsqrt(v + EPS) * w + b

    seq_orig, graph_orig = seq, graph
    for l in range(num_layers):
        v = seq @ p["sg_v_w"][l] + p["sg_v_b"][l]
        graph_attn = v @ p["sg_o_w"][l] + p["sg_o_b"][l]
        graph_res = ln(graph + graph_attn, p["ln_w"][l, 0], p["ln_b"][l, 0])
        v2 = graph @ p["gs_v_w"][l] + p["gs_v_b"][l]
        seq_attn = v2 @ p["gs_o_w"][l] + p["gs_o_b"][l]
        seq_res = ln(seq + seq_attn, p["ln_w"][l, 1], p["ln_b"][l, 1])
        h = jax.nn.gelu(seq_res @ p["ffn_w1"][l, 0] + p["ffn_b1"][l, 0], approximate=False)
        seq = ln(seq_res + h @ p["ffn_w2"][l, 0] + p["ffn_b2"][l, 0],
                 p["ln_w"][l, 2], p["ln_b"][l, 2])
        hg = jax.nn.gelu(graph_res @ p["ffn_w1"][l, 1] + p["ffn_b1"][l, 1], approximate=False)
        graph = ln(graph_res + hg @ p["ffn_w2"][l, 1] + p["ffn_b2"][l, 1],
                   p["ln_w"][l, 3], p["ln_b"][l, 3])
    seq = seq + seq_orig
    graph = graph + graph_orig
    gate = jax.nn.sigmoid(seq @ p["gate_w"][0] + graph @ p["gate_w"][1] + p["gate_b"])
    fused = gate * seq + (1.0 - gate) * graph
    proj = fused @ p["proj_w"] + p["proj_b"]
    return ln(proj, p["proj_ln_w"], p["proj_ln_b"])


if __name__ == "__main__":
    B, D, NUM_LAYERS = 16, 128, 2  # small shapes: batch=16, embedding_dim=128
    key = jax.random.PRNGKey(0)
    k_seq, k_graph, k_params = jax.random.split(key, 3)

    seq_embedding = jax.random.normal(k_seq, (B, D), jnp.float32)
    graph_embedding = jax.random.normal(k_graph, (B, D), jnp.float32)
    params = init_params(k_params, D, NUM_LAYERS)

    out = cross_attention_fusion(seq_embedding, graph_embedding, params,
                                 num_layers=NUM_LAYERS)
    out = jax.block_until_ready(out)

    ref = jax.block_until_ready(
        reference_forward(seq_embedding, graph_embedding, params, NUM_LAYERS))
    assert out.shape == (B, D)
    # Loose tolerance: weights/activations are fed to the MXU in bf16 (f32 accum)
    # and GELU uses the tanh approximation (reference uses exact erf GELU).
    assert jnp.allclose(out, ref, atol=5e-2, rtol=5e-2), (
        f"max abs diff {float(jnp.max(jnp.abs(out - ref)))}")

    print("KERNEL_OK")
</pallas_src>

<mosaic_0001>
module attributes {stable_mosaic.version = 11 : i64} {
  func.func @fusion_kernel(%arg0: i32, %arg1: memref<16x128xf32, #tpu.memory_space<vmem>>, %arg2: memref<16x128xf32, #tpu.memory_space<vmem>>, %arg3: memref<4x128x128xbf16, #tpu.memory_space<vmem>>, %arg4: memref<4x128x512xbf16, #tpu.memory_space<vmem>>, %arg5: memref<4x512x128xbf16, #tpu.memory_space<vmem>>, %arg6: memref<256x128xbf16, #tpu.memory_space<vmem>>, %arg7: memref<128x128xbf16, #tpu.memory_space<vmem>>, %arg8: memref<28x128xf32, #tpu.memory_space<vmem>>, %arg9: memref<4x512xf32, #tpu.memory_space<vmem>>, %arg10: memref<16x128xf32, #tpu.memory_space<vmem>>) attributes {dimension_semantics = [#tpu.dimension_semantics<parallel>], iteration_bounds = array<i64: 1>, scalar_prefetch = 0 : i64, scratch_operands = 0 : i64, tpu.core_type = #tpu.core_type<tc>, window_params = [{transform_indices = @transform_0, window_bounds = array<i64: 16, 128>}, {transform_indices = @transform_1, window_bounds = array<i64: 16, 128>}, {pipeline_mode = #tpu.pipeline_mode<synchronous>, transform_indices = @transform_2, window_bounds = array<i64: 4, 128, 128>}, {pipeline_mode = #tpu.pipeline_mode<synchronous>, transform_indices = @transform_3, window_bounds = array<i64: 4, 128, 512>}, {pipeline_mode = #tpu.pipeline_mode<synchronous>, transform_indices = @transform_4, window_bounds = array<i64: 4, 512, 128>}, {pipeline_mode = #tpu.pipeline_mode<synchronous>, transform_indices = @transform_5, window_bounds = array<i64: 256, 128>}, {pipeline_mode = #tpu.pipeline_mode<synchronous>, transform_indices = @transform_6, window_bounds = array<i64: 128, 128>}, {pipeline_mode = #tpu.pipeline_mode<synchronous>, transform_indices = @transform_7, window_bounds = array<i64: 28, 128>}, {pipeline_mode = #tpu.pipeline_mode<synchronous>, transform_indices = @transform_8, window_bounds = array<i64: 4, 512>}, {transform_indices = @transform_9, window_bounds = array<i64: 16, 128>}]} {
    %c0 = arith.constant 0 : index
    %c0_0 = arith.constant 0 : index
    %0 = vector.load %arg1[%c0, %c0_0] : memref<16x128xf32, #tpu.memory_space<vmem>>, vector<16x128xf32>
    %c0_1 = arith.constant 0 : index
    %c0_2 = arith.constant 0 : index
    %1 = vector.load %arg2[%c0_1, %c0_2] : memref<16x128xf32, #tpu.memory_space<vmem>>, vector<16x128xf32>
    %c0_3 = arith.constant 0 : index
    %c0_4 = arith.constant 0 : index
    %c0_5 = arith.constant 0 : index
    %2 = vector.load %arg3[%c0_3, %c0_4, %c0_5] : memref<4x128x128xbf16, #tpu.memory_space<vmem>>, vector<1x128x128xbf16>
    %3 = vector.shape_cast %2 : vector<1x128x128xbf16> to vector<128x128xbf16>
    %4 = arith.truncf %0 : vector<16x128xf32> to vector<16x128xbf16>
    %cst = arith.constant dense<0.000000e+00> : vector<16x128xf32>
    %5 = tpu.matmul %4, %3, %cst {dimension_numbers = #tpu.dot_dimension_numbers<[1], [0], [0], [1], [0, 0, 1, 1], [], []>} : vector<16x128xbf16>, vector<128x128xbf16>, vector<16x128xf32> -> vector<16x128xf32>
    %c0_6 = arith.constant 0 : index
    %c0_7 = arith.constant 0 : index
    %6 = vector.load %arg8[%c0_6, %c0_7] : memref<28x128xf32, #tpu.memory_space<vmem>>, vector<1x128xf32>
    %7 = vector.broadcast %6 : vector<1x128xf32> to vector<16x128xf32>
    %8 = arith.addf %5, %7 : vector<16x128xf32>
    %9 = arith.addf %1, %8 : vector<16x128xf32>
    %c4 = arith.constant 4 : index
    %c0_8 = arith.constant 0 : index
    %10 = vector.load %arg8[%c4, %c0_8] : memref<28x128xf32, #tpu.memory_space<vmem>>, vector<1x128xf32>
    %c12 = arith.constant 12 : index
    %c0_9 = arith.constant 0 : index
    %11 = vector.load %arg8[%c12, %c0_9] : memref<28x128xf32, #tpu.memory_space<vmem>>, vector<1x128xf32>
    %cst_10 = arith.constant dense<0.000000e+00> : vector<16xf32>
    %12 = vector.multi_reduction <add>, %9, %cst_10 [1] : vector<16x128xf32> to vector<16xf32>
    %13 = vector.shape_cast %12 : vector<16xf32> to vector<16x1xf32>
    %cst_11 = arith.constant 1.280000e+02 : f32
    %14 = vector.broadcast %cst_11 : f32 to vector<16x1xf32>
    %15 = arith.divf %13, %14 : vector<16x1xf32>
    %16 = vector.broadcast %15 : vector<16x1xf32> to vector<16x128xf32>
    %17 = arith.subf %9, %16 : vector<16x128xf32>
    %18 = arith.mulf %17, %17 : vector<16x128xf32>
    %cst_12 = arith.constant dense<0.000000e+00> : vector<16xf32>
    %19 = vector.multi_reduction <add>, %18, %cst_12 [1] : vector<16x128xf32> to vector<16xf32>
    %20 = vector.shape_cast %19 : vector<16xf32> to vector<16x1xf32>
    %cst_13 = arith.constant 1.280000e+02 : f32
    %21 = vector.broadcast %cst_13 : f32 to vector<16x1xf32>
    %22 = arith.divf %20, %21 : vector<16x1xf32>
    %cst_14 = arith.constant 9.99999974E-6 : f32
    %23 = vector.broadcast %cst_14 : f32 to vector<16x1xf32>
    %24 = arith.addf %22, %23 : vector<16x1xf32>
    %25 = math.rsqrt %24 : vector<16x1xf32>
    %26 = vector.broadcast %25 : vector<16x1xf32> to vector<16x128xf32>
    %27 = arith.mulf %17, %26 : vector<16x128xf32>
    %28 = vector.broadcast %10 : vector<1x128xf32> to vector<16x128xf32>
    %29 = arith.mulf %27, %28 : vector<16x128xf32>
    %30 = vector.broadcast %11 : vector<1x128xf32> to vector<16x128xf32>
    %31 = arith.addf %29, %30 : vector<16x128xf32>
    %c1 = arith.constant 1 : index
    %c0_15 = arith.constant 0 : index
    %c0_16 = arith.constant 0 : index
    %32 = vector.load %arg3[%c1, %c0_15, %c0_16] : memref<4x128x128xbf16, #tpu.memory_space<vmem>>, vector<1x128x128xbf16>
    %33 = vector.shape_cast %32 : vector<1x128x128xbf16> to vector<128x128xbf16>
    %34 = arith.truncf %1 : vector<16x128xf32> to vector<16x128xbf16>
    %cst_17 = arith.constant dense<0.000000e+00> : vector<16x128xf32>
    %35 = tpu.matmul %34, %33, %cst_17 {dimension_numbers = #tpu.dot_dimension_numbers<[1], [0], [0], [1], [0, 0, 1, 1], [], []>} : vector<16x128xbf16>, vector<128x128xbf16>, vector<16x128xf32> -> vector<16x128xf32>
    %c1_18 = arith.constant 1 : index
    %c0_19 = arith.constant 0 : index
    %36 = vector.load %arg8[%c1_18, %c0_19] : memref<28x128xf32, #tpu.memory_space<vmem>>, vector<1x128xf32>
    %37 = vector.broadcast %36 : vector<1x128xf32> to vector<16x128xf32>
    %38 = arith.addf %35, %37 : vector<16x128xf32>
    %39 = arith.addf %0, %38 : vector<16x128xf32>
    %c5 = arith.constant 5 : index
    %c0_20 = arith.constant 0 : index
    %40 = vector.load %arg8[%c5, %c0_20] : memref<28x128xf32, #tpu.memory_space<vmem>>, vector<1x128xf32>
    %c13 = arith.constant 13 : index
    %c0_21 = arith.constant 0 : index
    %41 = vector.load %arg8[%c13, %c0_21] : memref<28x128xf32, #tpu.memory_space<vmem>>, vector<1x128xf32>
    %cst_22 = arith.constant dense<0.000000e+00> : vector<16xf32>
    %42 = vector.multi_reduction <add>, %39, %cst_22 [1] : vector<16x128xf32> to vector<16xf32>
    %43 = vector.shape_cast %42 : vector<16xf32> to vector<16x1xf32>
    %cst_23 = arith.constant 1.280000e+02 : f32
    %44 = vector.broadcast %cst_23 : f32 to vector<16x1xf32>
    %45 = arith.divf %43, %44 : vector<16x1xf32>
    %46 = vector.broadcast %45 : vector<16x1xf32> to vector<16x128xf32>
    %47 = arith.subf %39, %46 : vector<16x128xf32>
    %48 = arith.mulf %47, %47 : vector<16x128xf32>
    %cst_24 = arith.constant dense<0.000000e+00> : vector<16xf32>
    %49 = vector.multi_reduction <add>, %48, %cst_24 [1] : vector<16x128xf32> to vector<16xf32>
    %50 = vector.shape_cast %49 : vector<16xf32> to vector<16x1xf32>
    %cst_25 = arith.constant 1.280000e+02 : f32
    %51 = vector.broadcast %cst_25 : f32 to vector<16x1xf32>
    %52 = arith.divf %50, %51 : vector<16x1xf32>
    %cst_26 = arith.constant 9.99999974E-6 : f32
    %53 = vector.broadcast %cst_26 : f32 to vector<16x1xf32>
    %54 = arith.addf %52, %53 : vector<16x1xf32>
    %55 = math.rsqrt %54 : vector<16x1xf32>
    %56 = vector.broadcast %55 : vector<16x1xf32> to vector<16x128xf32>
    %57 = arith.mulf %47, %56 : vector<16x128xf32>
    %58 = vector.broadcast %40 : vector<1x128xf32> to vector<16x128xf32>
    %59 = arith.mulf %57, %58 : vector<16x128xf32>
    %60 = vector.broadcast %41 : vector<1x128xf32> to vector<16x128xf32>
    %61 = arith.addf %59, %60 : vector<16x128xf32>
    %c0_27 = arith.constant 0 : index
    %c0_28 = arith.constant 0 : index
    %c0_29 = arith.constant 0 : index
    %62 = vector.load %arg4[%c0_27, %c0_28, %c0_29] : memref<4x128x512xbf16, #tpu.memory_space<vmem>>, vector<1x128x512xbf16>
    %63 = vector.shape_cast %62 : vector<1x128x512xbf16> to vector<128x512xbf16>
    %64 = arith.truncf %61 : vector<16x128xf32> to vector<16x128xbf16>
    %cst_30 = arith.constant dense<0.000000e+00> : vector<16x512xf32>
    %65 = tpu.matmul %64, %63, %cst_30 {dimension_numbers = #tpu.dot_dimension_numbers<[1], [0], [0], [1], [0, 0, 1, 1], [], []>} : vector<16x128xbf16>, vector<128x512xbf16>, vector<16x512xf32> -> vector<16x512xf32>
    %c0_31 = arith.constant 0 : index
    %c0_32 = arith.constant 0 : index
    %66 = vector.load %arg9[%c0_31, %c0_32] : memref<4x512xf32, #tpu.memory_space<vmem>>, vector<1x512xf32>
    %67 = vector.broadcast %66 : vector<1x512xf32> to vector<16x512xf32>
    %68 = arith.addf %65, %67 : vector<16x512xf32>
    %69 = arith.mulf %68, %68 : vector<16x512xf32>
    %70 = arith.mulf %68, %69 : vector<16x512xf32>
    %cst_33 = arith.constant 4.471500e-02 : f32
    %71 = vector.broadcast %cst_33 : f32 to vector<16x512xf32>
    %72 = arith.mulf %71, %70 : vector<16x512xf32>
    %73 = arith.addf %68, %72 : vector<16x512xf32>
    %cst_34 = arith.constant 0.797884583 : f32
    %74 = vector.broadcast %cst_34 : f32 to vector<16x512xf32>
    %75 = arith.mulf %74, %73 : vector<16x512xf32>
    %76 = math.tanh %75 : vector<16x512xf32>
    %cst_35 = arith.constant 1.000000e+00 : f32
    %77 = vector.broadcast %cst_35 : f32 to vector<16x512xf32>
    %78 = arith.addf %77, %76 : vector<16x512xf32>
    %cst_36 = arith.constant 5.000000e-01 : f32
    %79 = vector.broadcast %cst_36 : f32 to vector<16x512xf32>
    %80 = arith.mulf %79, %78 : vector<16x512xf32>
    %81 = arith.mulf %68, %80 : vector<16x512xf32>
    %c0_37 = arith.constant 0 : index
    %c0_38 = arith.constant 0 : index
    %c0_39 = arith.constant 0 : index
    %82 = vector.load %arg5[%c0_37, %c0_38, %c0_39] : memref<4x512x128xbf16, #tpu.memory_space<vmem>>, vector<1x512x128xbf16>
    %83 = vector.shape_cast %82 : vector<1x512x128xbf16> to vector<512x128xbf16>
    %84 = arith.truncf %81 : vector<16x512xf32> to vector<16x512xbf16>
    %cst_40 = arith.constant dense<0.000000e+00> : vector<16x128xf32>
    %85 = tpu.matmul %84, %83, %cst_40 {dimension_numbers = #tpu.dot_dimension_numbers<[1], [0], [0], [1], [0, 0, 1, 1], [], []>} : vector<16x512xbf16>, vector<512x128xbf16>, vector<16x128xf32> -> vector<16x128xf32>
    %c20 = arith.constant 20 : index
    %c0_41 = arith.constant 0 : index
    %86 = vector.load %arg8[%c20, %c0_41] : memref<28x128xf32, #tpu.memory_space<vmem>>, vector<1x128xf32>
    %87 = vector.broadcast %86 : vector<1x128xf32> to vector<16x128xf32>
    %88 = arith.addf %85, %87 : vector<16x128xf32>
    %89 = arith.addf %61, %88 : vector<16x128xf32>
    %c6 = arith.constant 6 : index
    %c0_42 = arith.constant 0 : index
    %90 = vector.load %arg8[%c6, %c0_42] : memref<28x128xf32, #tpu.memory_space<vmem>>, vector<1x128xf32>
    %c14 = arith.constant 14 : index
    %c0_43 = arith.constant 0 : index
    %91 = vector.load %arg8[%c14, %c0_43] : memref<28x128xf32, #tpu.memory_space<vmem>>, vector<1x128xf32>
    %cst_44 = arith.constant dense<0.000000e+00> : vector<16xf32>
    %92 = vector.multi_reduction <add>, %89, %cst_44 [1] : vector<16x128xf32> to vector<16xf32>
    %93 = vector.shape_cast %92 : vector<16xf32> to vector<16x1xf32>
    %cst_45 = arith.constant 1.280000e+02 : f32
    %94 = vector.broadcast %cst_45 : f32 to vector<16x1xf32>
    %95 = arith.divf %93, %94 : vector<16x1xf32>
    %96 = vector.broadcast %95 : vector<16x1xf32> to vector<16x128xf32>
    %97 = arith.subf %89, %96 : vector<16x128xf32>
    %98 = arith.mulf %97, %97 : vector<16x128xf32>
    %cst_46 = arith.constant dense<0.000000e+00> : vector<16xf32>
    %99 = vector.multi_reduction <add>, %98, %cst_46 [1] : vector<16x128xf32> to vector<16xf32>
    %100 = vector.shape_cast %99 : vector<16xf32> to vector<16x1xf32>
    %cst_47 = arith.constant 1.280000e+02 : f32
    %101 = vector.broadcast %cst_47 : f32 to vector<16x1xf32>
    %102 = arith.divf %100, %101 : vector<16x1xf32>
    %cst_48 = arith.constant 9.99999974E-6 : f32
    %103 = vector.broadcast %cst_48 : f32 to vector<16x1xf32>
    %104 = arith.addf %102, %103 : vector<16x1xf32>
    %105 = math.rsqrt %104 : vector<16x1xf32>
    %106 = vector.broadcast %105 : vector<16x1xf32> to vector<16x128xf32>
    %107 = arith.mulf %97, %106 : vector<16x128xf32>
    %108 = vector.broadcast %90 : vector<1x128xf32> to vector<16x128xf32>
    %109 = arith.mulf %107, %108 : vector<16x128xf32>
    %110 = vector.broadcast %91 : vector<1x128xf32> to vector<16x128xf32>
    %111 = arith.addf %109, %110 : vector<16x128xf32>
    %c1_49 = arith.constant 1 : index
    %c0_50 = arith.constant 0 : index
    %c0_51 = arith.constant 0 : index
    %112 = vector.load %arg4[%c1_49, %c0_50, %c0_51] : memref<4x128x512xbf16, #tpu.memory_space<vmem>>, vector<1x128x512xbf16>
    %113 = vector.shape_cast %112 : vector<1x128x512xbf16> to vector<128x512xbf16>
    %114 = arith.truncf %31 : vector<16x128xf32> to vector<16x128xbf16>
    %cst_52 = arith.constant dense<0.000000e+00> : vector<16x512xf32>
    %115 = tpu.matmul %114, %113, %cst_52 {dimension_numbers = #tpu.dot_dimension_numbers<[1], [0], [0], [1], [0, 0, 1, 1], [], []>} : vector<16x128xbf16>, vector<128x512xbf16>, vector<16x512xf32> -> vector<16x512xf32>
    %c1_53 = arith.constant 1 : index
    %c0_54 = arith.constant 0 : index
    %116 = vector.load %arg9[%c1_53, %c0_54] : memref<4x512xf32, #tpu.memory_space<vmem>>, vector<1x512xf32>
    %117 = vector.broadcast %116 : vector<1x512xf32> to vector<16x512xf32>
    %118 = arith.addf %115, %117 : vector<16x512xf32>
    %119 = arith.mulf %118, %118 : vector<16x512xf32>
    %120 = arith.mulf %118, %119 : vector<16x512xf32>
    %cst_55 = arith.constant 4.471500e-02 : f32
    %121 = vector.broadcast %cst_55 : f32 to vector<16x512xf32>
    %122 = arith.mulf %121, %120 : vector<16x512xf32>
    %123 = arith.addf %118, %122 : vector<16x512xf32>
    %cst_56 = arith.constant 0.797884583 : f32
    %124 = vector.broadcast %cst_56 : f32 to vector<16x512xf32>
    %125 = arith.mulf %124, %123 : vector<16x512xf32>
    %126 = math.tanh %125 : vector<16x512xf32>
    %cst_57 = arith.constant 1.000000e+00 : f32
    %127 = vector.broadcast %cst_57 : f32 to vector<16x512xf32>
    %128 = arith.addf %127, %126 : vector<16x512xf32>
    %cst_58 = arith.constant 5.000000e-01 : f32
    %129 = vector.broadcast %cst_58 : f32 to vector<16x512xf32>
    %130 = arith.mulf %129, %128 : vector<16x512xf32>
    %131 = arith.mulf %118, %130 : vector<16x512xf32>
    %c1_59 = arith.constant 1 : index
    %c0_60 = arith.constant 0 : index
    %c0_61 = arith.constant 0 : index
    %132 = vector.load %arg5[%c1_59, %c0_60, %c0_61] : memref<4x512x128xbf16, #tpu.memory_space<vmem>>, vector<1x512x128xbf16>
    %133 = vector.shape_cast %132 : vector<1x512x128xbf16> to vector<512x128xbf16>
    %134 = arith.truncf %131 : vector<16x512xf32> to vector<16x512xbf16>
    %cst_62 = arith.constant dense<0.000000e+00> : vector<16x128xf32>
    %135 = tpu.matmul %134, %133, %cst_62 {dimension_numbers = #tpu.dot_dimension_numbers<[1], [0], [0], [1], [0, 0, 1, 1], [], []>} : vector<16x512xbf16>, vector<512x128xbf16>, vector<16x128xf32> -> vector<16x128xf32>
    %c21 = arith.constant 21 : index
    %c0_63 = arith.constant 0 : index
    %136 = vector.load %arg8[%c21, %c0_63] : memref<28x128xf32, #tpu.memory_space<vmem>>, vector<1x128xf32>
    %137 = vector.broadcast %136 : vector<1x128xf32> to vector<16x128xf32>
    %138 = arith.addf %135, %137 : vector<16x128xf32>
    %139 = arith.addf %31, %138 : vector<16x128xf32>
    %c7 = arith.constant 7 : index
    %c0_64 = arith.constant 0 : index
    %140 = vector.load %arg8[%c7, %c0_64] : memref<28x128xf32, #tpu.memory_space<vmem>>, vector<1x128xf32>
    %c15 = arith.constant 15 : index
    %c0_65 = arith.constant 0 : index
    %141 = vector.load %arg8[%c15, %c0_65] : memref<28x128xf32, #tpu.memory_space<vmem>>, vector<1x128xf32>
    %cst_66 = arith.constant dense<0.000000e+00> : vector<16xf32>
    %142 = vector.multi_reduction <add>, %139, %cst_66 [1] : vector<16x128xf32> to vector<16xf32>
    %143 = vector.shape_cast %142 : vector<16xf32> to vector<16x1xf32>
    %cst_67 = arith.constant 1.280000e+02 : f32
    %144 = vector.broadcast %cst_67 : f32 to vector<16x1xf32>
    %145 = arith.divf %143, %144 : vector<16x1xf32>
    %146 = vector.broadcast %145 : vector<16x1xf32> to vector<16x128xf32>
    %147 = arith.subf %139, %146 : vector<16x128xf32>
    %148 = arith.mulf %147, %147 : vector<16x128xf32>
    %cst_68 = arith.constant dense<0.000000e+00> : vector<16xf32>
    %149 = vector.multi_reduction <add>, %148, %cst_68 [1] : vector<16x128xf32> to vector<16xf32>
    %150 = vector.shape_cast %149 : vector<16xf32> to vector<16x1xf32>
    %cst_69 = arith.constant 1.280000e+02 : f32
    %151 = vector.broadcast %cst_69 : f32 to vector<16x1xf32>
    %152 = arith.divf %150, %151 : vector<16x1xf32>
    %cst_70 = arith.constant 9.99999974E-6 : f32
    %153 = vector.broadcast %cst_70 : f32 to vector<16x1xf32>
    %154 = arith.addf %152, %153 : vector<16x1xf32>
    %155 = math.rsqrt %154 : vector<16x1xf32>
    %156 = vector.broadcast %155 : vector<16x1xf32> to vector<16x128xf32>
    %157 = arith.mulf %147, %156 : vector<16x128xf32>
    %158 = vector.broadcast %140 : vector<1x128xf32> to vector<16x128xf32>
    %159 = arith.mulf %157, %158 : vector<16x128xf32>
    %160 = vector.broadcast %141 : vector<1x128xf32> to vector<16x128xf32>
    %161 = arith.addf %159, %160 : vector<16x128xf32>
    %c2 = arith.constant 2 : index
    %c0_71 = arith.constant 0 : index
    %c0_72 = arith.constant 0 : index
    %162 = vector.load %arg3[%c2, %c0_71, %c0_72] : memref<4x128x128xbf16, #tpu.memory_space<vmem>>, vector<1x128x128xbf16>
    %163 = vector.shape_cast %162 : vector<1x128x128xbf16> to vector<128x128xbf16>
    %164 = arith.truncf %111 : vector<16x128xf32> to vector<16x128xbf16>
    %cst_73 = arith.constant dense<0.000000e+00> : vector<16x128xf32>
    %165 = tpu.matmul %164, %163, %cst_73 {dimension_numbers = #tpu.dot_dimension_numbers<[1], [0], [0], [1], [0, 0, 1, 1], [], []>} : vector<16x128xbf16>, vector<128x128xbf16>, vector<16x128xf32> -> vector<16x128xf32>
    %c2_74 = arith.constant 2 : index
    %c0_75 = arith.constant 0 : index
    %166 = vector.load %arg8[%c2_74, %c0_75] : memref<28x128xf32, #tpu.memory_space<vmem>>, vector<1x128xf32>
    %167 = vector.broadcast %166 : vector<1x128xf32> to vector<16x128xf32>
    %168 = arith.addf %165, %167 : vector<16x128xf32>
    %169 = arith.addf %161, %168 : vector<16x128xf32>
    %c8 = arith.constant 8 : index
    %c0_76 = arith.constant 0 : index
    %170 = vector.load %arg8[%c8, %c0_76] : memref<28x128xf32, #tpu.memory_space<vmem>>, vector<1x128xf32>
    %c16 = arith.constant 16 : index
    %c0_77 = arith.constant 0 : index
    %171 = vector.load %arg8[%c16, %c0_77] : memref<28x128xf32, #tpu.memory_space<vmem>>, vector<1x128xf32>
    %cst_78 = arith.constant dense<0.000000e+00> : vector<16xf32>
    %172 = vector.multi_reduction <add>, %169, %cst_78 [1] : vector<16x128xf32> to vector<16xf32>
    %173 = vector.shape_cast %172 : vector<16xf32> to vector<16x1xf32>
    %cst_79 = arith.constant 1.280000e+02 : f32
    %174 = vector.broadcast %cst_79 : f32 to vector<16x1xf32>
    %175 = arith.divf %173, %174 : vector<16x1xf32>
    %176 = vector.broadcast %175 : vector<16x1xf32> to vector<16x128xf32>
    %177 = arith.subf %169, %176 : vector<16x128xf32>
    %178 = arith.mulf %177, %177 : vector<16x128xf32>
    %cst_80 = arith.constant dense<0.000000e+00> : vector<16xf32>
    %179 = vector.multi_reduction <add>, %178, %cst_80 [1] : vector<16x128xf32> to vector<16xf32>
    %180 = vector.shape_cast %179 : vector<16xf32> to vector<16x1xf32>
    %cst_81 = arith.constant 1.280000e+02 : f32
    %181 = vector.broadcast %cst_81 : f32 to vector<16x1xf32>
    %182 = arith.divf %180, %181 : vector<16x1xf32>
    %cst_82 = arith.constant 9.99999974E-6 : f32
    %183 = vector.broadcast %cst_82 : f32 to vector<16x1xf32>
    %184 = arith.addf %182, %183 : vector<16x1xf32>
    %185 = math.rsqrt %184 : vector<16x1xf32>
    %186 = vector.broadcast %185 : vector<16x1xf32> to vector<16x128xf32>
    %187 = arith.mulf %177, %186 : vector<16x128xf32>
    %188 = vector.broadcast %170 : vector<1x128xf32> to vector<16x128xf32>
    %189 = arith.mulf %187, %188 : vector<16x128xf32>
    %190 = vector.broadcast %171 : vector<1x128xf32> to vector<16x128xf32>
    %191 = arith.addf %189, %190 : vector<16x128xf32>
    %c3 = arith.constant 3 : index
    %c0_83 = arith.constant 0 : index
    %c0_84 = arith.constant 0 : index
    %192 = vector.load %arg3[%c3, %c0_83, %c0_84] : memref<4x128x128xbf16, #tpu.memory_space<vmem>>, vector<1x128x128xbf16>
    %193 = vector.shape_cast %192 : vector<1x128x128xbf16> to vector<128x128xbf16>
    %194 = arith.truncf %161 : vector<16x128xf32> to vector<16x128xbf16>
    %cst_85 = arith.constant dense<0.000000e+00> : vector<16x128xf32>
    %195 = tpu.matmul %194, %193, %cst_85 {dimension_numbers = #tpu.dot_dimension_numbers<[1], [0], [0], [1], [0, 0, 1, 1], [], []>} : vector<16x128xbf16>, vector<128x128xbf16>, vector<16x128xf32> -> vector<16x128xf32>
    %c3_86 = arith.constant 3 : index
    %c0_87 = arith.constant 0 : index
    %196 = vector.load %arg8[%c3_86, %c0_87] : memref<28x128xf32, #tpu.memory_space<vmem>>, vector<1x128xf32>
    %197 = vector.broadcast %196 : vector<1x128xf32> to vector<16x128xf32>
    %198 = arith.addf %195, %197 : vector<16x128xf32>
    %199 = arith.addf %111, %198 : vector<16x128xf32>
    %c9 = arith.constant 9 : index
    %c0_88 = arith.constant 0 : index
    %200 = vector.load %arg8[%c9, %c0_88] : memref<28x128xf32, #tpu.memory_space<vmem>>, vector<1x128xf32>
    %c17 = arith.constant 17 : index
    %c0_89 = arith.constant 0 : index
    %201 = vector.load %arg8[%c17, %c0_89] : memref<28x128xf32, #tpu.memory_space<vmem>>, vector<1x128xf32>
    %cst_90 = arith.constant dense<0.000000e+00> : vector<16xf32>
    %202 = vector.multi_reduction <add>, %199, %cst_90 [1] : vector<16x128xf32> to vector<16xf32>
    %203 = vector.shape_cast %202 : vector<16xf32> to vector<16x1xf32>
    %cst_91 = arith.constant 1.280000e+02 : f32
    %204 = vector.broadcast %cst_91 : f32 to vector<16x1xf32>
    %205 = arith.divf %203, %204 : vector<16x1xf32>
    %206 = vector.broadcast %205 : vector<16x1xf32> to vector<16x128xf32>
    %207 = arith.subf %199, %206 : vector<16x128xf32>
    %208 = arith.mulf %207, %207 : vector<16x128xf32>
    %cst_92 = arith.constant dense<0.000000e+00> : vector<16xf32>
    %209 = vector.multi_reduction <add>, %208, %cst_92 [1] : vector<16x128xf32> to vector<16xf32>
    %210 = vector.shape_cast %209 : vector<16xf32> to vector<16x1xf32>
    %cst_93 = arith.constant 1.280000e+02 : f32
    %211 = vector.broadcast %cst_93 : f32 to vector<16x1xf32>
    %212 = arith.divf %210, %211 : vector<16x1xf32>
    %cst_94 = arith.constant 9.99999974E-6 : f32
    %213 = vector.broadcast %cst_94 : f32 to vector<16x1xf32>
    %214 = arith.addf %212, %213 : vector<16x1xf32>
    %215 = math.rsqrt %214 : vector<16x1xf32>
    %216 = vector.broadcast %215 : vector<16x1xf32> to vector<16x128xf32>
    %217 = arith.mulf %207, %216 : vector<16x128xf32>
    %218 = vector.broadcast %200 : vector<1x128xf32> to vector<16x128xf32>
    %219 = arith.mulf %217, %218 : vector<16x128xf32>
    %220 = vector.broadcast %201 : vector<1x128xf32> to vector<16x128xf32>
    %221 = arith.addf %219, %220 : vector<16x128xf32>
    %c2_95 = arith.constant 2 : index
    %c0_96 = arith.constant 0 : index
    %c0_97 = arith.constant 0 : index
    %222 = vector.load %arg4[%c2_95, %c0_96, %c0_97] : memref<4x128x512xbf16, #tpu.memory_space<vmem>>, vector<1x128x512xbf16>
    %223 = vector.shape_cast %222 : vector<1x128x512xbf16> to vector<128x512xbf16>
    %224 = arith.truncf %221 : vector<16x128xf32> to vector<16x128xbf16>
    %cst_98 = arith.constant dense<0.000000e+00> : vector<16x512xf32>
    %225 = tpu.matmul %224, %223, %cst_98 {dimension_numbers = #tpu.dot_dimension_numbers<[1], [0], [0], [1], [0, 0, 1, 1], [], []>} : vector<16x128xbf16>, vector<128x512xbf16>, vector<16x512xf32> -> vector<16x512xf32>
    %c2_99 = arith.constant 2 : index
    %c0_100 = arith.constant 0 : index
    %226 = vector.load %arg9[%c2_99, %c0_100] : memref<4x512xf32, #tpu.memory_space<vmem>>, vector<1x512xf32>
    %227 = vector.broadcast %226 : vector<1x512xf32> to vector<16x512xf32>
    %228 = arith.addf %225, %227 : vector<16x512xf32>
    %229 = arith.mulf %228, %228 : vector<16x512xf32>
    %230 = arith.mulf %228, %229 : vector<16x512xf32>
    %cst_101 = arith.constant 4.471500e-02 : f32
    %231 = vector.broadcast %cst_101 : f32 to vector<16x512xf32>
    %232 = arith.mulf %231, %230 : vector<16x512xf32>
    %233 = arith.addf %228, %232 : vector<16x512xf32>
    %cst_102 = arith.constant 0.797884583 : f32
    %234 = vector.broadcast %cst_102 : f32 to vector<16x512xf32>
    %235 = arith.mulf %234, %233 : vector<16x512xf32>
    %236 = math.tanh %235 : vector<16x512xf32>
    %cst_103 = arith.constant 1.000000e+00 : f32
    %237 = vector.broadcast %cst_103 : f32 to vector<16x512xf32>
    %238 = arith.addf %237, %236 : vector<16x512xf32>
    %cst_104 = arith.constant 5.000000e-01 : f32
    %239 = vector.broadcast %cst_104 : f32 to vector<16x512xf32>
    %240 = arith.mulf %239, %238 : vector<16x512xf32>
    %241 = arith.mulf %228, %240 : vector<16x512xf32>
    %c2_105 = arith.constant 2 : index
    %c0_106 = arith.constant 0 : index
    %c0_107 = arith.constant 0 : index
    %242 = vector.load %arg5[%c2_105, %c0_106, %c0_107] : memref<4x512x128xbf16, #tpu.memory_space<vmem>>, vector<1x512x128xbf16>
    %243 = vector.shape_cast %242 : vector<1x512x128xbf16> to vector<512x128xbf16>
    %244 = arith.truncf %241 : vector<16x512xf32> to vector<16x512xbf16>
    %cst_108 = arith.constant dense<0.000000e+00> : vector<16x128xf32>
    %245 = tpu.matmul %244, %243, %cst_108 {dimension_numbers = #tpu.dot_dimension_numbers<[1], [0], [0], [1], [0, 0, 1, 1], [], []>} : vector<16x512xbf16>, vector<512x128xbf16>, vector<16x128xf32> -> vector<16x128xf32>
    %c22 = arith.constant 22 : index
    %c0_109 = arith.constant 0 : index
    %246 = vector.load %arg8[%c22, %c0_109] : memref<28x128xf32, #tpu.memory_space<vmem>>, vector<1x128xf32>
    %247 = vector.broadcast %246 : vector<1x128xf32> to vector<16x128xf32>
    %248 = arith.addf %245, %247 : vector<16x128xf32>
    %249 = arith.addf %221, %248 : vector<16x128xf32>
    %c10 = arith.constant 10 : index
    %c0_110 = arith.constant 0 : index
    %250 = vector.load %arg8[%c10, %c0_110] : memref<28x128xf32, #tpu.memory_space<vmem>>, vector<1x128xf32>
    %c18 = arith.constant 18 : index
    %c0_111 = arith.constant 0 : index
    %251 = vector.load %arg8[%c18, %c0_111] : memref<28x128xf32, #tpu.memory_space<vmem>>, vector<1x128xf32>
    %cst_112 = arith.constant dense<0.000000e+00> : vector<16xf32>
    %252 = vector.multi_reduction <add>, %249, %cst_112 [1] : vector<16x128xf32> to vector<16xf32>
    %253 = vector.shape_cast %252 : vector<16xf32> to vector<16x1xf32>
    %cst_113 = arith.constant 1.280000e+02 : f32
    %254 = vector.broadcast %cst_113 : f32 to vector<16x1xf32>
    %255 = arith.divf %253, %254 : vector<16x1xf32>
    %256 = vector.broadcast %255 : vector<16x1xf32> to vector<16x128xf32>
    %257 = arith.subf %249, %256 : vector<16x128xf32>
    %258 = arith.mulf %257, %257 : vector<16x128xf32>
    %cst_114 = arith.constant dense<0.000000e+00> : vector<16xf32>
    %259 = vector.multi_reduction <add>, %258, %cst_114 [1] : vector<16x128xf32> to vector<16xf32>
    %260 = vector.shape_cast %259 : vector<16xf32> to vector<16x1xf32>
    %cst_115 = arith.constant 1.280000e+02 : f32
    %261 = vector.broadcast %cst_115 : f32 to vector<16x1xf32>
    %262 = arith.divf %260, %261 : vector<16x1xf32>
    %cst_116 = arith.constant 9.99999974E-6 : f32
    %263 = vector.broadcast %cst_116 : f32 to vector<16x1xf32>
    %264 = arith.addf %262, %263 : vector<16x1xf32>
    %265 = math.rsqrt %264 : vector<16x1xf32>
    %266 = vector.broadcast %265 : vector<16x1xf32> to vector<16x128xf32>
    %267 = arith.mulf %257, %266 : vector<16x128xf32>
    %268 = vector.broadcast %250 : vector<1x128xf32> to vector<16x128xf32>
    %269 = arith.mulf %267, %268 : vector<16x128xf32>
    %270 = vector.broadcast %251 : vector<1x128xf32> to vector<16x128xf32>
    %271 = arith.addf %269, %270 : vector<16x128xf32>
    %c3_117 = arith.constant 3 : index
    %c0_118 = arith.constant 0 : index
    %c0_119 = arith.constant 0 : index
    %272 = vector.load %arg4[%c3_117, %c0_118, %c0_119] : memref<4x128x512xbf16, #tpu.memory_space<vmem>>, vector<1x128x512xbf16>
    %273 = vector.shape_cast %272 : vector<1x128x512xbf16> to vector<128x512xbf16>
    %274 = arith.truncf %191 : vector<16x128xf32> to vector<16x128xbf16>
    %cst_120 = arith.constant dense<0.000000e+00> : vector<16x512xf32>
    %275 = tpu.matmul %274, %273, %cst_120 {dimension_numbers = #tpu.dot_dimension_numbers<[1], [0], [0], [1], [0, 0, 1, 1], [], []>} : vector<16x128xbf16>, vector<128x512xbf16>, vector<16x512xf32> -> vector<16x512xf32>
    %c3_121 = arith.constant 3 : index
    %c0_122 = arith.constant 0 : index
    %276 = vector.load %arg9[%c3_121, %c0_122] : memref<4x512xf32, #tpu.memory_space<vmem>>, vector<1x512xf32>
    %277 = vector.broadcast %276 : vector<1x512xf32> to vector<16x512xf32>
    %278 = arith.addf %275, %277 : vector<16x512xf32>
    %279 = arith.mulf %278, %278 : vector<16x512xf32>
    %280 = arith.mulf %278, %279 : vector<16x512xf32>
    %cst_123 = arith.constant 4.471500e-02 : f32
    %281 = vector.broadcast %cst_123 : f32 to vector<16x512xf32>
    %282 = arith.mulf %281, %280 : vector<16x512xf32>
    %283 = arith.addf %278, %282 : vector<16x512xf32>
    %cst_124 = arith.constant 0.797884583 : f32
    %284 = vector.broadcast %cst_124 : f32 to vector<16x512xf32>
    %285 = arith.mulf %284, %283 : vector<16x512xf32>
    %286 = math.tanh %285 : vector<16x512xf32>
    %cst_125 = arith.constant 1.000000e+00 : f32
    %287 = vector.broadcast %cst_125 : f32 to vector<16x512xf32>
    %288 = arith.addf %287, %286 : vector<16x512xf32>
    %cst_126 = arith.constant 5.000000e-01 : f32
    %289 = vector.broadcast %cst_126 : f32 to vector<16x512xf32>
    %290 = arith.mulf %289, %288 : vector<16x512xf32>
    %291 = arith.mulf %278, %290 : vector<16x512xf32>
    %c3_127 = arith.constant 3 : index
    %c0_128 = arith.constant 0 : index
    %c0_129 = arith.constant 0 : index
    %292 = vector.load %arg5[%c3_127, %c0_128, %c0_129] : memref<4x512x128xbf16, #tpu.memory_space<vmem>>, vector<1x512x128xbf16>
    %293 = vector.shape_cast %292 : vector<1x512x128xbf16> to vector<512x128xbf16>
    %294 = arith.truncf %291 : vector<16x512xf32> to vector<16x512xbf16>
    %cst_130 = arith.constant dense<0.000000e+00> : vector<16x128xf32>
    %295 = tpu.matmul %294, %293, %cst_130 {dimension_numbers = #tpu.dot_dimension_numbers<[1], [0], [0], [1], [0, 0, 1, 1], [], []>} : vector<16x512xbf16>, vector<512x128xbf16>, vector<16x128xf32> -> vector<16x128xf32>
    %c23 = arith.constant 23 : index
    %c0_131 = arith.constant 0 : index
    %296 = vector.load %arg8[%c23, %c0_131] : memref<28x128xf32, #tpu.memory_space<vmem>>, vector<1x128xf32>
    %297 = vector.broadcast %296 : vector<1x128xf32> to vector<16x128xf32>
    %298 = arith.addf %295, %297 : vector<16x128xf32>
    %299 = arith.addf %191, %298 : vector<16x128xf32>
    %c11 = arith.constant 11 : index
    %c0_132 = arith.constant 0 : index
    %300 = vector.load %arg8[%c11, %c0_132] : memref<28x128xf32, #tpu.memory_space<vmem>>, vector<1x128xf32>
    %c19 = arith.constant 19 : index
    %c0_133 = arith.constant 0 : index
    %301 = vector.load %arg8[%c19, %c0_133] : memref<28x128xf32, #tpu.memory_space<vmem>>, vector<1x128xf32>
    %cst_134 = arith.constant dense<0.000000e+00> : vector<16xf32>
    %302 = vector.multi_reduction <add>, %299, %cst_134 [1] : vector<16x128xf32> to vector<16xf32>
    %303 = vector.shape_cast %302 : vector<16xf32> to vector<16x1xf32>
    %cst_135 = arith.constant 1.280000e+02 : f32
    %304 = vector.broadcast %cst_135 : f32 to vector<16x1xf32>
    %305 = arith.divf %303, %304 : vector<16x1xf32>
    %306 = vector.broadcast %305 : vector<16x1xf32> to vector<16x128xf32>
    %307 = arith.subf %299, %306 : vector<16x128xf32>
    %308 = arith.mulf %307, %307 : vector<16x128xf32>
    %cst_136 = arith.constant dense<0.000000e+00> : vector<16xf32>
    %309 = vector.multi_reduction <add>, %308, %cst_136 [1] : vector<16x128xf32> to vector<16xf32>
    %310 = vector.shape_cast %309 : vector<16xf32> to vector<16x1xf32>
    %cst_137 = arith.constant 1.280000e+02 : f32
    %311 = vector.broadcast %cst_137 : f32 to vector<16x1xf32>
    %312 = arith.divf %310, %311 : vector<16x1xf32>
    %cst_138 = arith.constant 9.99999974E-6 : f32
    %313 = vector.broadcast %cst_138 : f32 to vector<16x1xf32>
    %314 = arith.addf %312, %313 : vector<16x1xf32>
    %315 = math.rsqrt %314 : vector<16x1xf32>
    %316 = vector.broadcast %315 : vector<16x1xf32> to vector<16x128xf32>
    %317 = arith.mulf %307, %316 : vector<16x128xf32>
    %318 = vector.broadcast %300 : vector<1x128xf32> to vector<16x128xf32>
    %319 = arith.mulf %317, %318 : vector<16x128xf32>
    %320 = vector.broadcast %301 : vector<1x128xf32> to vector<16x128xf32>
    %321 = arith.addf %319, %320 : vector<16x128xf32>
    %322 = arith.addf %271, %0 : vector<16x128xf32>
    %323 = arith.addf %321, %1 : vector<16x128xf32>
    %324 = tpu.concatenate %322, %323 in 1 : vector<16x128xf32>, vector<16x128xf32> -> vector<16x256xf32>
    %c0_139 = arith.constant 0 : index
    %c0_140 = arith.constant 0 : index
    %325 = vector.load %arg6[%c0_139, %c0_140] : memref<256x128xbf16, #tpu.memory_space<vmem>>, vector<256x128xbf16>
    %326 = arith.truncf %324 : vector<16x256xf32> to vector<16x256xbf16>
    %cst_141 = arith.constant dense<0.000000e+00> : vector<16x128xf32>
    %327 = tpu.matmul %326, %325, %cst_141 {dimension_numbers = #tpu.dot_dimension_numbers<[1], [0], [0], [1], [0, 0, 1, 1], [], []>} : vector<16x256xbf16>, vector<256x128xbf16>, vector<16x128xf32> -> vector<16x128xf32>
    %c24 = arith.constant 24 : index
    %c0_142 = arith.constant 0 : index
    %328 = vector.load %arg8[%c24, %c0_142] : memref<28x128xf32, #tpu.memory_space<vmem>>, vector<1x128xf32>
    %329 = vector.broadcast %328 : vector<1x128xf32> to vector<16x128xf32>
    %330 = arith.addf %327, %329 : vector<16x128xf32>
    %331 = arith.negf %330 : vector<16x128xf32>
    %332 = math.exp %331 : vector<16x128xf32>
    %cst_143 = arith.constant 1.000000e+00 : f32
    %333 = vector.broadcast %cst_143 : f32 to vector<16x128xf32>
    %334 = arith.addf %333, %332 : vector<16x128xf32>
    %335 = arith.divf %333, %334 : vector<16x128xf32>
    %336 = arith.mulf %335, %322 : vector<16x128xf32>
    %cst_144 = arith.constant 1.000000e+00 : f32
    %337 = vector.broadcast %cst_144 : f32 to vector<16x128xf32>
    %338 = arith.subf %337, %335 : vector<16x128xf32>
    %339 = arith.mulf %338, %323 : vector<16x128xf32>
    %340 = arith.addf %336, %339 : vector<16x128xf32>
    %c0_145 = arith.constant 0 : index
    %c0_146 = arith.constant 0 : index
    %341 = vector.load %arg7[%c0_145, %c0_146] : memref<128x128xbf16, #tpu.memory_space<vmem>>, vector<128x128xbf16>
    %342 = arith.truncf %340 : vector<16x128xf32> to vector<16x128xbf16>
    %cst_147 = arith.constant dense<0.000000e+00> : vector<16x128xf32>
    %343 = tpu.matmul %342, %341, %cst_147 {dimension_numbers = #tpu.dot_dimension_numbers<[1], [0], [0], [1], [0, 0, 1, 1], [], []>} : vector<16x128xbf16>, vector<128x128xbf16>, vector<16x128xf32> -> vector<16x128xf32>
    %c25 = arith.constant 25 : index
    %c0_148 = arith.constant 0 : index
    %344 = vector.load %arg8[%c25, %c0_148] : memref<28x128xf32, #tpu.memory_space<vmem>>, vector<1x128xf32>
    %345 = vector.broadcast %344 : vector<1x128xf32> to vector<16x128xf32>
    %346 = arith.addf %343, %345 : vector<16x128xf32>
    %c26 = arith.constant 26 : index
    %c0_149 = arith.constant 0 : index
    %347 = vector.load %arg8[%c26, %c0_149] : memref<28x128xf32, #tpu.memory_space<vmem>>, vector<1x128xf32>
    %c27 = arith.constant 27 : index
    %c0_150 = arith.constant 0 : index
    %348 = vector.load %arg8[%c27, %c0_150] : memref<28x128xf32, #tpu.memory_space<vmem>>, vector<1x128xf32>
    %cst_151 = arith.constant dense<0.000000e+00> : vector<16xf32>
    %349 = vector.multi_reduction <add>, %346, %cst_151 [1] : vector<16x128xf32> to vector<16xf32>
    %350 = vector.shape_cast %349 : vector<16xf32> to vector<16x1xf32>
    %cst_152 = arith.constant 1.280000e+02 : f32
    %351 = vector.broadcast %cst_152 : f32 to vector<16x1xf32>
    %352 = arith.divf %350, %351 : vector<16x1xf32>
    %353 = vector.broadcast %352 : vector<16x1xf32> to vector<16x128xf32>
    %354 = arith.subf %346, %353 : vector<16x128xf32>
    %355 = arith.mulf %354, %354 : vector<16x128xf32>
    %cst_153 = arith.constant dense<0.000000e+00> : vector<16xf32>
    %356 = vector.multi_reduction <add>, %355, %cst_153 [1] : vector<16x128xf32> to vector<16xf32>
    %357 = vector.shape_cast %356 : vector<16xf32> to vector<16x1xf32>
    %cst_154 = arith.constant 1.280000e+02 : f32
    %358 = vector.broadcast %cst_154 : f32 to vector<16x1xf32>
    %359 = arith.divf %357, %358 : vector<16x1xf32>
    %cst_155 = arith.constant 9.99999974E-6 : f32
    %360 = vector.broadcast %cst_155 : f32 to vector<16x1xf32>
    %361 = arith.addf %359, %360 : vector<16x1xf32>
    %362 = math.rsqrt %361 : vector<16x1xf32>
    %363 = vector.broadcast %362 : vector<16x1xf32> to vector<16x128xf32>
    %364 = arith.mulf %354, %363 : vector<16x128xf32>
    %365 = vector.broadcast %347 : vector<1x128xf32> to vector<16x128xf32>
    %366 = arith.mulf %364, %365 : vector<16x128xf32>
    %367 = vector.broadcast %348 : vector<1x128xf32> to vector<16x128xf32>
    %368 = arith.addf %366, %367 : vector<16x128xf32>
    %c0_156 = arith.constant 0 : index
    %c0_157 = arith.constant 0 : index
    %369 = vector.load %arg10[%c0_156, %c0_157] : memref<16x128xf32, #tpu.memory_space<vmem>>, vector<16x128xf32>
    tpu.vector_store %arg10[%c0_156, %c0_157], %368 {strides = array<i32>} : memref<16x128xf32, #tpu.memory_space<vmem>>, vector<16x128xf32>,
    return
  }
  func.func @transform_0(%arg0: i32) -> (i32, i32) {
    %c0_i32 = arith.constant 0 : i32
    %c0_i32_0 = arith.constant 0 : i32
    return %arg0, %c0_i32 : i32, i32
  }
  func.func @transform_1(%arg0: i32) -> (i32, i32) {
    %c0_i32 = arith.constant 0 : i32
    %c0_i32_0 = arith.constant 0 : i32
    return %arg0, %c0_i32 : i32, i32
  }
  func.func @transform_2(%arg0: i32) -> (i32, i32, i32) {
    %c0_i32 = arith.constant 0 : i32
    %c0_i32_0 = arith.constant 0 : i32
    %c0_i32_1 = arith.constant 0 : i32
    %c0_i32_2 = arith.constant 0 : i32
    return %c0_i32, %c0_i32_0, %c0_i32_1 : i32, i32, i32
  }
  func.func @transform_3(%arg0: i32) -> (i32, i32, i32) {
    %c0_i32 = arith.constant 0 : i32
    %c0_i32_0 = arith.constant 0 : i32
    %c0_i32_1 = arith.constant 0 : i32
    %c0_i32_2 = arith.constant 0 : i32
    return %c0_i32, %c0_i32_0, %c0_i32_1 : i32, i32, i32
  }
  func.func @transform_4(%arg0: i32) -> (i32, i32, i32) {
    %c0_i32 = arith.constant 0 : i32
    %c0_i32_0 = arith.constant 0 : i32
    %c0_i32_1 = arith.constant 0 : i32
    %c0_i32_2 = arith.constant 0 : i32
    return %c0_i32, %c0_i32_0, %c0_i32_1 : i32, i32, i32
  }
  func.func @transform_5(%arg0: i32) -> (i32, i32) {
    %c0_i32 = arith.constant 0 : i32
    %c0_i32_0 = arith.constant 0 : i32
    %c0_i32_1 = arith.constant 0 : i32
    return %c0_i32, %c0_i32_0 : i32, i32
  }
  func.func @transform_6(%arg0: i32) -> (i32, i32) {
    %c0_i32 = arith.constant 0 : i32
    %c0_i32_0 = arith.constant 0 : i32
    %c0_i32_1 = arith.constant 0 : i32
    return %c0_i32, %c0_i32_0 : i32, i32
  }
  func.func @transform_7(%arg0: i32) -> (i32, i32) {
    %c0_i32 = arith.constant 0 : i32
    %c0_i32_0 = arith.constant 0 : i32
    %c0_i32_1 = arith.constant 0 : i32
    return %c0_i32, %c0_i32_0 : i32, i32
  }
  func.func @transform_8(%arg0: i32) -> (i32, i32) {
    %c0_i32 = arith.constant 0 : i32
    %c0_i32_0 = arith.constant 0 : i32
    %c0_i32_1 = arith.constant 0 : i32
    return %c0_i32, %c0_i32_0 : i32, i32
  }
  func.func @transform_9(%arg0: i32) -> (i32, i32) {
    %c0_i32 = arith.constant 0 : i32
    %c0_i32_0 = arith.constant 0 : i32
    return %arg0, %c0_i32 : i32, i32
  }
}

module attributes {stable_mosaic.version = 11 : i64} {
  func.func @fusion_kernel(%arg0: i32, %arg1: memref<16x128xf32, #tpu.memory_space<vmem>>, %arg2: memref<16x128xf32, #tpu.memory_space<vmem>>, %arg3: memref<4x128x128xbf16, #tpu.memory_space<vmem>>, %arg4: memref<4x128x512xbf16, #tpu.memory_space<vmem>>, %arg5: memref<4x512x128xbf16, #tpu.memory_space<vmem>>, %arg6: memref<256x128xbf16, #tpu.memory_space<vmem>>, %arg7: memref<128x128xbf16, #tpu.memory_space<vmem>>, %arg8: memref<28x128xf32, #tpu.memory_space<vmem>>, %arg9: memref<4x512xf32, #tpu.memory_space<vmem>>, %arg10: memref<16x128xf32, #tpu.memory_space<vmem>>) attributes {dimension_semantics = [#tpu.dimension_semantics<parallel>], iteration_bounds = array<i64: 1>, scalar_prefetch = 0 : i64, scratch_operands = 0 : i64, tpu.core_type = #tpu.core_type<tc>, window_params = [{transform_indices = @transform_0, window_bounds = array<i64: 16, 128>}, {transform_indices = @transform_1, window_bounds = array<i64: 16, 128>}, {pipeline_mode = #tpu.pipeline_mode<synchronous>, transform_indices = @transform_2, window_bounds = array<i64: 4, 128, 128>}, {pipeline_mode = #tpu.pipeline_mode<synchronous>, transform_indices = @transform_3, window_bounds = array<i64: 4, 128, 512>}, {pipeline_mode = #tpu.pipeline_mode<synchronous>, transform_indices = @transform_4, window_bounds = array<i64: 4, 512, 128>}, {pipeline_mode = #tpu.pipeline_mode<synchronous>, transform_indices = @transform_5, window_bounds = array<i64: 256, 128>}, {pipeline_mode = #tpu.pipeline_mode<synchronous>, transform_indices = @transform_6, window_bounds = array<i64: 128, 128>}, {pipeline_mode = #tpu.pipeline_mode<synchronous>, transform_indices = @transform_7, window_bounds = array<i64: 28, 128>}, {pipeline_mode = #tpu.pipeline_mode<synchronous>, transform_indices = @transform_8, window_bounds = array<i64: 4, 512>}, {transform_indices = @transform_9, window_bounds = array<i64: 16, 128>}]} {
    %c0 = arith.constant 0 : index
    %c0_0 = arith.constant 0 : index
    %0 = vector.load %arg1[%c0, %c0_0] : memref<16x128xf32, #tpu.memory_space<vmem>>, vector<16x128xf32>
    %c0_1 = arith.constant 0 : index
    %c0_2 = arith.constant 0 : index
    %1 = vector.load %arg2[%c0_1, %c0_2] : memref<16x128xf32, #tpu.memory_space<vmem>>, vector<16x128xf32>
    %c0_3 = arith.constant 0 : index
    %c0_4 = arith.constant 0 : index
    %c0_5 = arith.constant 0 : index
    %2 = vector.load %arg3[%c0_3, %c0_4, %c0_5] : memref<4x128x128xbf16, #tpu.memory_space<vmem>>, vector<1x128x128xbf16>
    %3 = vector.shape_cast %2 : vector<1x128x128xbf16> to vector<128x128xbf16>
    %4 = arith.truncf %0 : vector<16x128xf32> to vector<16x128xbf16>
    %cst = arith.constant dense<0.000000e+00> : vector<16x128xf32>
    %5 = tpu.matmul %4, %3, %cst {dimension_numbers = #tpu.dot_dimension_numbers<[1], [0], [0], [1], [0, 0, 1, 1], [], []>} : vector<16x128xbf16>, vector<128x128xbf16>, vector<16x128xf32> -> vector<16x128xf32>
    %c0_6 = arith.constant 0 : index
    %c0_7 = arith.constant 0 : index
    %6 = vector.load %arg8[%c0_6, %c0_7] : memref<28x128xf32, #tpu.memory_space<vmem>>, vector<1x128xf32>
    %7 = vector.broadcast %6 : vector<1x128xf32> to vector<16x128xf32>
    %8 = arith.addf %5, %7 : vector<16x128xf32>
    %9 = arith.addf %1, %8 : vector<16x128xf32>
    %c4 = arith.constant 4 : index
    %c0_8 = arith.constant 0 : index
    %10 = vector.load %arg8[%c4, %c0_8] : memref<28x128xf32, #tpu.memory_space<vmem>>, vector<1x128xf32>
    %c12 = arith.constant 12 : index
    %c0_9 = arith.constant 0 : index
    %11 = vector.load %arg8[%c12, %c0_9] : memref<28x128xf32, #tpu.memory_space<vmem>>, vector<1x128xf32>
    %cst_10 = arith.constant dense<0.000000e+00> : vector<16xf32>
    %12 = vector.multi_reduction <add>, %9, %cst_10 [1] : vector<16x128xf32> to vector<16xf32>
    %13 = vector.shape_cast %12 : vector<16xf32> to vector<16x1xf32>
    %cst_11 = arith.constant 1.280000e+02 : f32
    %14 = vector.broadcast %cst_11 : f32 to vector<16x1xf32>
    %15 = arith.divf %13, %14 : vector<16x1xf32>
    %16 = vector.broadcast %15 : vector<16x1xf32> to vector<16x128xf32>
    %17 = arith.subf %9, %16 : vector<16x128xf32>
    %18 = arith.mulf %17, %17 : vector<16x128xf32>
    %cst_12 = arith.constant dense<0.000000e+00> : vector<16xf32>
    %19 = vector.multi_reduction <add>, %18, %cst_12 [1] : vector<16x128xf32> to vector<16xf32>
    %20 = vector.shape_cast %19 : vector<16xf32> to vector<16x1xf32>
    %cst_13 = arith.constant 1.280000e+02 : f32
    %21 = vector.broadcast %cst_13 : f32 to vector<16x1xf32>
    %22 = arith.divf %20, %21 : vector<16x1xf32>
    %cst_14 = arith.constant 9.99999974E-6 : f32
    %23 = vector.broadcast %cst_14 : f32 to vector<16x1xf32>
    %24 = arith.addf %22, %23 : vector<16x1xf32>
    %25 = math.rsqrt %24 : vector<16x1xf32>
    %26 = vector.broadcast %25 : vector<16x1xf32> to vector<16x128xf32>
    %27 = arith.mulf %17, %26 : vector<16x128xf32>
    %28 = vector.broadcast %10 : vector<1x128xf32> to vector<16x128xf32>
    %29 = arith.mulf %27, %28 : vector<16x128xf32>
    %30 = vector.broadcast %11 : vector<1x128xf32> to vector<16x128xf32>
    %31 = arith.addf %29, %30 : vector<16x128xf32>
    %c1 = arith.constant 1 : index
    %c0_15 = arith.constant 0 : index
    %c0_16 = arith.constant 0 : index
    %32 = vector.load %arg3[%c1, %c0_15, %c0_16] : memref<4x128x128xbf16, #tpu.memory_space<vmem>>, vector<1x128x128xbf16>
    %33 = vector.shape_cast %32 : vector<1x128x128xbf16> to vector<128x128xbf16>
    %34 = arith.truncf %1 : vector<16x128xf32> to vector<16x128xbf16>
    %cst_17 = arith.constant dense<0.000000e+00> : vector<16x128xf32>
    %35 = tpu.matmul %34, %33, %cst_17 {dimension_numbers = #tpu.dot_dimension_numbers<[1], [0], [0], [1], [0, 0, 1, 1], [], []>} : vector<16x128xbf16>, vector<128x128xbf16>, vector<16x128xf32> -> vector<16x128xf32>
    %c1_18 = arith.constant 1 : index
    %c0_19 = arith.constant 0 : index
    %36 = vector.load %arg8[%c1_18, %c0_19] : memref<28x128xf32, #tpu.memory_space<vmem>>, vector<1x128xf32>
    %37 = vector.broadcast %36 : vector<1x128xf32> to vector<16x128xf32>
    %38 = arith.addf %35, %37 : vector<16x128xf32>
    %39 = arith.addf %0, %38 : vector<16x128xf32>
    %c5 = arith.constant 5 : index
    %c0_20 = arith.constant 0 : index
    %40 = vector.load %arg8[%c5, %c0_20] : memref<28x128xf32, #tpu.memory_space<vmem>>, vector<1x128xf32>
    %c13 = arith.constant 13 : index
    %c0_21 = arith.constant 0 : index
    %41 = vector.load %arg8[%c13, %c0_21] : memref<28x128xf32, #tpu.memory_space<vmem>>, vector<1x128xf32>
    %cst_22 = arith.constant dense<0.000000e+00> : vector<16xf32>
    %42 = vector.multi_reduction <add>, %39, %cst_22 [1] : vector<16x128xf32> to vector<16xf32>
    %43 = vector.shape_cast %42 : vector<16xf32> to vector<16x1xf32>
    %cst_23 = arith.constant 1.280000e+02 : f32
    %44 = vector.broadcast %cst_23 : f32 to vector<16x1xf32>
    %45 = arith.divf %43, %44 : vector<16x1xf32>
    %46 = vector.broadcast %45 : vector<16x1xf32> to vector<16x128xf32>
    %47 = arith.subf %39, %46 : vector<16x128xf32>
    %48 = arith.mulf %47, %47 : vector<16x128xf32>
    %cst_24 = arith.constant dense<0.000000e+00> : vector<16xf32>
    %49 = vector.multi_reduction <add>, %48, %cst_24 [1] : vector<16x128xf32> to vector<16xf32>
    %50 = vector.shape_cast %49 : vector<16xf32> to vector<16x1xf32>
    %cst_25 = arith.constant 1.280000e+02 : f32
    %51 = vector.broadcast %cst_25 : f32 to vector<16x1xf32>
    %52 = arith.divf %50, %51 : vector<16x1xf32>
    %cst_26 = arith.constant 9.99999974E-6 : f32
    %53 = vector.broadcast %cst_26 : f32 to vector<16x1xf32>
    %54 = arith.addf %52, %53 : vector<16x1xf32>
    %55 = math.rsqrt %54 : vector<16x1xf32>
    %56 = vector.broadcast %55 : vector<16x1xf32> to vector<16x128xf32>
    %57 = arith.mulf %47, %56 : vector<16x128xf32>
    %58 = vector.broadcast %40 : vector<1x128xf32> to vector<16x128xf32>
    %59 = arith.mulf %57, %58 : vector<16x128xf32>
    %60 = vector.broadcast %41 : vector<1x128xf32> to vector<16x128xf32>
    %61 = arith.addf %59, %60 : vector<16x128xf32>
    %c0_27 = arith.constant 0 : index
    %c0_28 = arith.constant 0 : index
    %c0_29 = arith.constant 0 : index
    %62 = vector.load %arg4[%c0_27, %c0_28, %c0_29] : memref<4x128x512xbf16, #tpu.memory_space<vmem>>, vector<1x128x512xbf16>
    %63 = vector.shape_cast %62 : vector<1x128x512xbf16> to vector<128x512xbf16>
    %64 = arith.truncf %61 : vector<16x128xf32> to vector<16x128xbf16>
    %cst_30 = arith.constant dense<0.000000e+00> : vector<16x512xf32>
    %65 = tpu.matmul %64, %63, %cst_30 {dimension_numbers = #tpu.dot_dimension_numbers<[1], [0], [0], [1], [0, 0, 1, 1], [], []>} : vector<16x128xbf16>, vector<128x512xbf16>, vector<16x512xf32> -> vector<16x512xf32>
    %c0_31 = arith.constant 0 : index
    %c0_32 = arith.constant 0 : index
    %66 = vector.load %arg9[%c0_31, %c0_32] : memref<4x512xf32, #tpu.memory_space<vmem>>, vector<1x512xf32>
    %67 = vector.broadcast %66 : vector<1x512xf32> to vector<16x512xf32>
    %68 = arith.addf %65, %67 : vector<16x512xf32>
    %69 = arith.mulf %68, %68 : vector<16x512xf32>
    %70 = arith.mulf %68, %69 : vector<16x512xf32>
    %cst_33 = arith.constant 4.471500e-02 : f32
    %71 = vector.broadcast %cst_33 : f32 to vector<16x512xf32>
    %72 = arith.mulf %71, %70 : vector<16x512xf32>
    %73 = arith.addf %68, %72 : vector<16x512xf32>
    %cst_34 = arith.constant 0.797884583 : f32
    %74 = vector.broadcast %cst_34 : f32 to vector<16x512xf32>
    %75 = arith.mulf %74, %73 : vector<16x512xf32>
    %76 = math.tanh %75 : vector<16x512xf32>
    %cst_35 = arith.constant 1.000000e+00 : f32
    %77 = vector.broadcast %cst_35 : f32 to vector<16x512xf32>
    %78 = arith.addf %77, %76 : vector<16x512xf32>
    %cst_36 = arith.constant 5.000000e-01 : f32
    %79 = vector.broadcast %cst_36 : f32 to vector<16x512xf32>
    %80 = arith.mulf %79, %78 : vector<16x512xf32>
    %81 = arith.mulf %68, %80 : vector<16x512xf32>
    %c0_37 = arith.constant 0 : index
    %c0_38 = arith.constant 0 : index
    %c0_39 = arith.constant 0 : index
    %82 = vector.load %arg5[%c0_37, %c0_38, %c0_39] : memref<4x512x128xbf16, #tpu.memory_space<vmem>>, vector<1x512x128xbf16>
    %83 = vector.shape_cast %82 : vector<1x512x128xbf16> to vector<512x128xbf16>
    %84 = arith.truncf %81 : vector<16x512xf32> to vector<16x512xbf16>
    %cst_40 = arith.constant dense<0.000000e+00> : vector<16x128xf32>
    %85 = tpu.matmul %84, %83, %cst_40 {dimension_numbers = #tpu.dot_dimension_numbers<[1], [0], [0], [1], [0, 0, 1, 1], [], []>} : vector<16x512xbf16>, vector<512x128xbf16>, vector<16x128xf32> -> vector<16x128xf32>
    %c20 = arith.constant 20 : index
    %c0_41 = arith.constant 0 : index
    %86 = vector.load %arg8[%c20, %c0_41] : memref<28x128xf32, #tpu.memory_space<vmem>>, vector<1x128xf32>
    %87 = vector.broadcast %86 : vector<1x128xf32> to vector<16x128xf32>
    %88 = arith.addf %85, %87 : vector<16x128xf32>
    %89 = arith.addf %61, %88 : vector<16x128xf32>
    %c6 = arith.constant 6 : index
    %c0_42 = arith.constant 0 : index
    %90 = vector.load %arg8[%c6, %c0_42] : memref<28x128xf32, #tpu.memory_space<vmem>>, vector<1x128xf32>
    %c14 = arith.constant 14 : index
    %c0_43 = arith.constant 0 : index
    %91 = vector.load %arg8[%c14, %c0_43] : memref<28x128xf32, #tpu.memory_space<vmem>>, vector<1x128xf32>
    %cst_44 = arith.constant dense<0.000000e+00> : vector<16xf32>
    %92 = vector.multi_reduction <add>, %89, %cst_44 [1] : vector<16x128xf32> to vector<16xf32>
    %93 = vector.shape_cast %92 : vector<16xf32> to vector<16x1xf32>
    %cst_45 = arith.constant 1.280000e+02 : f32
    %94 = vector.broadcast %cst_45 : f32 to vector<16x1xf32>
    %95 = arith.divf %93, %94 : vector<16x1xf32>
    %96 = vector.broadcast %95 : vector<16x1xf32> to vector<16x128xf32>
    %97 = arith.subf %89, %96 : vector<16x128xf32>
    %98 = arith.mulf %97, %97 : vector<16x128xf32>
    %cst_46 = arith.constant dense<0.000000e+00> : vector<16xf32>
    %99 = vector.multi_reduction <add>, %98, %cst_46 [1] : vector<16x128xf32> to vector<16xf32>
    %100 = vector.shape_cast %99 : vector<16xf32> to vector<16x1xf32>
    %cst_47 = arith.constant 1.280000e+02 : f32
    %101 = vector.broadcast %cst_47 : f32 to vector<16x1xf32>
    %102 = arith.divf %100, %101 : vector<16x1xf32>
    %cst_48 = arith.constant 9.99999974E-6 : f32
    %103 = vector.broadcast %cst_48 : f32 to vector<16x1xf32>
    %104 = arith.addf %102, %103 : vector<16x1xf32>
    %105 = math.rsqrt %104 : vector<16x1xf32>
    %106 = vector.broadcast %105 : vector<16x1xf32> to vector<16x128xf32>
    %107 = arith.mulf %97, %106 : vector<16x128xf32>
    %108 = vector.broadcast %90 : vector<1x128xf32> to vector<16x128xf32>
    %109 = arith.mulf %107, %108 : vector<16x128xf32>
    %110 = vector.broadcast %91 : vector<1x128xf32> to vector<16x128xf32>
    %111 = arith.addf %109, %110 : vector<16x128xf32>
    %c1_49 = arith.constant 1 : index
    %c0_50 = arith.constant 0 : index
    %c0_51 = arith.constant 0 : index
    %112 = vector.load %arg4[%c1_49, %c0_50, %c0_51] : memref<4x128x512xbf16, #tpu.memory_space<vmem>>, vector<1x128x512xbf16>
    %113 = vector.shape_cast %112 : vector<1x128x512xbf16> to vector<128x512xbf16>
    %114 = arith.truncf %31 : vector<16x128xf32> to vector<16x128xbf16>
    %cst_52 = arith.constant dense<0.000000e+00> : vector<16x512xf32>
    %115 = tpu.matmul %114, %113, %cst_52 {dimension_numbers = #tpu.dot_dimension_numbers<[1], [0], [0], [1], [0, 0, 1, 1], [], []>} : vector<16x128xbf16>, vector<128x512xbf16>, vector<16x512xf32> -> vector<16x512xf32>
    %c1_53 = arith.constant 1 : index
    %c0_54 = arith.constant 0 : index
    %116 = vector.load %arg9[%c1_53, %c0_54] : memref<4x512xf32, #tpu.memory_space<vmem>>, vector<1x512xf32>
    %117 = vector.broadcast %116 : vector<1x512xf32> to vector<16x512xf32>
    %118 = arith.addf %115, %117 : vector<16x512xf32>
    %119 = arith.mulf %118, %118 : vector<16x512xf32>
    %120 = arith.mulf %118, %119 : vector<16x512xf32>
    %cst_55 = arith.constant 4.471500e-02 : f32
    %121 = vector.broadcast %cst_55 : f32 to vector<16x512xf32>
    %122 = arith.mulf %121, %120 : vector<16x512xf32>
    %123 = arith.addf %118, %122 : vector<16x512xf32>
    %cst_56 = arith.constant 0.797884583 : f32
    %124 = vector.broadcast %cst_56 : f32 to vector<16x512xf32>
    %125 = arith.mulf %124, %123 : vector<16x512xf32>
    %126 = math.tanh %125 : vector<16x512xf32>
    %cst_57 = arith.constant 1.000000e+00 : f32
    %127 = vector.broadcast %cst_57 : f32 to vector<16x512xf32>
    %128 = arith.addf %127, %126 : vector<16x512xf32>
    %cst_58 = arith.constant 5.000000e-01 : f32
    %129 = vector.broadcast %cst_58 : f32 to vector<16x512xf32>
    %130 = arith.mulf %129, %128 : vector<16x512xf32>
    %131 = arith.mulf %118, %130 : vector<16x512xf32>
    %c1_59 = arith.constant 1 : index
    %c0_60 = arith.constant 0 : index
    %c0_61 = arith.constant 0 : index
    %132 = vector.load %arg5[%c1_59, %c0_60, %c0_61] : memref<4x512x128xbf16, #tpu.memory_space<vmem>>, vector<1x512x128xbf16>
    %133 = vector.shape_cast %132 : vector<1x512x128xbf16> to vector<512x128xbf16>
    %134 = arith.truncf %131 : vector<16x512xf32> to vector<16x512xbf16>
    %cst_62 = arith.constant dense<0.000000e+00> : vector<16x128xf32>
    %135 = tpu.matmul %134, %133, %cst_62 {dimension_numbers = #tpu.dot_dimension_numbers<[1], [0], [0], [1], [0, 0, 1, 1], [], []>} : vector<16x512xbf16>, vector<512x128xbf16>, vector<16x128xf32> -> vector<16x128xf32>
    %c21 = arith.constant 21 : index
    %c0_63 = arith.constant 0 : index
    %136 = vector.load %arg8[%c21, %c0_63] : memref<28x128xf32, #tpu.memory_space<vmem>>, vector<1x128xf32>
    %137 = vector.broadcast %136 : vector<1x128xf32> to vector<16x128xf32>
    %138 = arith.addf %135, %137 : vector<16x128xf32>
    %139 = arith.addf %31, %138 : vector<16x128xf32>
    %c7 = arith.constant 7 : index
    %c0_64 = arith.constant 0 : index
    %140 = vector.load %arg8[%c7, %c0_64] : memref<28x128xf32, #tpu.memory_space<vmem>>, vector<1x128xf32>
    %c15 = arith.constant 15 : index
    %c0_65 = arith.constant 0 : index
    %141 = vector.load %arg8[%c15, %c0_65] : memref<28x128xf32, #tpu.memory_space<vmem>>, vector<1x128xf32>
    %cst_66 = arith.constant dense<0.000000e+00> : vector<16xf32>
    %142 = vector.multi_reduction <add>, %139, %cst_66 [1] : vector<16x128xf32> to vector<16xf32>
    %143 = vector.shape_cast %142 : vector<16xf32> to vector<16x1xf32>
    %cst_67 = arith.constant 1.280000e+02 : f32
    %144 = vector.broadcast %cst_67 : f32 to vector<16x1xf32>
    %145 = arith.divf %143, %144 : vector<16x1xf32>
    %146 = vector.broadcast %145 : vector<16x1xf32> to vector<16x128xf32>
    %147 = arith.subf %139, %146 : vector<16x128xf32>
    %148 = arith.mulf %147, %147 : vector<16x128xf32>
    %cst_68 = arith.constant dense<0.000000e+00> : vector<16xf32>
    %149 = vector.multi_reduction <add>, %148, %cst_68 [1] : vector<16x128xf32> to vector<16xf32>
    %150 = vector.shape_cast %149 : vector<16xf32> to vector<16x1xf32>
    %cst_69 = arith.constant 1.280000e+02 : f32
    %151 = vector.broadcast %cst_69 : f32 to vector<16x1xf32>
    %152 = arith.divf %150, %151 : vector<16x1xf32>
    %cst_70 = arith.constant 9.99999974E-6 : f32
    %153 = vector.broadcast %cst_70 : f32 to vector<16x1xf32>
    %154 = arith.addf %152, %153 : vector<16x1xf32>
    %155 = math.rsqrt %154 : vector<16x1xf32>
    %156 = vector.broadcast %155 : vector<16x1xf32> to vector<16x128xf32>
    %157 = arith.mulf %147, %156 : vector<16x128xf32>
    %158 = vector.broadcast %140 : vector<1x128xf32> to vector<16x128xf32>
    %159 = arith.mulf %157, %158 : vector<16x128xf32>
    %160 = vector.broadcast %141 : vector<1x128xf32> to vector<16x128xf32>
    %161 = arith.addf %159, %160 : vector<16x128xf32>
    %c2 = arith.constant 2 : index
    %c0_71 = arith.constant 0 : index
    %c0_72 = arith.constant 0 : index
    %162 = vector.load %arg3[%c2, %c0_71, %c0_72] : memref<4x128x128xbf16, #tpu.memory_space<vmem>>, vector<1x128x128xbf16>
    %163 = vector.shape_cast %162 : vector<1x128x128xbf16> to vector<128x128xbf16>
    %164 = arith.truncf %111 : vector<16x128xf32> to vector<16x128xbf16>
    %cst_73 = arith.constant dense<0.000000e+00> : vector<16x128xf32>
    %165 = tpu.matmul %164, %163, %cst_73 {dimension_numbers = #tpu.dot_dimension_numbers<[1], [0], [0], [1], [0, 0, 1, 1], [], []>} : vector<16x128xbf16>, vector<128x128xbf16>, vector<16x128xf32> -> vector<16x128xf32>
    %c2_74 = arith.constant 2 : index
    %c0_75 = arith.constant 0 : index
    %166 = vector.load %arg8[%c2_74, %c0_75] : memref<28x128xf32, #tpu.memory_space<vmem>>, vector<1x128xf32>
    %167 = vector.broadcast %166 : vector<1x128xf32> to vector<16x128xf32>
    %168 = arith.addf %165, %167 : vector<16x128xf32>
    %169 = arith.addf %161, %168 : vector<16x128xf32>
    %c8 = arith.constant 8 : index
    %c0_76 = arith.constant 0 : index
    %170 = vector.load %arg8[%c8, %c0_76] : memref<28x128xf32, #tpu.memory_space<vmem>>, vector<1x128xf32>
    %c16 = arith.constant 16 : index
    %c0_77 = arith.constant 0 : index
    %171 = vector.load %arg8[%c16, %c0_77] : memref<28x128xf32, #tpu.memory_space<vmem>>, vector<1x128xf32>
    %cst_78 = arith.constant dense<0.000000e+00> : vector<16xf32>
    %172 = vector.multi_reduction <add>, %169, %cst_78 [1] : vector<16x128xf32> to vector<16xf32>
    %173 = vector.shape_cast %172 : vector<16xf32> to vector<16x1xf32>
    %cst_79 = arith.constant 1.280000e+02 : f32
    %174 = vector.broadcast %cst_79 : f32 to vector<16x1xf32>
    %175 = arith.divf %173, %174 : vector<16x1xf32>
    %176 = vector.broadcast %175 : vector<16x1xf32> to vector<16x128xf32>
    %177 = arith.subf %169, %176 : vector<16x128xf32>
    %178 = arith.mulf %177, %177 : vector<16x128xf32>
    %cst_80 = arith.constant dense<0.000000e+00> : vector<16xf32>
    %179 = vector.multi_reduction <add>, %178, %cst_80 [1] : vector<16x128xf32> to vector<16xf32>
    %180 = vector.shape_cast %179 : vector<16xf32> to vector<16x1xf32>
    %cst_81 = arith.constant 1.280000e+02 : f32
    %181 = vector.broadcast %cst_81 : f32 to vector<16x1xf32>
    %182 = arith.divf %180, %181 : vector<16x1xf32>
    %cst_82 = arith.constant 9.99999974E-6 : f32
    %183 = vector.broadcast %cst_82 : f32 to vector<16x1xf32>
    %184 = arith.addf %182, %183 : vector<16x1xf32>
    %185 = math.rsqrt %184 : vector<16x1xf32>
    %186 = vector.broadcast %185 : vector<16x1xf32> to vector<16x128xf32>
    %187 = arith.mulf %177, %186 : vector<16x128xf32>
    %188 = vector.broadcast %170 : vector<1x128xf32> to vector<16x128xf32>
    %189 = arith.mulf %187, %188 : vector<16x128xf32>
    %190 = vector.broadcast %171 : vector<1x128xf32> to vector<16x128xf32>
    %191 = arith.addf %189, %190 : vector<16x128xf32>
    %c3 = arith.constant 3 : index
    %c0_83 = arith.constant 0 : index
    %c0_84 = arith.constant 0 : index
    %192 = vector.load %arg3[%c3, %c0_83, %c0_84] : memref<4x128x128xbf16, #tpu.memory_space<vmem>>, vector<1x128x128xbf16>
    %193 = vector.shape_cast %192 : vector<1x128x128xbf16> to vector<128x128xbf16>
    %194 = arith.truncf %161 : vector<16x128xf32> to vector<16x128xbf16>
    %cst_85 = arith.constant dense<0.000000e+00> : vector<16x128xf32>
    %195 = tpu.matmul %194, %193, %cst_85 {dimension_numbers = #tpu.dot_dimension_numbers<[1], [0], [0], [1], [0, 0, 1, 1], [], []>} : vector<16x128xbf16>, vector<128x128xbf16>, vector<16x128xf32> -> vector<16x128xf32>
    %c3_86 = arith.constant 3 : index
    %c0_87 = arith.constant 0 : index
    %196 = vector.load %arg8[%c3_86, %c0_87] : memref<28x128xf32, #tpu.memory_space<vmem>>, vector<1x128xf32>
    %197 = vector.broadcast %196 : vector<1x128xf32> to vector<16x128xf32>
    %198 = arith.addf %195, %197 : vector<16x128xf32>
    %199 = arith.addf %111, %198 : vector<16x128xf32>
    %c9 = arith.constant 9 : index
    %c0_88 = arith.constant 0 : index
    %200 = vector.load %arg8[%c9, %c0_88] : memref<28x128xf32, #tpu.memory_space<vmem>>, vector<1x128xf32>
    %c17 = arith.constant 17 : index
    %c0_89 = arith.constant 0 : index
    %201 = vector.load %arg8[%c17, %c0_89] : memref<28x128xf32, #tpu.memory_space<vmem>>, vector<1x128xf32>
    %cst_90 = arith.constant dense<0.000000e+00> : vector<16xf32>
    %202 = vector.multi_reduction <add>, %199, %cst_90 [1] : vector<16x128xf32> to vector<16xf32>
    %203 = vector.shape_cast %202 : vector<16xf32> to vector<16x1xf32>
    %cst_91 = arith.constant 1.280000e+02 : f32
    %204 = vector.broadcast %cst_91 : f32 to vector<16x1xf32>
    %205 = arith.divf %203, %204 : vector<16x1xf32>
    %206 = vector.broadcast %205 : vector<16x1xf32> to vector<16x128xf32>
    %207 = arith.subf %199, %206 : vector<16x128xf32>
    %208 = arith.mulf %207, %207 : vector<16x128xf32>
    %cst_92 = arith.constant dense<0.000000e+00> : vector<16xf32>
    %209 = vector.multi_reduction <add>, %208, %cst_92 [1] : vector<16x128xf32> to vector<16xf32>
    %210 = vector.shape_cast %209 : vector<16xf32> to vector<16x1xf32>
    %cst_93 = arith.constant 1.280000e+02 : f32
    %211 = vector.broadcast %cst_93 : f32 to vector<16x1xf32>
    %212 = arith.divf %210, %211 : vector<16x1xf32>
    %cst_94 = arith.constant 9.99999974E-6 : f32
    %213 = vector.broadcast %cst_94 : f32 to vector<16x1xf32>
    %214 = arith.addf %212, %213 : vector<16x1xf32>
    %215 = math.rsqrt %214 : vector<16x1xf32>
    %216 = vector.broadcast %215 : vector<16x1xf32> to vector<16x128xf32>
    %217 = arith.mulf %207, %216 : vector<16x128xf32>
    %218 = vector.broadcast %200 : vector<1x128xf32> to vector<16x128xf32>
    %219 = arith.mulf %217, %218 : vector<16x128xf32>
    %220 = vector.broadcast %201 : vector<1x128xf32> to vector<16x128xf32>
    %221 = arith.addf %219, %220 : vector<16x128xf32>
    %c2_95 = arith.constant 2 : index
    %c0_96 = arith.constant 0 : index
    %c0_97 = arith.constant 0 : index
    %222 = vector.load %arg4[%c2_95, %c0_96, %c0_97] : memref<4x128x512xbf16, #tpu.memory_space<vmem>>, vector<1x128x512xbf16>
    %223 = vector.shape_cast %222 : vector<1x128x512xbf16> to vector<128x512xbf16>
    %224 = arith.truncf %221 : vector<16x128xf32> to vector<16x128xbf16>
    %cst_98 = arith.constant dense<0.000000e+00> : vector<16x512xf32>
    %225 = tpu.matmul %224, %223, %cst_98 {dimension_numbers = #tpu.dot_dimension_numbers<[1], [0], [0], [1], [0, 0, 1, 1], [], []>} : vector<16x128xbf16>, vector<128x512xbf16>, vector<16x512xf32> -> vector<16x512xf32>
    %c2_99 = arith.constant 2 : index
    %c0_100 = arith.constant 0 : index
    %226 = vector.load %arg9[%c2_99, %c0_100] : memref<4x512xf32, #tpu.memory_space<vmem>>, vector<1x512xf32>
    %227 = vector.broadcast %226 : vector<1x512xf32> to vector<16x512xf32>
    %228 = arith.addf %225, %227 : vector<16x512xf32>
    %229 = arith.mulf %228, %228 : vector<16x512xf32>
    %230 = arith.mulf %228, %229 : vector<16x512xf32>
    %cst_101 = arith.constant 4.471500e-02 : f32
    %231 = vector.broadcast %cst_101 : f32 to vector<16x512xf32>
    %232 = arith.mulf %231, %230 : vector<16x512xf32>
    %233 = arith.addf %228, %232 : vector<16x512xf32>
    %cst_102 = arith.constant 0.797884583 : f32
    %234 = vector.broadcast %cst_102 : f32 to vector<16x512xf32>
    %235 = arith.mulf %234, %233 : vector<16x512xf32>
    %236 = math.tanh %235 : vector<16x512xf32>
    %cst_103 = arith.constant 1.000000e+00 : f32
    %237 = vector.broadcast %cst_103 : f32 to vector<16x512xf32>
    %238 = arith.addf %237, %236 : vector<16x512xf32>
    %cst_104 = arith.constant 5.000000e-01 : f32
    %239 = vector.broadcast %cst_104 : f32 to vector<16x512xf32>
    %240 = arith.mulf %239, %238 : vector<16x512xf32>
    %241 = arith.mulf %228, %240 : vector<16x512xf32>
    %c2_105 = arith.constant 2 : index
    %c0_106 = arith.constant 0 : index
    %c0_107 = arith.constant 0 : index
    %242 = vector.load %arg5[%c2_105, %c0_106, %c0_107] : memref<4x512x128xbf16, #tpu.memory_space<vmem>>, vector<1x512x128xbf16>
    %243 = vector.shape_cast %242 : vector<1x512x128xbf16> to vector<512x128xbf16>
    %244 = arith.truncf %241 : vector<16x512xf32> to vector<16x512xbf16>
    %cst_108 = arith.constant dense<0.000000e+00> : vector<16x128xf32>
    %245 = tpu.matmul %244, %243, %cst_108 {dimension_numbers = #tpu.dot_dimension_numbers<[1], [0], [0], [1], [0, 0, 1, 1], [], []>} : vector<16x512xbf16>, vector<512x128xbf16>, vector<16x128xf32> -> vector<16x128xf32>
    %c22 = arith.constant 22 : index
    %c0_109 = arith.constant 0 : index
    %246 = vector.load %arg8[%c22, %c0_109] : memref<28x128xf32, #tpu.memory_space<vmem>>, vector<1x128xf32>
    %247 = vector.broadcast %246 : vector<1x128xf32> to vector<16x128xf32>
    %248 = arith.addf %245, %247 : vector<16x128xf32>
    %249 = arith.addf %221, %248 : vector<16x128xf32>
    %c10 = arith.constant 10 : index
    %c0_110 = arith.constant 0 : index
    %250 = vector.load %arg8[%c10, %c0_110] : memref<28x128xf32, #tpu.memory_space<vmem>>, vector<1x128xf32>
    %c18 = arith.constant 18 : index
    %c0_111 = arith.constant 0 : index
    %251 = vector.load %arg8[%c18, %c0_111] : memref<28x128xf32, #tpu.memory_space<vmem>>, vector<1x128xf32>
    %cst_112 = arith.constant dense<0.000000e+00> : vector<16xf32>
    %252 = vector.multi_reduction <add>, %249, %cst_112 [1] : vector<16x128xf32> to vector<16xf32>
    %253 = vector.shape_cast %252 : vector<16xf32> to vector<16x1xf32>
    %cst_113 = arith.constant 1.280000e+02 : f32
    %254 = vector.broadcast %cst_113 : f32 to vector<16x1xf32>
    %255 = arith.divf %253, %254 : vector<16x1xf32>
    %256 = vector.broadcast %255 : vector<16x1xf32> to vector<16x128xf32>
    %257 = arith.subf %249, %256 : vector<16x128xf32>
    %258 = arith.mulf %257, %257 : vector<16x128xf32>
    %cst_114 = arith.constant dense<0.000000e+00> : vector<16xf32>
    %259 = vector.multi_reduction <add>, %258, %cst_114 [1] : vector<16x128xf32> to vector<16xf32>
    %260 = vector.shape_cast %259 : vector<16xf32> to vector<16x1xf32>
    %cst_115 = arith.constant 1.280000e+02 : f32
    %261 = vector.broadcast %cst_115 : f32 to vector<16x1xf32>
    %262 = arith.divf %260, %261 : vector<16x1xf32>
    %cst_116 = arith.constant 9.99999974E-6 : f32
    %263 = vector.broadcast %cst_116 : f32 to vector<16x1xf32>
    %264 = arith.addf %262, %263 : vector<16x1xf32>
    %265 = math.rsqrt %264 : vector<16x1xf32>
    %266 = vector.broadcast %265 : vector<16x1xf32> to vector<16x128xf32>
    %267 = arith.mulf %257, %266 : vector<16x128xf32>
    %268 = vector.broadcast %250 : vector<1x128xf32> to vector<16x128xf32>
    %269 = arith.mulf %267, %268 : vector<16x128xf32>
    %270 = vector.broadcast %251 : vector<1x128xf32> to vector<16x128xf32>
    %271 = arith.addf %269, %270 : vector<16x128xf32>
    %c3_117 = arith.constant 3 : index
    %c0_118 = arith.constant 0 : index
    %c0_119 = arith.constant 0 : index
    %272 = vector.load %arg4[%c3_117, %c0_118, %c0_119] : memref<4x128x512xbf16, #tpu.memory_space<vmem>>, vector<1x128x512xbf16>
    %273 = vector.shape_cast %272 : vector<1x128x512xbf16> to vector<128x512xbf16>
    %274 = arith.truncf %191 : vector<16x128xf32> to vector<16x128xbf16>
    %cst_120 = arith.constant dense<0.000000e+00> : vector<16x512xf32>
    %275 = tpu.matmul %274, %273, %cst_120 {dimension_numbers = #tpu.dot_dimension_numbers<[1], [0], [0], [1], [0, 0, 1, 1], [], []>} : vector<16x128xbf16>, vector<128x512xbf16>, vector<16x512xf32> -> vector<16x512xf32>
    %c3_121 = arith.constant 3 : index
    %c0_122 = arith.constant 0 : index
    %276 = vector.load %arg9[%c3_121, %c0_122] : memref<4x512xf32, #tpu.memory_space<vmem>>, vector<1x512xf32>
    %277 = vector.broadcast %276 : vector<1x512xf32> to vector<16x512xf32>
    %278 = arith.addf %275, %277 : vector<16x512xf32>
    %279 = arith.mulf %278, %278 : vector<16x512xf32>
    %280 = arith.mulf %278, %279 : vector<16x512xf32>
    %cst_123 = arith.constant 4.471500e-02 : f32
    %281 = vector.broadcast %cst_123 : f32 to vector<16x512xf32>
    %282 = arith.mulf %281, %280 : vector<16x512xf32>
    %283 = arith.addf %278, %282 : vector<16x512xf32>
    %cst_124 = arith.constant 0.797884583 : f32
    %284 = vector.broadcast %cst_124 : f32 to vector<16x512xf32>
    %285 = arith.mulf %284, %283 : vector<16x512xf32>
    %286 = math.tanh %285 : vector<16x512xf32>
    %cst_125 = arith.constant 1.000000e+00 : f32
    %287 = vector.broadcast %cst_125 : f32 to vector<16x512xf32>
    %288 = arith.addf %287, %286 : vector<16x512xf32>
    %cst_126 = arith.constant 5.000000e-01 : f32
    %289 = vector.broadcast %cst_126 : f32 to vector<16x512xf32>
    %290 = arith.mulf %289, %288 : vector<16x512xf32>
    %291 = arith.mulf %278, %290 : vector<16x512xf32>
    %c3_127 = arith.constant 3 : index
    %c0_128 = arith.constant 0 : index
    %c0_129 = arith.constant 0 : index
    %292 = vector.load %arg5[%c3_127, %c0_128, %c0_129] : memref<4x512x128xbf16, #tpu.memory_space<vmem>>, vector<1x512x128xbf16>
    %293 = vector.shape_cast %292 : vector<1x512x128xbf16> to vector<512x128xbf16>
    %294 = arith.truncf %291 : vector<16x512xf32> to vector<16x512xbf16>
    %cst_130 = arith.constant dense<0.000000e+00> : vector<16x128xf32>
    %295 = tpu.matmul %294, %293, %cst_130 {dimension_numbers = #tpu.dot_dimension_numbers<[1], [0], [0], [1], [0, 0, 1, 1], [], []>} : vector<16x512xbf16>, vector<512x128xbf16>, vector<16x128xf32> -> vector<16x128xf32>
    %c23 = arith.constant 23 : index
    %c0_131 = arith.constant 0 : index
    %296 = vector.load %arg8[%c23, %c0_131] : memref<28x128xf32, #tpu.memory_space<vmem>>, vector<1x128xf32>
    %297 = vector.broadcast %296 : vector<1x128xf32> to vector<16x128xf32>
    %298 = arith.addf %295, %297 : vector<16x128xf32>
    %299 = arith.addf %191, %298 : vector<16x128xf32>
    %c11 = arith.constant 11 : index
    %c0_132 = arith.constant 0 : index
    %300 = vector.load %arg8[%c11, %c0_132] : memref<28x128xf32, #tpu.memory_space<vmem>>, vector<1x128xf32>
    %c19 = arith.constant 19 : index
    %c0_133 = arith.constant 0 : index
    %301 = vector.load %arg8[%c19, %c0_133] : memref<28x128xf32, #tpu.memory_space<vmem>>, vector<1x128xf32>
    %cst_134 = arith.constant dense<0.000000e+00> : vector<16xf32>
    %302 = vector.multi_reduction <add>, %299, %cst_134 [1] : vector<16x128xf32> to vector<16xf32>
    %303 = vector.shape_cast %302 : vector<16xf32> to vector<16x1xf32>
    %cst_135 = arith.constant 1.280000e+02 : f32
    %304 = vector.broadcast %cst_135 : f32 to vector<16x1xf32>
    %305 = arith.divf %303, %304 : vector<16x1xf32>
    %306 = vector.broadcast %305 : vector<16x1xf32> to vector<16x128xf32>
    %307 = arith.subf %299, %306 : vector<16x128xf32>
    %308 = arith.mulf %307, %307 : vector<16x128xf32>
    %cst_136 = arith.constant dense<0.000000e+00> : vector<16xf32>
    %309 = vector.multi_reduction <add>, %308, %cst_136 [1] : vector<16x128xf32> to vector<16xf32>
    %310 = vector.shape_cast %309 : vector<16xf32> to vector<16x1xf32>
    %cst_137 = arith.constant 1.280000e+02 : f32
    %311 = vector.broadcast %cst_137 : f32 to vector<16x1xf32>
    %312 = arith.divf %310, %311 : vector<16x1xf32>
    %cst_138 = arith.constant 9.99999974E-6 : f32
    %313 = vector.broadcast %cst_138 : f32 to vector<16x1xf32>
    %314 = arith.addf %312, %313 : vector<16x1xf32>
    %315 = math.rsqrt %314 : vector<16x1xf32>
    %316 = vector.broadcast %315 : vector<16x1xf32> to vector<16x128xf32>
    %317 = arith.mulf %307, %316 : vector<16x128xf32>
    %318 = vector.broadcast %300 : vector<1x128xf32> to vector<16x128xf32>
    %319 = arith.mulf %317, %318 : vector<16x128xf32>
    %320 = vector.broadcast %301 : vector<1x128xf32> to vector<16x128xf32>
    %321 = arith.addf %319, %320 : vector<16x128xf32>
    %322 = arith.addf %271, %0 : vector<16x128xf32>
    %323 = arith.addf %321, %1 : vector<16x128xf32>
    %324 = tpu.concatenate %322, %323 in 1 : vector<16x128xf32>, vector<16x128xf32> -> vector<16x256xf32>
    %c0_139 = arith.constant 0 : index
    %c0_140 = arith.constant 0 : index
    %325 = vector.load %arg6[%c0_139, %c0_140] : memref<256x128xbf16, #tpu.memory_space<vmem>>, vector<256x128xbf16>
    %326 = arith.truncf %324 : vector<16x256xf32> to vector<16x256xbf16>
    %cst_141 = arith.constant dense<0.000000e+00> : vector<16x128xf32>
    %327 = tpu.matmul %326, %325, %cst_141 {dimension_numbers = #tpu.dot_dimension_numbers<[1], [0], [0], [1], [0, 0, 1, 1], [], []>} : vector<16x256xbf16>, vector<256x128xbf16>, vector<16x128xf32> -> vector<16x128xf32>
    %c24 = arith.constant 24 : index
    %c0_142 = arith.constant 0 : index
    %328 = vector.load %arg8[%c24, %c0_142] : memref<28x128xf32, #tpu.memory_space<vmem>>, vector<1x128xf32>
    %329 = vector.broadcast %328 : vector<1x128xf32> to vector<16x128xf32>
    %330 = arith.addf %327, %329 : vector<16x128xf32>
    %331 = arith.negf %330 : vector<16x128xf32>
    %332 = math.exp %331 : vector<16x128xf32>
    %cst_143 = arith.constant 1.000000e+00 : f32
    %333 = vector.broadcast %cst_143 : f32 to vector<16x128xf32>
    %334 = arith.addf %333, %332 : vector<16x128xf32>
    %335 = arith.divf %333, %334 : vector<16x128xf32>
    %336 = arith.mulf %335, %322 : vector<16x128xf32>
    %cst_144 = arith.constant 1.000000e+00 : f32
    %337 = vector.broadcast %cst_144 : f32 to vector<16x128xf32>
    %338 = arith.subf %337, %335 : vector<16x128xf32>
    %339 = arith.mulf %338, %323 : vector<16x128xf32>
    %340 = arith.addf %336, %339 : vector<16x128xf32>
    %c0_145 = arith.constant 0 : index
    %c0_146 = arith.constant 0 : index
    %341 = vector.load %arg7[%c0_145, %c0_146] : memref<128x128xbf16, #tpu.memory_space<vmem>>, vector<128x128xbf16>
    %342 = arith.truncf %340 : vector<16x128xf32> to vector<16x128xbf16>
    %cst_147 = arith.constant dense<0.000000e+00> : vector<16x128xf32>
    %343 = tpu.matmul %342, %341, %cst_147 {dimension_numbers = #tpu.dot_dimension_numbers<[1], [0], [0], [1], [0, 0, 1, 1], [], []>} : vector<16x128xbf16>, vector<128x128xbf16>, vector<16x128xf32> -> vector<16x128xf32>
    %c25 = arith.constant 25 : index
    %c0_148 = arith.constant 0 : index
    %344 = vector.load %arg8[%c25, %c0_148] : memref<28x128xf32, #tpu.memory_space<vmem>>, vector<1x128xf32>
    %345 = vector.broadcast %344 : vector<1x128xf32> to vector<16x128xf32>
    %346 = arith.addf %343, %345 : vector<16x128xf32>
    %c26 = arith.constant 26 : index
    %c0_149 = arith.constant 0 : index
    %347 = vector.load %arg8[%c26, %c0_149] : memref<28x128xf32, #tpu.memory_space<vmem>>, vector<1x128xf32>
    %c27 = arith.constant 27 : index
    %c0_150 = arith.constant 0 : index
    %348 = vector.load %arg8[%c27, %c0_150] : memref<28x128xf32, #tpu.memory_space<vmem>>, vector<1x128xf32>
    %cst_151 = arith.constant dense<0.000000e+00> : vector<16xf32>
    %349 = vector.multi_reduction <add>, %346, %cst_151 [1] : vector<16x128xf32> to vector<16xf32>
    %350 = vector.shape_cast %349 : vector<16xf32> to vector<16x1xf32>
    %cst_152 = arith.constant 1.280000e+02 : f32
    %351 = vector.broadcast %cst_152 : f32 to vector<16x1xf32>
    %352 = arith.divf %350, %351 : vector<16x1xf32>
    %353 = vector.broadcast %352 : vector<16x1xf32> to vector<16x128xf32>
    %354 = arith.subf %346, %353 : vector<16x128xf32>
    %355 = arith.mulf %354, %354 : vector<16x128xf32>
    %cst_153 = arith.constant dense<0.000000e+00> : vector<16xf32>
    %356 = vector.multi_reduction <add>, %355, %cst_153 [1] : vector<16x128xf32> to vector<16xf32>
    %357 = vector.shape_cast %356 : vector<16xf32> to vector<16x1xf32>
    %cst_154 = arith.constant 1.280000e+02 : f32
    %358 = vector.broadcast %cst_154 : f32 to vector<16x1xf32>
    %359 = arith.divf %357, %358 : vector<16x1xf32>
    %cst_155 = arith.constant 9.99999974E-6 : f32
    %360 = vector.broadcast %cst_155 : f32 to vector<16x1xf32>
    %361 = arith.addf %359, %360 : vector<16x1xf32>
    %362 = math.rsqrt %361 : vector<16x1xf32>
    %363 = vector.broadcast %362 : vector<16x1xf32> to vector<16x128xf32>
    %364 = arith.mulf %354, %363 : vector<16x128xf32>
    %365 = vector.broadcast %347 : vector<1x128xf32> to vector<16x128xf32>
    %366 = arith.mulf %364, %365 : vector<16x128xf32>
    %367 = vector.broadcast %348 : vector<1x128xf32> to vector<16x128xf32>
    %368 = arith.addf %366, %367 : vector<16x128xf32>
    %c0_156 = arith.constant 0 : index
    %c0_157 = arith.constant 0 : index
    %369 = vector.load %arg10[%c0_156, %c0_157] : memref<16x128xf32, #tpu.memory_space<vmem>>, vector<16x128xf32>
    tpu.vector_store %arg10[%c0_156, %c0_157], %368 {strides = array<i32>} : memref<16x128xf32, #tpu.memory_space<vmem>>, vector<16x128xf32>,
    return
  }
  func.func @transform_0(%arg0: i32) -> (i32, i32) {
    %c0_i32 = arith.constant 0 : i32
    %c0_i32_0 = arith.constant 0 : i32
    return %arg0, %c0_i32 : i32, i32
  }
  func.func @transform_1(%arg0: i32) -> (i32, i32) {
    %c0_i32 = arith.constant 0 : i32
    %c0_i32_0 = arith.constant 0 : i32
    return %arg0, %c0_i32 : i32, i32
  }
  func.func @transform_2(%arg0: i32) -> (i32, i32, i32) {
    %c0_i32 = arith.constant 0 : i32
    %c0_i32_0 = arith.constant 0 : i32
    %c0_i32_1 = arith.constant 0 : i32
    %c0_i32_2 = arith.constant 0 : i32
    return %c0_i32, %c0_i32_0, %c0_i32_1 : i32, i32, i32
  }
  func.func @transform_3(%arg0: i32) -> (i32, i32, i32) {
    %c0_i32 = arith.constant 0 : i32
    %c0_i32_0 = arith.constant 0 : i32
    %c0_i32_1 = arith.constant 0 : i32
    %c0_i32_2 = arith.constant 0 : i32
    return %c0_i32, %c0_i32_0, %c0_i32_1 : i32, i32, i32
  }
  func.func @transform_4(%arg0: i32) -> (i32, i32, i32) {
    %c0_i32 = arith.constant 0 : i32
    %c0_i32_0 = arith.constant 0 : i32
    %c0_i32_1 = arith.constant 0 : i32
    %c0_i32_2 = arith.constant 0 : i32
    return %c0_i32, %c0_i32_0, %c0_i32_1 : i32, i32, i32
  }
  func.func @transform_5(%arg0: i32) -> (i32, i32) {
    %c0_i32 = arith.constant 0 : i32
    %c0_i32_0 = arith.constant 0 : i32
    %c0_i32_1 = arith.constant 0 : i32
    return %c0_i32, %c0_i32_0 : i32, i32
  }
  func.func @transform_6(%arg0: i32) -> (i32, i32) {
    %c0_i32 = arith.constant 0 : i32
    %c0_i32_0 = arith.constant 0 : i32
    %c0_i32_1 = arith.constant 0 : i32
    return %c0_i32, %c0_i32_0 : i32, i32
  }
  func.func @transform_7(%arg0: i32) -> (i32, i32) {
    %c0_i32 = arith.constant 0 : i32
    %c0_i32_0 = arith.constant 0 : i32
    %c0_i32_1 = arith.constant 0 : i32
    return %c0_i32, %c0_i32_0 : i32, i32
  }
  func.func @transform_8(%arg0: i32) -> (i32, i32) {
    %c0_i32 = arith.constant 0 : i32
    %c0_i32_0 = arith.constant 0 : i32
    %c0_i32_1 = arith.constant 0 : i32
    return %c0_i32, %c0_i32_0 : i32, i32
  }
  func.func @transform_9(%arg0: i32) -> (i32, i32) {
    %c0_i32 = arith.constant 0 : i32
    %c0_i32_0 = arith.constant 0 : i32
    return %arg0, %c0_i32 : i32, i32
  }
}

</mosaic_0001>

<bundles_post_ra>
// kernel: tpu_custom_call.1
= control target key start
LH: loop header
LB: loop body
LE: loop exit
PB: predicated region body
PF: predicated region fallthrough
CT: control target
= control target key end

     0   :  { %14 = vsyncpa [#allocation3], 0  ;;  %s6491_s0 = inlined_call_operand.hbm [shape: f32[16,128], index: 0, kind: input, shape index: {}]   ;;  %s6492_s1 = inlined_call_operand.hbm [shape: f32[16,128], index: 1, kind: input, shape index: {}]   ;;  %s6493_s2 = inlined_call_operand.hbm [shape: bf16[4,128,128], index: 2, kind: input, shape index: {}]   ;;  %s6494_s3 = inlined_call_operand.hbm [shape: bf16[4,128,512], index: 3, kind: input, shape index: {}]   ;;  %s6495_s4 = inlined_call_operand.hbm [shape: bf16[4,512,128], index: 4, kind: input, shape index: {}]   ;;  %s6496_s5 = inlined_call_operand.hbm [shape: bf16[256,128], index: 5, kind: input, shape index: {}]   ;;  %s6497_s6 = inlined_call_operand.hbm [shape: bf16[128,128], index: 6, kind: input, shape index: {}]   ;;  %s6498_s7 = inlined_call_operand.hbm [shape: f32[28,128], index: 7, kind: input, shape index: {}]   ;;  %s6499_s8 = inlined_call_operand.hbm [shape: f32[4,512], index: 8, kind: input, shape index: {}]   ;;  %s6500_s9 = inlined_call_operand.hbm [shape: f32[16,128], index: 9, kind: output, shape index: {}]  }
   0x1   :  { %15 = vsyncpa [#allocation6], 0 }
   0x2   :  { %16 = vsyncpa [#allocation9], 0 }
   0x3   :  { %17 = vsyncpa [#allocation12], 0 }
   0x4   :  { %18 = vsyncpa [#allocation15], 0 }
   0x5   :  { %19 = vsyncpa [#allocation4], 0  ;;  %s37_s11 = sshll.u32 %s6492_s1, 4  ;;  %s5851_s12 = smov [#allocation5]   ;;  %s38_s11 = int_to_ptr.hbm [resolvable:$true] %s37_s11 }
   0x6   :  { %s39_s13 = sshll.u32 %s5851_s12, 4  ;;  %s63_s16 = sshll.u32 %s6494_s3, 4  ;;  %s40_s13 = int_to_ptr.vmem [resolvable:$true] %s39_s13  ;;  %s64_s16 = int_to_ptr.hbm [resolvable:$true] %s63_s16 }
   0x7   :  { %s5852_s17 = smov 128   ;;  %s5853_s18 = smov 8  }
   0x8   :  { %45 = dma.hbm_to_vmem [thread:$0]  %s38_s11, 256, %s40_s13, [#allocation6], %s5852_s17, %s5852_s17, %s5853_s18  }
   0x9   :  { %s5854_s19 = smov [#allocation8]   ;;  %s5855_s21 = smov 256  }
   0xa   :  { %s65_s20 = sshll.u32 %s5854_s19, 4  ;;  %s5856_s1 = smov 16   ;;  %s66_s20 = int_to_ptr.vmem [resolvable:$true] %s65_s20 }
   0xb   :  { %71 = dma.hbm_to_vmem [thread:$0]  %s64_s16, 16384, %s66_s20, [#allocation9], %s5855_s21, %s5855_s21, %s5856_s1  }
   0xc   :  { %s89_s24 = sshll.u32 %s6496_s5, 4  ;;  %s5857_s25 = smov [#allocation11]   ;;  %s90_s24 = int_to_ptr.hbm [resolvable:$true] %s89_s24 }
   0xd   :  { %s91_s3 = sshll.u32 %s5857_s25, 4  ;;  %s115_s28 = sshll.u32 %s6498_s7, 4  ;;  %s92_s3 = int_to_ptr.vmem [resolvable:$true] %s91_s3  ;;  %s116_s28 = int_to_ptr.hbm [resolvable:$true] %s115_s28 }
   0xe   :  { %s5858_s29 = smov 64   ;;  %s5859_s30 = smov 4  }
   0xf   :  { %97 = dma.hbm_to_vmem [thread:$0]  %s90_s24, 2048, %s92_s3, [#allocation12], %s5858_s29, %s5858_s29, %s5859_s30  }
  0x10   :  { %s5860_s10 = smov [#allocation14]   ;;  %s24_s5 = sshll.u32 %s6491_s0, 4  ;;  %s25_s5 = int_to_ptr.hbm [resolvable:$true] %s24_s5 }
  0x11   :  { %s117_s11 = sshll.u32 %s5860_s10, 4  ;;  %s50_s15 = sshll.u32 %s6493_s2, 4  ;;  %s118_s11 = int_to_ptr.vmem [resolvable:$true] %s117_s11  ;;  %s51_s15 = int_to_ptr.hbm [resolvable:$true] %s50_s15 }
  0x12   :  { %123 = dma.hbm_to_vmem [thread:$0]  %s116_s28, 512, %s118_s11, [#allocation15], %s5852_s17, %s5852_s17, %s5853_s18  }
  0x13   :  { %s5861_s16 = smov [#allocation2]   ;;  %s5862_s20 = smov [#allocation7]  }
  0x14   :  { %s26_s19 = sshll.u32 %s5861_s16, 4  ;;  %s52_s0 = sshll.u32 %s5862_s20, 4  ;;  %s27_s19 = int_to_ptr.vmem [resolvable:$true] %s26_s19  ;;  %s53_s0 = int_to_ptr.vmem [resolvable:$true] %s52_s0 }
  0x15   :  { %32 = dma.hbm_to_vmem [thread:$0]  %s25_s5, 256, %s27_s19, [#allocation3], %s5852_s17, %s5852_s17, %s5853_s18  }
  0x16   :  { %s76_s22 = sshll.u32 %s6495_s4, 4  ;;  %s102_s24 = sshll.u32 %s6497_s6, 4  ;;  %s77_s22 = int_to_ptr.hbm [resolvable:$true] %s76_s22  ;;  %s103_s24 = int_to_ptr.hbm [resolvable:$true] %s102_s24 }
  0x17   :  { %58 = dma.hbm_to_vmem [thread:$0]  %s51_s15, 4096, %s53_s0, [#allocation6], %s5858_s29, %s5858_s29, %s5859_s30  }
  0x18   :  { %s5863_s25 = smov [#allocation10]   ;;  %s5864_s26 = smov [#allocation13]  }
  0x19   :  { %s78_s3 = sshll.u32 %s5863_s25, 4  ;;  %s104_s4 = sshll.u32 %s5864_s26, 4  ;;  %s79_s3 = int_to_ptr.vmem [resolvable:$true] %s78_s3  ;;  %s105_s4 = int_to_ptr.vmem [resolvable:$true] %s104_s4 }
  0x1a   :  { %84 = dma.hbm_to_vmem [thread:$0]  %s77_s22, 16384, %s79_s3, [#allocation9], %s5858_s29, %s5858_s29, %s5859_s30  }
  0x1b   :  { %s129_s10 = sshll.u32 %s6499_s8, 4  ;;  %s5865_s6 = smov [#allocation16]   ;;  %s130_s10 = int_to_ptr.hbm [resolvable:$true] %s129_s10 }
  0x1c   :  { %110 = dma.hbm_to_vmem [thread:$0]  %s103_s24, 1024, %s105_s4, [#allocation12], %s5858_s29, %s5858_s29, %s5859_s30  }
  0x1d   :  { %s131_s11 = sshll.u32 %s5865_s6, 4  ;;  %s132_s11 = int_to_ptr.vmem [resolvable:$true] %s131_s11 }
  0x1e   :  { %134 = dma.hbm_to_vmem [thread:$0]  %s130_s10, 256, %s132_s11, [#allocation15]  }
  0x1f   :  { %5839 = dma.done.wait [#allocation3], 256  }
  0x20   :  { %5840 = vsyncadd [#allocation3], 4294967040 }
  0x21   :  { %5841 = dma.done.wait [#allocation6], 4352  }
  0x22   :  { %5842 = vsyncadd [#allocation6], 4294962944 }
  0x23   :  { %5843 = dma.done.wait [#allocation9], 32768  }
  0x24   :  { %5844 = vsyncadd [#allocation9], 4294934528 }
  0x25   :  { %5845 = dma.done.wait [#allocation12], 3072  }
  0x26   :  { %5846 = vsyncadd [#allocation12], 4294964224 }
  0x27   :  { %5847 = dma.done.wait [#allocation15], 768  }
  0x28   :  { %5848 = vsyncadd [#allocation15], 4294966528  ;;  %v5135_v0 = vld [vmem:[#allocation7 + $0x38] sm:$0xff]  ;;  %v5134_v2 = vld [vmem:[#allocation7 + $0x30] sm:$0xff]  ;;  %v5866_v36 = vmov 128.0   ;;  %s5867_s8 = smov [#allocation17]  }
  0x29   :  { %v5143_v1 = vld [vmem:[#allocation7 + $0x78] sm:$0xff]  ;;  %242 = vmatpush.bf16.msra.mxu0 %v5135_v0  ;;  %v5142_v3 = vld [vmem:[#allocation7 + $0x70] sm:$0xff]  ;;  %v5133_v4 = vld [vmem:[#allocation7 + $0x28] sm:$0xff]  ;;  %5485 = vrcp.f32 %v5866_v36  ;;  %s3859_s29 = sshll.u32 %s5867_s8, 4  ;;  %s3861_s13 = sshll.u32 %s6500_s9, 4  ;;  %s3860_s29 = int_to_ptr.vmem [resolvable:$true] %s3859_s29  ;;  %s3862_s13 = int_to_ptr.hbm [resolvable:$true] %s3861_s13 }
  0x2a   :  { %381 = vmatpush.bf16.msra.mxu1 %v5143_v1  ;;  %v5141_v5 = vld [vmem:[#allocation7 + $0x68] sm:$0xff]  ;;  %v5132_v6 = vld [vmem:[#allocation7 + $0x20] sm:$0xff]  ;;  %v5131_v8 = vld [vmem:[#allocation7 + $0x18] sm:$0xff] }
  0x2b   :  { %v5140_v7 = vld [vmem:[#allocation7 + $0x60] sm:$0xff]  ;;  %v5139_v9 = vld [vmem:[#allocation7 + $0x58] sm:$0xff]  ;;  %v5130_v10 = vld [vmem:[#allocation7 + $0x10] sm:$0xff] }
  0x2c   :  { %v5138_v11 = vld [vmem:[#allocation7 + $0x50] sm:$0xff]  ;;  %v5129_v12 = vld [vmem:[#allocation7 + $0x8] sm:$0xff]  ;;  %v5128_v14 = vld [vmem:[#allocation7] sm:$0xff] }
  0x2d   :  { %243 = vmatpush.bf16.msra.mxu0 %v5134_v2  ;;  %v5137_v13 = vld [vmem:[#allocation7 + $0x48] sm:$0xff]  ;;  %v5136_v15 = vld [vmem:[#allocation7 + $0x40] sm:$0xff]  ;;  %v173_v18 = vld [vmem:[#allocation5] sm:$0xff] }
  0x2e   :  { %382 = vmatpush.bf16.msra.mxu1 %v5142_v3  ;;  %v171_v16 = vld [vmem:[#allocation2] sm:$0xff]  ;;  %v172_v17 = vld [vmem:[#allocation2 + $0x8] sm:$0xff]  ;;  %v174_v19 = vld [vmem:[#allocation5 + $0x8] sm:$0xff] }
  0x2f   :  { %v191_v20 = vpack.c.bf16 %v172_v17, %v171_v16  ;;  %v330_v21 = vpack.c.bf16 %v174_v19, %v173_v18  ;;  %v5457_v22 = vld [vmem:[#allocation14] ss:$0 sm:$0xff]  ;;  %v5458_v23 = vld [vmem:[#allocation14 + $0x1] ss:$0 sm:$0xff]  ;;  %v5486_v37 = vpop.eup %5485  ;;  %v5174_v60 = vld [vmem:[#allocation8 + $0xec] sm:$0xf0] }
  0x30   :  { %v265_v38 = vmul.f32 128.0, %v5486_v37  ;;  %vm269_vm0 = vweird.f32 %v5486_v37  ;;  %v4056_v59 = vld [vmem:[#allocation8 + $0xe0] sm:$0xf]  ;;  %v5172_v61 = vld [vmem:[#allocation8 + $0xe4] sm:$0xf] }
  0x31   :  { %244 = vmatpush.bf16.msra.mxu0 %v5133_v4  ;;  %v4057_v62 = vor.u32 %v5174_v60, %v4056_v59  ;;  %v4058_v63 = vld [vmem:[#allocation8 + $0xf0] sm:$0xf0]  ;;  %v4064_v0 = vld [vmem:[#allocation8 + $0xe8] sm:$0xf]  ;;  %v5175_v1 = vld [vmem:[#allocation8 + $0xf4] sm:$0xf0] }
  0x32   :  { %383 = vmatpush.bf16.msra.mxu1 %v5141_v5  ;;  %v266_v39 = vsub.f32 1.0, %v265_v38  ;;  %v4061_v2 = vor.u32 %v5172_v61, %v4058_v63  ;;  %v4065_v3 = vor.u32 %v5175_v1, %v4064_v0  ;;  %v5173_v4 = vld [vmem:[#allocation8 + $0xec] sm:$0xf]  ;;  %v4066_v5 = vld [vmem:[#allocation8 + $0xf8] sm:$0xf0] }
  0x33   :  { %648 = vmatpush.bf16.msra.mxu2 %v4057_v62  ;;  %v4016_v36 = vld [vmem:[#allocation8 + $0x88] sm:$0xf]  ;;  %v3976_v60 = vld [vmem:[#allocation8 + $0x40] sm:$0xf]  ;;  %v5154_v61 = vld [vmem:[#allocation8 + $0x4c] sm:$0xf0] }
  0x34   :  { %v267_v40 = vmul.f32 %v5486_v37, %v266_v39  ;;  %662 = vmatpush.bf16.msra.mxu3 %v4061_v2  ;;  %v5152_v62 = vld [vmem:[#allocation8 + $0x44] sm:$0xf]  ;;  %v3977_v63 = vor.u32 %v5154_v61, %v3976_v60  ;;  %v3978_v0 = vld [vmem:[#allocation8 + $0x50] sm:$0xf0]  ;;  %v3984_v1 = vld [vmem:[#allocation8 + $0x48] sm:$0xf] }
  0x35   :  { %245 = vmatpush.bf16.msra.mxu0 %v5132_v6  ;;  %v4069_v6 = vor.u32 %v5173_v4, %v4066_v5  ;;  %v5155_v2 = vld [vmem:[#allocation8 + $0x54] sm:$0xf0]  ;;  %v5153_v5 = vld [vmem:[#allocation8 + $0x4c] sm:$0xf] }
  0x36   :  { %384 = vmatpush.bf16.msra.mxu1 %v5140_v7  ;;  %v268_v41 = vadd.f32 %v5486_v37, %v267_v40  ;;  %v4040_v7 = vld [vmem:[#allocation8 + $0xc0] sm:$0xf]  ;;  %v5161_v40 = vld [vmem:[#allocation8 + $0x8c] sm:$0xf]  ;;  %v3985_v4 = vor.u32 %v5155_v2, %v3984_v1 }
  0x38   :  { %v5966_v42 = vsel %vm269_vm0, %v5486_v37, %v268_v41  ;;  %v5163_v37 = vld [vmem:[#allocation8 + $0x94] sm:$0xf0]  ;;  %v4018_v41 = vld [vmem:[#allocation8 + $0x98] sm:$0xf0] }
  0x39   :  { %246 = vmatpush.bf16.msra.mxu0 %v5131_v8  ;;  %v5170_v8 = vld [vmem:[#allocation8 + $0xcc] sm:$0xf0]  ;;  %v4017_v39 = vor.u32 %v5163_v37, %v4016_v36  ;;  %v5199_v36 = vld [vmem:[#allocation10 + $0xb8] sm:$0xff] }
  0x3a   :  { %385 = vmatpush.bf16.msra.mxu1 %v5139_v9  ;;  %v5168_v9 = vld [vmem:[#allocation8 + $0xc4] sm:$0xf]  ;;  %v5207_v37 = vld [vmem:[#allocation10 + $0xf8] sm:$0xff] }
  0x3d   :  { %247 = vmatpush.bf16.msra.mxu0 %v5130_v10  ;;  %v4041_v10 = vor.u32 %v5170_v8, %v4040_v7  ;;  %v3960_v8 = vld [vmem:[#allocation8 + $0x20] sm:$0xf] }
  0x3e   :  { %386 = vmatpush.bf16.msra.mxu1 %v5138_v11  ;;  %v4042_v11 = vld [vmem:[#allocation8 + $0xd0] sm:$0xf0] }
  0x3f   :  { %649 = vmatpush.bf16.msra.mxu2 %v4041_v10  ;;  %v5148_v10 = vld [vmem:[#allocation8 + $0x24] sm:$0xf] }
  0x41   :  { %248 = vmatpush.bf16.msra.mxu0 %v5129_v12  ;;  %v4048_v12 = vld [vmem:[#allocation8 + $0xc8] sm:$0xf] }
  0x42   :  { %387 = vmatpush.bf16.msra.mxu1 %v5137_v13  ;;  %v5171_v13 = vld [vmem:[#allocation8 + $0xd4] sm:$0xf0] }
  0x45   :  { %249 = vmatpush.bf16.msra.mxu0 %v5128_v14  ;;  %v4045_v14 = vor.u32 %v5168_v9, %v4042_v11  ;;  %v5150_v9 = vld [vmem:[#allocation8 + $0x2c] sm:$0xf0] }
  0x46   :  { %388 = vmatpush.bf16.msra.mxu1 %v5136_v15  ;;  %v4049_v15 = vor.u32 %v5171_v13, %v4048_v12  ;;  %v3961_v11 = vor.u32 %v5150_v9, %v3960_v8  ;;  %v3962_v12 = vld [vmem:[#allocation8 + $0x30] sm:$0xf0]  ;;  %v3968_v13 = vld [vmem:[#allocation8 + $0x28] sm:$0xf] }
  0x47   :  { %663 = vmatpush.bf16.msra.mxu3 %v4045_v14  ;;  %v5151_v14 = vld [vmem:[#allocation8 + $0x34] sm:$0xf0]  ;;  %v5205_v8 = vld [vmem:[#allocation10 + $0xe8] sm:$0xff]  ;;  %v5182_v9 = vld [vmem:[#allocation10 + $0x30] sm:$0xff] }
  0x48   :  { %250 = vmatmul.bf16.vlgmr.msra.gmra.mxu0 %v191_v20  ;;  %v5166_v20 = vld [vmem:[#allocation8 + $0xac] sm:$0xf0] }
  0x49   :  { %389 = vmatmul.bf16.vlgmr.msra.gmra.mxu1 %v330_v21  ;;  %676 = vmatpush.bf16.msrb.mxu0 %v4065_v3  ;;  %v5164_v21 = vld [vmem:[#allocation8 + $0xa4] sm:$0xf]  ;;  %v3981_v3 = vor.u32 %v5152_v62, %v3978_v0 }
  0x4a   :  { %690 = vmatpush.bf16.msrb.mxu1 %v4069_v6  ;;  %v3986_v6 = vld [vmem:[#allocation8 + $0x58] sm:$0xf0]  ;;  %v5459_v62 = vld [vmem:[#allocation14 + $0x5] ss:$0 sm:$0xff] }
  0x4b   :  { %v3989_v7 = vor.u32 %v5153_v5, %v3986_v6 }
  0x4d   :  { %677 = vmatpush.bf16.msrb.mxu0 %v4049_v15 }
  0xc5   :  { %v251_v24 = vpop.f32.mrf.mxu0 }
  0xc6   :  { %v390_v25 = vpop.f32.mrf.mxu1  ;;  %v252_v26 = vadd.f32 %v5457_v22, %v251_v24  ;;  %v4032_v24 = vld [vmem:[#allocation8 + $0xa8] sm:$0xf] }
  0xc7   :  { %v391_v27 = vadd.f32 %v5458_v23, %v390_v25  ;;  %v5167_v25 = vld [vmem:[#allocation8 + $0xb4] sm:$0xf0] }
  0xc8   :  { %v256_v29 = vadd.f32 %v252_v26, %v173_v18 }
  0xc9   :  { %v395_v28 = vadd.f32 %v391_v27, %v171_v16  ;;  %v5169_v16 = vld [vmem:[#allocation8 + $0xcc] sm:$0xf]  ;;  %v4033_v27 = vor.u32 %v5167_v25, %v4032_v24  ;;  %v5144_v24 = vld [vmem:[#allocation8 + $0x4] sm:$0xf] }
  0xca   :  { %260 = vadd.xlane.f32.xlu2 %v256_v29 }
  0xcb   :  { %399 = vadd.xlane.f32.xlu0 %v395_v28  ;;  %678 = vmatpush.bf16.msrb.mxu0 %v4033_v27  ;;  %v3946_v27 = vld [vmem:[#allocation8 + $0x10] sm:$0xf0] }
  0xcd   :  { %v253_v31 = vpop.f32.mrf.mxu0 }
  0xce   :  { %v392_v30 = vpop.f32.mrf.mxu1  ;;  %v254_v33 = vadd.f32 %v5457_v22, %v253_v31  ;;  %v4008_v31 = vld [vmem:[#allocation8 + $0x80] sm:$0xf] }
  0xcf   :  { %v393_v32 = vadd.f32 %v5458_v23, %v392_v30  ;;  %v4026_v23 = vld [vmem:[#allocation8 + $0xb0] sm:$0xf0]  ;;  %679 = vmatpush.bf16.msrb.mxu0 %v4017_v39  ;;  %v5183_v39 = vld [vmem:[#allocation10 + $0x38] sm:$0xff] }
  0xd0   :  { %v257_v35 = vadd.f32 %v254_v33, %v174_v19  ;;  %v4024_v19 = vld [vmem:[#allocation8 + $0xa0] sm:$0xf]  ;;  %v4029_v26 = vor.u32 %v5164_v21, %v4026_v23  ;;  %v5160_v33 = vld [vmem:[#allocation8 + $0x84] sm:$0xf]  ;;  %v5146_v23 = vld [vmem:[#allocation8 + $0xc] sm:$0xf0] }
  0xd1   :  { %v396_v34 = vadd.f32 %v393_v32, %v172_v17  ;;  %v4050_v17 = vld [vmem:[#allocation8 + $0xd8] sm:$0xf0]  ;;  %v4025_v22 = vor.u32 %v5166_v20, %v4024_v19  ;;  %v5162_v32 = vld [vmem:[#allocation8 + $0x8c] sm:$0xf0] }
  0xd2   :  { %262 = vadd.xlane.f32.xlu2 %v257_v35  ;;  %v4053_v18 = vor.u32 %v5169_v16, %v4050_v17  ;;  %664 = vmatpush.bf16.msra.mxu3 %v4029_v26  ;;  %v3965_v16 = vor.u32 %v5148_v10, %v3962_v12  ;;  %v3969_v17 = vor.u32 %v5151_v14, %v3968_v13  ;;  %v3970_v19 = vld [vmem:[#allocation8 + $0x38] sm:$0xf0]  ;;  %v5196_v10 = vld [vmem:[#allocation10 + $0xa0] sm:$0xff]  ;;  %v5181_v12 = vld [vmem:[#allocation10 + $0x28] sm:$0xff] }
  0xd3   :  { %401 = vadd.xlane.f32.xlu0 %v396_v34  ;;  %650 = vmatpush.bf16.msra.mxu2 %v4025_v22  ;;  %v3944_v22 = vld [vmem:[#allocation8] sm:$0xf]  ;;  %v5189_v13 = vld [vmem:[#allocation10 + $0x68] sm:$0xff]  ;;  %v5195_v14 = vld [vmem:[#allocation10 + $0x98] sm:$0xff] }
  0xd4   :  { %691 = vmatpush.bf16.msrb.mxu1 %v4053_v18  ;;  %v5149_v18 = vld [vmem:[#allocation8 + $0x2c] sm:$0xf]  ;;  %v3945_v26 = vor.u32 %v5146_v23, %v3944_v22 }
  0xd5   :  { %v3973_v21 = vor.u32 %v5149_v18, %v3970_v19  ;;  %v5194_v18 = vld [vmem:[#allocation10 + $0x90] sm:$0xff]  ;;  %v5193_v23 = vld [vmem:[#allocation10 + $0x88] sm:$0xff] }
  0xd6   :  { %v5202_v19 = vld [vmem:[#allocation10 + $0xd0] sm:$0xff] }
 0x13d   :  { %v261_v44 = vpop.xlane.xlu2 %260 }
 0x13e   :  { %v400_v43 = vpop.xlane.xlu0 %399  ;;  %v271_v46 = vmul.f32 %v5966_v42, %v261_v44  ;;  %v3992_v44 = vld [vmem:[#allocation8 + $0x60] sm:$0xf] }
 0x13f   :  { %v403_v45 = vmul.f32 %v400_v43, %v5966_v42  ;;  %v4021_v43 = vor.u32 %v5161_v40, %v4018_v41  ;;  %v5191_v40 = vld [vmem:[#allocation10 + $0x78] sm:$0xff]  ;;  %v5198_v41 = vld [vmem:[#allocation10 + $0xb0] sm:$0xff] }
 0x140   :  { %v5970_v47 = vsub.f32 %v256_v29, %v271_v46  ;;  %v4034_v29 = vld [vmem:[#allocation8 + $0xb8] sm:$0xf0]  ;;  %v5156_v46 = vld [vmem:[#allocation8 + $0x64] sm:$0xf] }
 0x141   :  { %v5972_v48 = vsub.f32 %v395_v28, %v403_v45  ;;  %v5165_v28 = vld [vmem:[#allocation8 + $0xac] sm:$0xf]  ;;  %v5158_v45 = vld [vmem:[#allocation8 + $0x6c] sm:$0xf0] }
 0x142   :  { %v275_v50 = vmul.f32 %v5970_v47, %v5970_v47  ;;  %v4037_v30 = vor.u32 %v5165_v28, %v4034_v29  ;;  %v3949_v28 = vor.u32 %v5144_v24, %v3946_v27  ;;  %v3952_v29 = vld [vmem:[#allocation8 + $0x8] sm:$0xf] }
 0x143   :  { %v407_v49 = vmul.f32 %v5972_v48, %v5972_v48  ;;  %v5201_v24 = vld [vmem:[#allocation10 + $0xc8] sm:$0xff] }
 0x144   :  { %277 = vadd.xlane.f32.xlu0 %v275_v50  ;;  %692 = vmatpush.bf16.msrb.mxu1 %v4037_v30  ;;  %v3994_v50 = vld [vmem:[#allocation8 + $0x70] sm:$0xf0]  ;;  %v5147_v30 = vld [vmem:[#allocation8 + $0x14] sm:$0xf0] }
 0x145   :  { %409 = vadd.xlane.f32.xlu1 %v407_v49  ;;  %v263_v52 = vpop.xlane.xlu2 %262  ;;  %v3993_v49 = vor.u32 %v5158_v45, %v3992_v44 }
 0x146   :  { %v402_v51 = vpop.xlane.xlu0 %401  ;;  %v272_v55 = vmul.f32 %v5966_v42, %v263_v52  ;;  %v5159_v52 = vld [vmem:[#allocation8 + $0x74] sm:$0xf0] }
 0x147   :  { %v404_v53 = vmul.f32 %v402_v51, %v5966_v42  ;;  %v4000_v51 = vld [vmem:[#allocation8 + $0x68] sm:$0xf] }
 0x148   :  { %v5984_v57 = vsub.f32 %v257_v35, %v272_v55  ;;  %v4010_v35 = vld [vmem:[#allocation8 + $0x90] sm:$0xf0]  ;;  %693 = vmatpush.bf16.msrb.mxu1 %v4021_v43  ;;  %v4001_v55 = vor.u32 %v5159_v52, %v4000_v51 }
 0x149   :  { %v5979_v54 = vsub.f32 %v396_v34, %v404_v53  ;;  %v4009_v34 = vor.u32 %v5162_v32, %v4008_v31  ;;  %v4013_v38 = vor.u32 %v5160_v33, %v4010_v35  ;;  %v3997_v53 = vor.u32 %v5156_v46, %v3994_v50  ;;  %v5145_v31 = vld [vmem:[#allocation8 + $0xc] sm:$0xf]  ;;  %v3954_v33 = vld [vmem:[#allocation8 + $0x18] sm:$0xf0]  ;;  %v5206_v43 = vld [vmem:[#allocation10 + $0xf0] sm:$0xff] }
 0x14a   :  { %v276_v58 = vmul.f32 %v5984_v57, %v5984_v57  ;;  %680 = vmatpush.bf16.msrb.mxu0 %v4001_v55  ;;  %v3953_v32 = vor.u32 %v5147_v30, %v3952_v29  ;;  %v5192_v29 = vld [vmem:[#allocation10 + $0x80] sm:$0xff] }
 0x14b   :  { %v408_v56 = vmul.f32 %v5979_v54, %v5979_v54  ;;  %651 = vmatpush.bf16.msra.mxu2 %v4009_v34  ;;  %665 = vmatpush.bf16.msra.mxu3 %v4013_v38  ;;  %v3957_v34 = vor.u32 %v5145_v31, %v3954_v33  ;;  %v5200_v30 = vld [vmem:[#allocation10 + $0xc0] sm:$0xff]  ;;  %v4320_v31 = vld [vmem:[#allocation8 + $0x1e8] sm:$0xf]  ;;  %v5237_v33 = vld [vmem:[#allocation8 + $0x1ec] sm:$0xf] }
 0x14d   :  { %411 = vadd.xlane.f32.xlu1 %v408_v56  ;;  %v5157_v56 = vld [vmem:[#allocation8 + $0x6c] sm:$0xf] }
 0x14e   :  { %681 = vmatpush.bf16.msrb.mxu0 %v3985_v4 }
 0x14f   :  { %652 = vmatpush.bf16.msra.mxu2 %v3993_v49  ;;  %666 = vmatpush.bf16.msra.mxu3 %v3997_v53 }
 0x152   :  { %682 = vmatpush.bf16.msrb.mxu0 %v3969_v17  ;;  %v5188_v17 = vld [vmem:[#allocation10 + $0x60] sm:$0xff] }
 0x153   :  { %653 = vmatpush.bf16.msra.mxu2 %v3977_v63  ;;  %667 = vmatpush.bf16.msra.mxu3 %v3981_v3  ;;  %v5460_v3 = vld [vmem:[#allocation14 + $0xd] ss:$0 sm:$0xff] }
 0x155   :  { %279 = vadd.xlane.f32.xlu1 %v276_v58  ;;  %v4002_v58 = vld [vmem:[#allocation8 + $0x78] sm:$0xf0] }
 0x156   :  { %v4005_v59 = vor.u32 %v5157_v56, %v4002_v58  ;;  %683 = vmatpush.bf16.msrb.mxu0 %v3953_v32  ;;  %v5239_v32 = vld [vmem:[#allocation8 + $0x1f4] sm:$0xf0] }
 0x157   :  { %654 = vmatpush.bf16.msra.mxu2 %v3961_v11  ;;  %668 = vmatpush.bf16.msra.mxu3 %v3965_v16  ;;  %v5204_v11 = vld [vmem:[#allocation10 + $0xe0] sm:$0xff] }
 0x158   :  { %694 = vmatpush.bf16.msrb.mxu1 %v4005_v59  ;;  %v5180_v16 = vld [vmem:[#allocation10 + $0x20] sm:$0xff] }
 0x15a   :  { %1066 = vmatpush.bf16.msra.mxu0 %v5199_v36  ;;  %v4321_v36 = vor.u32 %v5239_v32, %v4320_v31  ;;  %v4256_v32 = vld [vmem:[#allocation8 + $0x168] sm:$0xf] }
 0x15b   :  { %655 = vmatpush.bf16.msra.mxu2 %v3945_v26  ;;  %669 = vmatpush.bf16.msra.mxu3 %v3949_v28  ;;  %v5186_v26 = vld [vmem:[#allocation10 + $0x50] sm:$0xff] }
 0x15c   :  { %695 = vmatpush.bf16.msrb.mxu1 %v3989_v7 }
 0x15e   :  { %1067 = vmatpush.bf16.msra.mxu0 %v5198_v41  ;;  %v4304_v41 = vld [vmem:[#allocation8 + $0x1c8] sm:$0xf] }
 0x15f   :  { %1038 = vmatpush.bf16.msrb.mxu2 %v5183_v39  ;;  %1052 = vmatpush.bf16.msrb.mxu3 %v5191_v40  ;;  %v5185_v39 = vld [vmem:[#allocation10 + $0x48] sm:$0xff] }
 0x160   :  { %696 = vmatpush.bf16.msrb.mxu1 %v3973_v21  ;;  %v5187_v21 = vld [vmem:[#allocation10 + $0x58] sm:$0xff] }
 0x163   :  { %1039 = vmatpush.bf16.msrb.mxu2 %v5182_v9  ;;  %v5232_v9 = vld [vmem:[#allocation8 + $0x1c4] sm:$0xf] }
 0x164   :  { %697 = vmatpush.bf16.msrb.mxu1 %v3957_v34  ;;  %v4322_v34 = vld [vmem:[#allocation8 + $0x1f8] sm:$0xf0] }
 0x167   :  { %1040 = vmatpush.bf16.msrb.mxu2 %v5181_v12  ;;  %v4272_v12 = vld [vmem:[#allocation8 + $0x188] sm:$0xf] }
 0x168   :  { %1080 = vmatpush.bf16.msra.mxu1 %v5207_v37  ;;  %v4325_v37 = vor.u32 %v5237_v33, %v4322_v34  ;;  %v5223_v33 = vld [vmem:[#allocation8 + $0x174] sm:$0xf0]  ;;  %v5221_v34 = vld [vmem:[#allocation8 + $0x16c] sm:$0xf] }
 0x16b   :  { %1041 = vmatpush.bf16.msrb.mxu2 %v5180_v16 }
 0x16c   :  { %1081 = vmatpush.bf16.msra.mxu1 %v5206_v43  ;;  %v5235_v43 = vld [vmem:[#allocation8 + $0x1d4] sm:$0xf0] }
 0x170   :  { %1082 = vmatpush.bf16.msra.mxu1 %v5205_v8  ;;  %v5234_v8 = vld [vmem:[#allocation8 + $0x1cc] sm:$0xf0] }
 0x174   :  { %1083 = vmatpush.bf16.msra.mxu1 %v5204_v11 }
 0x1b7   :  { %v278_v22 = vpop.xlane.xlu0 %277 }
 0x1b8   :  { %v410_v15 = vpop.xlane.xlu1 %409  ;;  %v281_v27 = vmul.f32 %v278_v22, %v5966_v42  ;;  %v4280_v22 = vld [vmem:[#allocation8 + $0x1a0] sm:$0xf] }
 0x1b9   :  { %v413_v20 = vmul.f32 %v410_v15, %v5966_v42  ;;  %v5203_v15 = vld [vmem:[#allocation10 + $0xd8] sm:$0xff] }
 0x1ba   :  { %1084 = vmatpush.bf16.msra.mxu1 %v5203_v15  ;;  %v6000_v40 = vadd.f32 1e-05, %v281_v27 }
 0x1bb   :  { %v415_v25 = vadd.f32 1e-05, %v413_v20  ;;  %v5179_v20 = vld [vmem:[#allocation10 + $0x18] sm:$0xff] }
 0x1bc   :  { %1042 = vmatpush.bf16.msrb.mxu2 %v5179_v20  ;;  %vm291_vm9 = vweird.f32 %v6000_v40 }
 0x1bd   :  { %5487 = vrsqrt.f32 %v415_v25  ;;  %vm423_vm2 = vweird.f32 %v415_v25 }
 0x1be   :  { %1085 = vmatpush.bf16.msra.mxu1 %v5202_v19 }
 0x1c0   :  { %v412_v35 = vpop.xlane.xlu1 %411 }
 0x1c1   :  { %v414_v38 = vmul.f32 %v412_v35, %v5966_v42 }
 0x1c2   :  { %1086 = vmatpush.bf16.msra.mxu1 %v5201_v24  ;;  %v5228_v24 = vld [vmem:[#allocation8 + $0x1a4] sm:$0xf] }
 0x1c3   :  { %v5488_v44 = vpop.eup %5487  ;;  %v416_v45 = vadd.f32 1e-05, %v414_v38  ;;  %v5177_v38 = vld [vmem:[#allocation10 + $0x8] sm:$0xff] }
 0x1c4   :  { %v418_v46 = vmul.f32 %v5488_v44, %v415_v25  ;;  %vm424_vm1 = vweird.f32 %v5488_v44  ;;  %v5178_v25 = vld [vmem:[#allocation10 + $0x10] sm:$0xff] }
 0x1c5   :  { %5489 = vrsqrt.f32 %v416_v45  ;;  %vm425_vm3 = vmor %vm423_vm2, %vm424_vm1  ;;  %vm433_vm5 = vweird.f32 %v416_v45  ;;  %1043 = vmatpush.bf16.msrb.mxu2 %v5178_v25 }
 0x1c6   :  { %v419_v49 = vmul.f32 %v5488_v44, %v418_v46  ;;  %1087 = vmatpush.bf16.msra.mxu1 %v5200_v30  ;;  %v4305_v46 = vor.u32 %v5235_v43, %v4304_v41  ;;  %5491 = vrsqrt.f32 %v6000_v40 }
 0x1c8   :  { %v420_v50 = vmul.f32 0.5, %v419_v49  ;;  %v280_v28 = vpop.xlane.xlu1 %279  ;;  %v4306_v49 = vld [vmem:[#allocation8 + $0x1d8] sm:$0xf0] }
 0x1c9   :  { %v282_v35 = vmul.f32 %v280_v28, %v5966_v42  ;;  %1044 = vmatpush.bf16.msrb.mxu2 %v5177_v38  ;;  %v4282_v28 = vld [vmem:[#allocation8 + $0x1b0] sm:$0xf0] }
 0x1ca   :  { %v421_v51 = vsub.f32 1.5, %v420_v50  ;;  %v4285_v31 = vor.u32 %v5228_v24, %v4282_v28  ;;  %v4250_v24 = vld [vmem:[#allocation8 + $0x170] sm:$0xf0]  ;;  %v5215_v28 = vld [vmem:[#allocation8 + $0x134] sm:$0xf0] }
 0x1cb   :  { %v5490_v52 = vpop.eup %5489  ;;  %v6004_v50 = vadd.f32 1e-05, %v282_v35 }
 0x1cc   :  { %v422_v53 = vmul.f32 %v5488_v44, %v421_v51  ;;  %v428_v55 = vmul.f32 %v5490_v52, %v416_v45  ;;  %vm434_vm4 = vweird.f32 %v5490_v52  ;;  %v6002_v45 = vld [vmem:[#allocation16] ss:$4 sm:$0xf]  ;;  %v6024_v35 = vpop.eup %5491 }
 0x1cd   :  { %vm435_vm6 = vmor %vm433_vm5, %vm434_vm4  ;;  %5493 = vrsqrt.f32 %v6004_v50  ;;  %v480_v25 = vperm.slane %v6002_v45, 0  ;;  %vm301_vm7 = vweird.f32 %v6004_v50  ;;  %vm292_vm10 = vweird.f32 %v6024_v35 }
 0x1ce   :  { %v429_v56 = vmul.f32 %v5490_v52, %v428_v55  ;;  %v426_v58 = vsel %vm425_vm3, %v5488_v44, %v422_v53  ;;  %v5233_v44 = vld [vmem:[#allocation8 + $0x1cc] sm:$0xf]  ;;  %v5184_v53 = vld [vmem:[#allocation10 + $0x40] sm:$0xff]  ;;  %vm6108_vm12 = vmor %vm291_vm9, %vm292_vm10 }
 0x1cf   :  { %v437_v61 = vmul.f32 %v426_v58, %v5972_v48  ;;  %v5197_v48 = vld [vmem:[#allocation10 + $0xa8] sm:$0xff]  ;;  %v4309_v51 = vor.u32 %v5233_v44, %v4306_v49  ;;  %v4312_v55 = vld [vmem:[#allocation8 + $0x1e0] sm:$0xf]  ;;  %v5236_v58 = vld [vmem:[#allocation8 + $0x1e4] sm:$0xf] }
 0x1d0   :  { %v430_v59 = vmul.f32 0.5, %v429_v56  ;;  %1068 = vmatpush.bf16.msra.mxu0 %v5197_v48  ;;  %v5238_v56 = vld [vmem:[#allocation8 + $0x1ec] sm:$0xf0]  ;;  %v4296_v48 = vld [vmem:[#allocation8 + $0x1c0] sm:$0xf] }
 0x1d1   :  { %v440_v2 = vmul.f32 %v5459_v62, %v437_v61  ;;  %v4264_v49 = vld [vmem:[#allocation8 + $0x180] sm:$0xf] }
 0x1d2   :  { %v431_v60 = vsub.f32 1.5, %v430_v59  ;;  %v4314_v59 = vld [vmem:[#allocation8 + $0x1f0] sm:$0xf0] }
 0x1d3   :  { %v5992_v5 = vadd.f32 %v5460_v3, %v440_v2  ;;  %v4317_v61 = vor.u32 %v5236_v58, %v4314_v59  ;;  %v483_v2 = vperm.slane %v6002_v45, 3  ;;  %v6026_v38 = vpop.eup %5493  ;;  %v4266_v58 = vld [vmem:[#allocation8 + $0x190] sm:$0xf0]  ;;  %v4240_v59 = vld [vmem:[#allocation8 + $0x148] sm:$0xf] }
 0x1d4   :  { %v432_v63 = vmul.f32 %v5490_v52, %v431_v60  ;;  %1069 = vmatpush.bf16.msra.mxu0 %v5196_v10  ;;  %v4313_v60 = vor.u32 %v5238_v56, %v4312_v55  ;;  %v4298_v10 = vld [vmem:[#allocation8 + $0x1d0] sm:$0xf0]  ;;  %vm302_vm8 = vweird.f32 %v6026_v38 }
 0x1d5   :  { %v4301_v11 = vor.u32 %v5232_v9, %v4298_v10  ;;  %v4242_v10 = vld [vmem:[#allocation8 + $0x158] sm:$0xf0]  ;;  %vm6100_vm11 = vmor %vm301_vm7, %vm302_vm8 }
 0x1d6   :  { %v436_v0 = vsel %vm435_vm6, %v5490_v52, %v432_v63  ;;  %v5176_v52 = vld [vmem:[#allocation10] sm:$0xff]  ;;  %v5231_v63 = vld [vmem:[#allocation8 + $0x1b4] sm:$0xf0] }
 0x1d7   :  { %v438_v1 = vmul.f32 %v436_v0, %v5979_v54  ;;  %v5190_v54 = vld [vmem:[#allocation10 + $0x70] sm:$0xff]  ;;  %v5229_v0 = vld [vmem:[#allocation8 + $0x1ac] sm:$0xf]  ;;  %1045 = vmatpush.bf16.msrb.mxu2 %v5176_v52  ;;  %v5224_v52 = vld [vmem:[#allocation8 + $0x184] sm:$0xf] }
 0x1d8   :  { %1053 = vmatpush.bf16.msrb.mxu3 %v5190_v54  ;;  %1070 = vmatpush.bf16.msra.mxu0 %v5195_v14  ;;  %v4297_v54 = vor.u32 %v5234_v8, %v4296_v48  ;;  %v5225_v14 = vld [vmem:[#allocation8 + $0x18c] sm:$0xf] }
 0x1d9   :  { %v441_v4 = vmul.f32 %v5459_v62, %v438_v1  ;;  %v4288_v62 = vld [vmem:[#allocation8 + $0x1a8] sm:$0xf]  ;;  %v482_v1 = vperm.slane %v6002_v45, 2 }
 0x1db   :  { %v5994_v6 = vadd.f32 %v5460_v3, %v441_v4  ;;  %v4289_v3 = vor.u32 %v5231_v63, %v4288_v62  ;;  %v4290_v4 = vld [vmem:[#allocation8 + $0x1b8] sm:$0xf0]  ;;  %v4269_v63 = vor.u32 %v5224_v52, %v4266_v58  ;;  %v5216_v52 = vld [vmem:[#allocation8 + $0x144] sm:$0xf] }
 0x1dc   :  { %1054 = vmatpush.bf16.msrb.mxu3 %v5189_v13  ;;  %1071 = vmatpush.bf16.msra.mxu0 %v5194_v18  ;;  %v5227_v13 = vld [vmem:[#allocation8 + $0x194] sm:$0xf0]  ;;  %v4274_v18 = vld [vmem:[#allocation8 + $0x198] sm:$0xf0] }
 0x1dd   :  { %v477_v7 = vpack.c.bf16 %v5994_v6, %v5992_v5 }
 0x1df   :  { %656 = vmatmul.bf16.vlgmr.msra.gmra.mxu2 %v477_v7  ;;  %670 = vmatmul.bf16.vlgmr.msra.gmra.mxu3 %v477_v7 }
 0x1e0   :  { %684 = vmatmul.bf16.vlgmr.msrb.gmra.mxu0 %v477_v7  ;;  %698 = vmatmul.bf16.vlgmr.msrb.gmra.mxu1 %v477_v7  ;;  %v4293_v7 = vor.u32 %v5229_v0, %v4290_v4  ;;  %v6040_v4 = vmul.f32 %v6024_v35, %v6000_v40 }
 0x1e1   :  { %1055 = vmatpush.bf16.msrb.mxu3 %v5188_v17  ;;  %1072 = vmatpush.bf16.msra.mxu0 %v5193_v23  ;;  %v4273_v17 = vor.u32 %v5227_v13, %v4272_v12  ;;  %v5230_v23 = vld [vmem:[#allocation8 + $0x1ac] sm:$0xf0] }
 0x1e2   :  { %1391 = vmatpush.bf16.msrb.mxu1 %v4325_v37  ;;  %1349 = vmatpush.bf16.msra.mxu2 %v4313_v60  ;;  %v4281_v27 = vor.u32 %v5230_v23, %v4280_v22  ;;  %v4258_v37 = vld [vmem:[#allocation8 + $0x178] sm:$0xf0]  ;;  %v5219_v60 = vld [vmem:[#allocation8 + $0x154] sm:$0xf0] }
 0x1e3   :  { %v4241_v0 = vor.u32 %v5219_v60, %v4240_v59  ;;  %v4234_v60 = vld [vmem:[#allocation8 + $0x150] sm:$0xf0] }
 0x1e5   :  { %1056 = vmatpush.bf16.msrb.mxu3 %v5187_v21  ;;  %1073 = vmatpush.bf16.msra.mxu0 %v5192_v29  ;;  %v4277_v21 = vor.u32 %v5225_v14, %v4274_v18 }
 0x1e6   :  { %1392 = vmatpush.bf16.msrb.mxu1 %v4309_v51  ;;  %1350 = vmatpush.bf16.msra.mxu2 %v4297_v54  ;;  %v5226_v51 = vld [vmem:[#allocation8 + $0x18c] sm:$0xf0] }
 0x1e7   :  { %v4265_v56 = vor.u32 %v5226_v51, %v4264_v49  ;;  %v4232_v49 = vld [vmem:[#allocation8 + $0x140] sm:$0xf]  ;;  %v5218_v51 = vld [vmem:[#allocation8 + $0x14c] sm:$0xf0] }
 0x1e9   :  { %1057 = vmatpush.bf16.msrb.mxu3 %v5186_v26  ;;  %1377 = vmatpush.bf16.msrb.mxu0 %v4321_v36  ;;  %v481_v26 = vperm.slane %v6002_v45, 1  ;;  %v4257_v36 = vor.u32 %v5223_v33, %v4256_v32 }
 0x1ea   :  { %1393 = vmatpush.bf16.msrb.mxu1 %v4293_v7  ;;  %1351 = vmatpush.bf16.msra.mxu2 %v4281_v27  ;;  %v6044_v7 = vmul.f32 %v6026_v38, %v6004_v50  ;;  %v4224_v27 = vld [vmem:[#allocation8 + $0x128] sm:$0xf] }
 0x1ed   :  { %1058 = vmatpush.bf16.msrb.mxu3 %v5185_v39  ;;  %1378 = vmatpush.bf16.msrb.mxu0 %v4305_v46  ;;  %v4261_v46 = vor.u32 %v5221_v34, %v4258_v37  ;;  %v4226_v37 = vld [vmem:[#allocation8 + $0x138] sm:$0xf0] }
 0x1ee   :  { %1394 = vmatpush.bf16.msrb.mxu1 %v4277_v21  ;;  %1352 = vmatpush.bf16.msra.mxu2 %v4265_v56 }
 0x1f1   :  { %1059 = vmatpush.bf16.msrb.mxu3 %v5184_v53  ;;  %1379 = vmatpush.bf16.msrb.mxu0 %v4289_v3  ;;  %v5217_v3 = vld [vmem:[#allocation8 + $0x14c] sm:$0xf] }
 0x1f2   :  { %1395 = vmatpush.bf16.msrb.mxu1 %v4261_v46  ;;  %v4245_v22 = vor.u32 %v5217_v3, %v4242_v10 }
 0x1f5   :  { %1363 = vmatpush.bf16.msra.mxu3 %v4317_v61  ;;  %1380 = vmatpush.bf16.msrb.mxu0 %v4273_v17  ;;  %v5220_v17 = vld [vmem:[#allocation8 + $0x164] sm:$0xf] }
 0x1f6   :  { %1396 = vmatpush.bf16.msrb.mxu1 %v4245_v22  ;;  %v4253_v34 = vor.u32 %v5220_v17, %v4250_v24  ;;  %v5214_v17 = vld [vmem:[#allocation8 + $0x12c] sm:$0xf0] }
 0x1f9   :  { %1364 = vmatpush.bf16.msra.mxu3 %v4301_v11  ;;  %1381 = vmatpush.bf16.msrb.mxu0 %v4257_v36  ;;  %v4225_v36 = vor.u32 %v5215_v28, %v4224_v27  ;;  %v4218_v27 = vld [vmem:[#allocation8 + $0x130] sm:$0xf0] }
 0x1fd   :  { %1365 = vmatpush.bf16.msra.mxu3 %v4285_v31  ;;  %1382 = vmatpush.bf16.msrb.mxu0 %v4241_v0  ;;  %v5213_v31 = vld [vmem:[#allocation8 + $0x12c] sm:$0xf] }
 0x1fe   :  { %v4229_v46 = vor.u32 %v5213_v31, %v4226_v37  ;;  %v287_v31 = vmul.f32 %v6024_v35, %v6040_v4  ;;  %v5210_v37 = vld [vmem:[#allocation8 + $0x10c] sm:$0xf0] }
 0x200   :  { %1397 = vmatpush.bf16.msrb.mxu1 %v4229_v46  ;;  %v4202_v46 = vld [vmem:[#allocation8 + $0x110] sm:$0xf0]  ;;  %v288_v4 = vmul.f32 0.5, %v287_v31 }
 0x201   :  { %1366 = vmatpush.bf16.msra.mxu3 %v4269_v63  ;;  %1383 = vmatpush.bf16.msrb.mxu0 %v4225_v36 }
 0x205   :  { %1367 = vmatpush.bf16.msra.mxu3 %v4253_v34  ;;  %v4200_v34 = vld [vmem:[#allocation8 + $0x100] sm:$0xf] }
 0x25d   :  { %v685_v15 = vpop.f32.mrf.mxu0  ;;  %v699_v16 = vpop.f32.mrf.mxu1 }
 0x25e   :  { %v6012_v19 = vadd.f32 %v685_v15, %v482_v1  ;;  %v6016_v20 = vadd.f32 %v699_v16, %v483_v2  ;;  %v4248_v15 = vld [vmem:[#allocation8 + $0x160] sm:$0xf]  ;;  %v5222_v16 = vld [vmem:[#allocation8 + $0x16c] sm:$0xf0] }
 0x25f   :  { %v4249_v23 = vor.u32 %v5222_v16, %v4248_v15  ;;  %v4216_v16 = vld [vmem:[#allocation8 + $0x120] sm:$0xf] }
 0x260   :  { %v706_v29 = vmul.f32 %v6012_v19, %v6012_v19  ;;  %v707_v30 = vmul.f32 %v6016_v20, %v6016_v20  ;;  %v4217_v24 = vor.u32 %v5214_v17, %v4216_v16  ;;  %v5257_v17 = vld [vmem:[#allocation10 + $0x188] sm:$0xff] }
 0x261   :  { %1353 = vmatpush.bf16.msra.mxu2 %v4249_v23 }
 0x262   :  { %v714_v39 = vmul.f32 %v706_v29, %v6012_v19  ;;  %v715_v41 = vmul.f32 %v707_v30, %v6016_v20  ;;  %v657_v43 = vpop.f32.mrf.mxu2  ;;  %v671_v44 = vpop.f32.mrf.mxu3 }
 0x263   :  { %v6032_v53 = vadd.f32 %v657_v43, %v480_v25  ;;  %v6036_v55 = vadd.f32 %v671_v44, %v481_v26 }
 0x264   :  { %v722_v61 = vmul.f32 0.044715, %v714_v39  ;;  %v723_v62 = vmul.f32 0.044715, %v715_v41 }
 0x265   :  { %v704_v48 = vmul.f32 %v6032_v53, %v6032_v53  ;;  %v705_v8 = vmul.f32 %v6036_v55, %v6036_v55  ;;  %v687_v9 = vpop.f32.mrf.mxu0  ;;  %v701_v54 = vpop.f32.mrf.mxu1 }
 0x266   :  { %v730_v11 = vadd.f32 %v722_v61, %v6012_v19  ;;  %v731_v12 = vadd.f32 %v723_v62, %v6016_v20  ;;  %v6054_v13 = vadd.f32 %v687_v9, %v482_v1  ;;  %v6058_v14 = vadd.f32 %v701_v54, %v483_v2  ;;  %v4208_v61 = vld [vmem:[#allocation8 + $0x108] sm:$0xf]  ;;  %v5211_v62 = vld [vmem:[#allocation8 + $0x114] sm:$0xf0] }
 0x267   :  { %v712_v18 = vmul.f32 %v704_v48, %v6032_v53  ;;  %v713_v21 = vmul.f32 %v705_v8, %v6036_v55  ;;  %v4233_v48 = vor.u32 %v5218_v51, %v4232_v49  ;;  %v5209_v8 = vld [vmem:[#allocation8 + $0x10c] sm:$0xf] }
 0x268   :  { %v738_v1 = vmul.f32 0.7978846, %v730_v11  ;;  %v739_v29 = vmul.f32 0.7978846, %v731_v12  ;;  %v710_v2 = vmul.f32 %v6054_v13, %v6054_v13  ;;  %v711_v30 = vmul.f32 %v6058_v14, %v6058_v14  ;;  %v4210_v11 = vld [vmem:[#allocation8 + $0x118] sm:$0xf0] }
 0x269   :  { %v720_v32 = vmul.f32 0.044715, %v712_v18  ;;  %v721_v33 = vmul.f32 0.044715, %v713_v21  ;;  %1354 = vmatpush.bf16.msra.mxu2 %v4233_v48  ;;  %v5212_v18 = vld [vmem:[#allocation8 + $0x124] sm:$0xf]  ;;  %v297_v21 = vmul.f32 %v6026_v38, %v6044_v7  ;;  %v4213_v23 = vor.u32 %v5209_v8, %v4210_v11 }
 0x26a   :  { %5495 = vtanh.f32 %v738_v1  ;;  %v718_v39 = vmul.f32 %v710_v2, %v6054_v13  ;;  %v719_v41 = vmul.f32 %v711_v30, %v6058_v14  ;;  %v659_v43 = vpop.f32.mrf.mxu2  ;;  %v673_v44 = vpop.f32.mrf.mxu3  ;;  %v4221_v7 = vor.u32 %v5212_v18, %v4218_v27 }
 0x26b   :  { %5497 = vtanh.f32 %v739_v29  ;;  %v728_v56 = vadd.f32 %v720_v32, %v6032_v53  ;;  %v729_v58 = vadd.f32 %v721_v33, %v6036_v55  ;;  %v6072_v59 = vadd.f32 %v659_v43, %v480_v25  ;;  %1398 = vmatpush.bf16.msrb.mxu1 %v4213_v23 }
 0x26c   :  { %v726_v63 = vmul.f32 0.044715, %v718_v39  ;;  %v727_v0 = vmul.f32 0.044715, %v719_v41  ;;  %v6076_v3 = vadd.f32 %v673_v44, %v481_v26  ;;  %v4237_v25 = vor.u32 %v5216_v52, %v4234_v60  ;;  %v5208_v39 = vld [vmem:[#allocation8 + $0x104] sm:$0xf] }
 0x26d   :  { %v736_v9 = vmul.f32 0.7978846, %v728_v56  ;;  %v737_v54 = vmul.f32 0.7978846, %v729_v58  ;;  %v708_v10 = vmul.f32 %v6072_v59, %v6072_v59  ;;  %v4209_v26 = vor.u32 %v5211_v62, %v4208_v61  ;;  %1355 = vmatpush.bf16.msra.mxu2 %v4217_v24 }
 0x26e   :  { %v734_v12 = vadd.f32 %v726_v63, %v6054_v13  ;;  %v735_v15 = vadd.f32 %v727_v0, %v6058_v14  ;;  %v709_v45 = vmul.f32 %v6076_v3, %v6076_v3  ;;  %1368 = vmatpush.bf16.msra.mxu3 %v4237_v25  ;;  %v298_v41 = vmul.f32 0.5, %v297_v21 }
 0x26f   :  { %v716_v22 = vmul.f32 %v708_v10, %v6072_v59  ;;  %5499 = vtanh.f32 %v736_v9  ;;  %1384 = vmatpush.bf16.msrb.mxu0 %v4209_v26  ;;  %v4201_v44 = vor.u32 %v5210_v37, %v4200_v34  ;;  %v4205_v52 = vor.u32 %v5208_v39, %v4202_v46  ;;  %v5461_v37 = vld [vmem:[#allocation14 + $0x4] ss:$0 sm:$0xff]  ;;  %v5269_v46 = vld [vmem:[#allocation10 + $0x1e8] sm:$0xff] }
 0x270   :  { %v5496_v28 = vpop.eup %5495  ;;  %v742_v1 = vmul.f32 0.7978846, %v734_v12  ;;  %v743_v29 = vmul.f32 0.7978846, %v735_v15  ;;  %v717_v2 = vmul.f32 %v709_v45, %v6076_v3  ;;  %5501 = vtanh.f32 %v737_v54 }
 0x271   :  { %v5498_v30 = vpop.eup %5497  ;;  %v724_v32 = vmul.f32 0.044715, %v716_v22  ;;  %v754_v49 = vadd.f32 1.0, %v5496_v28  ;;  %1356 = vmatpush.bf16.msra.mxu2 %v4201_v44  ;;  %v299_v63 = vsub.f32 1.5, %v298_v41  ;;  %v289_v48 = vsub.f32 1.5, %v288_v4  ;;  %v5261_v44 = vld [vmem:[#allocation10 + $0x1a8] sm:$0xff] }
 0x272   :  { %5503 = vtanh.f32 %v742_v1  ;;  %v725_v33 = vmul.f32 0.044715, %v717_v2  ;;  %1369 = vmatpush.bf16.msra.mxu3 %v4221_v7  ;;  %v755_v58 = vadd.f32 1.0, %v5498_v30  ;;  %v5462_v41 = vld [vmem:[#allocation14 + $0xc] ss:$0 sm:$0xff]  ;;  %v5251_v28 = vld [vmem:[#allocation10 + $0x158] sm:$0xff] }
 0x273   :  { %5505 = vtanh.f32 %v743_v29  ;;  %v732_v36 = vadd.f32 %v724_v32, %v6072_v59  ;;  %v762_v8 = vmul.f32 0.5, %v754_v49  ;;  %v300_v15 = vmul.f32 %v6026_v38, %v299_v63  ;;  %v5247_v49 = vld [vmem:[#allocation10 + $0x138] sm:$0xff] }
 0x274   :  { %v733_v43 = vadd.f32 %v725_v33, %v6076_v3  ;;  %v763_v54 = vmul.f32 0.5, %v755_v58  ;;  %v290_v16 = vmul.f32 %v6024_v35, %v289_v48  ;;  %v5268_v58 = vld [vmem:[#allocation10 + $0x1e0] sm:$0xff]  ;;  %v5267_v63 = vld [vmem:[#allocation10 + $0x1d8] sm:$0xff] }
 0x275   :  { %v740_v51 = vmul.f32 0.7978846, %v732_v36  ;;  %v5500_v56 = vpop.eup %5499  ;;  %v770_v18 = vmul.f32 %v762_v8, %v6012_v19  ;;  %v304_v19 = vsel %vm6100_vm11, %v6026_v38, %v300_v15  ;;  %v5245_v8 = vld [vmem:[#allocation10 + $0x128] sm:$0xff] }
 0x276   :  { %v741_v60 = vmul.f32 0.7978846, %v733_v43  ;;  %v5502_v61 = vpop.eup %5501  ;;  %1370 = vmatpush.bf16.msra.mxu3 %v4205_v52  ;;  %v752_v25 = vadd.f32 1.0, %v5500_v56  ;;  %v771_v40 = vmul.f32 %v763_v54, %v6016_v20  ;;  %v294_v20 = vsel %vm6108_vm12, %v6024_v35, %v290_v16  ;;  %v5260_v52 = vld [vmem:[#allocation10 + $0x1a0] sm:$0xff]  ;;  %v5258_v54 = vld [vmem:[#allocation10 + $0x190] sm:$0xff] }
 0x277   :  { %5507 = vtanh.f32 %v740_v51  ;;  %v753_v12 = vadd.f32 1.0, %v5502_v61  ;;  %v306_v32 = vmul.f32 %v304_v19, %v5984_v57  ;;  %v305_v34 = vmul.f32 %v294_v20, %v5970_v47  ;;  %v5271_v47 = vld [vmem:[#allocation10 + $0x1f8] sm:$0xff]  ;;  %v5254_v61 = vld [vmem:[#allocation10 + $0x170] sm:$0xff]  ;;  %v5252_v16 = vld [vmem:[#allocation10 + $0x160] sm:$0xff] }
 0x278   :  { %v5504_v62 = vpop.eup %5503  ;;  %5509 = vtanh.f32 %v741_v60  ;;  %v760_v27 = vmul.f32 0.5, %v752_v25  ;;  %v5255_v51 = vld [vmem:[#allocation10 + $0x178] sm:$0xff]  ;;  %v5246_v60 = vld [vmem:[#allocation10 + $0x130] sm:$0xff]  ;;  %v5264_v19 = vld [vmem:[#allocation10 + $0x1c0] sm:$0xff] }
 0x279   :  { %v5506_v0 = vpop.eup %5505  ;;  %v758_v9 = vadd.f32 1.0, %v5504_v62  ;;  %v761_v29 = vmul.f32 0.5, %v753_v12  ;;  %v309_v39 = vmul.f32 %v5461_v37, %v306_v32  ;;  %v308_v35 = vmul.f32 %v5461_v37, %v305_v34  ;;  %v5259_v62 = vld [vmem:[#allocation10 + $0x198] sm:$0xff]  ;;  %v5266_v25 = vld [vmem:[#allocation10 + $0x1d0] sm:$0xff] }
 0x27a   :  { %v759_v10 = vadd.f32 1.0, %v5506_v0  ;;  %v5463_v0 = vld [vmem:[#allocation14 + $0x14] ss:$0 sm:$0xff] }
 0x27b   :  { %v766_v11 = vmul.f32 0.5, %v758_v9  ;;  %v769_v7 = vmul.f32 %v761_v29, %v6036_v55  ;;  %v6124_v43 = vadd.f32 %v5462_v41, %v309_v39  ;;  %v5263_v55 = vld [vmem:[#allocation10 + $0x1b8] sm:$0xff]  ;;  %v5253_v9 = vld [vmem:[#allocation10 + $0x168] sm:$0xff] }
 0x27c   :  { %v767_v45 = vmul.f32 0.5, %v759_v10 }
 0x27d   :  { %v5508_v26 = vpop.eup %5507  ;;  %v774_v21 = vmul.f32 %v766_v11, %v6054_v13  ;;  %v6130_v11 = vld [vmem:[#allocation16 + $0x1] ss:$4 sm:$0xf] }
 0x27e   :  { %v5510_v22 = vpop.eup %5509  ;;  %v775_v23 = vmul.f32 %v767_v45, %v6058_v14  ;;  %v756_v24 = vadd.f32 1.0, %v5508_v26  ;;  %v768_v14 = vmul.f32 %v760_v27, %v6032_v53  ;;  %v6126_v53 = vadd.f32 %v5462_v41, %v308_v35  ;;  %v5244_v26 = vld [vmem:[#allocation10 + $0x120] sm:$0xff]  ;;  %v5243_v27 = vld [vmem:[#allocation10 + $0x118] sm:$0xff] }
 0x27f   :  { %v842_v50 = vpack.c.bf16 %v774_v21, %v770_v18  ;;  %v757_v1 = vadd.f32 1.0, %v5510_v22  ;;  %v1183_v18 = vperm.slane %v6130_v11, 2  ;;  %v5265_v21 = vld [vmem:[#allocation10 + $0x1c8] sm:$0xff] }
 0x280   :  { %v843_v2 = vpack.c.bf16 %v775_v23, %v771_v40  ;;  %v764_v13 = vmul.f32 0.5, %v756_v24  ;;  %v1177_v57 = vpack.c.bf16 %v6124_v43, %v6126_v53  ;;  %v1184_v40 = vperm.slane %v6130_v11, 3 }
 0x281   :  { %1074 = vmatmul.bf16.vlgmr.msra.gmra.mxu0 %v842_v50  ;;  %v765_v30 = vmul.f32 0.5, %v757_v1  ;;  %v5256_v50 = vld [vmem:[#allocation10 + $0x180] sm:$0xff] }
 0x282   :  { %1088 = vmatmul.bf16.vlgmr.msra.gmra.mxu1 %v843_v2  ;;  %v772_v31 = vmul.f32 %v764_v13, %v6072_v59  ;;  %1768 = vmatpush.bf16.msra.mxu0 %v5263_v55  ;;  %v5262_v59 = vld [vmem:[#allocation10 + $0x1b0] sm:$0xff]  ;;  %v5241_v55 = vld [vmem:[#allocation10 + $0x108] sm:$0xff] }
 0x283   :  { %v773_v33 = vmul.f32 %v765_v30, %v6076_v3  ;;  %1782 = vmatpush.bf16.msra.mxu1 %v5271_v47  ;;  %v5270_v3 = vld [vmem:[#allocation10 + $0x1f0] sm:$0xff]  ;;  %v5249_v47 = vld [vmem:[#allocation10 + $0x148] sm:$0xff] }
 0x284   :  { %v840_v38 = vpack.c.bf16 %v772_v31, %v768_v14 }
 0x285   :  { %v841_v36 = vpack.c.bf16 %v773_v33, %v769_v7  ;;  %v5242_v7 = vld [vmem:[#allocation10 + $0x110] sm:$0xff] }
 0x286   :  { %1046 = vmatmul.bf16.vlgmr.msrb.gmra.mxu2 %v840_v38  ;;  %1769 = vmatpush.bf16.msra.mxu0 %v5262_v59  ;;  %v5250_v33 = vld [vmem:[#allocation10 + $0x150] sm:$0xff] }
 0x287   :  { %1060 = vmatmul.bf16.vlgmr.msrb.gmra.mxu3 %v841_v36  ;;  %1783 = vmatpush.bf16.msra.mxu1 %v5270_v3 }
 0x288   :  { %1740 = vmatpush.bf16.msrb.mxu2 %v5247_v49  ;;  %1754 = vmatpush.bf16.msrb.mxu3 %v5255_v51 }
 0x28a   :  { %1770 = vmatpush.bf16.msra.mxu0 %v5261_v44 }
 0x28b   :  { %1784 = vmatpush.bf16.msra.mxu1 %v5269_v46  ;;  %v1182_v46 = vperm.slane %v6130_v11, 1 }
 0x28c   :  { %1741 = vmatpush.bf16.msrb.mxu2 %v5246_v60  ;;  %1755 = vmatpush.bf16.msrb.mxu3 %v5254_v61 }
 0x28e   :  { %1771 = vmatpush.bf16.msra.mxu0 %v5260_v52 }
 0x28f   :  { %1785 = vmatpush.bf16.msra.mxu1 %v5268_v58 }
 0x290   :  { %1742 = vmatpush.bf16.msrb.mxu2 %v5245_v8  ;;  %1756 = vmatpush.bf16.msrb.mxu3 %v5253_v9 }
 0x291   :  { %1385 = vmatmul.bf16.vlgmr.msrb.gmra.mxu0 %v1177_v57 }
 0x292   :  { %1399 = vmatmul.bf16.vlgmr.msrb.gmra.mxu1 %v1177_v57  ;;  %1772 = vmatpush.bf16.msra.mxu0 %v5259_v62 }
 0x293   :  { %1786 = vmatpush.bf16.msra.mxu1 %v5267_v63 }
 0x294   :  { %1743 = vmatpush.bf16.msrb.mxu2 %v5244_v26  ;;  %1757 = vmatpush.bf16.msrb.mxu3 %v5252_v16 }
 0x296   :  { %1357 = vmatmul.bf16.vlgmr.msra.gmra.mxu2 %v1177_v57  ;;  %1773 = vmatpush.bf16.msra.mxu0 %v5258_v54 }
 0x297   :  { %1371 = vmatmul.bf16.vlgmr.msra.gmra.mxu3 %v1177_v57  ;;  %1787 = vmatpush.bf16.msra.mxu1 %v5266_v25  ;;  %v1181_v57 = vperm.slane %v6130_v11, 0 }
 0x298   :  { %1744 = vmatpush.bf16.msrb.mxu2 %v5243_v27  ;;  %1758 = vmatpush.bf16.msrb.mxu3 %v5251_v28 }
 0x29a   :  { %1774 = vmatpush.bf16.msra.mxu0 %v5257_v17 }
 0x29b   :  { %1788 = vmatpush.bf16.msra.mxu1 %v5265_v21 }
 0x29c   :  { %1745 = vmatpush.bf16.msrb.mxu2 %v5242_v7  ;;  %1759 = vmatpush.bf16.msrb.mxu3 %v5250_v33 }
 0x29e   :  { %1775 = vmatpush.bf16.msra.mxu0 %v5256_v50 }
 0x29f   :  { %1789 = vmatpush.bf16.msra.mxu1 %v5264_v19 }
 0x2a0   :  { %1746 = vmatpush.bf16.msrb.mxu2 %v5241_v55  ;;  %1760 = vmatpush.bf16.msrb.mxu3 %v5249_v47 }
 0x2fe   :  { %v1075_v4 = vpop.f32.mrf.mxu0 }
 0x2ff   :  { %v1089_v56 = vpop.f32.mrf.mxu1 }
 0x306   :  { %v1077_v48 = vpop.f32.mrf.mxu0 }
 0x307   :  { %v1091_v10 = vpop.f32.mrf.mxu1 }
 0x309   :  { %v1047_v12 = vpop.f32.mrf.mxu2 }
 0x30a   :  { %v1048_v15 = vadd.f32 %v5463_v0, %v1047_v12  ;;  %v1061_v45 = vpop.f32.mrf.mxu3 }
 0x30c   :  { %v1062_v22 = vadd.f32 %v1061_v45, %v1048_v15 }
 0x30e   :  { %v1076_v23 = vadd.f32 %v1075_v4, %v1062_v22  ;;  %v1386_v24 = vpop.f32.mrf.mxu0 }
 0x30f   :  { %v6134_v1 = vadd.f32 %v1386_v24, %v1183_v18  ;;  %v1400_v29 = vpop.f32.mrf.mxu1 }
 0x310   :  { %v6136_v2 = vadd.f32 %v1400_v29, %v1184_v40  ;;  %v6138_v13 = vadd.f32 %v1089_v56, %v1076_v23 }
 0x311   :  { %v1407_v30 = vmul.f32 %v6134_v1, %v6134_v1  ;;  %v1049_v20 = vpop.f32.mrf.mxu2 }
 0x312   :  { %v1408_v14 = vmul.f32 %v6136_v2, %v6136_v2  ;;  %v1050_v31 = vadd.f32 %v5463_v0, %v1049_v20  ;;  %v1063_v32 = vpop.f32.mrf.mxu3  ;;  %v5240_v0 = vld [vmem:[#allocation10 + $0x100] sm:$0xff] }
 0x313   :  { %v1415_v38 = vmul.f32 %v1407_v30, %v6134_v1  ;;  %1747 = vmatpush.bf16.msrb.mxu2 %v5240_v0 }
 0x314   :  { %v1416_v34 = vmul.f32 %v1408_v14, %v6136_v2  ;;  %v1064_v36 = vadd.f32 %v1063_v32, %v1050_v31 }
 0x315   :  { %v1423_v37 = vmul.f32 0.044715, %v1415_v38 }
 0x316   :  { %v1424_v39 = vmul.f32 0.044715, %v1416_v34  ;;  %v1078_v35 = vadd.f32 %v1077_v48, %v1064_v36  ;;  %v1388_v41 = vpop.f32.mrf.mxu0  ;;  %v5248_v48 = vld [vmem:[#allocation10 + $0x140] sm:$0xff] }
 0x317   :  { %v1431_v59 = vadd.f32 %v1423_v37, %v6134_v1  ;;  %v6148_v3 = vadd.f32 %v1388_v41, %v1183_v18  ;;  %v1402_v44 = vpop.f32.mrf.mxu1  ;;  %1761 = vmatpush.bf16.msrb.mxu3 %v5248_v48 }
 0x318   :  { %v1432_v4 = vadd.f32 %v1424_v39, %v6136_v2  ;;  %v6152_v49 = vadd.f32 %v1402_v44, %v1184_v40  ;;  %v6154_v51 = vadd.f32 %v1091_v10, %v1078_v35 }
 0x319   :  { %v1439_v52 = vmul.f32 0.7978846, %v1431_v59  ;;  %v1411_v56 = vmul.f32 %v6148_v3, %v6148_v3  ;;  %v1358_v58 = vpop.f32.mrf.mxu2 }
 0x31a   :  { %v1440_v60 = vmul.f32 0.7978846, %v1432_v4  ;;  %v1412_v61 = vmul.f32 %v6152_v49, %v6152_v49  ;;  %v6160_v62 = vadd.f32 %v1358_v58, %v1181_v57  ;;  %v1372_v63 = vpop.f32.mrf.mxu3 }
 0x31b   :  { %v1419_v8 = vmul.f32 %v1411_v56, %v6148_v3  ;;  %v6163_v9 = vadd.f32 %v1372_v63, %v1182_v46  ;;  %5511 = vtanh.f32 %v1439_v52 }
 0x31c   :  { %v1420_v54 = vmul.f32 %v1412_v61, %v6152_v49  ;;  %v1405_v10 = vmul.f32 %v6160_v62, %v6160_v62  ;;  %5513 = vtanh.f32 %v1440_v60 }
 0x31d   :  { %v1427_v25 = vmul.f32 0.044715, %v1419_v8  ;;  %v1406_v11 = vmul.f32 %v6163_v9, %v6163_v9 }
 0x31e   :  { %v1428_v12 = vmul.f32 0.044715, %v1420_v54  ;;  %v1413_v15 = vmul.f32 %v1405_v10, %v6160_v62 }
 0x31f   :  { %v1435_v45 = vadd.f32 %v1427_v25, %v6148_v3  ;;  %v1414_v26 = vmul.f32 %v1406_v11, %v6163_v9 }
 0x320   :  { %v1436_v16 = vadd.f32 %v1428_v12, %v6152_v49  ;;  %v1421_v17 = vmul.f32 0.044715, %v1413_v15 }
 0x321   :  { %v1443_v18 = vmul.f32 0.7978846, %v1435_v45  ;;  %v1422_v21 = vmul.f32 0.044715, %v1414_v26  ;;  %v1360_v22 = vpop.f32.mrf.mxu2  ;;  %v5512_v28 = vpop.eup %5511 }
 0x322   :  { %v1444_v40 = vmul.f32 0.7978846, %v1436_v16  ;;  %v1429_v23 = vadd.f32 %v1421_v17, %v6160_v62  ;;  %v1361_v24 = vadd.f32 %v1360_v22, %v1181_v57  ;;  %v1374_v27 = vpop.f32.mrf.mxu3  ;;  %v5514_v19 = vpop.eup %5513  ;;  %v1455_v32 = vadd.f32 1.0, %v5512_v28  ;;  %v5464_v22 = vld [vmem:[#allocation14 + $0x15] ss:$0 sm:$0xff] }
 0x323   :  { %5515 = vtanh.f32 %v1443_v18  ;;  %v1430_v50 = vadd.f32 %v1422_v21, %v6163_v9  ;;  %v1375_v29 = vadd.f32 %v1374_v27, %v1182_v46  ;;  %v1456_v33 = vadd.f32 1.0, %v5514_v19 }
 0x324   :  { %5517 = vtanh.f32 %v1444_v40  ;;  %v1437_v30 = vmul.f32 0.7978846, %v1429_v23  ;;  %v1409_v20 = vmul.f32 %v1361_v24, %v1361_v24  ;;  %v1463_v35 = vmul.f32 0.5, %v1455_v32 }
 0x325   :  { %v1438_v14 = vmul.f32 0.7978846, %v1430_v50  ;;  %v1410_v31 = vmul.f32 %v1375_v29, %v1375_v29  ;;  %v1464_v55 = vmul.f32 0.5, %v1456_v33 }
 0x326   :  { %v1417_v7 = vmul.f32 %v1409_v20, %v1361_v24  ;;  %5519 = vtanh.f32 %v1437_v30  ;;  %v1471_v58 = vmul.f32 %v1463_v35, %v6134_v1 }
 0x327   :  { %v1418_v38 = vmul.f32 %v1410_v31, %v1375_v29  ;;  %5521 = vtanh.f32 %v1438_v14  ;;  %v1472_v63 = vmul.f32 %v1464_v55, %v6136_v2 }
 0x328   :  { %v1425_v34 = vmul.f32 0.044715, %v1417_v7 }
 0x329   :  { %v5516_v36 = vpop.eup %5515  ;;  %v1426_v37 = vmul.f32 0.044715, %v1418_v38 }
 0x32a   :  { %v5518_v39 = vpop.eup %5517  ;;  %v1459_v41 = vadd.f32 1.0, %v5516_v36  ;;  %v1433_v57 = vadd.f32 %v1425_v34, %v1361_v24  ;;  %v1094_v34 = vadd.f32 %v6138_v13, %v5992_v5 }
 0x32b   :  { %v1460_v47 = vadd.f32 1.0, %v5518_v39  ;;  %v1434_v59 = vadd.f32 %v1426_v37, %v1375_v29 }
 0x32c   :  { %v1467_v44 = vmul.f32 0.5, %v1459_v41  ;;  %v1441_v46 = vmul.f32 0.7978846, %v1433_v57  ;;  %v5520_v56 = vpop.eup %5519 }
 0x32d   :  { %v1468_v4 = vmul.f32 0.5, %v1460_v47  ;;  %v1442_v52 = vmul.f32 0.7978846, %v1434_v59  ;;  %v5522_v61 = vpop.eup %5521  ;;  %v1453_v8 = vadd.f32 1.0, %v5520_v56 }
 0x32e   :  { %v1475_v60 = vmul.f32 %v1467_v44, %v6148_v3  ;;  %5523 = vtanh.f32 %v1441_v46  ;;  %v1454_v10 = vadd.f32 1.0, %v5522_v61  ;;  %v5287_v44 = vld [vmem:[#allocation7 + $0xf8] sm:$0xff]  ;;  %v5286_v46 = vld [vmem:[#allocation7 + $0xf0] sm:$0xff] }
 0x32f   :  { %v1476_v0 = vmul.f32 %v1468_v4, %v6152_v49  ;;  %5525 = vtanh.f32 %v1442_v52  ;;  %v1461_v12 = vmul.f32 0.5, %v1453_v8  ;;  %2046 = vmatpush.bf16.msra.mxu3 %v5287_v44  ;;  %v5285_v4 = vld [vmem:[#allocation7 + $0xe8] sm:$0xff]  ;;  %v5284_v52 = vld [vmem:[#allocation7 + $0xe0] sm:$0xff] }
 0x330   :  { %v1544_v48 = vpack.c.bf16 %v1475_v60, %v1471_v58  ;;  %v1462_v1 = vmul.f32 0.5, %v1454_v10  ;;  %v5281_v58 = vld [vmem:[#allocation7 + $0xc8] sm:$0xff] }
 0x331   :  { %v1545_v54 = vpack.c.bf16 %v1476_v0, %v1472_v63  ;;  %v1469_v16 = vmul.f32 %v1461_v12, %v6160_v62  ;;  %v5280_v63 = vld [vmem:[#allocation7 + $0xc0] sm:$0xff]  ;;  %v5279_v0 = vld [vmem:[#allocation7 + $0xb8] sm:$0xff] }
 0x332   :  { %1776 = vmatmul.bf16.vlgmr.msra.gmra.mxu0 %v1544_v48  ;;  %v1470_v49 = vmul.f32 %v1462_v1, %v6163_v9  ;;  %1914 = vmatpush.bf16.msra.mxu2 %v5279_v0  ;;  %v5468_v0 = vld [vmem:[#allocation14 + $0xe] ss:$0 sm:$0xff] }
 0x333   :  { %1790 = vmatmul.bf16.vlgmr.msra.gmra.mxu1 %v1545_v54  ;;  %2047 = vmatpush.bf16.msra.mxu3 %v5286_v46 }
 0x334   :  { %v5524_v25 = vpop.eup %5523 }
 0x335   :  { %v5526_v11 = vpop.eup %5525  ;;  %v1457_v15 = vadd.f32 1.0, %v5524_v25 }
 0x336   :  { %v1458_v45 = vadd.f32 1.0, %v5526_v11 }
 0x337   :  { %v1465_v3 = vmul.f32 0.5, %v1457_v15  ;;  %2048 = vmatpush.bf16.msra.mxu3 %v5285_v4 }
 0x338   :  { %v1466_v26 = vmul.f32 0.5, %v1458_v45 }
 0x339   :  { %v1473_v2 = vmul.f32 %v1465_v3, %v1361_v24 }
 0x33a   :  { %v1474_v17 = vmul.f32 %v1466_v26, %v1375_v29 }
 0x33b   :  { %v1542_v18 = vpack.c.bf16 %v1473_v2, %v1469_v16  ;;  %2049 = vmatpush.bf16.msra.mxu3 %v5284_v52 }
 0x33c   :  { %v1543_v21 = vpack.c.bf16 %v1474_v17, %v1470_v49 }
 0x33d   :  { %1748 = vmatmul.bf16.vlgmr.msrb.gmra.mxu2 %v1542_v18 }
 0x33e   :  { %1762 = vmatmul.bf16.vlgmr.msrb.gmra.mxu3 %v1543_v21 }
 0x3af   :  { %v1777_v28 = vpop.f32.mrf.mxu0 }
 0x3b0   :  { %v1791_v19 = vpop.f32.mrf.mxu1 }
 0x3b7   :  { %v1779_v29 = vpop.f32.mrf.mxu0 }
 0x3b8   :  { %v1793_v7 = vpop.f32.mrf.mxu1 }
 0x3c0   :  { %v1749_v40 = vpop.f32.mrf.mxu2 }
 0x3c1   :  { %v1750_v23 = vadd.f32 %v5464_v22, %v1749_v40  ;;  %v1763_v27 = vpop.f32.mrf.mxu3 }
 0x3c3   :  { %v1764_v50 = vadd.f32 %v1763_v27, %v1750_v23  ;;  %v5465_v23 = vld [vmem:[#allocation14 + $0x7] ss:$0 sm:$0xff] }
 0x3c5   :  { %v1778_v30 = vadd.f32 %v1777_v28, %v1764_v50 }
 0x3c7   :  { %v1792_v20 = vadd.f32 %v1791_v19, %v1778_v30  ;;  %v5466_v30 = vld [vmem:[#allocation14 + $0xf] ss:$0 sm:$0xff] }
 0x3c8   :  { %v1751_v14 = vpop.f32.mrf.mxu2 }
 0x3c9   :  { %v1752_v31 = vadd.f32 %v5464_v22, %v1751_v14  ;;  %v1796_v62 = vadd.f32 %v1792_v20, %v6126_v53  ;;  %v1765_v24 = vpop.f32.mrf.mxu3 }
 0x3cb   :  { %v1766_v9 = vadd.f32 %v1765_v24, %v1752_v31  ;;  %1800 = vadd.xlane.f32.xlu2 %v1796_v62  ;;  %v5278_v24 = vld [vmem:[#allocation7 + $0xb0] sm:$0xff] }
 0x3cc   :  { %1915 = vmatpush.bf16.msra.mxu2 %v5278_v24  ;;  %v4634_v24 = vld [vmem:[#allocation8 + $0x2f0] sm:$0xf0] }
 0x3cd   :  { %v1780_v32 = vadd.f32 %v1779_v29, %v1766_v9  ;;  %v5277_v29 = vld [vmem:[#allocation7 + $0xa8] sm:$0xff] }
 0x3cf   :  { %v1794_v33 = vadd.f32 %v1793_v7, %v1780_v32  ;;  %v5276_v7 = vld [vmem:[#allocation7 + $0xa0] sm:$0xff] }
 0x3d0   :  { %1916 = vmatpush.bf16.msra.mxu2 %v5277_v29  ;;  %v5319_v29 = vld [vmem:[#allocation8 + $0x2f4] sm:$0xf0] }
 0x3d1   :  { %v1797_v38 = vadd.f32 %v1794_v33, %v6124_v43  ;;  %v1095_v43 = vadd.f32 %v6154_v51, %v5994_v6  ;;  %v5283_v6 = vld [vmem:[#allocation7 + $0xd8] sm:$0xff]  ;;  %v5282_v51 = vld [vmem:[#allocation7 + $0xd0] sm:$0xff] }
 0x3d2   :  { %2050 = vmatpush.bf16.msra.mxu3 %v5283_v6 }
 0x3d3   :  { %1802 = vadd.xlane.f32.xlu0 %v1797_v38 }
 0x3d4   :  { %1917 = vmatpush.bf16.msra.mxu2 %v5276_v7 }
 0x3d6   :  { %2051 = vmatpush.bf16.msra.mxu3 %v5282_v51 }
 0x3da   :  { %2052 = vmatpush.bf16.msra.mxu3 %v5281_v58 }
 0x3db   :  { %1098 = vadd.xlane.f32.xlu0 %v1094_v34 }
 0x3de   :  { %2053 = vmatpush.bf16.msra.mxu3 %v5280_v63 }
 0x43e   :  { %v1801_v36 = vpop.xlane.xlu2 %1800 }
 0x43f   :  { %v1804_v37 = vmul.f32 %v1801_v36, %v5966_v42  ;;  %v5273_v36 = vld [vmem:[#allocation7 + $0x88] sm:$0xff] }
 0x441   :  { %v1806_v39 = vsub.f32 %v1796_v62, %v1804_v37 }
 0x443   :  { %v1808_v35 = vmul.f32 %v1806_v39, %v1806_v39 }
 0x445   :  { %1810 = vadd.xlane.f32.xlu1 %v1808_v35 }
 0x446   :  { %v1803_v53 = vpop.xlane.xlu0 %1802 }
 0x447   :  { %v1805_v41 = vmul.f32 %v1803_v53, %v5966_v42 }
 0x449   :  { %v6188_v57 = vsub.f32 %v1797_v38, %v1805_v41  ;;  %v5275_v38 = vld [vmem:[#allocation7 + $0x98] sm:$0xff] }
 0x44a   :  { %1918 = vmatpush.bf16.msra.mxu2 %v5275_v38  ;;  %v4642_v38 = vld [vmem:[#allocation8 + $0x2f8] sm:$0xf0] }
 0x44b   :  { %v1809_v55 = vmul.f32 %v6188_v57, %v6188_v57 }
 0x44d   :  { %1812 = vadd.xlane.f32.xlu2 %v1809_v55  ;;  %1100 = vadd.xlane.f32.xlu1 %v1095_v43 }
 0x44e   :  { %v1099_v5 = vpop.xlane.xlu0 %1098 }
 0x44f   :  { %v1102_v13 = vmul.f32 %v1099_v5, %v5966_v42 }
 0x451   :  { %v6195_v47 = vsub.f32 %v1094_v34, %v1102_v13  ;;  %v5274_v34 = vld [vmem:[#allocation7 + $0x90] sm:$0xff] }
 0x452   :  { %1919 = vmatpush.bf16.msra.mxu2 %v5274_v34  ;;  %v4616_v34 = vld [vmem:[#allocation8 + $0x2c0] sm:$0xf] }
 0x453   :  { %v1106_v59 = vmul.f32 %v6195_v47, %v6195_v47 }
 0x455   :  { %1108 = vadd.xlane.f32.xlu2 %v1106_v59 }
 0x456   :  { %1920 = vmatpush.bf16.msra.mxu2 %v5273_v36  ;;  %v5314_v36 = vld [vmem:[#allocation8 + $0x2cc] sm:$0xf0] }
 0x4b8   :  { %v1811_v56 = vpop.xlane.xlu1 %1810 }
 0x4b9   :  { %v1814_v60 = vmul.f32 %v1811_v56, %v5966_v42  ;;  %v5467_v56 = vld [vmem:[#allocation14 + $0x6] ss:$0 sm:$0xff] }
 0x4bb   :  { %v1816_v61 = vadd.f32 1e-05, %v1814_v60 }
 0x4bd   :  { %5527 = vrsqrt.f32 %v1816_v61  ;;  %vm1824_vm14 = vweird.f32 %v1816_v61 }
 0x4c0   :  { %v1101_v48 = vpop.xlane.xlu1 %1100  ;;  %v1813_v8 = vpop.xlane.xlu2 %1812 }
 0x4c1   :  { %v1103_v54 = vmul.f32 %v1101_v48, %v5966_v42  ;;  %v1815_v10 = vmul.f32 %v1813_v8, %v5966_v42 }
 0x4c3   :  { %v5528_v25 = vpop.eup %5527  ;;  %v6202_v11 = vsub.f32 %v1095_v43, %v1103_v54  ;;  %v1817_v12 = vadd.f32 1e-05, %v1815_v10 }
 0x4c4   :  { %v1819_v15 = vmul.f32 %v5528_v25, %v1816_v61  ;;  %vm1825_vm13 = vweird.f32 %v5528_v25 }
 0x4c5   :  { %5529 = vrsqrt.f32 %v1817_v12  ;;  %v1107_v1 = vmul.f32 %v6202_v11, %v6202_v11  ;;  %vm1826_vm15 = vmor %vm1824_vm14, %vm1825_vm13  ;;  %vm1834_vm1 = vweird.f32 %v1817_v12 }
 0x4c6   :  { %v1820_v45 = vmul.f32 %v5528_v25, %v1819_v15 }
 0x4c7   :  { %1110 = vadd.xlane.f32.xlu0 %v1107_v1 }
 0x4c8   :  { %v1821_v3 = vmul.f32 0.5, %v1820_v45  ;;  %v1109_v9 = vpop.xlane.xlu2 %1108 }
 0x4c9   :  { %v1112_v32 = vmul.f32 %v1109_v9, %v5966_v42  ;;  %v4640_v9 = vld [vmem:[#allocation8 + $0x2e8] sm:$0xf] }
 0x4ca   :  { %v1822_v26 = vsub.f32 1.5, %v1821_v3  ;;  %v4641_v7 = vor.u32 %v5319_v29, %v4640_v9  ;;  %v4554_v9 = vld [vmem:[#allocation8 + $0x250] sm:$0xf0]  ;;  %v4560_v29 = vld [vmem:[#allocation8 + $0x248] sm:$0xf] }
 0x4cb   :  { %v5530_v16 = vpop.eup %5529  ;;  %v1114_v33 = vadd.f32 1e-05, %v1112_v32 }
 0x4cc   :  { %v1823_v2 = vmul.f32 %v5528_v25, %v1822_v26  ;;  %v1829_v49 = vmul.f32 %v5530_v16, %v1817_v12  ;;  %vm1835_vm0 = vweird.f32 %v5530_v16  ;;  %v5470_v26 = vld [vmem:[#allocation14 + $0x2] ss:$0 sm:$0xff] }
 0x4cd   :  { %vm1836_vm2 = vmor %vm1834_vm1, %vm1835_vm0  ;;  %5531 = vrsqrt.f32 %v1114_v33  ;;  %vm1122_vm4 = vweird.f32 %v1114_v33 }
 0x4ce   :  { %v1830_v17 = vmul.f32 %v5530_v16, %v1829_v49  ;;  %v1827_v18 = vsel %vm1826_vm15, %v5528_v25, %v1823_v2  ;;  %v5469_v25 = vld [vmem:[#allocation14 + $0x3] ss:$0 sm:$0xff] }
 0x4cf   :  { %v1838_v40 = vmul.f32 %v1827_v18, %v1806_v39  ;;  %v5272_v39 = vld [vmem:[#allocation7 + $0x80] sm:$0xff] }
 0x4d0   :  { %v1831_v21 = vmul.f32 0.5, %v1830_v17  ;;  %1921 = vmatpush.bf16.msra.mxu2 %v5272_v39  ;;  %v4617_v39 = vor.u32 %v5314_v36, %v4616_v34  ;;  %v4536_v36 = vld [vmem:[#allocation8 + $0x220] sm:$0xf] }
 0x4d1   :  { %v1841_v19 = vmul.f32 %v5465_v23, %v1838_v40 }
 0x4d2   :  { %v1832_v22 = vsub.f32 1.5, %v1831_v21 }
 0x4d3   :  { %v6207_v14 = vadd.f32 %v5466_v30, %v1841_v19  ;;  %v5532_v37 = vpop.eup %5531 }
 0x4d4   :  { %v1833_v27 = vmul.f32 %v5530_v16, %v1832_v22  ;;  %v1117_v35 = vmul.f32 %v5532_v37, %v1114_v33  ;;  %vm1123_vm3 = vweird.f32 %v5532_v37  ;;  %v5317_v33 = vld [vmem:[#allocation8 + $0x2ec] sm:$0xf]  ;;  %2343 = vmatpush.bf16.msrb.mxu2 %v4641_v7 }
 0x4d5   :  { %vm1124_vm5 = vmor %vm1122_vm4, %vm1123_vm3 }
 0x4d6   :  { %v1837_v28 = vsel %vm1836_vm2, %v5530_v16, %v1833_v27  ;;  %v1118_v53 = vmul.f32 %v5532_v37, %v1117_v35  ;;  %v4618_v35 = vld [vmem:[#allocation8 + $0x2d0] sm:$0xf0] }
 0x4d7   :  { %v1839_v50 = vmul.f32 %v1837_v28, %v6188_v57 }
 0x4d8   :  { %v1119_v43 = vmul.f32 0.5, %v1118_v53  ;;  %v4624_v53 = vld [vmem:[#allocation8 + $0x2c8] sm:$0xf] }
 0x4d9   :  { %v1842_v20 = vmul.f32 %v5465_v23, %v1839_v50 }
 0x4da   :  { %v1120_v5 = vsub.f32 1.5, %v1119_v43  ;;  %v5313_v43 = vld [vmem:[#allocation8 + $0x2cc] sm:$0xf] }
 0x4db   :  { %v6209_v31 = vadd.f32 %v5466_v30, %v1842_v20  ;;  %v4632_v30 = vld [vmem:[#allocation8 + $0x2e0] sm:$0xf]  ;;  %v5318_v20 = vld [vmem:[#allocation8 + $0x2ec] sm:$0xf0] }
 0x4dc   :  { %v1121_v59 = vmul.f32 %v5532_v37, %v1120_v5  ;;  %v4626_v5 = vld [vmem:[#allocation8 + $0x2d8] sm:$0xf0] }
 0x4dd   :  { %v1995_v62 = vpack.c.bf16 %v6209_v31, %v6207_v14 }
 0x4de   :  { %v1125_v4 = vsel %vm1124_vm5, %v5532_v37, %v1121_v59  ;;  %v5312_v37 = vld [vmem:[#allocation8 + $0x2c4] sm:$0xf]  ;;  %v4600_v59 = vld [vmem:[#allocation8 + $0x2a0] sm:$0xf] }
 0x4df   :  { %2054 = vmatmul.bf16.vlgmr.msra.gmra.mxu3 %v1995_v62  ;;  %v1136_v51 = vmul.f32 %v1125_v4, %v6195_v47  ;;  %v4633_v62 = vor.u32 %v5318_v20, %v4632_v30  ;;  %v4552_v20 = vld [vmem:[#allocation8 + $0x240] sm:$0xf] }
 0x4e1   :  { %v1139_v63 = vmul.f32 %v5467_v56, %v1136_v51  ;;  %2315 = vmatpush.bf16.msrb.mxu0 %v4633_v62  ;;  %v5311_v51 = vld [vmem:[#allocation8 + $0x2b4] sm:$0xf0]  ;;  %v5296_v62 = vld [vmem:[#allocation8 + $0x244] sm:$0xf] }
 0x4e2   :  { %v4557_v7 = vor.u32 %v5296_v62, %v4554_v9  ;;  %v5471_v62 = vld [vmem:[#allocation14 + $0x9] ss:$0 sm:$0xff] }
 0x4e3   :  { %v1142_v8 = vadd.f32 %v5468_v0, %v1139_v63 }
 0x4e5   :  { %2316 = vmatpush.bf16.msrb.mxu0 %v4617_v39  ;;  %v5292_v39 = vld [vmem:[#allocation8 + $0x224] sm:$0xf] }
 0x53a   :  { %v1111_v41 = vpop.xlane.xlu0 %1110 }
 0x53b   :  { %v1113_v57 = vmul.f32 %v1111_v41, %v5966_v42  ;;  %v5315_v41 = vld [vmem:[#allocation8 + $0x2d4] sm:$0xf0] }
 0x53d   :  { %v1115_v55 = vadd.f32 1e-05, %v1113_v57  ;;  %v4621_v57 = vor.u32 %v5312_v37, %v4618_v35  ;;  %v5294_v37 = vld [vmem:[#allocation8 + $0x22c] sm:$0xf0] }
 0x53f   :  { %5533 = vrsqrt.f32 %v1115_v55  ;;  %vm1132_vm7 = vweird.f32 %v1115_v55 }
 0x545   :  { %v5534_v13 = vpop.eup %5533 }
 0x546   :  { %v1127_v44 = vmul.f32 %v5534_v13, %v1115_v55  ;;  %vm1133_vm6 = vweird.f32 %v5534_v13  ;;  %v4625_v55 = vor.u32 %v5315_v41, %v4624_v53  ;;  %v4537_v41 = vor.u32 %v5294_v37, %v4536_v36  ;;  %v5335_v36 = vld [vmem:[#allocation10 + $0x278] sm:$0xff] }
 0x547   :  { %vm1134_vm8 = vmor %vm1132_vm7, %vm1133_vm6  ;;  %v5343_v37 = vld [vmem:[#allocation10 + $0x2b8] sm:$0xff] }
 0x548   :  { %v1128_v46 = vmul.f32 %v5534_v13, %v1127_v44  ;;  %2344 = vmatpush.bf16.msrb.mxu2 %v4625_v55  ;;  %v5310_v44 = vld [vmem:[#allocation8 + $0x2ac] sm:$0xf0]  ;;  %v4544_v55 = vld [vmem:[#allocation8 + $0x228] sm:$0xf] }
 0x549   :  { %v4601_v4 = vor.u32 %v5310_v44, %v4600_v59 }
 0x54a   :  { %v1129_v52 = vmul.f32 0.5, %v1128_v46  ;;  %v5308_v46 = vld [vmem:[#allocation8 + $0x2a4] sm:$0xf] }
 0x54b   :  { %2317 = vmatpush.bf16.msrb.mxu0 %v4601_v4  ;;  %v4546_v4 = vld [vmem:[#allocation8 + $0x238] sm:$0xf0] }
 0x54c   :  { %v1130_v6 = vsub.f32 1.5, %v1129_v52  ;;  %v4602_v52 = vld [vmem:[#allocation8 + $0x2b0] sm:$0xf0] }
 0x54e   :  { %v1131_v58 = vmul.f32 %v5534_v13, %v1130_v6  ;;  %v4608_v6 = vld [vmem:[#allocation8 + $0x2a8] sm:$0xf] }
 0x550   :  { %v1135_v60 = vsel %vm1134_vm8, %v5534_v13, %v1131_v58  ;;  %v4629_v13 = vor.u32 %v5313_v43, %v4626_v5  ;;  %v4609_v58 = vor.u32 %v5311_v51, %v4608_v6  ;;  %v5295_v43 = vld [vmem:[#allocation8 + $0x234] sm:$0xf0]  ;;  %v5290_v51 = vld [vmem:[#allocation8 + $0x20c] sm:$0xf0] }
 0x551   :  { %v1137_v61 = vmul.f32 %v1135_v60, %v6202_v11  ;;  %v5309_v60 = vld [vmem:[#allocation8 + $0x2ac] sm:$0xf]  ;;  %v4545_v44 = vor.u32 %v5295_v43, %v4544_v55  ;;  %v5350_v55 = vld [vmem:[#allocation10 + $0x2f0] sm:$0xff]  ;;  %v5324_v43 = vld [vmem:[#allocation10 + $0x220] sm:$0xff] }
 0x552   :  { %2345 = vmatpush.bf16.msrb.mxu2 %v4609_v58  ;;  %v4522_v58 = vld [vmem:[#allocation8 + $0x210] sm:$0xf0] }
 0x553   :  { %v1140_v48 = vmul.f32 %v5467_v56, %v1137_v61  ;;  %v4605_v56 = vor.u32 %v5308_v46, %v4602_v52  ;;  %v4610_v61 = vld [vmem:[#allocation8 + $0x2b8] sm:$0xf0]  ;;  %v5293_v46 = vld [vmem:[#allocation8 + $0x22c] sm:$0xf]  ;;  %v4520_v52 = vld [vmem:[#allocation8 + $0x200] sm:$0xf] }
 0x554   :  { %v4613_v63 = vor.u32 %v5309_v60, %v4610_v61  ;;  %v4549_v6 = vor.u32 %v5293_v46, %v4546_v4  ;;  %v5331_v46 = vld [vmem:[#allocation10 + $0x258] sm:$0xff]  ;;  %v5340_v4 = vld [vmem:[#allocation10 + $0x2a0] sm:$0xff] }
 0x555   :  { %v1143_v54 = vadd.f32 %v5468_v0, %v1140_v48  ;;  %v4584_v0 = vld [vmem:[#allocation8 + $0x280] sm:$0xf]  ;;  %v5306_v48 = vld [vmem:[#allocation8 + $0x28c] sm:$0xf0] }
 0x557   :  { %v1863_v10 = vpack.c.bf16 %v1143_v54, %v1142_v8 }
 0x559   :  { %1922 = vmatmul.bf16.vlgmr.msra.gmra.mxu2 %v1863_v10  ;;  %v4586_v10 = vld [vmem:[#allocation8 + $0x290] sm:$0xf0] }
 0x562   :  { %v2055_v12 = vpop.f32.mrf.mxu3 }
 0x563   :  { %v2056_v15 = vadd.f32 %v5469_v25, %v2055_v12  ;;  %v5307_v12 = vld [vmem:[#allocation8 + $0x294] sm:$0xf0] }
 0x565   :  { %v2060_v1 = vadd.f32 %v2056_v15, %v1142_v8  ;;  %v5304_v8 = vld [vmem:[#allocation8 + $0x284] sm:$0xf] }
 0x566   :  { %v4589_v15 = vor.u32 %v5304_v8, %v4586_v10  ;;  %v5291_v8 = vld [vmem:[#allocation8 + $0x214] sm:$0xf0]  ;;  %v5289_v10 = vld [vmem:[#allocation8 + $0x20c] sm:$0xf] }
 0x567   :  { %2064 = vadd.xlane.f32.xlu1 %v2060_v1 }
 0x56a   :  { %v2057_v47 = vpop.f32.mrf.mxu3 }
 0x56b   :  { %v2058_v45 = vadd.f32 %v5469_v25, %v2057_v47  ;;  %v4592_v25 = vld [vmem:[#allocation8 + $0x288] sm:$0xf]  ;;  %v5305_v47 = vld [vmem:[#allocation8 + $0x28c] sm:$0xf] }
 0x56d   :  { %v2061_v3 = vadd.f32 %v2058_v45, %v1143_v54  ;;  %v4585_v54 = vor.u32 %v5306_v48, %v4584_v0  ;;  %v4594_v45 = vld [vmem:[#allocation8 + $0x298] sm:$0xf0]  ;;  %v4528_v48 = vld [vmem:[#allocation8 + $0x208] sm:$0xf] }
 0x56f   :  { %2066 = vadd.xlane.f32.xlu2 %v2061_v3  ;;  %2318 = vmatpush.bf16.msrb.mxu0 %v4585_v54  ;;  %v4529_v54 = vor.u32 %v5291_v8, %v4528_v48  ;;  %v5338_v48 = vld [vmem:[#allocation10 + $0x290] sm:$0xff] }
 0x570   :  { %v5346_v8 = vld [vmem:[#allocation10 + $0x2d0] sm:$0xff] }
 0x5da   :  { %v2065_v16 = vpop.xlane.xlu1 %2064 }
 0x5db   :  { %v2068_v11 = vmul.f32 %v2065_v16, %v5966_v42  ;;  %v5302_v16 = vld [vmem:[#allocation8 + $0x26c] sm:$0xf0] }
 0x5dc   :  { %v1923_v2 = vpop.f32.mrf.mxu2 }
 0x5dd   :  { %v6218_v49 = vsub.f32 %v2060_v1, %v2068_v11  ;;  %v1924_v17 = vadd.f32 %v5470_v26, %v1923_v2  ;;  %v4593_v1 = vor.u32 %v5307_v12, %v4592_v25  ;;  %v5300_v11 = vld [vmem:[#allocation8 + $0x264] sm:$0xf]  ;;  %v4530_v25 = vld [vmem:[#allocation8 + $0x218] sm:$0xf0] }
 0x5df   :  { %v2072_v18 = vmul.f32 %v6218_v49, %v6218_v49  ;;  %v6223_v21 = vadd.f32 %v1924_v17, %v6207_v14  ;;  %v5316_v14 = vld [vmem:[#allocation8 + $0x2e4] sm:$0xf]  ;;  %2346 = vmatpush.bf16.msrb.mxu2 %v4593_v1  ;;  %v4570_v17 = vld [vmem:[#allocation8 + $0x270] sm:$0xf0] }
 0x5e0   :  { %v4637_v32 = vor.u32 %v5316_v14, %v4634_v24  ;;  %v5298_v14 = vld [vmem:[#allocation8 + $0x24c] sm:$0xf0] }
 0x5e1   :  { %2074 = vadd.xlane.f32.xlu0 %v2072_v18  ;;  %1932 = vadd.xlane.f32.xlu2 %v6223_v21  ;;  %v4576_v18 = vld [vmem:[#allocation8 + $0x268] sm:$0xf]  ;;  %v4553_v24 = vor.u32 %v5298_v14, %v4552_v20 }
 0x5e2   :  { %v2067_v22 = vpop.xlane.xlu2 %2066  ;;  %2329 = vmatpush.bf16.msrb.mxu1 %v4637_v32  ;;  %v5299_v32 = vld [vmem:[#allocation8 + $0x254] sm:$0xf0] }
 0x5e3   :  { %v2069_v40 = vmul.f32 %v2067_v22, %v5966_v42  ;;  %v5303_v22 = vld [vmem:[#allocation8 + $0x274] sm:$0xf0] }
 0x5e4   :  { %v1925_v23 = vpop.f32.mrf.mxu2 }
 0x5e5   :  { %v6227_v27 = vsub.f32 %v2061_v3, %v2069_v40  ;;  %v1926_v28 = vadd.f32 %v5470_v26, %v1925_v23  ;;  %v4597_v3 = vor.u32 %v5305_v47, %v4594_v45  ;;  %v4568_v26 = vld [vmem:[#allocation8 + $0x260] sm:$0xf]  ;;  %v4573_v40 = vor.u32 %v5300_v11, %v4570_v17 }
 0x5e6   :  { %2330 = vmatpush.bf16.msrb.mxu1 %v4621_v57  ;;  %v4569_v2 = vor.u32 %v5302_v16, %v4568_v26  ;;  %v4577_v23 = vor.u32 %v5303_v22, %v4576_v18  ;;  %v4538_v57 = vld [vmem:[#allocation8 + $0x230] sm:$0xf0] }
 0x5e7   :  { %v6230_v50 = vadd.f32 %v1926_v28, %v6209_v31  ;;  %v2073_v19 = vmul.f32 %v6227_v27, %v6227_v27  ;;  %v4645_v31 = vor.u32 %v5317_v33, %v4642_v38  ;;  %v5301_v28 = vld [vmem:[#allocation8 + $0x26c] sm:$0xf]  ;;  %v4561_v33 = vor.u32 %v5299_v32, %v4560_v29 }
 0x5e8   :  { %2319 = vmatpush.bf16.msrb.mxu0 %v4569_v2  ;;  %2347 = vmatpush.bf16.msrb.mxu2 %v4577_v23  ;;  %v5297_v38 = vld [vmem:[#allocation8 + $0x24c] sm:$0xf]  ;;  %v4541_v59 = vor.u32 %v5292_v39, %v4538_v57  ;;  %v5351_v39 = vld [vmem:[#allocation10 + $0x2f8] sm:$0xff]  ;;  %v5342_v57 = vld [vmem:[#allocation10 + $0x2b0] sm:$0xff] }
 0x5e9   :  { %1934 = vadd.xlane.f32.xlu0 %v6230_v50  ;;  %2076 = vadd.xlane.f32.xlu1 %v2073_v19  ;;  %v4578_v19 = vld [vmem:[#allocation8 + $0x278] sm:$0xf0] }
 0x5ea   :  { %2357 = vmatpush.bf16.msrb.mxu3 %v4645_v31  ;;  %2331 = vmatpush.bf16.msrb.mxu1 %v4605_v56  ;;  %v4581_v30 = vor.u32 %v5301_v28, %v4578_v19  ;;  %v4562_v31 = vld [vmem:[#allocation8 + $0x258] sm:$0xf0]  ;;  %v5288_v56 = vld [vmem:[#allocation8 + $0x204] sm:$0xf] }
 0x5eb   :  { %v4565_v34 = vor.u32 %v5297_v38, %v4562_v31  ;;  %v4525_v0 = vor.u32 %v5288_v56, %v4522_v58  ;;  %v5339_v56 = vld [vmem:[#allocation10 + $0x298] sm:$0xff] }
 0x5ec   :  { %2320 = vmatpush.bf16.msrb.mxu0 %v4553_v24  ;;  %2348 = vmatpush.bf16.msrb.mxu2 %v4561_v33  ;;  %v5347_v58 = vld [vmem:[#allocation10 + $0x2d8] sm:$0xff] }
 0x5ee   :  { %2358 = vmatpush.bf16.msrb.mxu3 %v4629_v13  ;;  %2332 = vmatpush.bf16.msrb.mxu1 %v4589_v15  ;;  %v4533_v15 = vor.u32 %v5289_v10, %v4530_v25  ;;  %v5320_v10 = vld [vmem:[#allocation10 + $0x200] sm:$0xff] }
 0x5ef   :  { %v5328_v25 = vld [vmem:[#allocation10 + $0x240] sm:$0xff] }
 0x5f0   :  { %2321 = vmatpush.bf16.msrb.mxu0 %v4537_v41  ;;  %2349 = vmatpush.bf16.msrb.mxu2 %v4545_v44  ;;  %v5333_v41 = vld [vmem:[#allocation10 + $0x268] sm:$0xff]  ;;  %v5323_v44 = vld [vmem:[#allocation10 + $0x218] sm:$0xff] }
 0x5f2   :  { %2359 = vmatpush.bf16.msrb.mxu3 %v4613_v63  ;;  %2333 = vmatpush.bf16.msrb.mxu1 %v4573_v40  ;;  %v4521_v63 = vor.u32 %v5290_v51, %v4520_v52  ;;  %v5348_v52 = vld [vmem:[#allocation10 + $0x2e0] sm:$0xff]  ;;  %v5330_v51 = vld [vmem:[#allocation10 + $0x250] sm:$0xff] }
 0x5f4   :  { %2322 = vmatpush.bf16.msrb.mxu0 %v4521_v63  ;;  %2350 = vmatpush.bf16.msrb.mxu2 %v4529_v54  ;;  %v5329_v63 = vld [vmem:[#allocation10 + $0x248] sm:$0xff] }
 0x5f6   :  { %2360 = vmatpush.bf16.msrb.mxu3 %v4597_v3  ;;  %2334 = vmatpush.bf16.msrb.mxu1 %v4557_v7  ;;  %v5472_v7 = vld [vmem:[#allocation14 + $0x11] ss:$0 sm:$0xff] }
 0x5f8   :  { %2734 = vmatpush.bf16.msra.mxu2 %v5343_v37 }
 0x5fa   :  { %2361 = vmatpush.bf16.msrb.mxu3 %v4581_v30  ;;  %2335 = vmatpush.bf16.msrb.mxu1 %v4541_v59  ;;  %v5349_v59 = vld [vmem:[#allocation10 + $0x2e8] sm:$0xff] }
 0x5fc   :  { %2735 = vmatpush.bf16.msra.mxu2 %v5342_v57  ;;  %v5377_v57 = vld [vmem:[#allocation8 + $0x3cc] sm:$0xf] }
 0x5fe   :  { %2362 = vmatpush.bf16.msrb.mxu3 %v4565_v34  ;;  %2336 = vmatpush.bf16.msrb.mxu1 %v4525_v0 }
 0x602   :  { %2363 = vmatpush.bf16.msrb.mxu3 %v4549_v6  ;;  %2720 = vmatpush.bf16.msra.mxu1 %v5335_v36  ;;  %v5322_v6 = vld [vmem:[#allocation10 + $0x210] sm:$0xff] }
 0x606   :  { %2364 = vmatpush.bf16.msrb.mxu3 %v4533_v15 }
 0x60a   :  { %2748 = vmatpush.bf16.msra.mxu3 %v5351_v39 }
 0x60e   :  { %2749 = vmatpush.bf16.msra.mxu3 %v5350_v55 }
 0x612   :  { %2750 = vmatpush.bf16.msra.mxu3 %v5349_v59 }
 0x616   :  { %2751 = vmatpush.bf16.msra.mxu3 %v5348_v52 }
 0x61a   :  { %2752 = vmatpush.bf16.msra.mxu3 %v5347_v58  ;;  %v4842_v58 = vld [vmem:[#allocation8 + $0x390] sm:$0xf0] }
 0x61e   :  { %2753 = vmatpush.bf16.msra.mxu3 %v5346_v8 }
 0x654   :  { %v2075_v35 = vpop.xlane.xlu0 %2074  ;;  %v1933_v53 = vpop.xlane.xlu2 %1932 }
 0x655   :  { %v2078_v5 = vmul.f32 %v2075_v35, %v5966_v42  ;;  %v1936_v13 = vmul.f32 %v1933_v53, %v5966_v42  ;;  %v5334_v35 = vld [vmem:[#allocation10 + $0x270] sm:$0xff]  ;;  %v5325_v53 = vld [vmem:[#allocation10 + $0x228] sm:$0xff] }
 0x656   :  { %2721 = vmatpush.bf16.msra.mxu1 %v5334_v35 }
 0x657   :  { %v2080_v60 = vadd.f32 1e-05, %v2078_v5  ;;  %v6238_v61 = vsub.f32 %v6223_v21, %v1936_v13  ;;  %v5332_v5 = vld [vmem:[#allocation10 + $0x260] sm:$0xff]  ;;  %v5341_v13 = vld [vmem:[#allocation10 + $0x2a8] sm:$0xff] }
 0x658   :  { %2736 = vmatpush.bf16.msra.mxu2 %v5341_v13 }
 0x659   :  { %5535 = vrsqrt.f32 %v2080_v60  ;;  %v1940_v12 = vmul.f32 %v6238_v61, %v6238_v61  ;;  %vm2088_vm10 = vweird.f32 %v2080_v60 }
 0x65a   :  { %2722 = vmatpush.bf16.msra.mxu1 %v5333_v41  ;;  %v5379_v41 = vld [vmem:[#allocation8 + $0x3d4] sm:$0xf0] }
 0x65b   :  { %1942 = vadd.xlane.f32.xlu1 %v1940_v12  ;;  %v4888_v12 = vld [vmem:[#allocation8 + $0x3e0] sm:$0xf] }
 0x65c   :  { %v1935_v21 = vpop.xlane.xlu0 %1934  ;;  %v2077_v1 = vpop.xlane.xlu1 %2076  ;;  %2737 = vmatpush.bf16.msra.mxu2 %v5340_v4  ;;  %v5368_v4 = vld [vmem:[#allocation8 + $0x384] sm:$0xf] }
 0x65d   :  { %v1937_v47 = vmul.f32 %v1935_v21, %v5966_v42  ;;  %v2079_v45 = vmul.f32 %v2077_v1, %v5966_v42  ;;  %v5382_v21 = vld [vmem:[#allocation8 + $0x3ec] sm:$0xf0]  ;;  %v5380_v1 = vld [vmem:[#allocation8 + $0x3e4] sm:$0xf] }
 0x65e   :  { %2723 = vmatpush.bf16.msra.mxu1 %v5332_v5 }
 0x65f   :  { %v5536_v3 = vpop.eup %5535  ;;  %v6245_v26 = vsub.f32 %v6230_v50, %v1937_v47  ;;  %v2081_v16 = vadd.f32 1e-05, %v2079_v45  ;;  %v4890_v47 = vld [vmem:[#allocation8 + $0x3f0] sm:$0xf0] }
 0x660   :  { %v2083_v11 = vmul.f32 %v5536_v3, %v2080_v60  ;;  %vm2089_vm9 = vweird.f32 %v5536_v3  ;;  %2738 = vmatpush.bf16.msra.mxu2 %v5339_v56  ;;  %v5321_v60 = vld [vmem:[#allocation10 + $0x208] sm:$0xff] }
 0x661   :  { %5537 = vrsqrt.f32 %v2081_v16  ;;  %v1941_v2 = vmul.f32 %v6245_v26, %v6245_v26  ;;  %vm2090_vm11 = vmor %vm2088_vm10, %vm2089_vm9  ;;  %vm2098_vm13 = vweird.f32 %v2081_v16 }
 0x662   :  { %v2084_v17 = vmul.f32 %v5536_v3, %v2083_v11  ;;  %2724 = vmatpush.bf16.msra.mxu1 %v5331_v46  ;;  %v5337_v11 = vld [vmem:[#allocation10 + $0x288] sm:$0xff]  ;;  %v5370_v46 = vld [vmem:[#allocation8 + $0x38c] sm:$0xf0] }
 0x663   :  { %1944 = vadd.xlane.f32.xlu2 %v1941_v2  ;;  %v5345_v2 = vld [vmem:[#allocation10 + $0x2c8] sm:$0xff] }
 0x664   :  { %v2085_v18 = vmul.f32 0.5, %v2084_v17  ;;  %2739 = vmatpush.bf16.msra.mxu2 %v5338_v48  ;;  %v6259_v17 = vld [vmem:[#allocation16 + $0x2] ss:$4 sm:$0xf]  ;;  %2754 = vmatpush.bf16.msra.mxu3 %v5345_v2 }
 0x665   :  { %v2147_v36 = vperm.slane %v6259_v17, 0  ;;  %v2148_v37 = vperm.slane %v6259_v17, 1  ;;  %v5373_v48 = vld [vmem:[#allocation8 + $0x3ac] sm:$0xf] }
 0x666   :  { %v2086_v22 = vsub.f32 1.5, %v2085_v18  ;;  %2725 = vmatpush.bf16.msra.mxu1 %v5330_v51  ;;  %v4872_v18 = vld [vmem:[#allocation8 + $0x3c0] sm:$0xf]  ;;  %v2149_v51 = vperm.slane %v6259_v17, 2 }
 0x667   :  { %v5538_v40 = vpop.eup %5537 }
 0x668   :  { %v2087_v23 = vmul.f32 %v5536_v3, %v2086_v22  ;;  %v2093_v28 = vmul.f32 %v5538_v40, %v2081_v16  ;;  %vm2099_vm12 = vweird.f32 %v5538_v40  ;;  %v4893_v16 = vor.u32 %v5380_v1, %v4890_v47  ;;  %v5378_v22 = vld [vmem:[#allocation8 + $0x3cc] sm:$0xf0]  ;;  %2740 = vmatpush.bf16.msra.mxu2 %v5337_v11  ;;  %v4824_v47 = vld [vmem:[#allocation8 + $0x360] sm:$0xf] }
 0x669   :  { %vm2100_vm14 = vmor %vm2098_vm13, %vm2099_vm12 }
 0x66a   :  { %v2094_v19 = vmul.f32 %v5538_v40, %v2093_v28  ;;  %v2091_v30 = vsel %vm2090_vm11, %v5536_v3, %v2087_v23  ;;  %2726 = vmatpush.bf16.msra.mxu1 %v5329_v63  ;;  %v4889_v3 = vor.u32 %v5382_v21, %v4888_v12  ;;  %v4873_v28 = vor.u32 %v5378_v22, %v4872_v18  ;;  %v4864_v63 = vld [vmem:[#allocation8 + $0x3a8] sm:$0xf]  ;;  %v4826_v18 = vld [vmem:[#allocation8 + $0x370] sm:$0xf0] }
 0x66b   :  { %v2102_v14 = vmul.f32 %v2091_v30, %v6218_v49  ;;  %v5327_v49 = vld [vmem:[#allocation10 + $0x238] sm:$0xff] }
 0x66c   :  { %v2095_v50 = vmul.f32 0.5, %v2094_v19  ;;  %2706 = vmatpush.bf16.msra.mxu0 %v5327_v49  ;;  %v4874_v19 = vld [vmem:[#allocation8 + $0x3d0] sm:$0xf0]  ;;  %v5372_v49 = vld [vmem:[#allocation8 + $0x3a4] sm:$0xf] }
 0x66d   :  { %v2105_v32 = vmul.f32 %v5471_v62, %v2102_v14  ;;  %v5344_v14 = vld [vmem:[#allocation10 + $0x2c0] sm:$0xff] }
 0x66e   :  { %v2096_v20 = vsub.f32 1.5, %v2095_v50  ;;  %2727 = vmatpush.bf16.msra.mxu1 %v5328_v25  ;;  %2755 = vmatpush.bf16.msra.mxu3 %v5344_v14  ;;  %v2150_v25 = vperm.slane %v6259_v17, 3 }
 0x66f   :  { %v6251_v38 = vadd.f32 %v5472_v7, %v2105_v32 }
 0x670   :  { %v2097_v24 = vmul.f32 %v5538_v40, %v2096_v20  ;;  %v5336_v20 = vld [vmem:[#allocation10 + $0x280] sm:$0xff] }
 0x671   :  { %2741 = vmatpush.bf16.msra.mxu2 %v5336_v20 }
 0x672   :  { %v2101_v9 = vsel %vm2100_vm14, %v5538_v40, %v2097_v24  ;;  %v5376_v40 = vld [vmem:[#allocation8 + $0x3c4] sm:$0xf]  ;;  %v5383_v24 = vld [vmem:[#allocation8 + $0x3f4] sm:$0xf0] }
 0x673   :  { %v2103_v29 = vmul.f32 %v2101_v9, %v6227_v27  ;;  %v5326_v27 = vld [vmem:[#allocation10 + $0x230] sm:$0xff]  ;;  %v4877_v50 = vor.u32 %v5376_v40, %v4874_v19  ;;  %v5381_v9 = vld [vmem:[#allocation8 + $0x3ec] sm:$0xf]  ;;  %v5371_v19 = vld [vmem:[#allocation8 + $0x394] sm:$0xf0] }
 0x674   :  { %2707 = vmatpush.bf16.msra.mxu0 %v5326_v27  ;;  %v4858_v27 = vld [vmem:[#allocation8 + $0x3b0] sm:$0xf0] }
 0x675   :  { %v2106_v33 = vmul.f32 %v5471_v62, %v2103_v29  ;;  %v4896_v62 = vld [vmem:[#allocation8 + $0x3e8] sm:$0xf]  ;;  %v4898_v29 = vld [vmem:[#allocation8 + $0x3f8] sm:$0xf0]  ;;  %v4861_v35 = vor.u32 %v5372_v49, %v4858_v27  ;;  %v4808_v27 = vld [vmem:[#allocation8 + $0x340] sm:$0xf] }
 0x676   :  { %v4897_v32 = vor.u32 %v5383_v24, %v4896_v62 }
 0x677   :  { %v6253_v31 = vadd.f32 %v5472_v7, %v2106_v33  ;;  %v4901_v7 = vor.u32 %v5381_v9, %v4898_v29  ;;  %v4856_v33 = vld [vmem:[#allocation8 + $0x3a0] sm:$0xf] }
 0x678   :  { %2708 = vmatpush.bf16.msra.mxu0 %v5325_v53  ;;  %v4880_v53 = vld [vmem:[#allocation8 + $0x3c8] sm:$0xf] }
 0x679   :  { %v2143_v34 = vpack.c.bf16 %v6253_v31, %v6251_v38  ;;  %v4881_v55 = vor.u32 %v5379_v41, %v4880_v53 }
 0x67b   :  { %2323 = vmatmul.bf16.vlgmr.msrb.gmra.mxu0 %v2143_v34  ;;  %2337 = vmatmul.bf16.vlgmr.msrb.gmra.mxu1 %v2143_v34 }
 0x67c   :  { %2351 = vmatmul.bf16.vlgmr.msrb.gmra.mxu2 %v2143_v34  ;;  %2365 = vmatmul.bf16.vlgmr.msrb.gmra.mxu3 %v2143_v34  ;;  %v5374_v34 = vld [vmem:[#allocation8 + $0x3ac] sm:$0xf0] }
 0x67d   :  { %2709 = vmatpush.bf16.msra.mxu0 %v5324_v43  ;;  %3031 = vmatpush.bf16.msrb.mxu1 %v4893_v16  ;;  %v4857_v39 = vor.u32 %v5374_v34, %v4856_v33  ;;  %v4882_v43 = vld [vmem:[#allocation8 + $0x3d8] sm:$0xf0] }
 0x67e   :  { %3045 = vmatpush.bf16.msrb.mxu2 %v4897_v32  ;;  %3059 = vmatpush.bf16.msrb.mxu3 %v4901_v7  ;;  %v4885_v59 = vor.u32 %v5377_v57, %v4882_v43  ;;  %v4850_v32 = vld [vmem:[#allocation8 + $0x398] sm:$0xf0]  ;;  %v5360_v43 = vld [vmem:[#allocation8 + $0x344] sm:$0xf] }
 0x681   :  { %2710 = vmatpush.bf16.msra.mxu0 %v5323_v44  ;;  %3032 = vmatpush.bf16.msrb.mxu1 %v4877_v50  ;;  %v4840_v44 = vld [vmem:[#allocation8 + $0x380] sm:$0xf]  ;;  %v5369_v50 = vld [vmem:[#allocation8 + $0x38c] sm:$0xf] }
 0x682   :  { %v4841_v56 = vor.u32 %v5370_v46, %v4840_v44  ;;  %3046 = vmatpush.bf16.msrb.mxu2 %v4881_v55  ;;  %3060 = vmatpush.bf16.msrb.mxu3 %v4885_v59  ;;  %v4832_v46 = vld [vmem:[#allocation8 + $0x368] sm:$0xf] }
 0x685   :  { %2711 = vmatpush.bf16.msra.mxu0 %v5322_v6  ;;  %3033 = vmatpush.bf16.msrb.mxu1 %v4861_v35  ;;  %v5362_v35 = vld [vmem:[#allocation8 + $0x34c] sm:$0xf0] }
 0x686   :  { %v4809_v44 = vor.u32 %v5362_v35, %v4808_v27  ;;  %v4776_v35 = vld [vmem:[#allocation8 + $0x300] sm:$0xf] }
 0x689   :  { %2712 = vmatpush.bf16.msra.mxu0 %v5321_v60  ;;  %v4845_v60 = vor.u32 %v5368_v4, %v4842_v58  ;;  %v5367_v4 = vld [vmem:[#allocation8 + $0x374] sm:$0xf0] }
 0x68b   :  { %3034 = vmatpush.bf16.msrb.mxu1 %v4845_v60 }
 0x68d   :  { %2713 = vmatpush.bf16.msra.mxu0 %v5320_v10 }
 0x691   :  { %3017 = vmatpush.bf16.msrb.mxu0 %v4889_v3  ;;  %v5364_v3 = vld [vmem:[#allocation8 + $0x364] sm:$0xf] }
 0x692   :  { %v4829_v40 = vor.u32 %v5364_v3, %v4826_v18 }
 0x694   :  { %3035 = vmatpush.bf16.msrb.mxu1 %v4829_v40 }
 0x695   :  { %3018 = vmatpush.bf16.msrb.mxu0 %v4873_v28  ;;  %v4848_v28 = vld [vmem:[#allocation8 + $0x388] sm:$0xf] }
 0x696   :  { %v4849_v29 = vor.u32 %v5371_v19, %v4848_v28  ;;  %v5361_v19 = vld [vmem:[#allocation8 + $0x34c] sm:$0xf] }
 0x699   :  { %3019 = vmatpush.bf16.msrb.mxu0 %v4857_v39  ;;  %v4853_v39 = vor.u32 %v5369_v50, %v4850_v32  ;;  %v4818_v32 = vld [vmem:[#allocation8 + $0x358] sm:$0xf0] }
 0x69d   :  { %3020 = vmatpush.bf16.msrb.mxu0 %v4841_v56  ;;  %v5365_v56 = vld [vmem:[#allocation8 + $0x36c] sm:$0xf] }
 0x6ce   :  { %v1943_v0 = vpop.xlane.xlu1 %1942 }
 0x6cf   :  { %v1946_v15 = vmul.f32 %v1943_v0, %v5966_v42  ;;  %v5375_v0 = vld [vmem:[#allocation8 + $0x3b4] sm:$0xf0] }
 0x6d0   :  { %v4865_v12 = vor.u32 %v5375_v0, %v4864_v63  ;;  %v4834_v63 = vld [vmem:[#allocation8 + $0x378] sm:$0xf0] }
 0x6d1   :  { %v6261_v23 = vadd.f32 1e-05, %v1946_v15  ;;  %v4866_v15 = vld [vmem:[#allocation8 + $0x3b8] sm:$0xf0]  ;;  %v4837_v3 = vor.u32 %v5365_v56, %v4834_v63 }
 0x6d2   :  { %v4869_v1 = vor.u32 %v5373_v48, %v4866_v15  ;;  %3047 = vmatpush.bf16.msrb.mxu2 %v4865_v12  ;;  %v4792_v12 = vld [vmem:[#allocation8 + $0x320] sm:$0xf]  ;;  %v5358_v15 = vld [vmem:[#allocation8 + $0x32c] sm:$0xf0] }
 0x6d3   :  { %5539 = vrsqrt.f32 %v6261_v23  ;;  %v4793_v28 = vor.u32 %v5358_v15, %v4792_v12  ;;  %vm1956_vm2 = vweird.f32 %v6261_v23 }
 0x6d4   :  { %3061 = vmatpush.bf16.msrb.mxu3 %v4869_v1  ;;  %v5356_v1 = vld [vmem:[#allocation8 + $0x324] sm:$0xf] }
 0x6d6   :  { %v1945_v54 = vpop.xlane.xlu2 %1944  ;;  %3048 = vmatpush.bf16.msrb.mxu2 %v4849_v29 }
 0x6d7   :  { %v1947_v45 = vmul.f32 %v1945_v54, %v5966_v42 }
 0x6d8   :  { %3062 = vmatpush.bf16.msrb.mxu3 %v4853_v39 }
 0x6d9   :  { %v6263_v30 = vadd.f32 1e-05, %v1947_v45  ;;  %v6278_v8 = vpop.eup %5539  ;;  %v5366_v45 = vld [vmem:[#allocation8 + $0x36c] sm:$0xf0] }
 0x6da   :  { %v4825_v2 = vor.u32 %v5366_v45, %v4824_v47  ;;  %v6291_v22 = vmul.f32 %v6278_v8, %v6261_v23  ;;  %vm1957_vm0 = vweird.f32 %v6278_v8 }
 0x6db   :  { %5541 = vrsqrt.f32 %v6263_v30  ;;  %vm1966_vm1 = vweird.f32 %v6263_v30  ;;  %vm1958_vm4 = vmor %vm1956_vm2, %vm1957_vm0 }
 0x6dc   :  { %3021 = vmatpush.bf16.msrb.mxu0 %v4825_v2  ;;  %v5363_v2 = vld [vmem:[#allocation8 + $0x354] sm:$0xf0]  ;;  %3063 = vmatpush.bf16.msrb.mxu3 %v4837_v3 }
 0x6e0   :  { %3022 = vmatpush.bf16.msrb.mxu0 %v4809_v44  ;;  %v4778_v44 = vld [vmem:[#allocation8 + $0x310] sm:$0xf0] }
 0x6e1   :  { %v6285_v21 = vpop.eup %5541 }
 0x6e2   :  { %v6295_v20 = vmul.f32 %v6285_v21, %v6263_v30  ;;  %vm1967_vm15 = vweird.f32 %v6285_v21 }
 0x6e3   :  { %vm1968_vm3 = vmor %vm1966_vm1, %vm1967_vm15 }
 0x6e4   :  { %3023 = vmatpush.bf16.msrb.mxu0 %v4793_v28  ;;  %v5353_v28 = vld [vmem:[#allocation8 + $0x30c] sm:$0xf] }
 0x6f8   :  { %v2324_v5 = vpop.f32.mrf.mxu0  ;;  %v2338_v13 = vpop.f32.mrf.mxu1 }
 0x6f9   :  { %v6271_v52 = vadd.f32 %v2324_v5, %v2147_v36  ;;  %v6275_v6 = vadd.f32 %v2338_v13, %v2148_v37  ;;  %v4810_v5 = vld [vmem:[#allocation8 + $0x350] sm:$0xf0] }
 0x6fb   :  { %v2371_v54 = vmul.f32 %v6271_v52, %v6271_v52  ;;  %v2372_v10 = vmul.f32 %v6275_v6, %v6275_v6 }
 0x6fd   :  { %v2379_v16 = vmul.f32 %v2371_v54, %v6271_v52  ;;  %v2380_v11 = vmul.f32 %v2372_v10, %v6275_v6  ;;  %v4813_v54 = vor.u32 %v5360_v43, %v4810_v5  ;;  %v4833_v10 = vor.u32 %v5367_v4, %v4832_v46  ;;  %v4800_v46 = vld [vmem:[#allocation8 + $0x328] sm:$0xf]  ;;  %v5359_v4 = vld [vmem:[#allocation8 + $0x334] sm:$0xf0] }
 0x6ff   :  { %v2387_v14 = vmul.f32 0.044715, %v2379_v16  ;;  %v2388_v62 = vmul.f32 0.044715, %v2380_v11  ;;  %v2352_v24 = vpop.f32.mrf.mxu2  ;;  %v2366_v9 = vpop.f32.mrf.mxu3  ;;  %v4794_v16 = vld [vmem:[#allocation8 + $0x330] sm:$0xf0]  ;;  %3036 = vmatpush.bf16.msrb.mxu1 %v4813_v54  ;;  %3049 = vmatpush.bf16.msrb.mxu2 %v4833_v10  ;;  %v1962_v10 = vmul.f32 %v6285_v21, %v6295_v20 }
 0x700   :  { %v6299_v7 = vadd.f32 %v2352_v24, %v2149_v51  ;;  %v6303_v33 = vadd.f32 %v2366_v9, %v2150_v25  ;;  %v2326_v34 = vpop.f32.mrf.mxu0  ;;  %v2340_v49 = vpop.f32.mrf.mxu1  ;;  %v4816_v11 = vld [vmem:[#allocation8 + $0x348] sm:$0xf]  ;;  %v4797_v9 = vor.u32 %v5356_v1, %v4794_v16  ;;  %v5355_v20 = vld [vmem:[#allocation8 + $0x314] sm:$0xf0] }
 0x701   :  { %v2395_v53 = vadd.f32 %v2387_v14, %v6271_v52  ;;  %v2396_v41 = vadd.f32 %v2388_v62, %v6275_v6  ;;  %v6309_v57 = vadd.f32 %v2326_v34, %v2147_v36  ;;  %v6313_v55 = vadd.f32 %v2340_v49, %v2148_v37  ;;  %v4784_v16 = vld [vmem:[#allocation8 + $0x308] sm:$0xf] }
 0x702   :  { %v2373_v13 = vmul.f32 %v6299_v7, %v6299_v7  ;;  %v2374_v59 = vmul.f32 %v6303_v33, %v6303_v33  ;;  %v4817_v29 = vor.u32 %v5363_v2, %v4816_v11  ;;  %v1963_v11 = vmul.f32 0.5, %v1962_v10 }
 0x703   :  { %v2403_v36 = vmul.f32 0.7978846, %v2395_v53  ;;  %v2404_v58 = vmul.f32 0.7978846, %v2396_v41  ;;  %v2375_v37 = vmul.f32 %v6309_v57, %v6309_v57  ;;  %v2376_v60 = vmul.f32 %v6313_v55, %v6313_v55  ;;  %v5354_v53 = vld [vmem:[#allocation8 + $0x30c] sm:$0xf0]  ;;  %3037 = vmatpush.bf16.msrb.mxu1 %v4797_v9 }
 0x704   :  { %v2381_v0 = vmul.f32 %v2373_v13, %v6299_v7  ;;  %v2382_v48 = vmul.f32 %v2374_v59, %v6303_v33  ;;  %v5352_v41 = vld [vmem:[#allocation8 + $0x304] sm:$0xf]  ;;  %v4821_v13 = vor.u32 %v5361_v19, %v4818_v32  ;;  %v4777_v59 = vor.u32 %v5354_v53, %v4776_v35  ;;  %3050 = vmatpush.bf16.msrb.mxu2 %v4817_v29  ;;  %v4786_v19 = vld [vmem:[#allocation8 + $0x318] sm:$0xf0] }
 0x705   :  { %5543 = vtanh.f32 %v2403_v36  ;;  %v2383_v47 = vmul.f32 %v2375_v37, %v6309_v57  ;;  %v2384_v45 = vmul.f32 %v2376_v60, %v6313_v55  ;;  %v5357_v36 = vld [vmem:[#allocation8 + $0x32c] sm:$0xf]  ;;  %v4781_v63 = vor.u32 %v5352_v41, %v4778_v44 }
 0x706   :  { %5545 = vtanh.f32 %v2404_v58  ;;  %v2389_v18 = vmul.f32 0.044715, %v2381_v0  ;;  %v2390_v40 = vmul.f32 0.044715, %v2382_v48  ;;  %3064 = vmatpush.bf16.msrb.mxu3 %v4821_v13  ;;  %v4801_v0 = vor.u32 %v5359_v4, %v4800_v46  ;;  %v4802_v48 = vld [vmem:[#allocation8 + $0x338] sm:$0xf0]  ;;  %3024 = vmatpush.bf16.msrb.mxu0 %v4777_v59 }
 0x707   :  { %v2391_v50 = vmul.f32 0.044715, %v2383_v47  ;;  %v2392_v14 = vmul.f32 0.044715, %v2384_v45  ;;  %v2354_v62 = vpop.f32.mrf.mxu2  ;;  %v2368_v24 = vpop.f32.mrf.mxu3  ;;  %v4805_v1 = vor.u32 %v5357_v36, %v4802_v48  ;;  %v1952_v47 = vmul.f32 %v6278_v8, %v6291_v22  ;;  %3038 = vmatpush.bf16.msrb.mxu1 %v4781_v63 }
 0x708   :  { %v2397_v34 = vadd.f32 %v2389_v18, %v6299_v7  ;;  %v2398_v49 = vadd.f32 %v2390_v40, %v6303_v33  ;;  %v6331_v39 = vadd.f32 %v2354_v62, %v2149_v51  ;;  %v6335_v27 = vadd.f32 %v2368_v24, %v2150_v25  ;;  %3051 = vmatpush.bf16.msrb.mxu2 %v4801_v0 }
 0x709   :  { %v2399_v43 = vadd.f32 %v2391_v50, %v6309_v57  ;;  %v2400_v5 = vadd.f32 %v2392_v14, %v6313_v55  ;;  %v4785_v40 = vor.u32 %v5355_v20, %v4784_v16  ;;  %v4789_v14 = vor.u32 %v5353_v28, %v4786_v19  ;;  %v5388_v19 = vld [vmem:[#allocation10 + $0x320] sm:$0xff] }
 0x70a   :  { %v2405_v56 = vmul.f32 0.7978846, %v2397_v34  ;;  %v2406_v51 = vmul.f32 0.7978846, %v2398_v49  ;;  %v2377_v17 = vmul.f32 %v6331_v39, %v6331_v39  ;;  %v2378_v25 = vmul.f32 %v6335_v27, %v6335_v27  ;;  %3065 = vmatpush.bf16.msrb.mxu3 %v4805_v1 }
 0x70b   :  { %v5544_v58 = vpop.eup %5543  ;;  %v2407_v37 = vmul.f32 0.7978846, %v2399_v43  ;;  %v2408_v60 = vmul.f32 0.7978846, %v2400_v5  ;;  %v1953_v62 = vmul.f32 0.5, %v1952_v47  ;;  %v1964_v49 = vsub.f32 1.5, %v1963_v11 }
 0x70c   :  { %v5546_v54 = vpop.eup %5545  ;;  %5547 = vtanh.f32 %v2405_v56  ;;  %v2385_v12 = vmul.f32 %v2377_v17, %v6331_v39  ;;  %v2386_v15 = vmul.f32 %v2378_v25, %v6335_v27  ;;  %v2419_v50 = vadd.f32 1.0, %v5544_v58  ;;  %3052 = vmatpush.bf16.msrb.mxu2 %v4785_v40  ;;  %v5474_v11 = vld [vmem:[#allocation14 + $0x10] ss:$0 sm:$0xff]  ;;  %v5397_v40 = vld [vmem:[#allocation10 + $0x368] sm:$0xff] }
 0x70d   :  { %5549 = vtanh.f32 %v2406_v51  ;;  %v2420_v24 = vadd.f32 1.0, %v5546_v54  ;;  %v1954_v43 = vsub.f32 1.5, %v1953_v62  ;;  %v1965_v46 = vmul.f32 %v6285_v21, %v1964_v49  ;;  %v5415_v62 = vld [vmem:[#allocation10 + $0x3f8] sm:$0xff] }
 0x70e   :  { %5551 = vtanh.f32 %v2407_v37  ;;  %v2393_v45 = vmul.f32 0.044715, %v2385_v12  ;;  %v2394_v3 = vmul.f32 0.044715, %v2386_v15  ;;  %3066 = vmatpush.bf16.msrb.mxu3 %v4789_v14  ;;  %v2427_v53 = vmul.f32 0.5, %v2419_v50  ;;  %v5396_v50 = vld [vmem:[#allocation10 + $0x360] sm:$0xff] }
 0x70f   :  { %5553 = vtanh.f32 %v2408_v60  ;;  %v2428_v5 = vmul.f32 0.5, %v2420_v24  ;;  %v1955_v36 = vmul.f32 %v6278_v8, %v1954_v43  ;;  %v5407_v14 = vld [vmem:[#allocation10 + $0x3b8] sm:$0xff]  ;;  %v5475_v24 = vld [vmem:[#allocation14 + $0x16] ss:$0 sm:$0xff]  ;;  %v5405_v43 = vld [vmem:[#allocation10 + $0x3a8] sm:$0xff] }
 0x710   :  { %v2401_v2 = vadd.f32 %v2393_v45, %v6331_v39  ;;  %v2402_v18 = vadd.f32 %v2394_v3, %v6335_v27  ;;  %v2435_v51 = vmul.f32 %v2427_v53, %v6271_v52  ;;  %v1969_v52 = vsel %vm1968_vm3, %v6285_v21, %v1965_v46  ;;  %v5473_v3 = vld [vmem:[#allocation14 + $0x8] ss:$0 sm:$0xff]  ;;  %v5386_v53 = vld [vmem:[#allocation10 + $0x310] sm:$0xff] }
 0x711   :  { %v2436_v58 = vmul.f32 %v2428_v5, %v6275_v6  ;;  %v1959_v6 = vsel %vm1958_vm4, %v6278_v8, %v1955_v36  ;;  %v1971_v23 = vmul.f32 %v1969_v52, %v6245_v26  ;;  %v5392_v52 = vld [vmem:[#allocation10 + $0x340] sm:$0xff] }
 0x712   :  { %v5548_v22 = vpop.eup %5547  ;;  %v2409_v9 = vmul.f32 0.7978846, %v2401_v2  ;;  %v2410_v29 = vmul.f32 0.7978846, %v2402_v18  ;;  %v1970_v47 = vmul.f32 %v1959_v6, %v6238_v61  ;;  %v5391_v61 = vld [vmem:[#allocation10 + $0x338] sm:$0xff]  ;;  %v5389_v18 = vld [vmem:[#allocation10 + $0x328] sm:$0xff] }
 0x713   :  { %v5550_v32 = vpop.eup %5549  ;;  %v2421_v59 = vadd.f32 1.0, %v5548_v22  ;;  %v1974_v20 = vmul.f32 %v5473_v3, %v1971_v23  ;;  %v5411_v6 = vld [vmem:[#allocation10 + $0x3d8] sm:$0xff] }
 0x714   :  { %v5552_v34 = vpop.eup %5551  ;;  %5555 = vtanh.f32 %v2409_v9  ;;  %v2422_v4 = vadd.f32 1.0, %v5550_v32  ;;  %v1973_v8 = vmul.f32 %v5473_v3, %v1970_v47  ;;  %v5387_v9 = vld [vmem:[#allocation10 + $0x318] sm:$0xff]  ;;  %v5406_v32 = vld [vmem:[#allocation10 + $0x3b0] sm:$0xff] }
 0x715   :  { %v5554_v35 = vpop.eup %5553  ;;  %v2423_v41 = vadd.f32 1.0, %v5552_v34  ;;  %5557 = vtanh.f32 %v2410_v29  ;;  %v2429_v63 = vmul.f32 0.5, %v2421_v59  ;;  %v6371_v2 = vadd.f32 %v5474_v11, %v1974_v20  ;;  %v5395_v29 = vld [vmem:[#allocation10 + $0x358] sm:$0xff]  ;;  %v5414_v34 = vld [vmem:[#allocation10 + $0x3f0] sm:$0xff] }
 0x716   :  { %v2424_v13 = vadd.f32 1.0, %v5554_v35  ;;  %v2430_v54 = vmul.f32 0.5, %v2422_v4  ;;  %v6373_v26 = vadd.f32 %v5474_v11, %v1973_v8  ;;  %v6377_v59 = vld [vmem:[#allocation16 + $0x3] ss:$4 sm:$0xf] }
 0x717   :  { %v2431_v44 = vmul.f32 0.5, %v2423_v41  ;;  %v2437_v12 = vmul.f32 %v2429_v63, %v6299_v7  ;;  %v5394_v41 = vld [vmem:[#allocation10 + $0x350] sm:$0xff]  ;;  %v5385_v4 = vld [vmem:[#allocation10 + $0x308] sm:$0xff]  ;;  %v2849_v36 = vperm.slane %v6377_v59, 0 }
 0x718   :  { %v2432_v56 = vmul.f32 0.5, %v2424_v13  ;;  %v2438_v21 = vmul.f32 %v2430_v54, %v6303_v33  ;;  %v2845_v7 = vpack.c.bf16 %v6371_v2, %v6373_v26  ;;  %v5399_v33 = vld [vmem:[#allocation10 + $0x378] sm:$0xff]  ;;  %v5413_v13 = vld [vmem:[#allocation10 + $0x3e8] sm:$0xff] }
 0x719   :  { %v2439_v17 = vmul.f32 %v2431_v44, %v6309_v57  ;;  %v5403_v54 = vld [vmem:[#allocation10 + $0x398] sm:$0xff] }
 0x71a   :  { %v5556_v25 = vpop.eup %5555  ;;  %v2440_v37 = vmul.f32 %v2432_v56, %v6313_v55  ;;  %v5393_v56 = vld [vmem:[#allocation10 + $0x348] sm:$0xff] }
 0x71b   :  { %v5558_v60 = vpop.eup %5557  ;;  %v2425_v0 = vadd.f32 1.0, %v5556_v25  ;;  %v2508_v48 = vpack.c.bf16 %v2439_v17, %v2435_v51  ;;  %v5404_v51 = vld [vmem:[#allocation10 + $0x3a0] sm:$0xff] }
 0x71c   :  { %v2426_v57 = vadd.f32 1.0, %v5558_v60  ;;  %v2509_v10 = vpack.c.bf16 %v2440_v37, %v2436_v58  ;;  %v5412_v58 = vld [vmem:[#allocation10 + $0x3e0] sm:$0xff]  ;;  %v2850_v37 = vperm.slane %v6377_v59, 1 }
 0x71d   :  { %v2433_v30 = vmul.f32 0.5, %v2425_v0  ;;  %2714 = vmatmul.bf16.vlgmr.msra.gmra.mxu0 %v2508_v48  ;;  %v5384_v48 = vld [vmem:[#allocation10 + $0x300] sm:$0xff] }
 0x71e   :  { %v2434_v55 = vmul.f32 0.5, %v2426_v57  ;;  %2728 = vmatmul.bf16.vlgmr.msra.gmra.mxu1 %v2509_v10  ;;  %3408 = vmatpush.bf16.msra.mxu0 %v5391_v61  ;;  %v5401_v61 = vld [vmem:[#allocation10 + $0x388] sm:$0xff] }
 0x71f   :  { %v2441_v15 = vmul.f32 %v2433_v30, %v6331_v39  ;;  %3422 = vmatpush.bf16.msra.mxu1 %v5399_v33  ;;  %v5390_v39 = vld [vmem:[#allocation10 + $0x330] sm:$0xff]  ;;  %v5409_v33 = vld [vmem:[#allocation10 + $0x3c8] sm:$0xff] }
 0x720   :  { %v2442_v1 = vmul.f32 %v2434_v55, %v6335_v27  ;;  %v5398_v27 = vld [vmem:[#allocation10 + $0x370] sm:$0xff] }
 0x721   :  { %v2510_v45 = vpack.c.bf16 %v2441_v15, %v2437_v12 }
 0x722   :  { %v2511_v16 = vpack.c.bf16 %v2442_v1, %v2438_v21  ;;  %3409 = vmatpush.bf16.msra.mxu0 %v5390_v39  ;;  %v5402_v1 = vld [vmem:[#allocation10 + $0x390] sm:$0xff] }
 0x723   :  { %2742 = vmatmul.bf16.vlgmr.msra.gmra.mxu2 %v2510_v45  ;;  %3423 = vmatpush.bf16.msra.mxu1 %v5398_v27 }
 0x724   :  { %2756 = vmatmul.bf16.vlgmr.msra.gmra.mxu3 %v2511_v16  ;;  %3436 = vmatpush.bf16.msra.mxu2 %v5407_v14  ;;  %v2852_v14 = vperm.slane %v6377_v59, 3 }
 0x725   :  { %3450 = vmatpush.bf16.msra.mxu3 %v5415_v62 }
 0x726   :  { %3410 = vmatpush.bf16.msra.mxu0 %v5389_v18 }
 0x727   :  { %3424 = vmatpush.bf16.msra.mxu1 %v5397_v40 }
 0x728   :  { %3437 = vmatpush.bf16.msra.mxu2 %v5406_v32  ;;  %v5408_v32 = vld [vmem:[#allocation10 + $0x3c0] sm:$0xff] }
 0x729   :  { %3451 = vmatpush.bf16.msra.mxu3 %v5414_v34 }
 0x72a   :  { %3411 = vmatpush.bf16.msra.mxu0 %v5388_v19 }
 0x72b   :  { %3425 = vmatpush.bf16.msra.mxu1 %v5396_v50 }
 0x72c   :  { %3438 = vmatpush.bf16.msra.mxu2 %v5405_v43 }
 0x72d   :  { %3025 = vmatmul.bf16.vlgmr.msrb.gmra.mxu0 %v2845_v7  ;;  %3452 = vmatpush.bf16.msra.mxu3 %v5413_v13 }
 0x72e   :  { %3039 = vmatmul.bf16.vlgmr.msrb.gmra.mxu1 %v2845_v7  ;;  %3412 = vmatpush.bf16.msra.mxu0 %v5387_v9 }
 0x72f   :  { %3426 = vmatpush.bf16.msra.mxu1 %v5395_v29  ;;  %v5400_v29 = vld [vmem:[#allocation10 + $0x380] sm:$0xff] }
 0x730   :  { %3439 = vmatpush.bf16.msra.mxu2 %v5404_v51 }
 0x731   :  { %3453 = vmatpush.bf16.msra.mxu3 %v5412_v58 }
 0x732   :  { %3413 = vmatpush.bf16.msra.mxu0 %v5386_v53 }
 0x733   :  { %3053 = vmatmul.bf16.vlgmr.msrb.gmra.mxu2 %v2845_v7  ;;  %3427 = vmatpush.bf16.msra.mxu1 %v5394_v41 }
 0x734   :  { %3067 = vmatmul.bf16.vlgmr.msrb.gmra.mxu3 %v2845_v7  ;;  %3440 = vmatpush.bf16.msra.mxu2 %v5403_v54 }
 0x735   :  { %3454 = vmatpush.bf16.msra.mxu3 %v5411_v6 }
 0x736   :  { %3414 = vmatpush.bf16.msra.mxu0 %v5385_v4 }
 0x737   :  { %3428 = vmatpush.bf16.msra.mxu1 %v5393_v56 }
 0x738   :  { %3441 = vmatpush.bf16.msra.mxu2 %v5402_v1 }
 0x73a   :  { %3415 = vmatpush.bf16.msra.mxu0 %v5384_v48 }
 0x73b   :  { %3429 = vmatpush.bf16.msra.mxu1 %v5392_v52 }
 0x73c   :  { %3442 = vmatpush.bf16.msra.mxu2 %v5401_v61 }
 0x740   :  { %3443 = vmatpush.bf16.msra.mxu2 %v5400_v29 }
 0x79a   :  { %v2715_v28 = vpop.f32.mrf.mxu0 }
 0x79b   :  { %v2729_v22 = vpop.f32.mrf.mxu1  ;;  %v2716_v49 = vadd.f32 %v5475_v24, %v2715_v28  ;;  %v2851_v28 = vperm.slane %v6377_v59, 2 }
 0x79d   :  { %v2730_v44 = vadd.f32 %v2729_v22, %v2716_v49 }
 0x7a2   :  { %v2717_v35 = vpop.f32.mrf.mxu0 }
 0x7a3   :  { %v2731_v5 = vpop.f32.mrf.mxu1  ;;  %v2718_v60 = vadd.f32 %v5475_v24, %v2717_v35 }
 0x7a5   :  { %v2732_v23 = vadd.f32 %v2731_v5, %v2718_v60 }
 0x7a6   :  { %v2743_v46 = vpop.f32.mrf.mxu2 }
 0x7a7   :  { %v2744_v17 = vadd.f32 %v2743_v46, %v2730_v44  ;;  %v2757_v25 = vpop.f32.mrf.mxu3 }
 0x7a9   :  { %v2758_v63 = vadd.f32 %v2757_v25, %v2744_v17 }
 0x7aa   :  { %v3026_v0 = vpop.f32.mrf.mxu0 }
 0x7ab   :  { %v6381_v57 = vadd.f32 %v3026_v0, %v2849_v36  ;;  %v3040_v10 = vpop.f32.mrf.mxu1  ;;  %v6384_v30 = vadd.f32 %v2758_v63, %v6251_v38  ;;  %v5410_v38 = vld [vmem:[#allocation10 + $0x3d0] sm:$0xff] }
 0x7ac   :  { %v6386_v55 = vadd.f32 %v3040_v10, %v2850_v37  ;;  %3455 = vmatpush.bf16.msra.mxu3 %v5410_v38 }
 0x7ad   :  { %v3073_v12 = vmul.f32 %v6381_v57, %v6381_v57  ;;  %2766 = vadd.xlane.f32.xlu0 %v6384_v30 }
 0x7ae   :  { %v3074_v15 = vmul.f32 %v6386_v55, %v6386_v55  ;;  %v2745_v21 = vpop.f32.mrf.mxu2 }
 0x7af   :  { %v3081_v47 = vmul.f32 %v3073_v12, %v6381_v57  ;;  %v2746_v45 = vadd.f32 %v2745_v21, %v2732_v23  ;;  %v2759_v3 = vpop.f32.mrf.mxu3 }
 0x7b0   :  { %v3082_v16 = vmul.f32 %v3074_v15, %v6386_v55  ;;  %3456 = vmatpush.bf16.msra.mxu3 %v5409_v33 }
 0x7b1   :  { %v3089_v20 = vmul.f32 0.044715, %v3081_v47  ;;  %v2760_v8 = vadd.f32 %v2759_v3, %v2746_v45 }
 0x7b2   :  { %v3090_v11 = vmul.f32 0.044715, %v3082_v16  ;;  %v3028_v7 = vpop.f32.mrf.mxu0 }
 0x7b3   :  { %v3097_v39 = vadd.f32 %v3089_v20, %v6381_v57  ;;  %v6396_v27 = vadd.f32 %v3028_v7, %v2849_v36  ;;  %v3042_v18 = vpop.f32.mrf.mxu1  ;;  %v6399_v40 = vadd.f32 %v2760_v8, %v6253_v31 }
 0x7b4   :  { %v3098_v19 = vadd.f32 %v3090_v11, %v6386_v55  ;;  %v6403_v50 = vadd.f32 %v3042_v18, %v2850_v37  ;;  %3457 = vmatpush.bf16.msra.mxu3 %v5408_v32 }
 0x7b5   :  { %v3105_v22 = vmul.f32 0.7978846, %v3097_v39  ;;  %v3077_v62 = vmul.f32 %v6396_v27, %v6396_v27  ;;  %2768 = vadd.xlane.f32.xlu1 %v6399_v40 }
 0x7b6   :  { %v3106_v24 = vmul.f32 0.7978846, %v3098_v19  ;;  %v3078_v31 = vmul.f32 %v6403_v50, %v6403_v50  ;;  %v3054_v9 = vpop.f32.mrf.mxu2 }
 0x7b7   :  { %v3085_v34 = vmul.f32 %v3077_v62, %v6396_v27  ;;  %v6412_v49 = vadd.f32 %v3054_v9, %v2851_v28  ;;  %v3068_v35 = vpop.f32.mrf.mxu3  ;;  %5559 = vtanh.f32 %v3105_v22 }
 0x7b8   :  { %v3086_v53 = vmul.f32 %v3078_v31, %v6403_v50  ;;  %v6415_v41 = vadd.f32 %v3068_v35, %v2852_v14  ;;  %5561 = vtanh.f32 %v3106_v24 }
 0x7b9   :  { %v3093_v43 = vmul.f32 0.044715, %v3085_v34  ;;  %v3075_v5 = vmul.f32 %v6412_v49, %v6412_v49 }
 0x7ba   :  { %v3094_v13 = vmul.f32 0.044715, %v3086_v53  ;;  %v3076_v59 = vmul.f32 %v6415_v41, %v6415_v41 }
 0x7bb   :  { %v3101_v44 = vadd.f32 %v3093_v43, %v6396_v27  ;;  %v3083_v46 = vmul.f32 %v3075_v5, %v6412_v49 }
 0x7bc   :  { %v3102_v4 = vadd.f32 %v3094_v13, %v6403_v50  ;;  %v3084_v56 = vmul.f32 %v3076_v59, %v6415_v41 }
 0x7bd   :  { %v3109_v51 = vmul.f32 0.7978846, %v3101_v44  ;;  %v3091_v17 = vmul.f32 0.044715, %v3083_v46  ;;  %v5560_v37 = vpop.eup %5559 }
 0x7be   :  { %v3110_v25 = vmul.f32 0.7978846, %v3102_v4  ;;  %v3092_v36 = vmul.f32 0.044715, %v3084_v56  ;;  %v3056_v58 = vpop.f32.mrf.mxu2  ;;  %v5562_v48 = vpop.eup %5561  ;;  %v3121_v23 = vadd.f32 1.0, %v5560_v37 }
 0x7bf   :  { %5563 = vtanh.f32 %v3109_v51  ;;  %v3099_v60 = vadd.f32 %v3091_v17, %v6412_v49  ;;  %v3057_v63 = vadd.f32 %v3056_v58, %v2851_v28  ;;  %v3070_v0 = vpop.f32.mrf.mxu3  ;;  %v3122_v21 = vadd.f32 1.0, %v5562_v48 }
 0x7c0   :  { %5565 = vtanh.f32 %v3110_v25  ;;  %v3100_v52 = vadd.f32 %v3092_v36, %v6415_v41  ;;  %v3071_v54 = vadd.f32 %v3070_v0, %v2852_v14  ;;  %v3129_v16 = vmul.f32 0.5, %v3121_v23 }
 0x7c1   :  { %v3107_v10 = vmul.f32 0.7978846, %v3099_v60  ;;  %v3079_v6 = vmul.f32 %v3057_v63, %v3057_v63  ;;  %v3130_v11 = vmul.f32 0.5, %v3122_v21 }
 0x7c2   :  { %v3108_v12 = vmul.f32 0.7978846, %v3100_v52  ;;  %v3080_v15 = vmul.f32 %v3071_v54, %v3071_v54  ;;  %v3137_v19 = vmul.f32 %v3129_v16, %v6381_v57 }
 0x7c3   :  { %v3087_v1 = vmul.f32 %v3079_v6, %v3057_v63  ;;  %5567 = vtanh.f32 %v3107_v10  ;;  %v3138_v24 = vmul.f32 %v3130_v11, %v6386_v55 }
 0x7c4   :  { %v3088_v38 = vmul.f32 %v3080_v15, %v3071_v54  ;;  %5569 = vtanh.f32 %v3108_v12 }
 0x7c5   :  { %v5564_v47 = vpop.eup %5563  ;;  %v3095_v45 = vmul.f32 0.044715, %v3087_v1 }
 0x7c6   :  { %v5566_v3 = vpop.eup %5565  ;;  %v3125_v20 = vadd.f32 1.0, %v5564_v47  ;;  %v3096_v8 = vmul.f32 0.044715, %v3088_v38 }
 0x7c7   :  { %v3126_v7 = vadd.f32 1.0, %v5566_v3  ;;  %v3103_v61 = vadd.f32 %v3095_v45, %v3057_v63 }
 0x7c8   :  { %v3133_v33 = vmul.f32 0.5, %v3125_v20  ;;  %v3104_v39 = vadd.f32 %v3096_v8, %v3071_v54  ;;  %v5423_v8 = vld [vmem:[#allocation11 + $0x38] sm:$0xff] }
 0x7c9   :  { %v3134_v18 = vmul.f32 0.5, %v3126_v7  ;;  %v3111_v28 = vmul.f32 0.7978846, %v3103_v61  ;;  %v5568_v62 = vpop.eup %5567  ;;  %3650 = vmatpush.bf16.msrb.mxu0 %v5423_v8  ;;  %v5421_v61 = vld [vmem:[#allocation11 + $0x28] sm:$0xff] }
 0x7ca   :  { %v3141_v14 = vmul.f32 %v3133_v33, %v6396_v27  ;;  %v3112_v22 = vmul.f32 0.7978846, %v3104_v39  ;;  %v5570_v9 = vpop.eup %5569  ;;  %v3123_v34 = vadd.f32 1.0, %v5568_v62  ;;  %v5420_v33 = vld [vmem:[#allocation11 + $0x20] sm:$0xff]  ;;  %v5419_v39 = vld [vmem:[#allocation11 + $0x18] sm:$0xff] }
 0x7cb   :  { %v3142_v31 = vmul.f32 %v3134_v18, %v6403_v50  ;;  %5571 = vtanh.f32 %v3111_v28  ;;  %v3124_v35 = vadd.f32 1.0, %v5570_v9 }
 0x7cc   :  { %5573 = vtanh.f32 %v3112_v22  ;;  %v3210_v29 = vpack.c.bf16 %v3141_v14, %v3137_v19  ;;  %v3131_v57 = vmul.f32 0.5, %v3123_v34  ;;  %v5417_v14 = vld [vmem:[#allocation11 + $0x8] sm:$0xff] }
 0x7cd   :  { %v3211_v32 = vpack.c.bf16 %v3142_v31, %v3138_v24  ;;  %v3132_v27 = vmul.f32 0.5, %v3124_v35  ;;  %v5416_v24 = vld [vmem:[#allocation11] sm:$0xff] }
 0x7ce   :  { %3416 = vmatmul.bf16.vlgmr.msra.gmra.mxu0 %v3210_v29  ;;  %v3139_v55 = vmul.f32 %v3131_v57, %v6412_v49  ;;  %v5476_v49 = vld [vmem:[#allocation14 + $0x17] ss:$0 sm:$0xff] }
 0x7cf   :  { %3430 = vmatmul.bf16.vlgmr.msra.gmra.mxu1 %v3211_v32  ;;  %v3140_v46 = vmul.f32 %v3132_v27, %v6415_v41 }
 0x7d1   :  { %v5572_v53 = vpop.eup %5571 }
 0x7d2   :  { %v5574_v43 = vpop.eup %5573  ;;  %v3127_v5 = vadd.f32 1.0, %v5572_v53 }
 0x7d3   :  { %v3128_v13 = vadd.f32 1.0, %v5574_v43 }
 0x7d4   :  { %v3135_v59 = vmul.f32 0.5, %v3127_v5 }
 0x7d5   :  { %v3136_v44 = vmul.f32 0.5, %v3128_v13 }
 0x7d6   :  { %v3143_v50 = vmul.f32 %v3135_v59, %v3057_v63 }
 0x7d7   :  { %v3144_v4 = vmul.f32 %v3136_v44, %v3071_v54 }
 0x7d8   :  { %v3212_v56 = vpack.c.bf16 %v3143_v50, %v3139_v55 }
 0x7d9   :  { %v3213_v51 = vpack.c.bf16 %v3144_v4, %v3140_v46  ;;  %v5477_v4 = vld [vmem:[#allocation14 + $0xa] ss:$0 sm:$0xff] }
 0x7da   :  { %3444 = vmatmul.bf16.vlgmr.msra.gmra.mxu2 %v3212_v56 }
 0x7db   :  { %3458 = vmatmul.bf16.vlgmr.msra.gmra.mxu3 %v3213_v51 }
 0x820   :  { %v2767_v17 = vpop.xlane.xlu0 %2766 }
 0x821   :  { %v2770_v25 = vmul.f32 %v2767_v17, %v5966_v42 }
 0x823   :  { %v6435_v36 = vsub.f32 %v6384_v30, %v2770_v25 }
 0x825   :  { %v2774_v58 = vmul.f32 %v6435_v36, %v6435_v36 }
 0x827   :  { %2776 = vadd.xlane.f32.xlu1 %v2774_v58  ;;  %v5478_v58 = vld [vmem:[#allocation14 + $0x12] ss:$0 sm:$0xff] }
 0x828   :  { %v2769_v10 = vpop.xlane.xlu1 %2768 }
 0x829   :  { %v2771_v12 = vmul.f32 %v2769_v10, %v5966_v42  ;;  %v5431_v10 = vld [vmem:[#allocation11 + $0x78] sm:$0xff] }
 0x82a   :  { %3664 = vmatpush.bf16.msrb.mxu1 %v5431_v10 }
 0x82b   :  { %v6442_v38 = vsub.f32 %v6399_v40, %v2771_v12  ;;  %v5428_v12 = vld [vmem:[#allocation11 + $0x60] sm:$0xff] }
 0x82d   :  { %v2775_v20 = vmul.f32 %v6442_v38, %v6442_v38 }
 0x84b   :  { %v3417_v37 = vpop.f32.mrf.mxu0 }
 0x84c   :  { %v3418_v60 = vadd.f32 %v5476_v49, %v3417_v37  ;;  %v3431_v63 = vpop.f32.mrf.mxu1 }
 0x84e   :  { %v3432_v41 = vadd.f32 %v3431_v63, %v3418_v60 }
 0x853   :  { %v3419_v0 = vpop.f32.mrf.mxu0 }
 0x854   :  { %v3420_v6 = vadd.f32 %v5476_v49, %v3419_v0  ;;  %v3433_v15 = vpop.f32.mrf.mxu1  ;;  %v5595_v0 = vld [vmem:[#allocation2] sm:$0xff] }
 0x856   :  { %v3434_v21 = vadd.f32 %v3433_v15, %v3420_v6  ;;  %v5430_v6 = vld [vmem:[#allocation11 + $0x70] sm:$0xff] }
 0x857   :  { %3665 = vmatpush.bf16.msrb.mxu1 %v5430_v6  ;;  %v5426_v15 = vld [vmem:[#allocation11 + $0x50] sm:$0xff] }
 0x85d   :  { %v3445_v48 = vpop.f32.mrf.mxu2 }
 0x85e   :  { %v3446_v52 = vadd.f32 %v3445_v48, %v3432_v41  ;;  %v3459_v54 = vpop.f32.mrf.mxu3 }
 0x860   :  { %v3460_v23 = vadd.f32 %v3459_v54, %v3446_v52  ;;  %v5596_v52 = vld [vmem:[#allocation2 + $0x8] sm:$0xff] }
 0x862   :  { %v3464_v30 = vadd.f32 %v3460_v23, %v6373_v26  ;;  %v5422_v26 = vld [vmem:[#allocation11 + $0x30] sm:$0xff]  ;;  %v5429_v23 = vld [vmem:[#allocation11 + $0x68] sm:$0xff] }
 0x863   :  { %3651 = vmatpush.bf16.msrb.mxu0 %v5422_v26  ;;  %3666 = vmatpush.bf16.msrb.mxu1 %v5429_v23 }
 0x864   :  { %3468 = vadd.xlane.f32.xlu2 %v3464_v30 }
 0x865   :  { %v3447_v1 = vpop.f32.mrf.mxu2 }
 0x866   :  { %v3448_v47 = vadd.f32 %v3447_v1, %v3434_v21  ;;  %v3461_v45 = vpop.f32.mrf.mxu3 }
 0x867   :  { %3652 = vmatpush.bf16.msrb.mxu0 %v5421_v61  ;;  %3667 = vmatpush.bf16.msrb.mxu1 %v5428_v12 }
 0x868   :  { %v3462_v3 = vadd.f32 %v3461_v45, %v3448_v47  ;;  %v5424_v45 = vld [vmem:[#allocation11 + $0x40] sm:$0xff] }
 0x86a   :  { %v3465_v16 = vadd.f32 %v3462_v3, %v6371_v2  ;;  %v5418_v2 = vld [vmem:[#allocation11 + $0x10] sm:$0xff] }
 0x86b   :  { %3653 = vmatpush.bf16.msrb.mxu0 %v5420_v33 }
 0x86c   :  { %3470 = vadd.xlane.f32.xlu0 %v3465_v16  ;;  %2778 = vadd.xlane.f32.xlu2 %v2775_v20 }
 0x86f   :  { %3654 = vmatpush.bf16.msrb.mxu0 %v5419_v39 }
 0x873   :  { %3655 = vmatpush.bf16.msrb.mxu0 %v5418_v2 }
 0x877   :  { %3656 = vmatpush.bf16.msrb.mxu0 %v5417_v14 }
 0x87b   :  { %3657 = vmatpush.bf16.msrb.mxu0 %v5416_v24 }
 0x89a   :  { %v2777_v11 = vpop.xlane.xlu1 %2776 }
 0x89b   :  { %v2780_v7 = vmul.f32 %v2777_v11, %v5966_v42 }
 0x89d   :  { %v2782_v40 = vadd.f32 1e-05, %v2780_v7 }
 0x89f   :  { %5575 = vrsqrt.f32 %v2782_v40  ;;  %vm2790_vm6 = vweird.f32 %v2782_v40 }
 0x8a5   :  { %v5576_v18 = vpop.eup %5575 }
 0x8a6   :  { %v2785_v22 = vmul.f32 %v5576_v18, %v2782_v40  ;;  %vm2791_vm5 = vweird.f32 %v5576_v18 }
 0x8a7   :  { %vm2792_vm7 = vmor %vm2790_vm6, %vm2791_vm5 }
 0x8a8   :  { %v2786_v9 = vmul.f32 %v5576_v18, %v2785_v22 }
 0x8aa   :  { %v2787_v53 = vmul.f32 0.5, %v2786_v9  ;;  %v5480_v9 = vld [vmem:[#allocation14 + $0x13] ss:$0 sm:$0xff] }
 0x8ac   :  { %v2788_v27 = vsub.f32 1.5, %v2787_v53 }
 0x8ae   :  { %v2789_v13 = vmul.f32 %v5576_v18, %v2788_v27  ;;  %v5598_v27 = vld [vmem:[#allocation5 + $0x8] sm:$0xff] }
 0x8b0   :  { %v2793_v55 = vsel %vm2792_vm7, %v5576_v18, %v2789_v13 }
 0x8b1   :  { %v2804_v56 = vmul.f32 %v2793_v55, %v6435_v36  ;;  %v5437_v55 = vld [vmem:[#allocation13 + $0x28] sm:$0xff] }
 0x8b3   :  { %v2807_v25 = vmul.f32 %v5477_v4, %v2804_v56  ;;  %v5435_v56 = vld [vmem:[#allocation13 + $0x18] sm:$0xff] }
 0x8b5   :  { %v2810_v63 = vadd.f32 %v5478_v58, %v2807_v25  ;;  %v5434_v25 = vld [vmem:[#allocation13 + $0x10] sm:$0xff] }
 0x8b7   :  { %v6461_v48 = vadd.f32 %v5595_v0, %v2810_v63  ;;  %v5432_v0 = vld [vmem:[#allocation13] sm:$0xff] }
 0x8d7   :  { %v3469_v28 = vpop.xlane.xlu2 %3468 }
 0x8d8   :  { %v3472_v19 = vmul.f32 %v3469_v28, %v5966_v42 }
 0x8da   :  { %v6449_v62 = vsub.f32 %v3464_v30, %v3472_v19  ;;  %v5427_v30 = vld [vmem:[#allocation11 + $0x58] sm:$0xff]  ;;  %v5479_v19 = vld [vmem:[#allocation14 + $0xb] ss:$0 sm:$0xff] }
 0x8db   :  { %3668 = vmatpush.bf16.msrb.mxu1 %v5427_v30 }
 0x8dc   :  { %v3476_v31 = vmul.f32 %v6449_v62, %v6449_v62 }
 0x8de   :  { %3478 = vadd.xlane.f32.xlu0 %v3476_v31 }
 0x8df   :  { %v3471_v29 = vpop.xlane.xlu0 %3470  ;;  %v2779_v32 = vpop.xlane.xlu2 %2778  ;;  %3669 = vmatpush.bf16.msrb.mxu1 %v5426_v15 }
 0x8e0   :  { %v3473_v34 = vmul.f32 %v3471_v29, %v5966_v42  ;;  %v2781_v35 = vmul.f32 %v2779_v32, %v5966_v42 }
 0x8e2   :  { %v6455_v43 = vsub.f32 %v3465_v16, %v3473_v34  ;;  %v2783_v57 = vadd.f32 1e-05, %v2781_v35 }
 0x8e4   :  { %5577 = vrsqrt.f32 %v2783_v57  ;;  %v3477_v5 = vmul.f32 %v6455_v43, %v6455_v43  ;;  %vm2800_vm9 = vweird.f32 %v2783_v57 }
 0x8e6   :  { %3480 = vadd.xlane.f32.xlu1 %v3477_v5 }
 0x8ea   :  { %v5578_v59 = vpop.eup %5577 }
 0x8eb   :  { %v2795_v44 = vmul.f32 %v5578_v59, %v2783_v57  ;;  %vm2801_vm8 = vweird.f32 %v5578_v59  ;;  %v5597_v57 = vld [vmem:[#allocation5] sm:$0xff] }
 0x8ec   :  { %vm2802_vm10 = vmor %vm2800_vm9, %vm2801_vm8 }
 0x8ed   :  { %v2796_v50 = vmul.f32 %v5578_v59, %v2795_v44  ;;  %v5438_v44 = vld [vmem:[#allocation13 + $0x30] sm:$0xff] }
 0x8ef   :  { %v2797_v46 = vmul.f32 0.5, %v2796_v50  ;;  %v5481_v50 = vld [vmem:[#allocation14 + $0x18] ss:$0 sm:$0xff] }
 0x8f1   :  { %v2798_v51 = vsub.f32 1.5, %v2797_v46  ;;  %v5436_v46 = vld [vmem:[#allocation13 + $0x20] sm:$0xff] }
 0x8f3   :  { %v2799_v17 = vmul.f32 %v5578_v59, %v2798_v51 }
 0x8f5   :  { %v2803_v37 = vsel %vm2802_vm10, %v5578_v59, %v2799_v17  ;;  %v5439_v59 = vld [vmem:[#allocation13 + $0x38] sm:$0xff] }
 0x8f6   :  { %v2805_v49 = vmul.f32 %v2803_v37, %v6442_v38  ;;  %v5425_v38 = vld [vmem:[#allocation11 + $0x48] sm:$0xff]  ;;  %3791 = vmatpush.bf16.msrb.mxu2 %v5439_v59 }
 0x8f7   :  { %3670 = vmatpush.bf16.msrb.mxu1 %v5425_v38 }
 0x8f8   :  { %v2808_v60 = vmul.f32 %v5477_v4, %v2805_v49  ;;  %v5433_v49 = vld [vmem:[#allocation13 + $0x8] sm:$0xff] }
 0x8fa   :  { %v2811_v41 = vadd.f32 %v5478_v58, %v2808_v60  ;;  %3792 = vmatpush.bf16.msrb.mxu2 %v5438_v44 }
 0x8fb   :  { %3671 = vmatpush.bf16.msrb.mxu1 %v5424_v45 }
 0x8fc   :  { %v6463_v54 = vadd.f32 %v5596_v52, %v2811_v41 }
 0x8fe   :  { %v3550_v36 = vpack.c.bf16 %v6463_v54, %v6461_v48  ;;  %3793 = vmatpush.bf16.msrb.mxu2 %v5437_v55 }
 0x900   :  { %3658 = vmatmul.bf16.vlgmr.msrb.gmra.mxu0 %v3550_v36 }
 0x902   :  { %3794 = vmatpush.bf16.msrb.mxu2 %v5436_v46 }
 0x906   :  { %3795 = vmatpush.bf16.msrb.mxu2 %v5435_v56 }
 0x90a   :  { %3796 = vmatpush.bf16.msrb.mxu2 %v5434_v25 }
 0x90e   :  { %3797 = vmatpush.bf16.msrb.mxu2 %v5433_v49 }
 0x912   :  { %3798 = vmatpush.bf16.msrb.mxu2 %v5432_v0 }
 0x951   :  { %v3479_v21 = vpop.xlane.xlu0 %3478 }
 0x952   :  { %v3482_v1 = vmul.f32 %v3479_v21, %v5966_v42 }
 0x954   :  { %v3484_v47 = vadd.f32 1e-05, %v3482_v1 }
 0x956   :  { %5579 = vrsqrt.f32 %v3484_v47  ;;  %vm3492_vm12 = vweird.f32 %v3484_v47 }
 0x959   :  { %v3481_v3 = vpop.xlane.xlu1 %3480 }
 0x95a   :  { %v3483_v16 = vmul.f32 %v3481_v3, %v5966_v42 }
 0x95c   :  { %v5580_v20 = vpop.eup %5579  ;;  %v3485_v8 = vadd.f32 1e-05, %v3483_v16 }
 0x95d   :  { %v3487_v26 = vmul.f32 %v5580_v20, %v3484_v47  ;;  %vm3493_vm11 = vweird.f32 %v5580_v20 }
 0x95e   :  { %5581 = vrsqrt.f32 %v3485_v8  ;;  %vm3494_vm13 = vmor %vm3492_vm12, %vm3493_vm11  ;;  %vm3502_vm15 = vweird.f32 %v3485_v8 }
 0x95f   :  { %v3488_v11 = vmul.f32 %v5580_v20, %v3487_v26 }
 0x961   :  { %v3489_v7 = vmul.f32 0.5, %v3488_v11 }
 0x963   :  { %v3490_v61 = vsub.f32 1.5, %v3489_v7 }
 0x964   :  { %v5582_v40 = vpop.eup %5581 }
 0x965   :  { %v3491_v33 = vmul.f32 %v5580_v20, %v3490_v61  ;;  %v3497_v39 = vmul.f32 %v5582_v40, %v3485_v8  ;;  %vm3503_vm14 = vweird.f32 %v5582_v40 }
 0x966   :  { %vm3504_vm0 = vmor %vm3502_vm15, %vm3503_vm14 }
 0x967   :  { %v3495_v2 = vsel %vm3494_vm13, %v5580_v20, %v3491_v33  ;;  %v3498_v18 = vmul.f32 %v5582_v40, %v3497_v39 }
 0x968   :  { %v3506_v14 = vmul.f32 %v3495_v2, %v6449_v62 }
 0x969   :  { %v3499_v28 = vmul.f32 0.5, %v3498_v18 }
 0x96a   :  { %v3509_v31 = vmul.f32 %v5479_v19, %v3506_v14 }
 0x96b   :  { %v3500_v22 = vsub.f32 1.5, %v3499_v28 }
 0x96c   :  { %v3512_v35 = vadd.f32 %v5480_v9, %v3509_v31 }
 0x96d   :  { %v3501_v24 = vmul.f32 %v5582_v40, %v3500_v22 }
 0x96e   :  { %v6471_v5 = vadd.f32 %v5597_v57, %v3512_v35 }
 0x96f   :  { %v3505_v29 = vsel %vm3504_vm0, %v5582_v40, %v3501_v24 }
 0x970   :  { %v3507_v32 = vmul.f32 %v3505_v29, %v6455_v43 }
 0x972   :  { %v3510_v34 = vmul.f32 %v5479_v19, %v3507_v32  ;;  %v5482_v32 = vld [vmem:[#allocation14 + $0x19] ss:$0 sm:$0xff] }
 0x974   :  { %v3513_v53 = vadd.f32 %v5480_v9, %v3510_v34 }
 0x976   :  { %v6473_v13 = vadd.f32 %v5598_v27, %v3513_v53 }
 0x978   :  { %v3551_v62 = vpack.c.bf16 %v6473_v13, %v6471_v5 }
 0x97a   :  { %3672 = vmatmul.bf16.vlgmr.msrb.gmra.mxu1 %v3551_v62 }
 0x97d   :  { %v3659_v43 = vpop.f32.mrf.mxu0 }
 0x97e   :  { %v3660_v4 = vadd.f32 %v5481_v50, %v3659_v43 }
 0x985   :  { %v3661_v37 = vpop.f32.mrf.mxu0 }
 0x986   :  { %v3662_v60 = vadd.f32 %v5481_v50, %v3661_v37 }
 0x9f7   :  { %v3673_v51 = vpop.f32.mrf.mxu1 }
 0x9f8   :  { %v3674_v17 = vadd.f32 %v3673_v51, %v3660_v4 }
 0x9fa   :  { %v5094_v58 = vmul.f32 -1.442695, %v3674_v17 }
 0x9fc   :  { %5583 = vpow2.f32 %v5094_v58 }
 0x9ff   :  { %v3675_v63 = vpop.f32.mrf.mxu1 }
 0xa00   :  { %v3676_v41 = vadd.f32 %v3675_v63, %v3662_v60 }
 0xa02   :  { %v5584_v52 = vpop.eup %5583  ;;  %v5095_v36 = vmul.f32 -1.442695, %v3676_v41  ;;  %v5483_v41 = vld [vmem:[#allocation14 + $0x1a] ss:$0 sm:$0xff] }
 0xa03   :  { %v3684_v10 = vadd.f32 1.0, %v5584_v52 }
 0xa04   :  { %5585 = vpow2.f32 %v5095_v36 }
 0xa05   :  { %5587 = vrcp.f32 %v3684_v10  ;;  %v3697_v1 = vand.u32 2147483648, %v3684_v10  ;;  %vm3691_vm2 = vweird.f32 %v3684_v10  ;;  %v3695_v47 = vand.u32 2147483647, %v3684_v10 }
 0xa07   :  { %v3698_v20 = vor.u32 1.1754944e-38, %v3697_v1  ;;  %vm3696_vm4 = vcmp.eq.f32.partialorder %v3695_v47, 8.507059e+37 }
 0xa0a   :  { %v5586_v6 = vpop.eup %5585 }
 0xa0b   :  { %v5588_v23 = vpop.eup %5587  ;;  %v3685_v12 = vadd.f32 1.0, %v5586_v6 }
 0xa0c   :  { %v3687_v30 = vmul.f32 %v5588_v23, %v3684_v10  ;;  %vm3692_vm1 = vweird.f32 %v5588_v23  ;;  %v5484_v10 = vld [vmem:[#allocation14 + $0x1b] ss:$0 sm:$0xff] }
 0xa0d   :  { %5589 = vrcp.f32 %v3685_v12  ;;  %vm3693_vm3 = vmor %vm3691_vm2, %vm3692_vm1  ;;  %v3712_v26 = vand.u32 2147483648, %v3685_v12  ;;  %v3710_v61 = vand.u32 2147483647, %v3685_v12  ;;  %vm3706_vm6 = vweird.f32 %v3685_v12 }
 0xa0e   :  { %v3688_v15 = vsub.f32 1.0, %v3687_v30 }
 0xa0f   :  { %v3713_v39 = vor.u32 1.1754944e-38, %v3712_v26  ;;  %vm3711_vm8 = vcmp.eq.f32.partialorder %v3710_v61, 8.507059e+37 }
 0xa10   :  { %v3689_v21 = vmul.f32 %v5588_v23, %v3688_v15 }
 0xa12   :  { %v3690_v38 = vadd.f32 %v5588_v23, %v3689_v21 }
 0xa13   :  { %v5590_v45 = vpop.eup %5589 }
 0xa14   :  { %v3702_v3 = vmul.f32 %v5590_v45, %v3685_v12  ;;  %v3694_v16 = vsel %vm3693_vm3, %v5588_v23, %v3690_v38  ;;  %vm3707_vm5 = vweird.f32 %v5590_v45 }
 0xa15   :  { %v3699_v11 = vsel %vm3696_vm4, %v3698_v20, %v3694_v16  ;;  %vm3708_vm7 = vmor %vm3706_vm6, %vm3707_vm5 }
 0xa16   :  { %v3703_v8 = vsub.f32 1.0, %v3702_v3  ;;  %v3718_v33 = vsub.f32 1.0, %v3699_v11  ;;  %v3716_v14 = vmul.f32 %v3699_v11, %v6461_v48 }
 0xa18   :  { %v3704_v7 = vmul.f32 %v5590_v45, %v3703_v8  ;;  %v3720_v19 = vmul.f32 %v3718_v33, %v6471_v5 }
 0xa1a   :  { %v3705_v40 = vadd.f32 %v5590_v45, %v3704_v7  ;;  %v3722_v31 = vadd.f32 %v3720_v19, %v3716_v14 }
 0xa1c   :  { %v3709_v2 = vsel %vm3708_vm7, %v5590_v45, %v3705_v40 }
 0xa1d   :  { %v3714_v18 = vsel %vm3711_vm8, %v3713_v39, %v3709_v2 }
 0xa1e   :  { %v3719_v28 = vsub.f32 1.0, %v3714_v18  ;;  %v3717_v22 = vmul.f32 %v3714_v18, %v6463_v54 }
 0xa20   :  { %v3721_v24 = vmul.f32 %v3719_v28, %v6473_v13 }
 0xa22   :  { %v3723_v9 = vadd.f32 %v3721_v24, %v3717_v22 }
 0xa24   :  { %v3740_v29 = vpack.c.bf16 %v3723_v9, %v3722_v31 }
 0xa26   :  { %3799 = vmatmul.bf16.vlgmr.msrb.gmra.mxu2 %v3740_v29 }
 0xaa9   :  { %v3800_v34 = vpop.f32.mrf.mxu2 }
 0xaaa   :  { %v3801_v35 = vadd.f32 %v5482_v32, %v3800_v34 }
 0xaac   :  { %3807 = vadd.xlane.f32.xlu2 %v3801_v35 }
 0xab1   :  { %v3802_v53 = vpop.f32.mrf.mxu2 }
 0xab2   :  { %v3803_v57 = vadd.f32 %v5482_v32, %v3802_v53 }
 0xab4   :  { %3809 = vadd.xlane.f32.xlu0 %v3803_v57 }
 0xb1f   :  { %v3808_v27 = vpop.xlane.xlu2 %3807 }
 0xb20   :  { %v3811_v5 = vmul.f32 %v3808_v27, %v5966_v42 }
 0xb22   :  { %v3813_v62 = vsub.f32 %v3801_v35, %v3811_v5 }
 0xb24   :  { %v3815_v48 = vmul.f32 %v3813_v62, %v3813_v62 }
 0xb26   :  { %3817 = vadd.xlane.f32.xlu1 %v3815_v48 }
 0xb27   :  { %v3810_v54 = vpop.xlane.xlu0 %3809 }
 0xb28   :  { %v3812_v13 = vmul.f32 %v3810_v54, %v5966_v42 }
 0xb2a   :  { %v3814_v59 = vsub.f32 %v3803_v57, %v3812_v13 }
 0xb2c   :  { %v3816_v44 = vmul.f32 %v3814_v59, %v3814_v59 }
 0xb2e   :  { %3819 = vadd.xlane.f32.xlu2 %v3816_v44 }
 0xb99   :  { %v3818_v55 = vpop.xlane.xlu1 %3817 }
 0xb9a   :  { %v3821_v43 = vmul.f32 %v3818_v55, %v5966_v42 }
 0xb9c   :  { %v3823_v50 = vadd.f32 1e-05, %v3821_v43 }
 0xb9e   :  { %5591 = vrsqrt.f32 %v3823_v50  ;;  %vm3831_vm10 = vweird.f32 %v3823_v50 }
 0xba1   :  { %v3820_v46 = vpop.xlane.xlu2 %3819 }
 0xba2   :  { %v3822_v4 = vmul.f32 %v3820_v46, %v5966_v42 }
 0xba4   :  { %v5592_v56 = vpop.eup %5591  ;;  %v3824_v51 = vadd.f32 1e-05, %v3822_v4 }
 0xba5   :  { %v3826_v17 = vmul.f32 %v5592_v56, %v3823_v50  ;;  %vm3832_vm9 = vweird.f32 %v5592_v56 }
 0xba6   :  { %5593 = vrsqrt.f32 %v3824_v51  ;;  %vm3833_vm11 = vmor %vm3831_vm10, %vm3832_vm9  ;;  %vm3841_vm13 = vweird.f32 %v3824_v51 }
 0xba7   :  { %v3827_v25 = vmul.f32 %v5592_v56, %v3826_v17 }
 0xba9   :  { %v3828_v58 = vmul.f32 0.5, %v3827_v25 }
 0xbab   :  { %v3829_v37 = vsub.f32 1.5, %v3828_v58 }
 0xbac   :  { %v5594_v49 = vpop.eup %5593 }
 0xbad   :  { %v3830_v60 = vmul.f32 %v5592_v56, %v3829_v37  ;;  %v3836_v63 = vmul.f32 %v5594_v49, %v3824_v51  ;;  %vm3842_vm12 = vweird.f32 %v5594_v49 }
 0xbae   :  { %vm3843_vm14 = vmor %vm3841_vm13, %vm3842_vm12 }
 0xbaf   :  { %v3834_v0 = vsel %vm3833_vm11, %v5592_v56, %v3830_v60  ;;  %v3837_v52 = vmul.f32 %v5594_v49, %v3836_v63 }
 0xbb0   :  { %v3845_v36 = vmul.f32 %v3834_v0, %v3813_v62 }
 0xbb1   :  { %v3838_v6 = vmul.f32 0.5, %v3837_v52 }
 0xbb2   :  { %v3848_v42 = vmul.f32 %v5483_v41, %v3845_v36 }
 0xbb3   :  { %v3839_v23 = vsub.f32 1.5, %v3838_v6 }
 0xbb4   :  { %v3851_v12 = vadd.f32 %v5484_v10, %v3848_v42 }
 0xbb5   :  { %v3840_v30 = vmul.f32 %v5594_v49, %v3839_v23 }
 0xbb6   :  { %3853 = vst [vmem:[#allocation17] sm:$0xff] %v3851_v12 }
 0xbb7   :  { %v3844_v15 = vsel %vm3843_vm14, %v5594_v49, %v3840_v30 }
 0xbb8   :  { %v3846_v21 = vmul.f32 %v3844_v15, %v3814_v59 }
 0xbba   :  { %v3849_v1 = vmul.f32 %v5483_v41, %v3846_v21 }
 0xbbc   :  { %v3852_v38 = vadd.f32 %v5484_v10, %v3849_v1 }
 0xbbe   :  { %3854 = vst [vmem:[#allocation17 + $0x8] sm:$0xff] %v3852_v38 }
 0xbbf   :  { %3867 = dma.vmem_to_hbm [thread:$0]  %s3860_s29, 256, %s3862_s13, [#allocation4], %s5852_s17, %s5852_s17, %s5853_s18  }
 0xbc0   :  { %5849 = dma.done.wait [#allocation4], 256  }
 0xbc1   :  { %5850 = vsyncadd [#allocation4], 4294967040 }
 0xbc2   :  { %3872 = vsyncpa [#allocation3], 1 }
 0xbc3   :  { %3873 = vsyncpa [#allocation6], 1 }
 0xbc4   :  { %3874 = vsyncpa [#allocation9], 1 }
 0xbc5   :  { %3875 = vsyncpa [#allocation12], 1 }
 0xbc6   :  { %3876 = vsyncpa [#allocation15], 1 }
 0xbc7   :  { %3877 = vsyncpa [#allocation4], 1 }

// kernel: tpu_custom_call.1
= control target key start
LH: loop header
LB: loop body
LE: loop exit
PB: predicated region body
PF: predicated region fallthrough
CT: control target
= control target key end

     0   :  { %14 = vsyncpa [#allocation3], 0  ;;  %s6491_s0 = inlined_call_operand.hbm [shape: f32[16,128], index: 0, kind: input, shape index: {}]   ;;  %s6492_s1 = inlined_call_operand.hbm [shape: f32[16,128], index: 1, kind: input, shape index: {}]   ;;  %s6493_s2 = inlined_call_operand.hbm [shape: bf16[4,128,128], index: 2, kind: input, shape index: {}]   ;;  %s6494_s3 = inlined_call_operand.hbm [shape: bf16[4,128,512], index: 3, kind: input, shape index: {}]   ;;  %s6495_s4 = inlined_call_operand.hbm [shape: bf16[4,512,128], index: 4, kind: input, shape index: {}]   ;;  %s6496_s5 = inlined_call_operand.hbm [shape: bf16[256,128], index: 5, kind: input, shape index: {}]   ;;  %s6497_s6 = inlined_call_operand.hbm [shape: bf16[128,128], index: 6, kind: input, shape index: {}]   ;;  %s6498_s7 = inlined_call_operand.hbm [shape: f32[28,128], index: 7, kind: input, shape index: {}]   ;;  %s6499_s8 = inlined_call_operand.hbm [shape: f32[4,512], index: 8, kind: input, shape index: {}]   ;;  %s6500_s9 = inlined_call_operand.hbm [shape: f32[16,128], index: 9, kind: output, shape index: {}]  }
   0x1   :  { %15 = vsyncpa [#allocation6], 0 }
   0x2   :  { %16 = vsyncpa [#allocation9], 0 }
   0x3   :  { %17 = vsyncpa [#allocation12], 0 }
   0x4   :  { %18 = vsyncpa [#allocation15], 0 }
   0x5   :  { %19 = vsyncpa [#allocation4], 0  ;;  %s37_s11 = sshll.u32 %s6492_s1, 4  ;;  %s5851_s12 = smov [#allocation5]   ;;  %s38_s11 = int_to_ptr.hbm [resolvable:$true] %s37_s11 }
   0x6   :  { %s39_s13 = sshll.u32 %s5851_s12, 4  ;;  %s63_s16 = sshll.u32 %s6494_s3, 4  ;;  %s40_s13 = int_to_ptr.vmem [resolvable:$true] %s39_s13  ;;  %s64_s16 = int_to_ptr.hbm [resolvable:$true] %s63_s16 }
   0x7   :  { %s5852_s17 = smov 128   ;;  %s5853_s18 = smov 8  }
   0x8   :  { %45 = dma.hbm_to_vmem [thread:$0]  %s38_s11, 256, %s40_s13, [#allocation6], %s5852_s17, %s5852_s17, %s5853_s18  }
   0x9   :  { %s5854_s19 = smov [#allocation8]   ;;  %s5855_s21 = smov 256  }
   0xa   :  { %s65_s20 = sshll.u32 %s5854_s19, 4  ;;  %s5856_s1 = smov 16   ;;  %s66_s20 = int_to_ptr.vmem [resolvable:$true] %s65_s20 }
   0xb   :  { %71 = dma.hbm_to_vmem [thread:$0]  %s64_s16, 16384, %s66_s20, [#allocation9], %s5855_s21, %s5855_s21, %s5856_s1  }
   0xc   :  { %s89_s24 = sshll.u32 %s6496_s5, 4  ;;  %s5857_s25 = smov [#allocation11]   ;;  %s90_s24 = int_to_ptr.hbm [resolvable:$true] %s89_s24 }
   0xd   :  { %s91_s3 = sshll.u32 %s5857_s25, 4  ;;  %s115_s28 = sshll.u32 %s6498_s7, 4  ;;  %s92_s3 = int_to_ptr.vmem [resolvable:$true] %s91_s3  ;;  %s116_s28 = int_to_ptr.hbm [resolvable:$true] %s115_s28 }
   0xe   :  { %s5858_s29 = smov 64   ;;  %s5859_s30 = smov 4  }
   0xf   :  { %97 = dma.hbm_to_vmem [thread:$0]  %s90_s24, 2048, %s92_s3, [#allocation12], %s5858_s29, %s5858_s29, %s5859_s30  }
  0x10   :  { %s5860_s10 = smov [#allocation14]   ;;  %s24_s5 = sshll.u32 %s6491_s0, 4  ;;  %s25_s5 = int_to_ptr.hbm [resolvable:$true] %s24_s5 }
  0x11   :  { %s117_s11 = sshll.u32 %s5860_s10, 4  ;;  %s50_s15 = sshll.u32 %s6493_s2, 4  ;;  %s118_s11 = int_to_ptr.vmem [resolvable:$true] %s117_s11  ;;  %s51_s15 = int_to_ptr.hbm [resolvable:$true] %s50_s15 }
  0x12   :  { %123 = dma.hbm_to_vmem [thread:$0]  %s116_s28, 512, %s118_s11, [#allocation15], %s5852_s17, %s5852_s17, %s5853_s18  }
  0x13   :  { %s5861_s16 = smov [#allocation2]   ;;  %s5862_s20 = smov [#allocation7]  }
  0x14   :  { %s26_s19 = sshll.u32 %s5861_s16, 4  ;;  %s52_s0 = sshll.u32 %s5862_s20, 4  ;;  %s27_s19 = int_to_ptr.vmem [resolvable:$true] %s26_s19  ;;  %s53_s0 = int_to_ptr.vmem [resolvable:$true] %s52_s0 }
  0x15   :  { %32 = dma.hbm_to_vmem [thread:$0]  %s25_s5, 256, %s27_s19, [#allocation3], %s5852_s17, %s5852_s17, %s5853_s18  }
  0x16   :  { %s76_s22 = sshll.u32 %s6495_s4, 4  ;;  %s102_s24 = sshll.u32 %s6497_s6, 4  ;;  %s77_s22 = int_to_ptr.hbm [resolvable:$true] %s76_s22  ;;  %s103_s24 = int_to_ptr.hbm [resolvable:$true] %s102_s24 }
  0x17   :  { %58 = dma.hbm_to_vmem [thread:$0]  %s51_s15, 4096, %s53_s0, [#allocation6], %s5858_s29, %s5858_s29, %s5859_s30  }
  0x18   :  { %s5863_s25 = smov [#allocation10]   ;;  %s5864_s26 = smov [#allocation13]  }
  0x19   :  { %s78_s3 = sshll.u32 %s5863_s25, 4  ;;  %s104_s4 = sshll.u32 %s5864_s26, 4  ;;  %s79_s3 = int_to_ptr.vmem [resolvable:$true] %s78_s3  ;;  %s105_s4 = int_to_ptr.vmem [resolvable:$true] %s104_s4 }
  0x1a   :  { %84 = dma.hbm_to_vmem [thread:$0]  %s77_s22, 16384, %s79_s3, [#allocation9], %s5858_s29, %s5858_s29, %s5859_s30  }
  0x1b   :  { %s129_s10 = sshll.u32 %s6499_s8, 4  ;;  %s5865_s6 = smov [#allocation16]   ;;  %s130_s10 = int_to_ptr.hbm [resolvable:$true] %s129_s10 }
  0x1c   :  { %110 = dma.hbm_to_vmem [thread:$0]  %s103_s24, 1024, %s105_s4, [#allocation12], %s5858_s29, %s5858_s29, %s5859_s30  }
  0x1d   :  { %s131_s11 = sshll.u32 %s5865_s6, 4  ;;  %s132_s11 = int_to_ptr.vmem [resolvable:$true] %s131_s11 }
  0x1e   :  { %134 = dma.hbm_to_vmem [thread:$0]  %s130_s10, 256, %s132_s11, [#allocation15]  }
  0x1f   :  { %5839 = dma.done.wait [#allocation3], 256  }
  0x20   :  { %5840 = vsyncadd [#allocation3], 4294967040 }
  0x21   :  { %5841 = dma.done.wait [#allocation6], 4352  }
  0x22   :  { %5842 = vsyncadd [#allocation6], 4294962944 }
  0x23   :  { %5843 = dma.done.wait [#allocation9], 32768  }
  0x24   :  { %5844 = vsyncadd [#allocation9], 4294934528 }
  0x25   :  { %5845 = dma.done.wait [#allocation12], 3072  }
  0x26   :  { %5846 = vsyncadd [#allocation12], 4294964224 }
  0x27   :  { %5847 = dma.done.wait [#allocation15], 768  }
  0x28   :  { %5848 = vsyncadd [#allocation15], 4294966528  ;;  %v5135_v0 = vld [vmem:[#allocation7 + $0x38] sm:$0xff]  ;;  %v5134_v2 = vld [vmem:[#allocation7 + $0x30] sm:$0xff]  ;;  %v5866_v36 = vmov 128.0   ;;  %s5867_s8 = smov [#allocation17]  }
  0x29   :  { %v5143_v1 = vld [vmem:[#allocation7 + $0x78] sm:$0xff]  ;;  %242 = vmatpush.bf16.msra.mxu0 %v5135_v0  ;;  %v5142_v3 = vld [vmem:[#allocation7 + $0x70] sm:$0xff]  ;;  %v5133_v4 = vld [vmem:[#allocation7 + $0x28] sm:$0xff]  ;;  %5485 = vrcp.f32 %v5866_v36  ;;  %s3859_s29 = sshll.u32 %s5867_s8, 4  ;;  %s3861_s13 = sshll.u32 %s6500_s9, 4  ;;  %s3860_s29 = int_to_ptr.vmem [resolvable:$true] %s3859_s29  ;;  %s3862_s13 = int_to_ptr.hbm [resolvable:$true] %s3861_s13 }
  0x2a   :  { %381 = vmatpush.bf16.msra.mxu1 %v5143_v1  ;;  %v5141_v5 = vld [vmem:[#allocation7 + $0x68] sm:$0xff]  ;;  %v5132_v6 = vld [vmem:[#allocation7 + $0x20] sm:$0xff]  ;;  %v5131_v8 = vld [vmem:[#allocation7 + $0x18] sm:$0xff] }
  0x2b   :  { %v5140_v7 = vld [vmem:[#allocation7 + $0x60] sm:$0xff]  ;;  %v5139_v9 = vld [vmem:[#allocation7 + $0x58] sm:$0xff]  ;;  %v5130_v10 = vld [vmem:[#allocation7 + $0x10] sm:$0xff] }
  0x2c   :  { %v5138_v11 = vld [vmem:[#allocation7 + $0x50] sm:$0xff]  ;;  %v5129_v12 = vld [vmem:[#allocation7 + $0x8] sm:$0xff]  ;;  %v5128_v14 = vld [vmem:[#allocation7] sm:$0xff] }
  0x2d   :  { %243 = vmatpush.bf16.msra.mxu0 %v5134_v2  ;;  %v5137_v13 = vld [vmem:[#allocation7 + $0x48] sm:$0xff]  ;;  %v5136_v15 = vld [vmem:[#allocation7 + $0x40] sm:$0xff]  ;;  %v173_v18 = vld [vmem:[#allocation5] sm:$0xff] }
  0x2e   :  { %382 = vmatpush.bf16.msra.mxu1 %v5142_v3  ;;  %v171_v16 = vld [vmem:[#allocation2] sm:$0xff]  ;;  %v172_v17 = vld [vmem:[#allocation2 + $0x8] sm:$0xff]  ;;  %v174_v19 = vld [vmem:[#allocation5 + $0x8] sm:$0xff] }
  0x2f   :  { %v191_v20 = vpack.c.bf16 %v172_v17, %v171_v16  ;;  %v330_v21 = vpack.c.bf16 %v174_v19, %v173_v18  ;;  %v5457_v22 = vld [vmem:[#allocation14] ss:$0 sm:$0xff]  ;;  %v5458_v23 = vld [vmem:[#allocation14 + $0x1] ss:$0 sm:$0xff]  ;;  %v5486_v37 = vpop.eup %5485  ;;  %v5174_v60 = vld [vmem:[#allocation8 + $0xec] sm:$0xf0] }
  0x30   :  { %v265_v38 = vmul.f32 128.0, %v5486_v37  ;;  %vm269_vm0 = vweird.f32 %v5486_v37  ;;  %v4056_v59 = vld [vmem:[#allocation8 + $0xe0] sm:$0xf]  ;;  %v5172_v61 = vld [vmem:[#allocation8 + $0xe4] sm:$0xf] }
  0x31   :  { %244 = vmatpush.bf16.msra.mxu0 %v5133_v4  ;;  %v4057_v62 = vor.u32 %v5174_v60, %v4056_v59  ;;  %v4058_v63 = vld [vmem:[#allocation8 + $0xf0] sm:$0xf0]  ;;  %v4064_v0 = vld [vmem:[#allocation8 + $0xe8] sm:$0xf]  ;;  %v5175_v1 = vld [vmem:[#allocation8 + $0xf4] sm:$0xf0] }
  0x32   :  { %383 = vmatpush.bf16.msra.mxu1 %v5141_v5  ;;  %v266_v39 = vsub.f32 1.0, %v265_v38  ;;  %v4061_v2 = vor.u32 %v5172_v61, %v4058_v63  ;;  %v4065_v3 = vor.u32 %v5175_v1, %v4064_v0  ;;  %v5173_v4 = vld [vmem:[#allocation8 + $0xec] sm:$0xf]  ;;  %v4066_v5 = vld [vmem:[#allocation8 + $0xf8] sm:$0xf0] }
  0x33   :  { %648 = vmatpush.bf16.msra.mxu2 %v4057_v62  ;;  %v4016_v36 = vld [vmem:[#allocation8 + $0x88] sm:$0xf]  ;;  %v3976_v60 = vld [vmem:[#allocation8 + $0x40] sm:$0xf]  ;;  %v5154_v61 = vld [vmem:[#allocation8 + $0x4c] sm:$0xf0] }
  0x34   :  { %v267_v40 = vmul.f32 %v5486_v37, %v266_v39  ;;  %662 = vmatpush.bf16.msra.mxu3 %v4061_v2  ;;  %v5152_v62 = vld [vmem:[#allocation8 + $0x44] sm:$0xf]  ;;  %v3977_v63 = vor.u32 %v5154_v61, %v3976_v60  ;;  %v3978_v0 = vld [vmem:[#allocation8 + $0x50] sm:$0xf0]  ;;  %v3984_v1 = vld [vmem:[#allocation8 + $0x48] sm:$0xf] }
  0x35   :  { %245 = vmatpush.bf16.msra.mxu0 %v5132_v6  ;;  %v4069_v6 = vor.u32 %v5173_v4, %v4066_v5  ;;  %v5155_v2 = vld [vmem:[#allocation8 + $0x54] sm:$0xf0]  ;;  %v5153_v5 = vld [vmem:[#allocation8 + $0x4c] sm:$0xf] }
  0x36   :  { %384 = vmatpush.bf16.msra.mxu1 %v5140_v7  ;;  %v268_v41 = vadd.f32 %v5486_v37, %v267_v40  ;;  %v4040_v7 = vld [vmem:[#allocation8 + $0xc0] sm:$0xf]  ;;  %v5161_v40 = vld [vmem:[#allocation8 + $0x8c] sm:$0xf]  ;;  %v3985_v4 = vor.u32 %v5155_v2, %v3984_v1 }
  0x38   :  { %v5966_v42 = vsel %vm269_vm0, %v5486_v37, %v268_v41  ;;  %v5163_v37 = vld [vmem:[#allocation8 + $0x94] sm:$0xf0]  ;;  %v4018_v41 = vld [vmem:[#allocation8 + $0x98] sm:$0xf0] }
  0x39   :  { %246 = vmatpush.bf16.msra.mxu0 %v5131_v8  ;;  %v5170_v8 = vld [vmem:[#allocation8 + $0xcc] sm:$0xf0]  ;;  %v4017_v39 = vor.u32 %v5163_v37, %v4016_v36  ;;  %v5199_v36 = vld [vmem:[#allocation10 + $0xb8] sm:$0xff] }
  0x3a   :  { %385 = vmatpush.bf16.msra.mxu1 %v5139_v9  ;;  %v5168_v9 = vld [vmem:[#allocation8 + $0xc4] sm:$0xf]  ;;  %v5207_v37 = vld [vmem:[#allocation10 + $0xf8] sm:$0xff] }
  0x3d   :  { %247 = vmatpush.bf16.msra.mxu0 %v5130_v10  ;;  %v4041_v10 = vor.u32 %v5170_v8, %v4040_v7  ;;  %v3960_v8 = vld [vmem:[#allocation8 + $0x20] sm:$0xf] }
  0x3e   :  { %386 = vmatpush.bf16.msra.mxu1 %v5138_v11  ;;  %v4042_v11 = vld [vmem:[#allocation8 + $0xd0] sm:$0xf0] }
  0x3f   :  { %649 = vmatpush.bf16.msra.mxu2 %v4041_v10  ;;  %v5148_v10 = vld [vmem:[#allocation8 + $0x24] sm:$0xf] }
  0x41   :  { %248 = vmatpush.bf16.msra.mxu0 %v5129_v12  ;;  %v4048_v12 = vld [vmem:[#allocation8 + $0xc8] sm:$0xf] }
  0x42   :  { %387 = vmatpush.bf16.msra.mxu1 %v5137_v13  ;;  %v5171_v13 = vld [vmem:[#allocation8 + $0xd4] sm:$0xf0] }
  0x45   :  { %249 = vmatpush.bf16.msra.mxu0 %v5128_v14  ;;  %v4045_v14 = vor.u32 %v5168_v9, %v4042_v11  ;;  %v5150_v9 = vld [vmem:[#allocation8 + $0x2c] sm:$0xf0] }
  0x46   :  { %388 = vmatpush.bf16.msra.mxu1 %v5136_v15  ;;  %v4049_v15 = vor.u32 %v5171_v13, %v4048_v12  ;;  %v3961_v11 = vor.u32 %v5150_v9, %v3960_v8  ;;  %v3962_v12 = vld [vmem:[#allocation8 + $0x30] sm:$0xf0]  ;;  %v3968_v13 = vld [vmem:[#allocation8 + $0x28] sm:$0xf] }
  0x47   :  { %663 = vmatpush.bf16.msra.mxu3 %v4045_v14  ;;  %v5151_v14 = vld [vmem:[#allocation8 + $0x34] sm:$0xf0]  ;;  %v5205_v8 = vld [vmem:[#allocation10 + $0xe8] sm:$0xff]  ;;  %v5182_v9 = vld [vmem:[#allocation10 + $0x30] sm:$0xff] }
  0x48   :  { %250 = vmatmul.bf16.vlgmr.msra.gmra.mxu0 %v191_v20  ;;  %v5166_v20 = vld [vmem:[#allocation8 + $0xac] sm:$0xf0] }
  0x49   :  { %389 = vmatmul.bf16.vlgmr.msra.gmra.mxu1 %v330_v21  ;;  %676 = vmatpush.bf16.msrb.mxu0 %v4065_v3  ;;  %v5164_v21 = vld [vmem:[#allocation8 + $0xa4] sm:$0xf]  ;;  %v3981_v3 = vor.u32 %v5152_v62, %v3978_v0 }
  0x4a   :  { %690 = vmatpush.bf16.msrb.mxu1 %v4069_v6  ;;  %v3986_v6 = vld [vmem:[#allocation8 + $0x58] sm:$0xf0]  ;;  %v5459_v62 = vld [vmem:[#allocation14 + $0x5] ss:$0 sm:$0xff] }
  0x4b   :  { %v3989_v7 = vor.u32 %v5153_v5, %v3986_v6 }
  0x4d   :  { %677 = vmatpush.bf16.msrb.mxu0 %v4049_v15 }
  0xc5   :  { %v251_v24 = vpop.f32.mrf.mxu0 }
  0xc6   :  { %v390_v25 = vpop.f32.mrf.mxu1  ;;  %v252_v26 = vadd.f32 %v5457_v22, %v251_v24  ;;  %v4032_v24 = vld [vmem:[#allocation8 + $0xa8] sm:$0xf] }
  0xc7   :  { %v391_v27 = vadd.f32 %v5458_v23, %v390_v25  ;;  %v5167_v25 = vld [vmem:[#allocation8 + $0xb4] sm:$0xf0] }
  0xc8   :  { %v256_v29 = vadd.f32 %v252_v26, %v173_v18 }
  0xc9   :  { %v395_v28 = vadd.f32 %v391_v27, %v171_v16  ;;  %v5169_v16 = vld [vmem:[#allocation8 + $0xcc] sm:$0xf]  ;;  %v4033_v27 = vor.u32 %v5167_v25, %v4032_v24  ;;  %v5144_v24 = vld [vmem:[#allocation8 + $0x4] sm:$0xf] }
  0xca   :  { %260 = vadd.xlane.f32.xlu2 %v256_v29 }
  0xcb   :  { %399 = vadd.xlane.f32.xlu0 %v395_v28  ;;  %678 = vmatpush.bf16.msrb.mxu0 %v4033_v27  ;;  %v3946_v27 = vld [vmem:[#allocation8 + $0x10] sm:$0xf0] }
  0xcd   :  { %v253_v31 = vpop.f32.mrf.mxu0 }
  0xce   :  { %v392_v30 = vpop.f32.mrf.mxu1  ;;  %v254_v33 = vadd.f32 %v5457_v22, %v253_v31  ;;  %v4008_v31 = vld [vmem:[#allocation8 + $0x80] sm:$0xf] }
  0xcf   :  { %v393_v32 = vadd.f32 %v5458_v23, %v392_v30  ;;  %v4026_v23 = vld [vmem:[#allocation8 + $0xb0] sm:$0xf0]  ;;  %679 = vmatpush.bf16.msrb.mxu0 %v4017_v39  ;;  %v5183_v39 = vld [vmem:[#allocation10 + $0x38] sm:$0xff] }
  0xd0   :  { %v257_v35 = vadd.f32 %v254_v33, %v174_v19  ;;  %v4024_v19 = vld [vmem:[#allocation8 + $0xa0] sm:$0xf]  ;;  %v4029_v26 = vor.u32 %v5164_v21, %v4026_v23  ;;  %v5160_v33 = vld [vmem:[#allocation8 + $0x84] sm:$0xf]  ;;  %v5146_v23 = vld [vmem:[#allocation8 + $0xc] sm:$0xf0] }
  0xd1   :  { %v396_v34 = vadd.f32 %v393_v32, %v172_v17  ;;  %v4050_v17 = vld [vmem:[#allocation8 + $0xd8] sm:$0xf0]  ;;  %v4025_v22 = vor.u32 %v5166_v20, %v4024_v19  ;;  %v5162_v32 = vld [vmem:[#allocation8 + $0x8c] sm:$0xf0] }
  0xd2   :  { %262 = vadd.xlane.f32.xlu2 %v257_v35  ;;  %v4053_v18 = vor.u32 %v5169_v16, %v4050_v17  ;;  %664 = vmatpush.bf16.msra.mxu3 %v4029_v26  ;;  %v3965_v16 = vor.u32 %v5148_v10, %v3962_v12  ;;  %v3969_v17 = vor.u32 %v5151_v14, %v3968_v13  ;;  %v3970_v19 = vld [vmem:[#allocation8 + $0x38] sm:$0xf0]  ;;  %v5196_v10 = vld [vmem:[#allocation10 + $0xa0] sm:$0xff]  ;;  %v5181_v12 = vld [vmem:[#allocation10 + $0x28] sm:$0xff] }
  0xd3   :  { %401 = vadd.xlane.f32.xlu0 %v396_v34  ;;  %650 = vmatpush.bf16.msra.mxu2 %v4025_v22  ;;  %v3944_v22 = vld [vmem:[#allocation8] sm:$0xf]  ;;  %v5189_v13 = vld [vmem:[#allocation10 + $0x68] sm:$0xff]  ;;  %v5195_v14 = vld [vmem:[#allocation10 + $0x98] sm:$0xff] }
  0xd4   :  { %691 = vmatpush.bf16.msrb.mxu1 %v4053_v18  ;;  %v5149_v18 = vld [vmem:[#allocation8 + $0x2c] sm:$0xf]  ;;  %v3945_v26 = vor.u32 %v5146_v23, %v3944_v22 }
  0xd5   :  { %v3973_v21 = vor.u32 %v5149_v18, %v3970_v19  ;;  %v5194_v18 = vld [vmem:[#allocation10 + $0x90] sm:$0xff]  ;;  %v5193_v23 = vld [vmem:[#allocation10 + $0x88] sm:$0xff] }
  0xd6   :  { %v5202_v19 = vld [vmem:[#allocation10 + $0xd0] sm:$0xff] }
 0x13d   :  { %v261_v44 = vpop.xlane.xlu2 %260 }
 0x13e   :  { %v400_v43 = vpop.xlane.xlu0 %399  ;;  %v271_v46 = vmul.f32 %v5966_v42, %v261_v44  ;;  %v3992_v44 = vld [vmem:[#allocation8 + $0x60] sm:$0xf] }
 0x13f   :  { %v403_v45 = vmul.f32 %v400_v43, %v5966_v42  ;;  %v4021_v43 = vor.u32 %v5161_v40, %v4018_v41  ;;  %v5191_v40 = vld [vmem:[#allocation10 + $0x78] sm:$0xff]  ;;  %v5198_v41 = vld [vmem:[#allocation10 + $0xb0] sm:$0xff] }
 0x140   :  { %v5970_v47 = vsub.f32 %v256_v29, %v271_v46  ;;  %v4034_v29 = vld [vmem:[#allocation8 + $0xb8] sm:$0xf0]  ;;  %v5156_v46 = vld [vmem:[#allocation8 + $0x64] sm:$0xf] }
 0x141   :  { %v5972_v48 = vsub.f32 %v395_v28, %v403_v45  ;;  %v5165_v28 = vld [vmem:[#allocation8 + $0xac] sm:$0xf]  ;;  %v5158_v45 = vld [vmem:[#allocation8 + $0x6c] sm:$0xf0] }
 0x142   :  { %v275_v50 = vmul.f32 %v5970_v47, %v5970_v47  ;;  %v4037_v30 = vor.u32 %v5165_v28, %v4034_v29  ;;  %v3949_v28 = vor.u32 %v5144_v24, %v3946_v27  ;;  %v3952_v29 = vld [vmem:[#allocation8 + $0x8] sm:$0xf] }
 0x143   :  { %v407_v49 = vmul.f32 %v5972_v48, %v5972_v48  ;;  %v5201_v24 = vld [vmem:[#allocation10 + $0xc8] sm:$0xff] }
 0x144   :  { %277 = vadd.xlane.f32.xlu0 %v275_v50  ;;  %692 = vmatpush.bf16.msrb.mxu1 %v4037_v30  ;;  %v3994_v50 = vld [vmem:[#allocation8 + $0x70] sm:$0xf0]  ;;  %v5147_v30 = vld [vmem:[#allocation8 + $0x14] sm:$0xf0] }
 0x145   :  { %409 = vadd.xlane.f32.xlu1 %v407_v49  ;;  %v263_v52 = vpop.xlane.xlu2 %262  ;;  %v3993_v49 = vor.u32 %v5158_v45, %v3992_v44 }
 0x146   :  { %v402_v51 = vpop.xlane.xlu0 %401  ;;  %v272_v55 = vmul.f32 %v5966_v42, %v263_v52  ;;  %v5159_v52 = vld [vmem:[#allocation8 + $0x74] sm:$0xf0] }
 0x147   :  { %v404_v53 = vmul.f32 %v402_v51, %v5966_v42  ;;  %v4000_v51 = vld [vmem:[#allocation8 + $0x68] sm:$0xf] }
 0x148   :  { %v5984_v57 = vsub.f32 %v257_v35, %v272_v55  ;;  %v4010_v35 = vld [vmem:[#allocation8 + $0x90] sm:$0xf0]  ;;  %693 = vmatpush.bf16.msrb.mxu1 %v4021_v43  ;;  %v4001_v55 = vor.u32 %v5159_v52, %v4000_v51 }
 0x149   :  { %v5979_v54 = vsub.f32 %v396_v34, %v404_v53  ;;  %v4009_v34 = vor.u32 %v5162_v32, %v4008_v31  ;;  %v4013_v38 = vor.u32 %v5160_v33, %v4010_v35  ;;  %v3997_v53 = vor.u32 %v5156_v46, %v3994_v50  ;;  %v5145_v31 = vld [vmem:[#allocation8 + $0xc] sm:$0xf]  ;;  %v3954_v33 = vld [vmem:[#allocation8 + $0x18] sm:$0xf0]  ;;  %v5206_v43 = vld [vmem:[#allocation10 + $0xf0] sm:$0xff] }
 0x14a   :  { %v276_v58 = vmul.f32 %v5984_v57, %v5984_v57  ;;  %680 = vmatpush.bf16.msrb.mxu0 %v4001_v55  ;;  %v3953_v32 = vor.u32 %v5147_v30, %v3952_v29  ;;  %v5192_v29 = vld [vmem:[#allocation10 + $0x80] sm:$0xff] }
 0x14b   :  { %v408_v56 = vmul.f32 %v5979_v54, %v5979_v54  ;;  %651 = vmatpush.bf16.msra.mxu2 %v4009_v34  ;;  %665 = vmatpush.bf16.msra.mxu3 %v4013_v38  ;;  %v3957_v34 = vor.u32 %v5145_v31, %v3954_v33  ;;  %v5200_v30 = vld [vmem:[#allocation10 + $0xc0] sm:$0xff]  ;;  %v4320_v31 = vld [vmem:[#allocation8 + $0x1e8] sm:$0xf]  ;;  %v5237_v33 = vld [vmem:[#allocation8 + $0x1ec] sm:$0xf] }
 0x14d   :  { %411 = vadd.xlane.f32.xlu1 %v408_v56  ;;  %v5157_v56 = vld [vmem:[#allocation8 + $0x6c] sm:$0xf] }
 0x14e   :  { %681 = vmatpush.bf16.msrb.mxu0 %v3985_v4 }
 0x14f   :  { %652 = vmatpush.bf16.msra.mxu2 %v3993_v49  ;;  %666 = vmatpush.bf16.msra.mxu3 %v3997_v53 }
 0x152   :  { %682 = vmatpush.bf16.msrb.mxu0 %v3969_v17  ;;  %v5188_v17 = vld [vmem:[#allocation10 + $0x60] sm:$0xff] }
 0x153   :  { %653 = vmatpush.bf16.msra.mxu2 %v3977_v63  ;;  %667 = vmatpush.bf16.msra.mxu3 %v3981_v3  ;;  %v5460_v3 = vld [vmem:[#allocation14 + $0xd] ss:$0 sm:$0xff] }
 0x155   :  { %279 = vadd.xlane.f32.xlu1 %v276_v58  ;;  %v4002_v58 = vld [vmem:[#allocation8 + $0x78] sm:$0xf0] }
 0x156   :  { %v4005_v59 = vor.u32 %v5157_v56, %v4002_v58  ;;  %683 = vmatpush.bf16.msrb.mxu0 %v3953_v32  ;;  %v5239_v32 = vld [vmem:[#allocation8 + $0x1f4] sm:$0xf0] }
 0x157   :  { %654 = vmatpush.bf16.msra.mxu2 %v3961_v11  ;;  %668 = vmatpush.bf16.msra.mxu3 %v3965_v16  ;;  %v5204_v11 = vld [vmem:[#allocation10 + $0xe0] sm:$0xff] }
 0x158   :  { %694 = vmatpush.bf16.msrb.mxu1 %v4005_v59  ;;  %v5180_v16 = vld [vmem:[#allocation10 + $0x20] sm:$0xff] }
 0x15a   :  { %1066 = vmatpush.bf16.msra.mxu0 %v5199_v36  ;;  %v4321_v36 = vor.u32 %v5239_v32, %v4320_v31  ;;  %v4256_v32 = vld [vmem:[#allocation8 + $0x168] sm:$0xf] }
 0x15b   :  { %655 = vmatpush.bf16.msra.mxu2 %v3945_v26  ;;  %669 = vmatpush.bf16.msra.mxu3 %v3949_v28  ;;  %v5186_v26 = vld [vmem:[#allocation10 + $0x50] sm:$0xff] }
 0x15c   :  { %695 = vmatpush.bf16.msrb.mxu1 %v3989_v7 }
 0x15e   :  { %1067 = vmatpush.bf16.msra.mxu0 %v5198_v41  ;;  %v4304_v41 = vld [vmem:[#allocation8 + $0x1c8] sm:$0xf] }
 0x15f   :  { %1038 = vmatpush.bf16.msrb.mxu2 %v5183_v39  ;;  %1052 = vmatpush.bf16.msrb.mxu3 %v5191_v40  ;;  %v5185_v39 = vld [vmem:[#allocation10 + $0x48] sm:$0xff] }
 0x160   :  { %696 = vmatpush.bf16.msrb.mxu1 %v3973_v21  ;;  %v5187_v21 = vld [vmem:[#allocation10 + $0x58] sm:$0xff] }
 0x163   :  { %1039 = vmatpush.bf16.msrb.mxu2 %v5182_v9  ;;  %v5232_v9 = vld [vmem:[#allocation8 + $0x1c4] sm:$0xf] }
 0x164   :  { %697 = vmatpush.bf16.msrb.mxu1 %v3957_v34  ;;  %v4322_v34 = vld [vmem:[#allocation8 + $0x1f8] sm:$0xf0] }
 0x167   :  { %1040 = vmatpush.bf16.msrb.mxu2 %v5181_v12  ;;  %v4272_v12 = vld [vmem:[#allocation8 + $0x188] sm:$0xf] }
 0x168   :  { %1080 = vmatpush.bf16.msra.mxu1 %v5207_v37  ;;  %v4325_v37 = vor.u32 %v5237_v33, %v4322_v34  ;;  %v5223_v33 = vld [vmem:[#allocation8 + $0x174] sm:$0xf0]  ;;  %v5221_v34 = vld [vmem:[#allocation8 + $0x16c] sm:$0xf] }
 0x16b   :  { %1041 = vmatpush.bf16.msrb.mxu2 %v5180_v16 }
 0x16c   :  { %1081 = vmatpush.bf16.msra.mxu1 %v5206_v43  ;;  %v5235_v43 = vld [vmem:[#allocation8 + $0x1d4] sm:$0xf0] }
 0x170   :  { %1082 = vmatpush.bf16.msra.mxu1 %v5205_v8  ;;  %v5234_v8 = vld [vmem:[#allocation8 + $0x1cc] sm:$0xf0] }
 0x174   :  { %1083 = vmatpush.bf16.msra.mxu1 %v5204_v11 }
 0x1b7   :  { %v278_v22 = vpop.xlane.xlu0 %277 }
 0x1b8   :  { %v410_v15 = vpop.xlane.xlu1 %409  ;;  %v281_v27 = vmul.f32 %v278_v22, %v5966_v42  ;;  %v4280_v22 = vld [vmem:[#allocation8 + $0x1a0] sm:$0xf] }
 0x1b9   :  { %v413_v20 = vmul.f32 %v410_v15, %v5966_v42  ;;  %v5203_v15 = vld [vmem:[#allocation10 + $0xd8] sm:$0xff] }
 0x1ba   :  { %1084 = vmatpush.bf16.msra.mxu1 %v5203_v15  ;;  %v6000_v40 = vadd.f32 1e-05, %v281_v27 }
 0x1bb   :  { %v415_v25 = vadd.f32 1e-05, %v413_v20  ;;  %v5179_v20 = vld [vmem:[#allocation10 + $0x18] sm:$0xff] }
 0x1bc   :  { %1042 = vmatpush.bf16.msrb.mxu2 %v5179_v20  ;;  %vm291_vm9 = vweird.f32 %v6000_v40 }
 0x1bd   :  { %5487 = vrsqrt.f32 %v415_v25  ;;  %vm423_vm2 = vweird.f32 %v415_v25 }
 0x1be   :  { %1085 = vmatpush.bf16.msra.mxu1 %v5202_v19 }
 0x1c0   :  { %v412_v35 = vpop.xlane.xlu1 %411 }
 0x1c1   :  { %v414_v38 = vmul.f32 %v412_v35, %v5966_v42 }
 0x1c2   :  { %1086 = vmatpush.bf16.msra.mxu1 %v5201_v24  ;;  %v5228_v24 = vld [vmem:[#allocation8 + $0x1a4] sm:$0xf] }
 0x1c3   :  { %v5488_v44 = vpop.eup %5487  ;;  %v416_v45 = vadd.f32 1e-05, %v414_v38  ;;  %v5177_v38 = vld [vmem:[#allocation10 + $0x8] sm:$0xff] }
 0x1c4   :  { %v418_v46 = vmul.f32 %v5488_v44, %v415_v25  ;;  %vm424_vm1 = vweird.f32 %v5488_v44  ;;  %v5178_v25 = vld [vmem:[#allocation10 + $0x10] sm:$0xff] }
 0x1c5   :  { %5489 = vrsqrt.f32 %v416_v45  ;;  %vm425_vm3 = vmor %vm423_vm2, %vm424_vm1  ;;  %vm433_vm5 = vweird.f32 %v416_v45  ;;  %1043 = vmatpush.bf16.msrb.mxu2 %v5178_v25 }
 0x1c6   :  { %v419_v49 = vmul.f32 %v5488_v44, %v418_v46  ;;  %1087 = vmatpush.bf16.msra.mxu1 %v5200_v30  ;;  %v4305_v46 = vor.u32 %v5235_v43, %v4304_v41  ;;  %5491 = vrsqrt.f32 %v6000_v40 }
 0x1c8   :  { %v420_v50 = vmul.f32 0.5, %v419_v49  ;;  %v280_v28 = vpop.xlane.xlu1 %279  ;;  %v4306_v49 = vld [vmem:[#allocation8 + $0x1d8] sm:$0xf0] }
 0x1c9   :  { %v282_v35 = vmul.f32 %v280_v28, %v5966_v42  ;;  %1044 = vmatpush.bf16.msrb.mxu2 %v5177_v38  ;;  %v4282_v28 = vld [vmem:[#allocation8 + $0x1b0] sm:$0xf0] }
 0x1ca   :  { %v421_v51 = vsub.f32 1.5, %v420_v50  ;;  %v4285_v31 = vor.u32 %v5228_v24, %v4282_v28  ;;  %v4250_v24 = vld [vmem:[#allocation8 + $0x170] sm:$0xf0]  ;;  %v5215_v28 = vld [vmem:[#allocation8 + $0x134] sm:$0xf0] }
 0x1cb   :  { %v5490_v52 = vpop.eup %5489  ;;  %v6004_v50 = vadd.f32 1e-05, %v282_v35 }
 0x1cc   :  { %v422_v53 = vmul.f32 %v5488_v44, %v421_v51  ;;  %v428_v55 = vmul.f32 %v5490_v52, %v416_v45  ;;  %vm434_vm4 = vweird.f32 %v5490_v52  ;;  %v6002_v45 = vld [vmem:[#allocation16] ss:$4 sm:$0xf]  ;;  %v6024_v35 = vpop.eup %5491 }
 0x1cd   :  { %vm435_vm6 = vmor %vm433_vm5, %vm434_vm4  ;;  %5493 = vrsqrt.f32 %v6004_v50  ;;  %v480_v25 = vperm.slane %v6002_v45, 0  ;;  %vm301_vm7 = vweird.f32 %v6004_v50  ;;  %vm292_vm10 = vweird.f32 %v6024_v35 }
 0x1ce   :  { %v429_v56 = vmul.f32 %v5490_v52, %v428_v55  ;;  %v426_v58 = vsel %vm425_vm3, %v5488_v44, %v422_v53  ;;  %v5233_v44 = vld [vmem:[#allocation8 + $0x1cc] sm:$0xf]  ;;  %v5184_v53 = vld [vmem:[#allocation10 + $0x40] sm:$0xff]  ;;  %vm6108_vm12 = vmor %vm291_vm9, %vm292_vm10 }
 0x1cf   :  { %v437_v61 = vmul.f32 %v426_v58, %v5972_v48  ;;  %v5197_v48 = vld [vmem:[#allocation10 + $0xa8] sm:$0xff]  ;;  %v4309_v51 = vor.u32 %v5233_v44, %v4306_v49  ;;  %v4312_v55 = vld [vmem:[#allocation8 + $0x1e0] sm:$0xf]  ;;  %v5236_v58 = vld [vmem:[#allocation8 + $0x1e4] sm:$0xf] }
 0x1d0   :  { %v430_v59 = vmul.f32 0.5, %v429_v56  ;;  %1068 = vmatpush.bf16.msra.mxu0 %v5197_v48  ;;  %v5238_v56 = vld [vmem:[#allocation8 + $0x1ec] sm:$0xf0]  ;;  %v4296_v48 = vld [vmem:[#allocation8 + $0x1c0] sm:$0xf] }
 0x1d1   :  { %v440_v2 = vmul.f32 %v5459_v62, %v437_v61  ;;  %v4264_v49 = vld [vmem:[#allocation8 + $0x180] sm:$0xf] }
 0x1d2   :  { %v431_v60 = vsub.f32 1.5, %v430_v59  ;;  %v4314_v59 = vld [vmem:[#allocation8 + $0x1f0] sm:$0xf0] }
 0x1d3   :  { %v5992_v5 = vadd.f32 %v5460_v3, %v440_v2  ;;  %v4317_v61 = vor.u32 %v5236_v58, %v4314_v59  ;;  %v483_v2 = vperm.slane %v6002_v45, 3  ;;  %v6026_v38 = vpop.eup %5493  ;;  %v4266_v58 = vld [vmem:[#allocation8 + $0x190] sm:$0xf0]  ;;  %v4240_v59 = vld [vmem:[#allocation8 + $0x148] sm:$0xf] }
 0x1d4   :  { %v432_v63 = vmul.f32 %v5490_v52, %v431_v60  ;;  %1069 = vmatpush.bf16.msra.mxu0 %v5196_v10  ;;  %v4313_v60 = vor.u32 %v5238_v56, %v4312_v55  ;;  %v4298_v10 = vld [vmem:[#allocation8 + $0x1d0] sm:$0xf0]  ;;  %vm302_vm8 = vweird.f32 %v6026_v38 }
 0x1d5   :  { %v4301_v11 = vor.u32 %v5232_v9, %v4298_v10  ;;  %v4242_v10 = vld [vmem:[#allocation8 + $0x158] sm:$0xf0]  ;;  %vm6100_vm11 = vmor %vm301_vm7, %vm302_vm8 }
 0x1d6   :  { %v436_v0 = vsel %vm435_vm6, %v5490_v52, %v432_v63  ;;  %v5176_v52 = vld [vmem:[#allocation10] sm:$0xff]  ;;  %v5231_v63 = vld [vmem:[#allocation8 + $0x1b4] sm:$0xf0] }
 0x1d7   :  { %v438_v1 = vmul.f32 %v436_v0, %v5979_v54  ;;  %v5190_v54 = vld [vmem:[#allocation10 + $0x70] sm:$0xff]  ;;  %v5229_v0 = vld [vmem:[#allocation8 + $0x1ac] sm:$0xf]  ;;  %1045 = vmatpush.bf16.msrb.mxu2 %v5176_v52  ;;  %v5224_v52 = vld [vmem:[#allocation8 + $0x184] sm:$0xf] }
 0x1d8   :  { %1053 = vmatpush.bf16.msrb.mxu3 %v5190_v54  ;;  %1070 = vmatpush.bf16.msra.mxu0 %v5195_v14  ;;  %v4297_v54 = vor.u32 %v5234_v8, %v4296_v48  ;;  %v5225_v14 = vld [vmem:[#allocation8 + $0x18c] sm:$0xf] }
 0x1d9   :  { %v441_v4 = vmul.f32 %v5459_v62, %v438_v1  ;;  %v4288_v62 = vld [vmem:[#allocation8 + $0x1a8] sm:$0xf]  ;;  %v482_v1 = vperm.slane %v6002_v45, 2 }
 0x1db   :  { %v5994_v6 = vadd.f32 %v5460_v3, %v441_v4  ;;  %v4289_v3 = vor.u32 %v5231_v63, %v4288_v62  ;;  %v4290_v4 = vld [vmem:[#allocation8 + $0x1b8] sm:$0xf0]  ;;  %v4269_v63 = vor.u32 %v5224_v52, %v4266_v58  ;;  %v5216_v52 = vld [vmem:[#allocation8 + $0x144] sm:$0xf] }
 0x1dc   :  { %1054 = vmatpush.bf16.msrb.mxu3 %v5189_v13  ;;  %1071 = vmatpush.bf16.msra.mxu0 %v5194_v18  ;;  %v5227_v13 = vld [vmem:[#allocation8 + $0x194] sm:$0xf0]  ;;  %v4274_v18 = vld [vmem:[#allocation8 + $0x198] sm:$0xf0] }
 0x1dd   :  { %v477_v7 = vpack.c.bf16 %v5994_v6, %v5992_v5 }
 0x1df   :  { %656 = vmatmul.bf16.vlgmr.msra.gmra.mxu2 %v477_v7  ;;  %670 = vmatmul.bf16.vlgmr.msra.gmra.mxu3 %v477_v7 }
 0x1e0   :  { %684 = vmatmul.bf16.vlgmr.msrb.gmra.mxu0 %v477_v7  ;;  %698 = vmatmul.bf16.vlgmr.msrb.gmra.mxu1 %v477_v7  ;;  %v4293_v7 = vor.u32 %v5229_v0, %v4290_v4  ;;  %v6040_v4 = vmul.f32 %v6024_v35, %v6000_v40 }
 0x1e1   :  { %1055 = vmatpush.bf16.msrb.mxu3 %v5188_v17  ;;  %1072 = vmatpush.bf16.msra.mxu0 %v5193_v23  ;;  %v4273_v17 = vor.u32 %v5227_v13, %v4272_v12  ;;  %v5230_v23 = vld [vmem:[#allocation8 + $0x1ac] sm:$0xf0] }
 0x1e2   :  { %1391 = vmatpush.bf16.msrb.mxu1 %v4325_v37  ;;  %1349 = vmatpush.bf16.msra.mxu2 %v4313_v60  ;;  %v4281_v27 = vor.u32 %v5230_v23, %v4280_v22  ;;  %v4258_v37 = vld [vmem:[#allocation8 + $0x178] sm:$0xf0]  ;;  %v5219_v60 = vld [vmem:[#allocation8 + $0x154] sm:$0xf0] }
 0x1e3   :  { %v4241_v0 = vor.u32 %v5219_v60, %v4240_v59  ;;  %v4234_v60 = vld [vmem:[#allocation8 + $0x150] sm:$0xf0] }
 0x1e5   :  { %1056 = vmatpush.bf16.msrb.mxu3 %v5187_v21  ;;  %1073 = vmatpush.bf16.msra.mxu0 %v5192_v29  ;;  %v4277_v21 = vor.u32 %v5225_v14, %v4274_v18 }
 0x1e6   :  { %1392 = vmatpush.bf16.msrb.mxu1 %v4309_v51  ;;  %1350 = vmatpush.bf16.msra.mxu2 %v4297_v54  ;;  %v5226_v51 = vld [vmem:[#allocation8 + $0x18c] sm:$0xf0] }
 0x1e7   :  { %v4265_v56 = vor.u32 %v5226_v51, %v4264_v49  ;;  %v4232_v49 = vld [vmem:[#allocation8 + $0x140] sm:$0xf]  ;;  %v5218_v51 = vld [vmem:[#allocation8 + $0x14c] sm:$0xf0] }
 0x1e9   :  { %1057 = vmatpush.bf16.msrb.mxu3 %v5186_v26  ;;  %1377 = vmatpush.bf16.msrb.mxu0 %v4321_v36  ;;  %v481_v26 = vperm.slane %v6002_v45, 1  ;;  %v4257_v36 = vor.u32 %v5223_v33, %v4256_v32 }
 0x1ea   :  { %1393 = vmatpush.bf16.msrb.mxu1 %v4293_v7  ;;  %1351 = vmatpush.bf16.msra.mxu2 %v4281_v27  ;;  %v6044_v7 = vmul.f32 %v6026_v38, %v6004_v50  ;;  %v4224_v27 = vld [vmem:[#allocation8 + $0x128] sm:$0xf] }
 0x1ed   :  { %1058 = vmatpush.bf16.msrb.mxu3 %v5185_v39  ;;  %1378 = vmatpush.bf16.msrb.mxu0 %v4305_v46  ;;  %v4261_v46 = vor.u32 %v5221_v34, %v4258_v37  ;;  %v4226_v37 = vld [vmem:[#allocation8 + $0x138] sm:$0xf0] }
 0x1ee   :  { %1394 = vmatpush.bf16.msrb.mxu1 %v4277_v21  ;;  %1352 = vmatpush.bf16.msra.mxu2 %v4265_v56 }
 0x1f1   :  { %1059 = vmatpush.bf16.msrb.mxu3 %v5184_v53  ;;  %1379 = vmatpush.bf16.msrb.mxu0 %v4289_v3  ;;  %v5217_v3 = vld [vmem:[#allocation8 + $0x14c] sm:$0xf] }
 0x1f2   :  { %1395 = vmatpush.bf16.msrb.mxu1 %v4261_v46  ;;  %v4245_v22 = vor.u32 %v5217_v3, %v4242_v10 }
 0x1f5   :  { %1363 = vmatpush.bf16.msra.mxu3 %v4317_v61  ;;  %1380 = vmatpush.bf16.msrb.mxu0 %v4273_v17  ;;  %v5220_v17 = vld [vmem:[#allocation8 + $0x164] sm:$0xf] }
 0x1f6   :  { %1396 = vmatpush.bf16.msrb.mxu1 %v4245_v22  ;;  %v4253_v34 = vor.u32 %v5220_v17, %v4250_v24  ;;  %v5214_v17 = vld [vmem:[#allocation8 + $0x12c] sm:$0xf0] }
 0x1f9   :  { %1364 = vmatpush.bf16.msra.mxu3 %v4301_v11  ;;  %1381 = vmatpush.bf16.msrb.mxu0 %v4257_v36  ;;  %v4225_v36 = vor.u32 %v5215_v28, %v4224_v27  ;;  %v4218_v27 = vld [vmem:[#allocation8 + $0x130] sm:$0xf0] }
 0x1fd   :  { %1365 = vmatpush.bf16.msra.mxu3 %v4285_v31  ;;  %1382 = vmatpush.bf16.msrb.mxu0 %v4241_v0  ;;  %v5213_v31 = vld [vmem:[#allocation8 + $0x12c] sm:$0xf] }
 0x1fe   :  { %v4229_v46 = vor.u32 %v5213_v31, %v4226_v37  ;;  %v287_v31 = vmul.f32 %v6024_v35, %v6040_v4  ;;  %v5210_v37 = vld [vmem:[#allocation8 + $0x10c] sm:$0xf0] }
 0x200   :  { %1397 = vmatpush.bf16.msrb.mxu1 %v4229_v46  ;;  %v4202_v46 = vld [vmem:[#allocation8 + $0x110] sm:$0xf0]  ;;  %v288_v4 = vmul.f32 0.5, %v287_v31 }
 0x201   :  { %1366 = vmatpush.bf16.msra.mxu3 %v4269_v63  ;;  %1383 = vmatpush.bf16.msrb.mxu0 %v4225_v36 }
 0x205   :  { %1367 = vmatpush.bf16.msra.mxu3 %v4253_v34  ;;  %v4200_v34 = vld [vmem:[#allocation8 + $0x100] sm:$0xf] }
 0x25d   :  { %v685_v15 = vpop.f32.mrf.mxu0  ;;  %v699_v16 = vpop.f32.mrf.mxu1 }
 0x25e   :  { %v6012_v19 = vadd.f32 %v685_v15, %v482_v1  ;;  %v6016_v20 = vadd.f32 %v699_v16, %v483_v2  ;;  %v4248_v15 = vld [vmem:[#allocation8 + $0x160] sm:$0xf]  ;;  %v5222_v16 = vld [vmem:[#allocation8 + $0x16c] sm:$0xf0] }
 0x25f   :  { %v4249_v23 = vor.u32 %v5222_v16, %v4248_v15  ;;  %v4216_v16 = vld [vmem:[#allocation8 + $0x120] sm:$0xf] }
 0x260   :  { %v706_v29 = vmul.f32 %v6012_v19, %v6012_v19  ;;  %v707_v30 = vmul.f32 %v6016_v20, %v6016_v20  ;;  %v4217_v24 = vor.u32 %v5214_v17, %v4216_v16  ;;  %v5257_v17 = vld [vmem:[#allocation10 + $0x188] sm:$0xff] }
 0x261   :  { %1353 = vmatpush.bf16.msra.mxu2 %v4249_v23 }
 0x262   :  { %v714_v39 = vmul.f32 %v706_v29, %v6012_v19  ;;  %v715_v41 = vmul.f32 %v707_v30, %v6016_v20  ;;  %v657_v43 = vpop.f32.mrf.mxu2  ;;  %v671_v44 = vpop.f32.mrf.mxu3 }
 0x263   :  { %v6032_v53 = vadd.f32 %v657_v43, %v480_v25  ;;  %v6036_v55 = vadd.f32 %v671_v44, %v481_v26 }
 0x264   :  { %v722_v61 = vmul.f32 0.044715, %v714_v39  ;;  %v723_v62 = vmul.f32 0.044715, %v715_v41 }
 0x265   :  { %v704_v48 = vmul.f32 %v6032_v53, %v6032_v53  ;;  %v705_v8 = vmul.f32 %v6036_v55, %v6036_v55  ;;  %v687_v9 = vpop.f32.mrf.mxu0  ;;  %v701_v54 = vpop.f32.mrf.mxu1 }
 0x266   :  { %v730_v11 = vadd.f32 %v722_v61, %v6012_v19  ;;  %v731_v12 = vadd.f32 %v723_v62, %v6016_v20  ;;  %v6054_v13 = vadd.f32 %v687_v9, %v482_v1  ;;  %v6058_v14 = vadd.f32 %v701_v54, %v483_v2  ;;  %v4208_v61 = vld [vmem:[#allocation8 + $0x108] sm:$0xf]  ;;  %v5211_v62 = vld [vmem:[#allocation8 + $0x114] sm:$0xf0] }
 0x267   :  { %v712_v18 = vmul.f32 %v704_v48, %v6032_v53  ;;  %v713_v21 = vmul.f32 %v705_v8, %v6036_v55  ;;  %v4233_v48 = vor.u32 %v5218_v51, %v4232_v49  ;;  %v5209_v8 = vld [vmem:[#allocation8 + $0x10c] sm:$0xf] }
 0x268   :  { %v738_v1 = vmul.f32 0.7978846, %v730_v11  ;;  %v739_v29 = vmul.f32 0.7978846, %v731_v12  ;;  %v710_v2 = vmul.f32 %v6054_v13, %v6054_v13  ;;  %v711_v30 = vmul.f32 %v6058_v14, %v6058_v14  ;;  %v4210_v11 = vld [vmem:[#allocation8 + $0x118] sm:$0xf0] }
 0x269   :  { %v720_v32 = vmul.f32 0.044715, %v712_v18  ;;  %v721_v33 = vmul.f32 0.044715, %v713_v21  ;;  %1354 = vmatpush.bf16.msra.mxu2 %v4233_v48  ;;  %v5212_v18 = vld [vmem:[#allocation8 + $0x124] sm:$0xf]  ;;  %v297_v21 = vmul.f32 %v6026_v38, %v6044_v7  ;;  %v4213_v23 = vor.u32 %v5209_v8, %v4210_v11 }
 0x26a   :  { %5495 = vtanh.f32 %v738_v1  ;;  %v718_v39 = vmul.f32 %v710_v2, %v6054_v13  ;;  %v719_v41 = vmul.f32 %v711_v30, %v6058_v14  ;;  %v659_v43 = vpop.f32.mrf.mxu2  ;;  %v673_v44 = vpop.f32.mrf.mxu3  ;;  %v4221_v7 = vor.u32 %v5212_v18, %v4218_v27 }
 0x26b   :  { %5497 = vtanh.f32 %v739_v29  ;;  %v728_v56 = vadd.f32 %v720_v32, %v6032_v53  ;;  %v729_v58 = vadd.f32 %v721_v33, %v6036_v55  ;;  %v6072_v59 = vadd.f32 %v659_v43, %v480_v25  ;;  %1398 = vmatpush.bf16.msrb.mxu1 %v4213_v23 }
 0x26c   :  { %v726_v63 = vmul.f32 0.044715, %v718_v39  ;;  %v727_v0 = vmul.f32 0.044715, %v719_v41  ;;  %v6076_v3 = vadd.f32 %v673_v44, %v481_v26  ;;  %v4237_v25 = vor.u32 %v5216_v52, %v4234_v60  ;;  %v5208_v39 = vld [vmem:[#allocation8 + $0x104] sm:$0xf] }
 0x26d   :  { %v736_v9 = vmul.f32 0.7978846, %v728_v56  ;;  %v737_v54 = vmul.f32 0.7978846, %v729_v58  ;;  %v708_v10 = vmul.f32 %v6072_v59, %v6072_v59  ;;  %v4209_v26 = vor.u32 %v5211_v62, %v4208_v61  ;;  %1355 = vmatpush.bf16.msra.mxu2 %v4217_v24 }
 0x26e   :  { %v734_v12 = vadd.f32 %v726_v63, %v6054_v13  ;;  %v735_v15 = vadd.f32 %v727_v0, %v6058_v14  ;;  %v709_v45 = vmul.f32 %v6076_v3, %v6076_v3  ;;  %1368 = vmatpush.bf16.msra.mxu3 %v4237_v25  ;;  %v298_v41 = vmul.f32 0.5, %v297_v21 }
 0x26f   :  { %v716_v22 = vmul.f32 %v708_v10, %v6072_v59  ;;  %5499 = vtanh.f32 %v736_v9  ;;  %1384 = vmatpush.bf16.msrb.mxu0 %v4209_v26  ;;  %v4201_v44 = vor.u32 %v5210_v37, %v4200_v34  ;;  %v4205_v52 = vor.u32 %v5208_v39, %v4202_v46  ;;  %v5461_v37 = vld [vmem:[#allocation14 + $0x4] ss:$0 sm:$0xff]  ;;  %v5269_v46 = vld [vmem:[#allocation10 + $0x1e8] sm:$0xff] }
 0x270   :  { %v5496_v28 = vpop.eup %5495  ;;  %v742_v1 = vmul.f32 0.7978846, %v734_v12  ;;  %v743_v29 = vmul.f32 0.7978846, %v735_v15  ;;  %v717_v2 = vmul.f32 %v709_v45, %v6076_v3  ;;  %5501 = vtanh.f32 %v737_v54 }
 0x271   :  { %v5498_v30 = vpop.eup %5497  ;;  %v724_v32 = vmul.f32 0.044715, %v716_v22  ;;  %v754_v49 = vadd.f32 1.0, %v5496_v28  ;;  %1356 = vmatpush.bf16.msra.mxu2 %v4201_v44  ;;  %v299_v63 = vsub.f32 1.5, %v298_v41  ;;  %v289_v48 = vsub.f32 1.5, %v288_v4  ;;  %v5261_v44 = vld [vmem:[#allocation10 + $0x1a8] sm:$0xff] }
 0x272   :  { %5503 = vtanh.f32 %v742_v1  ;;  %v725_v33 = vmul.f32 0.044715, %v717_v2  ;;  %1369 = vmatpush.bf16.msra.mxu3 %v4221_v7  ;;  %v755_v58 = vadd.f32 1.0, %v5498_v30  ;;  %v5462_v41 = vld [vmem:[#allocation14 + $0xc] ss:$0 sm:$0xff]  ;;  %v5251_v28 = vld [vmem:[#allocation10 + $0x158] sm:$0xff] }
 0x273   :  { %5505 = vtanh.f32 %v743_v29  ;;  %v732_v36 = vadd.f32 %v724_v32, %v6072_v59  ;;  %v762_v8 = vmul.f32 0.5, %v754_v49  ;;  %v300_v15 = vmul.f32 %v6026_v38, %v299_v63  ;;  %v5247_v49 = vld [vmem:[#allocation10 + $0x138] sm:$0xff] }
 0x274   :  { %v733_v43 = vadd.f32 %v725_v33, %v6076_v3  ;;  %v763_v54 = vmul.f32 0.5, %v755_v58  ;;  %v290_v16 = vmul.f32 %v6024_v35, %v289_v48  ;;  %v5268_v58 = vld [vmem:[#allocation10 + $0x1e0] sm:$0xff]  ;;  %v5267_v63 = vld [vmem:[#allocation10 + $0x1d8] sm:$0xff] }
 0x275   :  { %v740_v51 = vmul.f32 0.7978846, %v732_v36  ;;  %v5500_v56 = vpop.eup %5499  ;;  %v770_v18 = vmul.f32 %v762_v8, %v6012_v19  ;;  %v304_v19 = vsel %vm6100_vm11, %v6026_v38, %v300_v15  ;;  %v5245_v8 = vld [vmem:[#allocation10 + $0x128] sm:$0xff] }
 0x276   :  { %v741_v60 = vmul.f32 0.7978846, %v733_v43  ;;  %v5502_v61 = vpop.eup %5501  ;;  %1370 = vmatpush.bf16.msra.mxu3 %v4205_v52  ;;  %v752_v25 = vadd.f32 1.0, %v5500_v56  ;;  %v771_v40 = vmul.f32 %v763_v54, %v6016_v20  ;;  %v294_v20 = vsel %vm6108_vm12, %v6024_v35, %v290_v16  ;;  %v5260_v52 = vld [vmem:[#allocation10 + $0x1a0] sm:$0xff]  ;;  %v5258_v54 = vld [vmem:[#allocation10 + $0x190] sm:$0xff] }
 0x277   :  { %5507 = vtanh.f32 %v740_v51  ;;  %v753_v12 = vadd.f32 1.0, %v5502_v61  ;;  %v306_v32 = vmul.f32 %v304_v19, %v5984_v57  ;;  %v305_v34 = vmul.f32 %v294_v20, %v5970_v47  ;;  %v5271_v47 = vld [vmem:[#allocation10 + $0x1f8] sm:$0xff]  ;;  %v5254_v61 = vld [vmem:[#allocation10 + $0x170] sm:$0xff]  ;;  %v5252_v16 = vld [vmem:[#allocation10 + $0x160] sm:$0xff] }
 0x278   :  { %v5504_v62 = vpop.eup %5503  ;;  %5509 = vtanh.f32 %v741_v60  ;;  %v760_v27 = vmul.f32 0.5, %v752_v25  ;;  %v5255_v51 = vld [vmem:[#allocation10 + $0x178] sm:$0xff]  ;;  %v5246_v60 = vld [vmem:[#allocation10 + $0x130] sm:$0xff]  ;;  %v5264_v19 = vld [vmem:[#allocation10 + $0x1c0] sm:$0xff] }
 0x279   :  { %v5506_v0 = vpop.eup %5505  ;;  %v758_v9 = vadd.f32 1.0, %v5504_v62  ;;  %v761_v29 = vmul.f32 0.5, %v753_v12  ;;  %v309_v39 = vmul.f32 %v5461_v37, %v306_v32  ;;  %v308_v35 = vmul.f32 %v5461_v37, %v305_v34  ;;  %v5259_v62 = vld [vmem:[#allocation10 + $0x198] sm:$0xff]  ;;  %v5266_v25 = vld [vmem:[#allocation10 + $0x1d0] sm:$0xff] }
 0x27a   :  { %v759_v10 = vadd.f32 1.0, %v5506_v0  ;;  %v5463_v0 = vld [vmem:[#allocation14 + $0x14] ss:$0 sm:$0xff] }
 0x27b   :  { %v766_v11 = vmul.f32 0.5, %v758_v9  ;;  %v769_v7 = vmul.f32 %v761_v29, %v6036_v55  ;;  %v6124_v43 = vadd.f32 %v5462_v41, %v309_v39  ;;  %v5263_v55 = vld [vmem:[#allocation10 + $0x1b8] sm:$0xff]  ;;  %v5253_v9 = vld [vmem:[#allocation10 + $0x168] sm:$0xff] }
 0x27c   :  { %v767_v45 = vmul.f32 0.5, %v759_v10 }
 0x27d   :  { %v5508_v26 = vpop.eup %5507  ;;  %v774_v21 = vmul.f32 %v766_v11, %v6054_v13  ;;  %v6130_v11 = vld [vmem:[#allocation16 + $0x1] ss:$4 sm:$0xf] }
 0x27e   :  { %v5510_v22 = vpop.eup %5509  ;;  %v775_v23 = vmul.f32 %v767_v45, %v6058_v14  ;;  %v756_v24 = vadd.f32 1.0, %v5508_v26  ;;  %v768_v14 = vmul.f32 %v760_v27, %v6032_v53  ;;  %v6126_v53 = vadd.f32 %v5462_v41, %v308_v35  ;;  %v5244_v26 = vld [vmem:[#allocation10 + $0x120] sm:$0xff]  ;;  %v5243_v27 = vld [vmem:[#allocation10 + $0x118] sm:$0xff] }
 0x27f   :  { %v842_v50 = vpack.c.bf16 %v774_v21, %v770_v18  ;;  %v757_v1 = vadd.f32 1.0, %v5510_v22  ;;  %v1183_v18 = vperm.slane %v6130_v11, 2  ;;  %v5265_v21 = vld [vmem:[#allocation10 + $0x1c8] sm:$0xff] }
 0x280   :  { %v843_v2 = vpack.c.bf16 %v775_v23, %v771_v40  ;;  %v764_v13 = vmul.f32 0.5, %v756_v24  ;;  %v1177_v57 = vpack.c.bf16 %v6124_v43, %v6126_v53  ;;  %v1184_v40 = vperm.slane %v6130_v11, 3 }
 0x281   :  { %1074 = vmatmul.bf16.vlgmr.msra.gmra.mxu0 %v842_v50  ;;  %v765_v30 = vmul.f32 0.5, %v757_v1  ;;  %v5256_v50 = vld [vmem:[#allocation10 + $0x180] sm:$0xff] }
 0x282   :  { %1088 = vmatmul.bf16.vlgmr.msra.gmra.mxu1 %v843_v2  ;;  %v772_v31 = vmul.f32 %v764_v13, %v6072_v59  ;;  %1768 = vmatpush.bf16.msra.mxu0 %v5263_v55  ;;  %v5262_v59 = vld [vmem:[#allocation10 + $0x1b0] sm:$0xff]  ;;  %v5241_v55 = vld [vmem:[#allocation10 + $0x108] sm:$0xff] }
 0x283   :  { %v773_v33 = vmul.f32 %v765_v30, %v6076_v3  ;;  %1782 = vmatpush.bf16.msra.mxu1 %v5271_v47  ;;  %v5270_v3 = vld [vmem:[#allocation10 + $0x1f0] sm:$0xff]  ;;  %v5249_v47 = vld [vmem:[#allocation10 + $0x148] sm:$0xff] }
 0x284   :  { %v840_v38 = vpack.c.bf16 %v772_v31, %v768_v14 }
 0x285   :  { %v841_v36 = vpack.c.bf16 %v773_v33, %v769_v7  ;;  %v5242_v7 = vld [vmem:[#allocation10 + $0x110] sm:$0xff] }
 0x286   :  { %1046 = vmatmul.bf16.vlgmr.msrb.gmra.mxu2 %v840_v38  ;;  %1769 = vmatpush.bf16.msra.mxu0 %v5262_v59  ;;  %v5250_v33 = vld [vmem:[#allocation10 + $0x150] sm:$0xff] }
 0x287   :  { %1060 = vmatmul.bf16.vlgmr.msrb.gmra.mxu3 %v841_v36  ;;  %1783 = vmatpush.bf16.msra.mxu1 %v5270_v3 }
 0x288   :  { %1740 = vmatpush.bf16.msrb.mxu2 %v5247_v49  ;;  %1754 = vmatpush.bf16.msrb.mxu3 %v5255_v51 }
 0x28a   :  { %1770 = vmatpush.bf16.msra.mxu0 %v5261_v44 }
 0x28b   :  { %1784 = vmatpush.bf16.msra.mxu1 %v5269_v46  ;;  %v1182_v46 = vperm.slane %v6130_v11, 1 }
 0x28c   :  { %1741 = vmatpush.bf16.msrb.mxu2 %v5246_v60  ;;  %1755 = vmatpush.bf16.msrb.mxu3 %v5254_v61 }
 0x28e   :  { %1771 = vmatpush.bf16.msra.mxu0 %v5260_v52 }
 0x28f   :  { %1785 = vmatpush.bf16.msra.mxu1 %v5268_v58 }
 0x290   :  { %1742 = vmatpush.bf16.msrb.mxu2 %v5245_v8  ;;  %1756 = vmatpush.bf16.msrb.mxu3 %v5253_v9 }
 0x291   :  { %1385 = vmatmul.bf16.vlgmr.msrb.gmra.mxu0 %v1177_v57 }
 0x292   :  { %1399 = vmatmul.bf16.vlgmr.msrb.gmra.mxu1 %v1177_v57  ;;  %1772 = vmatpush.bf16.msra.mxu0 %v5259_v62 }
 0x293   :  { %1786 = vmatpush.bf16.msra.mxu1 %v5267_v63 }
 0x294   :  { %1743 = vmatpush.bf16.msrb.mxu2 %v5244_v26  ;;  %1757 = vmatpush.bf16.msrb.mxu3 %v5252_v16 }
 0x296   :  { %1357 = vmatmul.bf16.vlgmr.msra.gmra.mxu2 %v1177_v57  ;;  %1773 = vmatpush.bf16.msra.mxu0 %v5258_v54 }
 0x297   :  { %1371 = vmatmul.bf16.vlgmr.msra.gmra.mxu3 %v1177_v57  ;;  %1787 = vmatpush.bf16.msra.mxu1 %v5266_v25  ;;  %v1181_v57 = vperm.slane %v6130_v11, 0 }
 0x298   :  { %1744 = vmatpush.bf16.msrb.mxu2 %v5243_v27  ;;  %1758 = vmatpush.bf16.msrb.mxu3 %v5251_v28 }
 0x29a   :  { %1774 = vmatpush.bf16.msra.mxu0 %v5257_v17 }
 0x29b   :  { %1788 = vmatpush.bf16.msra.mxu1 %v5265_v21 }
 0x29c   :  { %1745 = vmatpush.bf16.msrb.mxu2 %v5242_v7  ;;  %1759 = vmatpush.bf16.msrb.mxu3 %v5250_v33 }
 0x29e   :  { %1775 = vmatpush.bf16.msra.mxu0 %v5256_v50 }
 0x29f   :  { %1789 = vmatpush.bf16.msra.mxu1 %v5264_v19 }
 0x2a0   :  { %1746 = vmatpush.bf16.msrb.mxu2 %v5241_v55  ;;  %1760 = vmatpush.bf16.msrb.mxu3 %v5249_v47 }
 0x2fe   :  { %v1075_v4 = vpop.f32.mrf.mxu0 }
 0x2ff   :  { %v1089_v56 = vpop.f32.mrf.mxu1 }
 0x306   :  { %v1077_v48 = vpop.f32.mrf.mxu0 }
 0x307   :  { %v1091_v10 = vpop.f32.mrf.mxu1 }
 0x309   :  { %v1047_v12 = vpop.f32.mrf.mxu2 }
 0x30a   :  { %v1048_v15 = vadd.f32 %v5463_v0, %v1047_v12  ;;  %v1061_v45 = vpop.f32.mrf.mxu3 }
 0x30c   :  { %v1062_v22 = vadd.f32 %v1061_v45, %v1048_v15 }
 0x30e   :  { %v1076_v23 = vadd.f32 %v1075_v4, %v1062_v22  ;;  %v1386_v24 = vpop.f32.mrf.mxu0 }
 0x30f   :  { %v6134_v1 = vadd.f32 %v1386_v24, %v1183_v18  ;;  %v1400_v29 = vpop.f32.mrf.mxu1 }
 0x310   :  { %v6136_v2 = vadd.f32 %v1400_v29, %v1184_v40  ;;  %v6138_v13 = vadd.f32 %v1089_v56, %v1076_v23 }
 0x311   :  { %v1407_v30 = vmul.f32 %v6134_v1, %v6134_v1  ;;  %v1049_v20 = vpop.f32.mrf.mxu2 }
 0x312   :  { %v1408_v14 = vmul.f32 %v6136_v2, %v6136_v2  ;;  %v1050_v31 = vadd.f32 %v5463_v0, %v1049_v20  ;;  %v1063_v32 = vpop.f32.mrf.mxu3  ;;  %v5240_v0 = vld [vmem:[#allocation10 + $0x100] sm:$0xff] }
 0x313   :  { %v1415_v38 = vmul.f32 %v1407_v30, %v6134_v1  ;;  %1747 = vmatpush.bf16.msrb.mxu2 %v5240_v0 }
 0x314   :  { %v1416_v34 = vmul.f32 %v1408_v14, %v6136_v2  ;;  %v1064_v36 = vadd.f32 %v1063_v32, %v1050_v31 }
 0x315   :  { %v1423_v37 = vmul.f32 0.044715, %v1415_v38 }
 0x316   :  { %v1424_v39 = vmul.f32 0.044715, %v1416_v34  ;;  %v1078_v35 = vadd.f32 %v1077_v48, %v1064_v36  ;;  %v1388_v41 = vpop.f32.mrf.mxu0  ;;  %v5248_v48 = vld [vmem:[#allocation10 + $0x140] sm:$0xff] }
 0x317   :  { %v1431_v59 = vadd.f32 %v1423_v37, %v6134_v1  ;;  %v6148_v3 = vadd.f32 %v1388_v41, %v1183_v18  ;;  %v1402_v44 = vpop.f32.mrf.mxu1  ;;  %1761 = vmatpush.bf16.msrb.mxu3 %v5248_v48 }
 0x318   :  { %v1432_v4 = vadd.f32 %v1424_v39, %v6136_v2  ;;  %v6152_v49 = vadd.f32 %v1402_v44, %v1184_v40  ;;  %v6154_v51 = vadd.f32 %v1091_v10, %v1078_v35 }
 0x319   :  { %v1439_v52 = vmul.f32 0.7978846, %v1431_v59  ;;  %v1411_v56 = vmul.f32 %v6148_v3, %v6148_v3  ;;  %v1358_v58 = vpop.f32.mrf.mxu2 }
 0x31a   :  { %v1440_v60 = vmul.f32 0.7978846, %v1432_v4  ;;  %v1412_v61 = vmul.f32 %v6152_v49, %v6152_v49  ;;  %v6160_v62 = vadd.f32 %v1358_v58, %v1181_v57  ;;  %v1372_v63 = vpop.f32.mrf.mxu3 }
 0x31b   :  { %v1419_v8 = vmul.f32 %v1411_v56, %v6148_v3  ;;  %v6163_v9 = vadd.f32 %v1372_v63, %v1182_v46  ;;  %5511 = vtanh.f32 %v1439_v52 }
 0x31c   :  { %v1420_v54 = vmul.f32 %v1412_v61, %v6152_v49  ;;  %v1405_v10 = vmul.f32 %v6160_v62, %v6160_v62  ;;  %5513 = vtanh.f32 %v1440_v60 }
 0x31d   :  { %v1427_v25 = vmul.f32 0.044715, %v1419_v8  ;;  %v1406_v11 = vmul.f32 %v6163_v9, %v6163_v9 }
 0x31e   :  { %v1428_v12 = vmul.f32 0.044715, %v1420_v54  ;;  %v1413_v15 = vmul.f32 %v1405_v10, %v6160_v62 }
 0x31f   :  { %v1435_v45 = vadd.f32 %v1427_v25, %v6148_v3  ;;  %v1414_v26 = vmul.f32 %v1406_v11, %v6163_v9 }
 0x320   :  { %v1436_v16 = vadd.f32 %v1428_v12, %v6152_v49  ;;  %v1421_v17 = vmul.f32 0.044715, %v1413_v15 }
 0x321   :  { %v1443_v18 = vmul.f32 0.7978846, %v1435_v45  ;;  %v1422_v21 = vmul.f32 0.044715, %v1414_v26  ;;  %v1360_v22 = vpop.f32.mrf.mxu2  ;;  %v5512_v28 = vpop.eup %5511 }
 0x322   :  { %v1444_v40 = vmul.f32 0.7978846, %v1436_v16  ;;  %v1429_v23 = vadd.f32 %v1421_v17, %v6160_v62  ;;  %v1361_v24 = vadd.f32 %v1360_v22, %v1181_v57  ;;  %v1374_v27 = vpop.f32.mrf.mxu3  ;;  %v5514_v19 = vpop.eup %5513  ;;  %v1455_v32 = vadd.f32 1.0, %v5512_v28  ;;  %v5464_v22 = vld [vmem:[#allocation14 + $0x15] ss:$0 sm:$0xff] }
 0x323   :  { %5515 = vtanh.f32 %v1443_v18  ;;  %v1430_v50 = vadd.f32 %v1422_v21, %v6163_v9  ;;  %v1375_v29 = vadd.f32 %v1374_v27, %v1182_v46  ;;  %v1456_v33 = vadd.f32 1.0, %v5514_v19 }
 0x324   :  { %5517 = vtanh.f32 %v1444_v40  ;;  %v1437_v30 = vmul.f32 0.7978846, %v1429_v23  ;;  %v1409_v20 = vmul.f32 %v1361_v24, %v1361_v24  ;;  %v1463_v35 = vmul.f32 0.5, %v1455_v32 }
 0x325   :  { %v1438_v14 = vmul.f32 0.7978846, %v1430_v50  ;;  %v1410_v31 = vmul.f32 %v1375_v29, %v1375_v29  ;;  %v1464_v55 = vmul.f32 0.5, %v1456_v33 }
 0x326   :  { %v1417_v7 = vmul.f32 %v1409_v20, %v1361_v24  ;;  %5519 = vtanh.f32 %v1437_v30  ;;  %v1471_v58 = vmul.f32 %v1463_v35, %v6134_v1 }
 0x327   :  { %v1418_v38 = vmul.f32 %v1410_v31, %v1375_v29  ;;  %5521 = vtanh.f32 %v1438_v14  ;;  %v1472_v63 = vmul.f32 %v1464_v55, %v6136_v2 }
 0x328   :  { %v1425_v34 = vmul.f32 0.044715, %v1417_v7 }
 0x329   :  { %v5516_v36 = vpop.eup %5515  ;;  %v1426_v37 = vmul.f32 0.044715, %v1418_v38 }
 0x32a   :  { %v5518_v39 = vpop.eup %5517  ;;  %v1459_v41 = vadd.f32 1.0, %v5516_v36  ;;  %v1433_v57 = vadd.f32 %v1425_v34, %v1361_v24  ;;  %v1094_v34 = vadd.f32 %v6138_v13, %v5992_v5 }
 0x32b   :  { %v1460_v47 = vadd.f32 1.0, %v5518_v39  ;;  %v1434_v59 = vadd.f32 %v1426_v37, %v1375_v29 }
 0x32c   :  { %v1467_v44 = vmul.f32 0.5, %v1459_v41  ;;  %v1441_v46 = vmul.f32 0.7978846, %v1433_v57  ;;  %v5520_v56 = vpop.eup %5519 }
 0x32d   :  { %v1468_v4 = vmul.f32 0.5, %v1460_v47  ;;  %v1442_v52 = vmul.f32 0.7978846, %v1434_v59  ;;  %v5522_v61 = vpop.eup %5521  ;;  %v1453_v8 = vadd.f32 1.0, %v5520_v56 }
 0x32e   :  { %v1475_v60 = vmul.f32 %v1467_v44, %v6148_v3  ;;  %5523 = vtanh.f32 %v1441_v46  ;;  %v1454_v10 = vadd.f32 1.0, %v5522_v61  ;;  %v5287_v44 = vld [vmem:[#allocation7 + $0xf8] sm:$0xff]  ;;  %v5286_v46 = vld [vmem:[#allocation7 + $0xf0] sm:$0xff] }
 0x32f   :  { %v1476_v0 = vmul.f32 %v1468_v4, %v6152_v49  ;;  %5525 = vtanh.f32 %v1442_v52  ;;  %v1461_v12 = vmul.f32 0.5, %v1453_v8  ;;  %2046 = vmatpush.bf16.msra.mxu3 %v5287_v44  ;;  %v5285_v4 = vld [vmem:[#allocation7 + $0xe8] sm:$0xff]  ;;  %v5284_v52 = vld [vmem:[#allocation7 + $0xe0] sm:$0xff] }
 0x330   :  { %v1544_v48 = vpack.c.bf16 %v1475_v60, %v1471_v58  ;;  %v1462_v1 = vmul.f32 0.5, %v1454_v10  ;;  %v5281_v58 = vld [vmem:[#allocation7 + $0xc8] sm:$0xff] }
 0x331   :  { %v1545_v54 = vpack.c.bf16 %v1476_v0, %v1472_v63  ;;  %v1469_v16 = vmul.f32 %v1461_v12, %v6160_v62  ;;  %v5280_v63 = vld [vmem:[#allocation7 + $0xc0] sm:$0xff]  ;;  %v5279_v0 = vld [vmem:[#allocation7 + $0xb8] sm:$0xff] }
 0x332   :  { %1776 = vmatmul.bf16.vlgmr.msra.gmra.mxu0 %v1544_v48  ;;  %v1470_v49 = vmul.f32 %v1462_v1, %v6163_v9  ;;  %1914 = vmatpush.bf16.msra.mxu2 %v5279_v0  ;;  %v5468_v0 = vld [vmem:[#allocation14 + $0xe] ss:$0 sm:$0xff] }
 0x333   :  { %1790 = vmatmul.bf16.vlgmr.msra.gmra.mxu1 %v1545_v54  ;;  %2047 = vmatpush.bf16.msra.mxu3 %v5286_v46 }
 0x334   :  { %v5524_v25 = vpop.eup %5523 }
 0x335   :  { %v5526_v11 = vpop.eup %5525  ;;  %v1457_v15 = vadd.f32 1.0, %v5524_v25 }
 0x336   :  { %v1458_v45 = vadd.f32 1.0, %v5526_v11 }
 0x337   :  { %v1465_v3 = vmul.f32 0.5, %v1457_v15  ;;  %2048 = vmatpush.bf16.msra.mxu3 %v5285_v4 }
 0x338   :  { %v1466_v26 = vmul.f32 0.5, %v1458_v45 }
 0x339   :  { %v1473_v2 = vmul.f32 %v1465_v3, %v1361_v24 }
 0x33a   :  { %v1474_v17 = vmul.f32 %v1466_v26, %v1375_v29 }
 0x33b   :  { %v1542_v18 = vpack.c.bf16 %v1473_v2, %v1469_v16  ;;  %2049 = vmatpush.bf16.msra.mxu3 %v5284_v52 }
 0x33c   :  { %v1543_v21 = vpack.c.bf16 %v1474_v17, %v1470_v49 }
 0x33d   :  { %1748 = vmatmul.bf16.vlgmr.msrb.gmra.mxu2 %v1542_v18 }
 0x33e   :  { %1762 = vmatmul.bf16.vlgmr.msrb.gmra.mxu3 %v1543_v21 }
 0x3af   :  { %v1777_v28 = vpop.f32.mrf.mxu0 }
 0x3b0   :  { %v1791_v19 = vpop.f32.mrf.mxu1 }
 0x3b7   :  { %v1779_v29 = vpop.f32.mrf.mxu0 }
 0x3b8   :  { %v1793_v7 = vpop.f32.mrf.mxu1 }
 0x3c0   :  { %v1749_v40 = vpop.f32.mrf.mxu2 }
 0x3c1   :  { %v1750_v23 = vadd.f32 %v5464_v22, %v1749_v40  ;;  %v1763_v27 = vpop.f32.mrf.mxu3 }
 0x3c3   :  { %v1764_v50 = vadd.f32 %v1763_v27, %v1750_v23  ;;  %v5465_v23 = vld [vmem:[#allocation14 + $0x7] ss:$0 sm:$0xff] }
 0x3c5   :  { %v1778_v30 = vadd.f32 %v1777_v28, %v1764_v50 }
 0x3c7   :  { %v1792_v20 = vadd.f32 %v1791_v19, %v1778_v30  ;;  %v5466_v30 = vld [vmem:[#allocation14 + $0xf] ss:$0 sm:$0xff] }
 0x3c8   :  { %v1751_v14 = vpop.f32.mrf.mxu2 }
 0x3c9   :  { %v1752_v31 = vadd.f32 %v5464_v22, %v1751_v14  ;;  %v1796_v62 = vadd.f32 %v1792_v20, %v6126_v53  ;;  %v1765_v24 = vpop.f32.mrf.mxu3 }
 0x3cb   :  { %v1766_v9 = vadd.f32 %v1765_v24, %v1752_v31  ;;  %1800 = vadd.xlane.f32.xlu2 %v1796_v62  ;;  %v5278_v24 = vld [vmem:[#allocation7 + $0xb0] sm:$0xff] }
 0x3cc   :  { %1915 = vmatpush.bf16.msra.mxu2 %v5278_v24  ;;  %v4634_v24 = vld [vmem:[#allocation8 + $0x2f0] sm:$0xf0] }
 0x3cd   :  { %v1780_v32 = vadd.f32 %v1779_v29, %v1766_v9  ;;  %v5277_v29 = vld [vmem:[#allocation7 + $0xa8] sm:$0xff] }
 0x3cf   :  { %v1794_v33 = vadd.f32 %v1793_v7, %v1780_v32  ;;  %v5276_v7 = vld [vmem:[#allocation7 + $0xa0] sm:$0xff] }
 0x3d0   :  { %1916 = vmatpush.bf16.msra.mxu2 %v5277_v29  ;;  %v5319_v29 = vld [vmem:[#allocation8 + $0x2f4] sm:$0xf0] }
 0x3d1   :  { %v1797_v38 = vadd.f32 %v1794_v33, %v6124_v43  ;;  %v1095_v43 = vadd.f32 %v6154_v51, %v5994_v6  ;;  %v5283_v6 = vld [vmem:[#allocation7 + $0xd8] sm:$0xff]  ;;  %v5282_v51 = vld [vmem:[#allocation7 + $0xd0] sm:$0xff] }
 0x3d2   :  { %2050 = vmatpush.bf16.msra.mxu3 %v5283_v6 }
 0x3d3   :  { %1802 = vadd.xlane.f32.xlu0 %v1797_v38 }
 0x3d4   :  { %1917 = vmatpush.bf16.msra.mxu2 %v5276_v7 }
 0x3d6   :  { %2051 = vmatpush.bf16.msra.mxu3 %v5282_v51 }
 0x3da   :  { %2052 = vmatpush.bf16.msra.mxu3 %v5281_v58 }
 0x3db   :  { %1098 = vadd.xlane.f32.xlu0 %v1094_v34 }
 0x3de   :  { %2053 = vmatpush.bf16.msra.mxu3 %v5280_v63 }
 0x43e   :  { %v1801_v36 = vpop.xlane.xlu2 %1800 }
 0x43f   :  { %v1804_v37 = vmul.f32 %v1801_v36, %v5966_v42  ;;  %v5273_v36 = vld [vmem:[#allocation7 + $0x88] sm:$0xff] }
 0x441   :  { %v1806_v39 = vsub.f32 %v1796_v62, %v1804_v37 }
 0x443   :  { %v1808_v35 = vmul.f32 %v1806_v39, %v1806_v39 }
 0x445   :  { %1810 = vadd.xlane.f32.xlu1 %v1808_v35 }
 0x446   :  { %v1803_v53 = vpop.xlane.xlu0 %1802 }
 0x447   :  { %v1805_v41 = vmul.f32 %v1803_v53, %v5966_v42 }
 0x449   :  { %v6188_v57 = vsub.f32 %v1797_v38, %v1805_v41  ;;  %v5275_v38 = vld [vmem:[#allocation7 + $0x98] sm:$0xff] }
 0x44a   :  { %1918 = vmatpush.bf16.msra.mxu2 %v5275_v38  ;;  %v4642_v38 = vld [vmem:[#allocation8 + $0x2f8] sm:$0xf0] }
 0x44b   :  { %v1809_v55 = vmul.f32 %v6188_v57, %v6188_v57 }
 0x44d   :  { %1812 = vadd.xlane.f32.xlu2 %v1809_v55  ;;  %1100 = vadd.xlane.f32.xlu1 %v1095_v43 }
 0x44e   :  { %v1099_v5 = vpop.xlane.xlu0 %1098 }
 0x44f   :  { %v1102_v13 = vmul.f32 %v1099_v5, %v5966_v42 }
 0x451   :  { %v6195_v47 = vsub.f32 %v1094_v34, %v1102_v13  ;;  %v5274_v34 = vld [vmem:[#allocation7 + $0x90] sm:$0xff] }
 0x452   :  { %1919 = vmatpush.bf16.msra.mxu2 %v5274_v34  ;;  %v4616_v34 = vld [vmem:[#allocation8 + $0x2c0] sm:$0xf] }
 0x453   :  { %v1106_v59 = vmul.f32 %v6195_v47, %v6195_v47 }
 0x455   :  { %1108 = vadd.xlane.f32.xlu2 %v1106_v59 }
 0x456   :  { %1920 = vmatpush.bf16.msra.mxu2 %v5273_v36  ;;  %v5314_v36 = vld [vmem:[#allocation8 + $0x2cc] sm:$0xf0] }
 0x4b8   :  { %v1811_v56 = vpop.xlane.xlu1 %1810 }
 0x4b9   :  { %v1814_v60 = vmul.f32 %v1811_v56, %v5966_v42  ;;  %v5467_v56 = vld [vmem:[#allocation14 + $0x6] ss:$0 sm:$0xff] }
 0x4bb   :  { %v1816_v61 = vadd.f32 1e-05, %v1814_v60 }
 0x4bd   :  { %5527 = vrsqrt.f32 %v1816_v61  ;;  %vm1824_vm14 = vweird.f32 %v1816_v61 }
 0x4c0   :  { %v1101_v48 = vpop.xlane.xlu1 %1100  ;;  %v1813_v8 = vpop.xlane.xlu2 %1812 }
 0x4c1   :  { %v1103_v54 = vmul.f32 %v1101_v48, %v5966_v42  ;;  %v1815_v10 = vmul.f32 %v1813_v8, %v5966_v42 }
 0x4c3   :  { %v5528_v25 = vpop.eup %5527  ;;  %v6202_v11 = vsub.f32 %v1095_v43, %v1103_v54  ;;  %v1817_v12 = vadd.f32 1e-05, %v1815_v10 }
 0x4c4   :  { %v1819_v15 = vmul.f32 %v5528_v25, %v1816_v61  ;;  %vm1825_vm13 = vweird.f32 %v5528_v25 }
 0x4c5   :  { %5529 = vrsqrt.f32 %v1817_v12  ;;  %v1107_v1 = vmul.f32 %v6202_v11, %v6202_v11  ;;  %vm1826_vm15 = vmor %vm1824_vm14, %vm1825_vm13  ;;  %vm1834_vm1 = vweird.f32 %v1817_v12 }
 0x4c6   :  { %v1820_v45 = vmul.f32 %v5528_v25, %v1819_v15 }
 0x4c7   :  { %1110 = vadd.xlane.f32.xlu0 %v1107_v1 }
 0x4c8   :  { %v1821_v3 = vmul.f32 0.5, %v1820_v45  ;;  %v1109_v9 = vpop.xlane.xlu2 %1108 }
 0x4c9   :  { %v1112_v32 = vmul.f32 %v1109_v9, %v5966_v42  ;;  %v4640_v9 = vld [vmem:[#allocation8 + $0x2e8] sm:$0xf] }
 0x4ca   :  { %v1822_v26 = vsub.f32 1.5, %v1821_v3  ;;  %v4641_v7 = vor.u32 %v5319_v29, %v4640_v9  ;;  %v4554_v9 = vld [vmem:[#allocation8 + $0x250] sm:$0xf0]  ;;  %v4560_v29 = vld [vmem:[#allocation8 + $0x248] sm:$0xf] }
 0x4cb   :  { %v5530_v16 = vpop.eup %5529  ;;  %v1114_v33 = vadd.f32 1e-05, %v1112_v32 }
 0x4cc   :  { %v1823_v2 = vmul.f32 %v5528_v25, %v1822_v26  ;;  %v1829_v49 = vmul.f32 %v5530_v16, %v1817_v12  ;;  %vm1835_vm0 = vweird.f32 %v5530_v16  ;;  %v5470_v26 = vld [vmem:[#allocation14 + $0x2] ss:$0 sm:$0xff] }
 0x4cd   :  { %vm1836_vm2 = vmor %vm1834_vm1, %vm1835_vm0  ;;  %5531 = vrsqrt.f32 %v1114_v33  ;;  %vm1122_vm4 = vweird.f32 %v1114_v33 }
 0x4ce   :  { %v1830_v17 = vmul.f32 %v5530_v16, %v1829_v49  ;;  %v1827_v18 = vsel %vm1826_vm15, %v5528_v25, %v1823_v2  ;;  %v5469_v25 = vld [vmem:[#allocation14 + $0x3] ss:$0 sm:$0xff] }
 0x4cf   :  { %v1838_v40 = vmul.f32 %v1827_v18, %v1806_v39  ;;  %v5272_v39 = vld [vmem:[#allocation7 + $0x80] sm:$0xff] }
 0x4d0   :  { %v1831_v21 = vmul.f32 0.5, %v1830_v17  ;;  %1921 = vmatpush.bf16.msra.mxu2 %v5272_v39  ;;  %v4617_v39 = vor.u32 %v5314_v36, %v4616_v34  ;;  %v4536_v36 = vld [vmem:[#allocation8 + $0x220] sm:$0xf] }
 0x4d1   :  { %v1841_v19 = vmul.f32 %v5465_v23, %v1838_v40 }
 0x4d2   :  { %v1832_v22 = vsub.f32 1.5, %v1831_v21 }
 0x4d3   :  { %v6207_v14 = vadd.f32 %v5466_v30, %v1841_v19  ;;  %v5532_v37 = vpop.eup %5531 }
 0x4d4   :  { %v1833_v27 = vmul.f32 %v5530_v16, %v1832_v22  ;;  %v1117_v35 = vmul.f32 %v5532_v37, %v1114_v33  ;;  %vm1123_vm3 = vweird.f32 %v5532_v37  ;;  %v5317_v33 = vld [vmem:[#allocation8 + $0x2ec] sm:$0xf]  ;;  %2343 = vmatpush.bf16.msrb.mxu2 %v4641_v7 }
 0x4d5   :  { %vm1124_vm5 = vmor %vm1122_vm4, %vm1123_vm3 }
 0x4d6   :  { %v1837_v28 = vsel %vm1836_vm2, %v5530_v16, %v1833_v27  ;;  %v1118_v53 = vmul.f32 %v5532_v37, %v1117_v35  ;;  %v4618_v35 = vld [vmem:[#allocation8 + $0x2d0] sm:$0xf0] }
 0x4d7   :  { %v1839_v50 = vmul.f32 %v1837_v28, %v6188_v57 }
 0x4d8   :  { %v1119_v43 = vmul.f32 0.5, %v1118_v53  ;;  %v4624_v53 = vld [vmem:[#allocation8 + $0x2c8] sm:$0xf] }
 0x4d9   :  { %v1842_v20 = vmul.f32 %v5465_v23, %v1839_v50 }
 0x4da   :  { %v1120_v5 = vsub.f32 1.5, %v1119_v43  ;;  %v5313_v43 = vld [vmem:[#allocation8 + $0x2cc] sm:$0xf] }
 0x4db   :  { %v6209_v31 = vadd.f32 %v5466_v30, %v1842_v20  ;;  %v4632_v30 = vld [vmem:[#allocation8 + $0x2e0] sm:$0xf]  ;;  %v5318_v20 = vld [vmem:[#allocation8 + $0x2ec] sm:$0xf0] }
 0x4dc   :  { %v1121_v59 = vmul.f32 %v5532_v37, %v1120_v5  ;;  %v4626_v5 = vld [vmem:[#allocation8 + $0x2d8] sm:$0xf0] }
 0x4dd   :  { %v1995_v62 = vpack.c.bf16 %v6209_v31, %v6207_v14 }
 0x4de   :  { %v1125_v4 = vsel %vm1124_vm5, %v5532_v37, %v1121_v59  ;;  %v5312_v37 = vld [vmem:[#allocation8 + $0x2c4] sm:$0xf]  ;;  %v4600_v59 = vld [vmem:[#allocation8 + $0x2a0] sm:$0xf] }
 0x4df   :  { %2054 = vmatmul.bf16.vlgmr.msra.gmra.mxu3 %v1995_v62  ;;  %v1136_v51 = vmul.f32 %v1125_v4, %v6195_v47  ;;  %v4633_v62 = vor.u32 %v5318_v20, %v4632_v30  ;;  %v4552_v20 = vld [vmem:[#allocation8 + $0x240] sm:$0xf] }
 0x4e1   :  { %v1139_v63 = vmul.f32 %v5467_v56, %v1136_v51  ;;  %2315 = vmatpush.bf16.msrb.mxu0 %v4633_v62  ;;  %v5311_v51 = vld [vmem:[#allocation8 + $0x2b4] sm:$0xf0]  ;;  %v5296_v62 = vld [vmem:[#allocation8 + $0x244] sm:$0xf] }
 0x4e2   :  { %v4557_v7 = vor.u32 %v5296_v62, %v4554_v9  ;;  %v5471_v62 = vld [vmem:[#allocation14 + $0x9] ss:$0 sm:$0xff] }
 0x4e3   :  { %v1142_v8 = vadd.f32 %v5468_v0, %v1139_v63 }
 0x4e5   :  { %2316 = vmatpush.bf16.msrb.mxu0 %v4617_v39  ;;  %v5292_v39 = vld [vmem:[#allocation8 + $0x224] sm:$0xf] }
 0x53a   :  { %v1111_v41 = vpop.xlane.xlu0 %1110 }
 0x53b   :  { %v1113_v57 = vmul.f32 %v1111_v41, %v5966_v42  ;;  %v5315_v41 = vld [vmem:[#allocation8 + $0x2d4] sm:$0xf0] }
 0x53d   :  { %v1115_v55 = vadd.f32 1e-05, %v1113_v57  ;;  %v4621_v57 = vor.u32 %v5312_v37, %v4618_v35  ;;  %v5294_v37 = vld [vmem:[#allocation8 + $0x22c] sm:$0xf0] }
 0x53f   :  { %5533 = vrsqrt.f32 %v1115_v55  ;;  %vm1132_vm7 = vweird.f32 %v1115_v55 }
 0x545   :  { %v5534_v13 = vpop.eup %5533 }
 0x546   :  { %v1127_v44 = vmul.f32 %v5534_v13, %v1115_v55  ;;  %vm1133_vm6 = vweird.f32 %v5534_v13  ;;  %v4625_v55 = vor.u32 %v5315_v41, %v4624_v53  ;;  %v4537_v41 = vor.u32 %v5294_v37, %v4536_v36  ;;  %v5335_v36 = vld [vmem:[#allocation10 + $0x278] sm:$0xff] }
 0x547   :  { %vm1134_vm8 = vmor %vm1132_vm7, %vm1133_vm6  ;;  %v5343_v37 = vld [vmem:[#allocation10 + $0x2b8] sm:$0xff] }
 0x548   :  { %v1128_v46 = vmul.f32 %v5534_v13, %v1127_v44  ;;  %2344 = vmatpush.bf16.msrb.mxu2 %v4625_v55  ;;  %v5310_v44 = vld [vmem:[#allocation8 + $0x2ac] sm:$0xf0]  ;;  %v4544_v55 = vld [vmem:[#allocation8 + $0x228] sm:$0xf] }
 0x549   :  { %v4601_v4 = vor.u32 %v5310_v44, %v4600_v59 }
 0x54a   :  { %v1129_v52 = vmul.f32 0.5, %v1128_v46  ;;  %v5308_v46 = vld [vmem:[#allocation8 + $0x2a4] sm:$0xf] }
 0x54b   :  { %2317 = vmatpush.bf16.msrb.mxu0 %v4601_v4  ;;  %v4546_v4 = vld [vmem:[#allocation8 + $0x238] sm:$0xf0] }
 0x54c   :  { %v1130_v6 = vsub.f32 1.5, %v1129_v52  ;;  %v4602_v52 = vld [vmem:[#allocation8 + $0x2b0] sm:$0xf0] }
 0x54e   :  { %v1131_v58 = vmul.f32 %v5534_v13, %v1130_v6  ;;  %v4608_v6 = vld [vmem:[#allocation8 + $0x2a8] sm:$0xf] }
 0x550   :  { %v1135_v60 = vsel %vm1134_vm8, %v5534_v13, %v1131_v58  ;;  %v4629_v13 = vor.u32 %v5313_v43, %v4626_v5  ;;  %v4609_v58 = vor.u32 %v5311_v51, %v4608_v6  ;;  %v5295_v43 = vld [vmem:[#allocation8 + $0x234] sm:$0xf0]  ;;  %v5290_v51 = vld [vmem:[#allocation8 + $0x20c] sm:$0xf0] }
 0x551   :  { %v1137_v61 = vmul.f32 %v1135_v60, %v6202_v11  ;;  %v5309_v60 = vld [vmem:[#allocation8 + $0x2ac] sm:$0xf]  ;;  %v4545_v44 = vor.u32 %v5295_v43, %v4544_v55  ;;  %v5350_v55 = vld [vmem:[#allocation10 + $0x2f0] sm:$0xff]  ;;  %v5324_v43 = vld [vmem:[#allocation10 + $0x220] sm:$0xff] }
 0x552   :  { %2345 = vmatpush.bf16.msrb.mxu2 %v4609_v58  ;;  %v4522_v58 = vld [vmem:[#allocation8 + $0x210] sm:$0xf0] }
 0x553   :  { %v1140_v48 = vmul.f32 %v5467_v56, %v1137_v61  ;;  %v4605_v56 = vor.u32 %v5308_v46, %v4602_v52  ;;  %v4610_v61 = vld [vmem:[#allocation8 + $0x2b8] sm:$0xf0]  ;;  %v5293_v46 = vld [vmem:[#allocation8 + $0x22c] sm:$0xf]  ;;  %v4520_v52 = vld [vmem:[#allocation8 + $0x200] sm:$0xf] }
 0x554   :  { %v4613_v63 = vor.u32 %v5309_v60, %v4610_v61  ;;  %v4549_v6 = vor.u32 %v5293_v46, %v4546_v4  ;;  %v5331_v46 = vld [vmem:[#allocation10 + $0x258] sm:$0xff]  ;;  %v5340_v4 = vld [vmem:[#allocation10 + $0x2a0] sm:$0xff] }
 0x555   :  { %v1143_v54 = vadd.f32 %v5468_v0, %v1140_v48  ;;  %v4584_v0 = vld [vmem:[#allocation8 + $0x280] sm:$0xf]  ;;  %v5306_v48 = vld [vmem:[#allocation8 + $0x28c] sm:$0xf0] }
 0x557   :  { %v1863_v10 = vpack.c.bf16 %v1143_v54, %v1142_v8 }
 0x559   :  { %1922 = vmatmul.bf16.vlgmr.msra.gmra.mxu2 %v1863_v10  ;;  %v4586_v10 = vld [vmem:[#allocation8 + $0x290] sm:$0xf0] }
 0x562   :  { %v2055_v12 = vpop.f32.mrf.mxu3 }
 0x563   :  { %v2056_v15 = vadd.f32 %v5469_v25, %v2055_v12  ;;  %v5307_v12 = vld [vmem:[#allocation8 + $0x294] sm:$0xf0] }
 0x565   :  { %v2060_v1 = vadd.f32 %v2056_v15, %v1142_v8  ;;  %v5304_v8 = vld [vmem:[#allocation8 + $0x284] sm:$0xf] }
 0x566   :  { %v4589_v15 = vor.u32 %v5304_v8, %v4586_v10  ;;  %v5291_v8 = vld [vmem:[#allocation8 + $0x214] sm:$0xf0]  ;;  %v5289_v10 = vld [vmem:[#allocation8 + $0x20c] sm:$0xf] }
 0x567   :  { %2064 = vadd.xlane.f32.xlu1 %v2060_v1 }
 0x56a   :  { %v2057_v47 = vpop.f32.mrf.mxu3 }
 0x56b   :  { %v2058_v45 = vadd.f32 %v5469_v25, %v2057_v47  ;;  %v4592_v25 = vld [vmem:[#allocation8 + $0x288] sm:$0xf]  ;;  %v5305_v47 = vld [vmem:[#allocation8 + $0x28c] sm:$0xf] }
 0x56d   :  { %v2061_v3 = vadd.f32 %v2058_v45, %v1143_v54  ;;  %v4585_v54 = vor.u32 %v5306_v48, %v4584_v0  ;;  %v4594_v45 = vld [vmem:[#allocation8 + $0x298] sm:$0xf0]  ;;  %v4528_v48 = vld [vmem:[#allocation8 + $0x208] sm:$0xf] }
 0x56f   :  { %2066 = vadd.xlane.f32.xlu2 %v2061_v3  ;;  %2318 = vmatpush.bf16.msrb.mxu0 %v4585_v54  ;;  %v4529_v54 = vor.u32 %v5291_v8, %v4528_v48  ;;  %v5338_v48 = vld [vmem:[#allocation10 + $0x290] sm:$0xff] }
 0x570   :  { %v5346_v8 = vld [vmem:[#allocation10 + $0x2d0] sm:$0xff] }
 0x5da   :  { %v2065_v16 = vpop.xlane.xlu1 %2064 }
 0x5db   :  { %v2068_v11 = vmul.f32 %v2065_v16, %v5966_v42  ;;  %v5302_v16 = vld [vmem:[#allocation8 + $0x26c] sm:$0xf0] }
 0x5dc   :  { %v1923_v2 = vpop.f32.mrf.mxu2 }
 0x5dd   :  { %v6218_v49 = vsub.f32 %v2060_v1, %v2068_v11  ;;  %v1924_v17 = vadd.f32 %v5470_v26, %v1923_v2  ;;  %v4593_v1 = vor.u32 %v5307_v12, %v4592_v25  ;;  %v5300_v11 = vld [vmem:[#allocation8 + $0x264] sm:$0xf]  ;;  %v4530_v25 = vld [vmem:[#allocation8 + $0x218] sm:$0xf0] }
 0x5df   :  { %v2072_v18 = vmul.f32 %v6218_v49, %v6218_v49  ;;  %v6223_v21 = vadd.f32 %v1924_v17, %v6207_v14  ;;  %v5316_v14 = vld [vmem:[#allocation8 + $0x2e4] sm:$0xf]  ;;  %2346 = vmatpush.bf16.msrb.mxu2 %v4593_v1  ;;  %v4570_v17 = vld [vmem:[#allocation8 + $0x270] sm:$0xf0] }
 0x5e0   :  { %v4637_v32 = vor.u32 %v5316_v14, %v4634_v24  ;;  %v5298_v14 = vld [vmem:[#allocation8 + $0x24c] sm:$0xf0] }
 0x5e1   :  { %2074 = vadd.xlane.f32.xlu0 %v2072_v18  ;;  %1932 = vadd.xlane.f32.xlu2 %v6223_v21  ;;  %v4576_v18 = vld [vmem:[#allocation8 + $0x268] sm:$0xf]  ;;  %v4553_v24 = vor.u32 %v5298_v14, %v4552_v20 }
 0x5e2   :  { %v2067_v22 = vpop.xlane.xlu2 %2066  ;;  %2329 = vmatpush.bf16.msrb.mxu1 %v4637_v32  ;;  %v5299_v32 = vld [vmem:[#allocation8 + $0x254] sm:$0xf0] }
 0x5e3   :  { %v2069_v40 = vmul.f32 %v2067_v22, %v5966_v42  ;;  %v5303_v22 = vld [vmem:[#allocation8 + $0x274] sm:$0xf0] }
 0x5e4   :  { %v1925_v23 = vpop.f32.mrf.mxu2 }
 0x5e5   :  { %v6227_v27 = vsub.f32 %v2061_v3, %v2069_v40  ;;  %v1926_v28 = vadd.f32 %v5470_v26, %v1925_v23  ;;  %v4597_v3 = vor.u32 %v5305_v47, %v4594_v45  ;;  %v4568_v26 = vld [vmem:[#allocation8 + $0x260] sm:$0xf]  ;;  %v4573_v40 = vor.u32 %v5300_v11, %v4570_v17 }
 0x5e6   :  { %2330 = vmatpush.bf16.msrb.mxu1 %v4621_v57  ;;  %v4569_v2 = vor.u32 %v5302_v16, %v4568_v26  ;;  %v4577_v23 = vor.u32 %v5303_v22, %v4576_v18  ;;  %v4538_v57 = vld [vmem:[#allocation8 + $0x230] sm:$0xf0] }
 0x5e7   :  { %v6230_v50 = vadd.f32 %v1926_v28, %v6209_v31  ;;  %v2073_v19 = vmul.f32 %v6227_v27, %v6227_v27  ;;  %v4645_v31 = vor.u32 %v5317_v33, %v4642_v38  ;;  %v5301_v28 = vld [vmem:[#allocation8 + $0x26c] sm:$0xf]  ;;  %v4561_v33 = vor.u32 %v5299_v32, %v4560_v29 }
 0x5e8   :  { %2319 = vmatpush.bf16.msrb.mxu0 %v4569_v2  ;;  %2347 = vmatpush.bf16.msrb.mxu2 %v4577_v23  ;;  %v5297_v38 = vld [vmem:[#allocation8 + $0x24c] sm:$0xf]  ;;  %v4541_v59 = vor.u32 %v5292_v39, %v4538_v57  ;;  %v5351_v39 = vld [vmem:[#allocation10 + $0x2f8] sm:$0xff]  ;;  %v5342_v57 = vld [vmem:[#allocation10 + $0x2b0] sm:$0xff] }
 0x5e9   :  { %1934 = vadd.xlane.f32.xlu0 %v6230_v50  ;;  %2076 = vadd.xlane.f32.xlu1 %v2073_v19  ;;  %v4578_v19 = vld [vmem:[#allocation8 + $0x278] sm:$0xf0] }
 0x5ea   :  { %2357 = vmatpush.bf16.msrb.mxu3 %v4645_v31  ;;  %2331 = vmatpush.bf16.msrb.mxu1 %v4605_v56  ;;  %v4581_v30 = vor.u32 %v5301_v28, %v4578_v19  ;;  %v4562_v31 = vld [vmem:[#allocation8 + $0x258] sm:$0xf0]  ;;  %v5288_v56 = vld [vmem:[#allocation8 + $0x204] sm:$0xf] }
 0x5eb   :  { %v4565_v34 = vor.u32 %v5297_v38, %v4562_v31  ;;  %v4525_v0 = vor.u32 %v5288_v56, %v4522_v58  ;;  %v5339_v56 = vld [vmem:[#allocation10 + $0x298] sm:$0xff] }
 0x5ec   :  { %2320 = vmatpush.bf16.msrb.mxu0 %v4553_v24  ;;  %2348 = vmatpush.bf16.msrb.mxu2 %v4561_v33  ;;  %v5347_v58 = vld [vmem:[#allocation10 + $0x2d8] sm:$0xff] }
 0x5ee   :  { %2358 = vmatpush.bf16.msrb.mxu3 %v4629_v13  ;;  %2332 = vmatpush.bf16.msrb.mxu1 %v4589_v15  ;;  %v4533_v15 = vor.u32 %v5289_v10, %v4530_v25  ;;  %v5320_v10 = vld [vmem:[#allocation10 + $0x200] sm:$0xff] }
 0x5ef   :  { %v5328_v25 = vld [vmem:[#allocation10 + $0x240] sm:$0xff] }
 0x5f0   :  { %2321 = vmatpush.bf16.msrb.mxu0 %v4537_v41  ;;  %2349 = vmatpush.bf16.msrb.mxu2 %v4545_v44  ;;  %v5333_v41 = vld [vmem:[#allocation10 + $0x268] sm:$0xff]  ;;  %v5323_v44 = vld [vmem:[#allocation10 + $0x218] sm:$0xff] }
 0x5f2   :  { %2359 = vmatpush.bf16.msrb.mxu3 %v4613_v63  ;;  %2333 = vmatpush.bf16.msrb.mxu1 %v4573_v40  ;;  %v4521_v63 = vor.u32 %v5290_v51, %v4520_v52  ;;  %v5348_v52 = vld [vmem:[#allocation10 + $0x2e0] sm:$0xff]  ;;  %v5330_v51 = vld [vmem:[#allocation10 + $0x250] sm:$0xff] }
 0x5f4   :  { %2322 = vmatpush.bf16.msrb.mxu0 %v4521_v63  ;;  %2350 = vmatpush.bf16.msrb.mxu2 %v4529_v54  ;;  %v5329_v63 = vld [vmem:[#allocation10 + $0x248] sm:$0xff] }
 0x5f6   :  { %2360 = vmatpush.bf16.msrb.mxu3 %v4597_v3  ;;  %2334 = vmatpush.bf16.msrb.mxu1 %v4557_v7  ;;  %v5472_v7 = vld [vmem:[#allocation14 + $0x11] ss:$0 sm:$0xff] }
 0x5f8   :  { %2734 = vmatpush.bf16.msra.mxu2 %v5343_v37 }
 0x5fa   :  { %2361 = vmatpush.bf16.msrb.mxu3 %v4581_v30  ;;  %2335 = vmatpush.bf16.msrb.mxu1 %v4541_v59  ;;  %v5349_v59 = vld [vmem:[#allocation10 + $0x2e8] sm:$0xff] }
 0x5fc   :  { %2735 = vmatpush.bf16.msra.mxu2 %v5342_v57  ;;  %v5377_v57 = vld [vmem:[#allocation8 + $0x3cc] sm:$0xf] }
 0x5fe   :  { %2362 = vmatpush.bf16.msrb.mxu3 %v4565_v34  ;;  %2336 = vmatpush.bf16.msrb.mxu1 %v4525_v0 }
 0x602   :  { %2363 = vmatpush.bf16.msrb.mxu3 %v4549_v6  ;;  %2720 = vmatpush.bf16.msra.mxu1 %v5335_v36  ;;  %v5322_v6 = vld [vmem:[#allocation10 + $0x210] sm:$0xff] }
 0x606   :  { %2364 = vmatpush.bf16.msrb.mxu3 %v4533_v15 }
 0x60a   :  { %2748 = vmatpush.bf16.msra.mxu3 %v5351_v39 }
 0x60e   :  { %2749 = vmatpush.bf16.msra.mxu3 %v5350_v55 }
 0x612   :  { %2750 = vmatpush.bf16.msra.mxu3 %v5349_v59 }
 0x616   :  { %2751 = vmatpush.bf16.msra.mxu3 %v5348_v52 }
 0x61a   :  { %2752 = vmatpush.bf16.msra.mxu3 %v5347_v58  ;;  %v4842_v58 = vld [vmem:[#allocation8 + $0x390] sm:$0xf0] }
 0x61e   :  { %2753 = vmatpush.bf16.msra.mxu3 %v5346_v8 }
 0x654   :  { %v2075_v35 = vpop.xlane.xlu0 %2074  ;;  %v1933_v53 = vpop.xlane.xlu2 %1932 }
 0x655   :  { %v2078_v5 = vmul.f32 %v2075_v35, %v5966_v42  ;;  %v1936_v13 = vmul.f32 %v1933_v53, %v5966_v42  ;;  %v5334_v35 = vld [vmem:[#allocation10 + $0x270] sm:$0xff]  ;;  %v5325_v53 = vld [vmem:[#allocation10 + $0x228] sm:$0xff] }
 0x656   :  { %2721 = vmatpush.bf16.msra.mxu1 %v5334_v35 }
 0x657   :  { %v2080_v60 = vadd.f32 1e-05, %v2078_v5  ;;  %v6238_v61 = vsub.f32 %v6223_v21, %v1936_v13  ;;  %v5332_v5 = vld [vmem:[#allocation10 + $0x260] sm:$0xff]  ;;  %v5341_v13 = vld [vmem:[#allocation10 + $0x2a8] sm:$0xff] }
 0x658   :  { %2736 = vmatpush.bf16.msra.mxu2 %v5341_v13 }
 0x659   :  { %5535 = vrsqrt.f32 %v2080_v60  ;;  %v1940_v12 = vmul.f32 %v6238_v61, %v6238_v61  ;;  %vm2088_vm10 = vweird.f32 %v2080_v60 }
 0x65a   :  { %2722 = vmatpush.bf16.msra.mxu1 %v5333_v41  ;;  %v5379_v41 = vld [vmem:[#allocation8 + $0x3d4] sm:$0xf0] }
 0x65b   :  { %1942 = vadd.xlane.f32.xlu1 %v1940_v12  ;;  %v4888_v12 = vld [vmem:[#allocation8 + $0x3e0] sm:$0xf] }
 0x65c   :  { %v1935_v21 = vpop.xlane.xlu0 %1934  ;;  %v2077_v1 = vpop.xlane.xlu1 %2076  ;;  %2737 = vmatpush.bf16.msra.mxu2 %v5340_v4  ;;  %v5368_v4 = vld [vmem:[#allocation8 + $0x384] sm:$0xf] }
 0x65d   :  { %v1937_v47 = vmul.f32 %v1935_v21, %v5966_v42  ;;  %v2079_v45 = vmul.f32 %v2077_v1, %v5966_v42  ;;  %v5382_v21 = vld [vmem:[#allocation8 + $0x3ec] sm:$0xf0]  ;;  %v5380_v1 = vld [vmem:[#allocation8 + $0x3e4] sm:$0xf] }
 0x65e   :  { %2723 = vmatpush.bf16.msra.mxu1 %v5332_v5 }
 0x65f   :  { %v5536_v3 = vpop.eup %5535  ;;  %v6245_v26 = vsub.f32 %v6230_v50, %v1937_v47  ;;  %v2081_v16 = vadd.f32 1e-05, %v2079_v45  ;;  %v4890_v47 = vld [vmem:[#allocation8 + $0x3f0] sm:$0xf0] }
 0x660   :  { %v2083_v11 = vmul.f32 %v5536_v3, %v2080_v60  ;;  %vm2089_vm9 = vweird.f32 %v5536_v3  ;;  %2738 = vmatpush.bf16.msra.mxu2 %v5339_v56  ;;  %v5321_v60 = vld [vmem:[#allocation10 + $0x208] sm:$0xff] }
 0x661   :  { %5537 = vrsqrt.f32 %v2081_v16  ;;  %v1941_v2 = vmul.f32 %v6245_v26, %v6245_v26  ;;  %vm2090_vm11 = vmor %vm2088_vm10, %vm2089_vm9  ;;  %vm2098_vm13 = vweird.f32 %v2081_v16 }
 0x662   :  { %v2084_v17 = vmul.f32 %v5536_v3, %v2083_v11  ;;  %2724 = vmatpush.bf16.msra.mxu1 %v5331_v46  ;;  %v5337_v11 = vld [vmem:[#allocation10 + $0x288] sm:$0xff]  ;;  %v5370_v46 = vld [vmem:[#allocation8 + $0x38c] sm:$0xf0] }
 0x663   :  { %1944 = vadd.xlane.f32.xlu2 %v1941_v2  ;;  %v5345_v2 = vld [vmem:[#allocation10 + $0x2c8] sm:$0xff] }
 0x664   :  { %v2085_v18 = vmul.f32 0.5, %v2084_v17  ;;  %2739 = vmatpush.bf16.msra.mxu2 %v5338_v48  ;;  %v6259_v17 = vld [vmem:[#allocation16 + $0x2] ss:$4 sm:$0xf]  ;;  %2754 = vmatpush.bf16.msra.mxu3 %v5345_v2 }
 0x665   :  { %v2147_v36 = vperm.slane %v6259_v17, 0  ;;  %v2148_v37 = vperm.slane %v6259_v17, 1  ;;  %v5373_v48 = vld [vmem:[#allocation8 + $0x3ac] sm:$0xf] }
 0x666   :  { %v2086_v22 = vsub.f32 1.5, %v2085_v18  ;;  %2725 = vmatpush.bf16.msra.mxu1 %v5330_v51  ;;  %v4872_v18 = vld [vmem:[#allocation8 + $0x3c0] sm:$0xf]  ;;  %v2149_v51 = vperm.slane %v6259_v17, 2 }
 0x667   :  { %v5538_v40 = vpop.eup %5537 }
 0x668   :  { %v2087_v23 = vmul.f32 %v5536_v3, %v2086_v22  ;;  %v2093_v28 = vmul.f32 %v5538_v40, %v2081_v16  ;;  %vm2099_vm12 = vweird.f32 %v5538_v40  ;;  %v4893_v16 = vor.u32 %v5380_v1, %v4890_v47  ;;  %v5378_v22 = vld [vmem:[#allocation8 + $0x3cc] sm:$0xf0]  ;;  %2740 = vmatpush.bf16.msra.mxu2 %v5337_v11  ;;  %v4824_v47 = vld [vmem:[#allocation8 + $0x360] sm:$0xf] }
 0x669   :  { %vm2100_vm14 = vmor %vm2098_vm13, %vm2099_vm12 }
 0x66a   :  { %v2094_v19 = vmul.f32 %v5538_v40, %v2093_v28  ;;  %v2091_v30 = vsel %vm2090_vm11, %v5536_v3, %v2087_v23  ;;  %2726 = vmatpush.bf16.msra.mxu1 %v5329_v63  ;;  %v4889_v3 = vor.u32 %v5382_v21, %v4888_v12  ;;  %v4873_v28 = vor.u32 %v5378_v22, %v4872_v18  ;;  %v4864_v63 = vld [vmem:[#allocation8 + $0x3a8] sm:$0xf]  ;;  %v4826_v18 = vld [vmem:[#allocation8 + $0x370] sm:$0xf0] }
 0x66b   :  { %v2102_v14 = vmul.f32 %v2091_v30, %v6218_v49  ;;  %v5327_v49 = vld [vmem:[#allocation10 + $0x238] sm:$0xff] }
 0x66c   :  { %v2095_v50 = vmul.f32 0.5, %v2094_v19  ;;  %2706 = vmatpush.bf16.msra.mxu0 %v5327_v49  ;;  %v4874_v19 = vld [vmem:[#allocation8 + $0x3d0] sm:$0xf0]  ;;  %v5372_v49 = vld [vmem:[#allocation8 + $0x3a4] sm:$0xf] }
 0x66d   :  { %v2105_v32 = vmul.f32 %v5471_v62, %v2102_v14  ;;  %v5344_v14 = vld [vmem:[#allocation10 + $0x2c0] sm:$0xff] }
 0x66e   :  { %v2096_v20 = vsub.f32 1.5, %v2095_v50  ;;  %2727 = vmatpush.bf16.msra.mxu1 %v5328_v25  ;;  %2755 = vmatpush.bf16.msra.mxu3 %v5344_v14  ;;  %v2150_v25 = vperm.slane %v6259_v17, 3 }
 0x66f   :  { %v6251_v38 = vadd.f32 %v5472_v7, %v2105_v32 }
 0x670   :  { %v2097_v24 = vmul.f32 %v5538_v40, %v2096_v20  ;;  %v5336_v20 = vld [vmem:[#allocation10 + $0x280] sm:$0xff] }
 0x671   :  { %2741 = vmatpush.bf16.msra.mxu2 %v5336_v20 }
 0x672   :  { %v2101_v9 = vsel %vm2100_vm14, %v5538_v40, %v2097_v24  ;;  %v5376_v40 = vld [vmem:[#allocation8 + $0x3c4] sm:$0xf]  ;;  %v5383_v24 = vld [vmem:[#allocation8 + $0x3f4] sm:$0xf0] }
 0x673   :  { %v2103_v29 = vmul.f32 %v2101_v9, %v6227_v27  ;;  %v5326_v27 = vld [vmem:[#allocation10 + $0x230] sm:$0xff]  ;;  %v4877_v50 = vor.u32 %v5376_v40, %v4874_v19  ;;  %v5381_v9 = vld [vmem:[#allocation8 + $0x3ec] sm:$0xf]  ;;  %v5371_v19 = vld [vmem:[#allocation8 + $0x394] sm:$0xf0] }
 0x674   :  { %2707 = vmatpush.bf16.msra.mxu0 %v5326_v27  ;;  %v4858_v27 = vld [vmem:[#allocation8 + $0x3b0] sm:$0xf0] }
 0x675   :  { %v2106_v33 = vmul.f32 %v5471_v62, %v2103_v29  ;;  %v4896_v62 = vld [vmem:[#allocation8 + $0x3e8] sm:$0xf]  ;;  %v4898_v29 = vld [vmem:[#allocation8 + $0x3f8] sm:$0xf0]  ;;  %v4861_v35 = vor.u32 %v5372_v49, %v4858_v27  ;;  %v4808_v27 = vld [vmem:[#allocation8 + $0x340] sm:$0xf] }
 0x676   :  { %v4897_v32 = vor.u32 %v5383_v24, %v4896_v62 }
 0x677   :  { %v6253_v31 = vadd.f32 %v5472_v7, %v2106_v33  ;;  %v4901_v7 = vor.u32 %v5381_v9, %v4898_v29  ;;  %v4856_v33 = vld [vmem:[#allocation8 + $0x3a0] sm:$0xf] }
 0x678   :  { %2708 = vmatpush.bf16.msra.mxu0 %v5325_v53  ;;  %v4880_v53 = vld [vmem:[#allocation8 + $0x3c8] sm:$0xf] }
 0x679   :  { %v2143_v34 = vpack.c.bf16 %v6253_v31, %v6251_v38  ;;  %v4881_v55 = vor.u32 %v5379_v41, %v4880_v53 }
 0x67b   :  { %2323 = vmatmul.bf16.vlgmr.msrb.gmra.mxu0 %v2143_v34  ;;  %2337 = vmatmul.bf16.vlgmr.msrb.gmra.mxu1 %v2143_v34 }
 0x67c   :  { %2351 = vmatmul.bf16.vlgmr.msrb.gmra.mxu2 %v2143_v34  ;;  %2365 = vmatmul.bf16.vlgmr.msrb.gmra.mxu3 %v2143_v34  ;;  %v5374_v34 = vld [vmem:[#allocation8 + $0x3ac] sm:$0xf0] }
 0x67d   :  { %2709 = vmatpush.bf16.msra.mxu0 %v5324_v43  ;;  %3031 = vmatpush.bf16.msrb.mxu1 %v4893_v16  ;;  %v4857_v39 = vor.u32 %v5374_v34, %v4856_v33  ;;  %v4882_v43 = vld [vmem:[#allocation8 + $0x3d8] sm:$0xf0] }
 0x67e   :  { %3045 = vmatpush.bf16.msrb.mxu2 %v4897_v32  ;;  %3059 = vmatpush.bf16.msrb.mxu3 %v4901_v7  ;;  %v4885_v59 = vor.u32 %v5377_v57, %v4882_v43  ;;  %v4850_v32 = vld [vmem:[#allocation8 + $0x398] sm:$0xf0]  ;;  %v5360_v43 = vld [vmem:[#allocation8 + $0x344] sm:$0xf] }
 0x681   :  { %2710 = vmatpush.bf16.msra.mxu0 %v5323_v44  ;;  %3032 = vmatpush.bf16.msrb.mxu1 %v4877_v50  ;;  %v4840_v44 = vld [vmem:[#allocation8 + $0x380] sm:$0xf]  ;;  %v5369_v50 = vld [vmem:[#allocation8 + $0x38c] sm:$0xf] }
 0x682   :  { %v4841_v56 = vor.u32 %v5370_v46, %v4840_v44  ;;  %3046 = vmatpush.bf16.msrb.mxu2 %v4881_v55  ;;  %3060 = vmatpush.bf16.msrb.mxu3 %v4885_v59  ;;  %v4832_v46 = vld [vmem:[#allocation8 + $0x368] sm:$0xf] }
 0x685   :  { %2711 = vmatpush.bf16.msra.mxu0 %v5322_v6  ;;  %3033 = vmatpush.bf16.msrb.mxu1 %v4861_v35  ;;  %v5362_v35 = vld [vmem:[#allocation8 + $0x34c] sm:$0xf0] }
 0x686   :  { %v4809_v44 = vor.u32 %v5362_v35, %v4808_v27  ;;  %v4776_v35 = vld [vmem:[#allocation8 + $0x300] sm:$0xf] }
 0x689   :  { %2712 = vmatpush.bf16.msra.mxu0 %v5321_v60  ;;  %v4845_v60 = vor.u32 %v5368_v4, %v4842_v58  ;;  %v5367_v4 = vld [vmem:[#allocation8 + $0x374] sm:$0xf0] }
 0x68b   :  { %3034 = vmatpush.bf16.msrb.mxu1 %v4845_v60 }
 0x68d   :  { %2713 = vmatpush.bf16.msra.mxu0 %v5320_v10 }
 0x691   :  { %3017 = vmatpush.bf16.msrb.mxu0 %v4889_v3  ;;  %v5364_v3 = vld [vmem:[#allocation8 + $0x364] sm:$0xf] }
 0x692   :  { %v4829_v40 = vor.u32 %v5364_v3, %v4826_v18 }
 0x694   :  { %3035 = vmatpush.bf16.msrb.mxu1 %v4829_v40 }
 0x695   :  { %3018 = vmatpush.bf16.msrb.mxu0 %v4873_v28  ;;  %v4848_v28 = vld [vmem:[#allocation8 + $0x388] sm:$0xf] }
 0x696   :  { %v4849_v29 = vor.u32 %v5371_v19, %v4848_v28  ;;  %v5361_v19 = vld [vmem:[#allocation8 + $0x34c] sm:$0xf] }
 0x699   :  { %3019 = vmatpush.bf16.msrb.mxu0 %v4857_v39  ;;  %v4853_v39 = vor.u32 %v5369_v50, %v4850_v32  ;;  %v4818_v32 = vld [vmem:[#allocation8 + $0x358] sm:$0xf0] }
 0x69d   :  { %3020 = vmatpush.bf16.msrb.mxu0 %v4841_v56  ;;  %v5365_v56 = vld [vmem:[#allocation8 + $0x36c] sm:$0xf] }
 0x6ce   :  { %v1943_v0 = vpop.xlane.xlu1 %1942 }
 0x6cf   :  { %v1946_v15 = vmul.f32 %v1943_v0, %v5966_v42  ;;  %v5375_v0 = vld [vmem:[#allocation8 + $0x3b4] sm:$0xf0] }
 0x6d0   :  { %v4865_v12 = vor.u32 %v5375_v0, %v4864_v63  ;;  %v4834_v63 = vld [vmem:[#allocation8 + $0x378] sm:$0xf0] }
 0x6d1   :  { %v6261_v23 = vadd.f32 1e-05, %v1946_v15  ;;  %v4866_v15 = vld [vmem:[#allocation8 + $0x3b8] sm:$0xf0]  ;;  %v4837_v3 = vor.u32 %v5365_v56, %v4834_v63 }
 0x6d2   :  { %v4869_v1 = vor.u32 %v5373_v48, %v4866_v15  ;;  %3047 = vmatpush.bf16.msrb.mxu2 %v4865_v12  ;;  %v4792_v12 = vld [vmem:[#allocation8 + $0x320] sm:$0xf]  ;;  %v5358_v15 = vld [vmem:[#allocation8 + $0x32c] sm:$0xf0] }
 0x6d3   :  { %5539 = vrsqrt.f32 %v6261_v23  ;;  %v4793_v28 = vor.u32 %v5358_v15, %v4792_v12  ;;  %vm1956_vm2 = vweird.f32 %v6261_v23 }
 0x6d4   :  { %3061 = vmatpush.bf16.msrb.mxu3 %v4869_v1  ;;  %v5356_v1 = vld [vmem:[#allocation8 + $0x324] sm:$0xf] }
 0x6d6   :  { %v1945_v54 = vpop.xlane.xlu2 %1944  ;;  %3048 = vmatpush.bf16.msrb.mxu2 %v4849_v29 }
 0x6d7   :  { %v1947_v45 = vmul.f32 %v1945_v54, %v5966_v42 }
 0x6d8   :  { %3062 = vmatpush.bf16.msrb.mxu3 %v4853_v39 }
 0x6d9   :  { %v6263_v30 = vadd.f32 1e-05, %v1947_v45  ;;  %v6278_v8 = vpop.eup %5539  ;;  %v5366_v45 = vld [vmem:[#allocation8 + $0x36c] sm:$0xf0] }
 0x6da   :  { %v4825_v2 = vor.u32 %v5366_v45, %v4824_v47  ;;  %v6291_v22 = vmul.f32 %v6278_v8, %v6261_v23  ;;  %vm1957_vm0 = vweird.f32 %v6278_v8 }
 0x6db   :  { %5541 = vrsqrt.f32 %v6263_v30  ;;  %vm1966_vm1 = vweird.f32 %v6263_v30  ;;  %vm1958_vm4 = vmor %vm1956_vm2, %vm1957_vm0 }
 0x6dc   :  { %3021 = vmatpush.bf16.msrb.mxu0 %v4825_v2  ;;  %v5363_v2 = vld [vmem:[#allocation8 + $0x354] sm:$0xf0]  ;;  %3063 = vmatpush.bf16.msrb.mxu3 %v4837_v3 }
 0x6e0   :  { %3022 = vmatpush.bf16.msrb.mxu0 %v4809_v44  ;;  %v4778_v44 = vld [vmem:[#allocation8 + $0x310] sm:$0xf0] }
 0x6e1   :  { %v6285_v21 = vpop.eup %5541 }
 0x6e2   :  { %v6295_v20 = vmul.f32 %v6285_v21, %v6263_v30  ;;  %vm1967_vm15 = vweird.f32 %v6285_v21 }
 0x6e3   :  { %vm1968_vm3 = vmor %vm1966_vm1, %vm1967_vm15 }
 0x6e4   :  { %3023 = vmatpush.bf16.msrb.mxu0 %v4793_v28  ;;  %v5353_v28 = vld [vmem:[#allocation8 + $0x30c] sm:$0xf] }
 0x6f8   :  { %v2324_v5 = vpop.f32.mrf.mxu0  ;;  %v2338_v13 = vpop.f32.mrf.mxu1 }
 0x6f9   :  { %v6271_v52 = vadd.f32 %v2324_v5, %v2147_v36  ;;  %v6275_v6 = vadd.f32 %v2338_v13, %v2148_v37  ;;  %v4810_v5 = vld [vmem:[#allocation8 + $0x350] sm:$0xf0] }
 0x6fb   :  { %v2371_v54 = vmul.f32 %v6271_v52, %v6271_v52  ;;  %v2372_v10 = vmul.f32 %v6275_v6, %v6275_v6 }
 0x6fd   :  { %v2379_v16 = vmul.f32 %v2371_v54, %v6271_v52  ;;  %v2380_v11 = vmul.f32 %v2372_v10, %v6275_v6  ;;  %v4813_v54 = vor.u32 %v5360_v43, %v4810_v5  ;;  %v4833_v10 = vor.u32 %v5367_v4, %v4832_v46  ;;  %v4800_v46 = vld [vmem:[#allocation8 + $0x328] sm:$0xf]  ;;  %v5359_v4 = vld [vmem:[#allocation8 + $0x334] sm:$0xf0] }
 0x6ff   :  { %v2387_v14 = vmul.f32 0.044715, %v2379_v16  ;;  %v2388_v62 = vmul.f32 0.044715, %v2380_v11  ;;  %v2352_v24 = vpop.f32.mrf.mxu2  ;;  %v2366_v9 = vpop.f32.mrf.mxu3  ;;  %v4794_v16 = vld [vmem:[#allocation8 + $0x330] sm:$0xf0]  ;;  %3036 = vmatpush.bf16.msrb.mxu1 %v4813_v54  ;;  %3049 = vmatpush.bf16.msrb.mxu2 %v4833_v10  ;;  %v1962_v10 = vmul.f32 %v6285_v21, %v6295_v20 }
 0x700   :  { %v6299_v7 = vadd.f32 %v2352_v24, %v2149_v51  ;;  %v6303_v33 = vadd.f32 %v2366_v9, %v2150_v25  ;;  %v2326_v34 = vpop.f32.mrf.mxu0  ;;  %v2340_v49 = vpop.f32.mrf.mxu1  ;;  %v4816_v11 = vld [vmem:[#allocation8 + $0x348] sm:$0xf]  ;;  %v4797_v9 = vor.u32 %v5356_v1, %v4794_v16  ;;  %v5355_v20 = vld [vmem:[#allocation8 + $0x314] sm:$0xf0] }
 0x701   :  { %v2395_v53 = vadd.f32 %v2387_v14, %v6271_v52  ;;  %v2396_v41 = vadd.f32 %v2388_v62, %v6275_v6  ;;  %v6309_v57 = vadd.f32 %v2326_v34, %v2147_v36  ;;  %v6313_v55 = vadd.f32 %v2340_v49, %v2148_v37  ;;  %v4784_v16 = vld [vmem:[#allocation8 + $0x308] sm:$0xf] }
 0x702   :  { %v2373_v13 = vmul.f32 %v6299_v7, %v6299_v7  ;;  %v2374_v59 = vmul.f32 %v6303_v33, %v6303_v33  ;;  %v4817_v29 = vor.u32 %v5363_v2, %v4816_v11  ;;  %v1963_v11 = vmul.f32 0.5, %v1962_v10 }
 0x703   :  { %v2403_v36 = vmul.f32 0.7978846, %v2395_v53  ;;  %v2404_v58 = vmul.f32 0.7978846, %v2396_v41  ;;  %v2375_v37 = vmul.f32 %v6309_v57, %v6309_v57  ;;  %v2376_v60 = vmul.f32 %v6313_v55, %v6313_v55  ;;  %v5354_v53 = vld [vmem:[#allocation8 + $0x30c] sm:$0xf0]  ;;  %3037 = vmatpush.bf16.msrb.mxu1 %v4797_v9 }
 0x704   :  { %v2381_v0 = vmul.f32 %v2373_v13, %v6299_v7  ;;  %v2382_v48 = vmul.f32 %v2374_v59, %v6303_v33  ;;  %v5352_v41 = vld [vmem:[#allocation8 + $0x304] sm:$0xf]  ;;  %v4821_v13 = vor.u32 %v5361_v19, %v4818_v32  ;;  %v4777_v59 = vor.u32 %v5354_v53, %v4776_v35  ;;  %3050 = vmatpush.bf16.msrb.mxu2 %v4817_v29  ;;  %v4786_v19 = vld [vmem:[#allocation8 + $0x318] sm:$0xf0] }
 0x705   :  { %5543 = vtanh.f32 %v2403_v36  ;;  %v2383_v47 = vmul.f32 %v2375_v37, %v6309_v57  ;;  %v2384_v45 = vmul.f32 %v2376_v60, %v6313_v55  ;;  %v5357_v36 = vld [vmem:[#allocation8 + $0x32c] sm:$0xf]  ;;  %v4781_v63 = vor.u32 %v5352_v41, %v4778_v44 }
 0x706   :  { %5545 = vtanh.f32 %v2404_v58  ;;  %v2389_v18 = vmul.f32 0.044715, %v2381_v0  ;;  %v2390_v40 = vmul.f32 0.044715, %v2382_v48  ;;  %3064 = vmatpush.bf16.msrb.mxu3 %v4821_v13  ;;  %v4801_v0 = vor.u32 %v5359_v4, %v4800_v46  ;;  %v4802_v48 = vld [vmem:[#allocation8 + $0x338] sm:$0xf0]  ;;  %3024 = vmatpush.bf16.msrb.mxu0 %v4777_v59 }
 0x707   :  { %v2391_v50 = vmul.f32 0.044715, %v2383_v47  ;;  %v2392_v14 = vmul.f32 0.044715, %v2384_v45  ;;  %v2354_v62 = vpop.f32.mrf.mxu2  ;;  %v2368_v24 = vpop.f32.mrf.mxu3  ;;  %v4805_v1 = vor.u32 %v5357_v36, %v4802_v48  ;;  %v1952_v47 = vmul.f32 %v6278_v8, %v6291_v22  ;;  %3038 = vmatpush.bf16.msrb.mxu1 %v4781_v63 }
 0x708   :  { %v2397_v34 = vadd.f32 %v2389_v18, %v6299_v7  ;;  %v2398_v49 = vadd.f32 %v2390_v40, %v6303_v33  ;;  %v6331_v39 = vadd.f32 %v2354_v62, %v2149_v51  ;;  %v6335_v27 = vadd.f32 %v2368_v24, %v2150_v25  ;;  %3051 = vmatpush.bf16.msrb.mxu2 %v4801_v0 }
 0x709   :  { %v2399_v43 = vadd.f32 %v2391_v50, %v6309_v57  ;;  %v2400_v5 = vadd.f32 %v2392_v14, %v6313_v55  ;;  %v4785_v40 = vor.u32 %v5355_v20, %v4784_v16  ;;  %v4789_v14 = vor.u32 %v5353_v28, %v4786_v19  ;;  %v5388_v19 = vld [vmem:[#allocation10 + $0x320] sm:$0xff] }
 0x70a   :  { %v2405_v56 = vmul.f32 0.7978846, %v2397_v34  ;;  %v2406_v51 = vmul.f32 0.7978846, %v2398_v49  ;;  %v2377_v17 = vmul.f32 %v6331_v39, %v6331_v39  ;;  %v2378_v25 = vmul.f32 %v6335_v27, %v6335_v27  ;;  %3065 = vmatpush.bf16.msrb.mxu3 %v4805_v1 }
 0x70b   :  { %v5544_v58 = vpop.eup %5543  ;;  %v2407_v37 = vmul.f32 0.7978846, %v2399_v43  ;;  %v2408_v60 = vmul.f32 0.7978846, %v2400_v5  ;;  %v1953_v62 = vmul.f32 0.5, %v1952_v47  ;;  %v1964_v49 = vsub.f32 1.5, %v1963_v11 }
 0x70c   :  { %v5546_v54 = vpop.eup %5545  ;;  %5547 = vtanh.f32 %v2405_v56  ;;  %v2385_v12 = vmul.f32 %v2377_v17, %v6331_v39  ;;  %v2386_v15 = vmul.f32 %v2378_v25, %v6335_v27  ;;  %v2419_v50 = vadd.f32 1.0, %v5544_v58  ;;  %3052 = vmatpush.bf16.msrb.mxu2 %v4785_v40  ;;  %v5474_v11 = vld [vmem:[#allocation14 + $0x10] ss:$0 sm:$0xff]  ;;  %v5397_v40 = vld [vmem:[#allocation10 + $0x368] sm:$0xff] }
 0x70d   :  { %5549 = vtanh.f32 %v2406_v51  ;;  %v2420_v24 = vadd.f32 1.0, %v5546_v54  ;;  %v1954_v43 = vsub.f32 1.5, %v1953_v62  ;;  %v1965_v46 = vmul.f32 %v6285_v21, %v1964_v49  ;;  %v5415_v62 = vld [vmem:[#allocation10 + $0x3f8] sm:$0xff] }
 0x70e   :  { %5551 = vtanh.f32 %v2407_v37  ;;  %v2393_v45 = vmul.f32 0.044715, %v2385_v12  ;;  %v2394_v3 = vmul.f32 0.044715, %v2386_v15  ;;  %3066 = vmatpush.bf16.msrb.mxu3 %v4789_v14  ;;  %v2427_v53 = vmul.f32 0.5, %v2419_v50  ;;  %v5396_v50 = vld [vmem:[#allocation10 + $0x360] sm:$0xff] }
 0x70f   :  { %5553 = vtanh.f32 %v2408_v60  ;;  %v2428_v5 = vmul.f32 0.5, %v2420_v24  ;;  %v1955_v36 = vmul.f32 %v6278_v8, %v1954_v43  ;;  %v5407_v14 = vld [vmem:[#allocation10 + $0x3b8] sm:$0xff]  ;;  %v5475_v24 = vld [vmem:[#allocation14 + $0x16] ss:$0 sm:$0xff]  ;;  %v5405_v43 = vld [vmem:[#allocation10 + $0x3a8] sm:$0xff] }
 0x710   :  { %v2401_v2 = vadd.f32 %v2393_v45, %v6331_v39  ;;  %v2402_v18 = vadd.f32 %v2394_v3, %v6335_v27  ;;  %v2435_v51 = vmul.f32 %v2427_v53, %v6271_v52  ;;  %v1969_v52 = vsel %vm1968_vm3, %v6285_v21, %v1965_v46  ;;  %v5473_v3 = vld [vmem:[#allocation14 + $0x8] ss:$0 sm:$0xff]  ;;  %v5386_v53 = vld [vmem:[#allocation10 + $0x310] sm:$0xff] }
 0x711   :  { %v2436_v58 = vmul.f32 %v2428_v5, %v6275_v6  ;;  %v1959_v6 = vsel %vm1958_vm4, %v6278_v8, %v1955_v36  ;;  %v1971_v23 = vmul.f32 %v1969_v52, %v6245_v26  ;;  %v5392_v52 = vld [vmem:[#allocation10 + $0x340] sm:$0xff] }
 0x712   :  { %v5548_v22 = vpop.eup %5547  ;;  %v2409_v9 = vmul.f32 0.7978846, %v2401_v2  ;;  %v2410_v29 = vmul.f32 0.7978846, %v2402_v18  ;;  %v1970_v47 = vmul.f32 %v1959_v6, %v6238_v61  ;;  %v5391_v61 = vld [vmem:[#allocation10 + $0x338] sm:$0xff]  ;;  %v5389_v18 = vld [vmem:[#allocation10 + $0x328] sm:$0xff] }
 0x713   :  { %v5550_v32 = vpop.eup %5549  ;;  %v2421_v59 = vadd.f32 1.0, %v5548_v22  ;;  %v1974_v20 = vmul.f32 %v5473_v3, %v1971_v23  ;;  %v5411_v6 = vld [vmem:[#allocation10 + $0x3d8] sm:$0xff] }
 0x714   :  { %v5552_v34 = vpop.eup %5551  ;;  %5555 = vtanh.f32 %v2409_v9  ;;  %v2422_v4 = vadd.f32 1.0, %v5550_v32  ;;  %v1973_v8 = vmul.f32 %v5473_v3, %v1970_v47  ;;  %v5387_v9 = vld [vmem:[#allocation10 + $0x318] sm:$0xff]  ;;  %v5406_v32 = vld [vmem:[#allocation10 + $0x3b0] sm:$0xff] }
 0x715   :  { %v5554_v35 = vpop.eup %5553  ;;  %v2423_v41 = vadd.f32 1.0, %v5552_v34  ;;  %5557 = vtanh.f32 %v2410_v29  ;;  %v2429_v63 = vmul.f32 0.5, %v2421_v59  ;;  %v6371_v2 = vadd.f32 %v5474_v11, %v1974_v20  ;;  %v5395_v29 = vld [vmem:[#allocation10 + $0x358] sm:$0xff]  ;;  %v5414_v34 = vld [vmem:[#allocation10 + $0x3f0] sm:$0xff] }
 0x716   :  { %v2424_v13 = vadd.f32 1.0, %v5554_v35  ;;  %v2430_v54 = vmul.f32 0.5, %v2422_v4  ;;  %v6373_v26 = vadd.f32 %v5474_v11, %v1973_v8  ;;  %v6377_v59 = vld [vmem:[#allocation16 + $0x3] ss:$4 sm:$0xf] }
 0x717   :  { %v2431_v44 = vmul.f32 0.5, %v2423_v41  ;;  %v2437_v12 = vmul.f32 %v2429_v63, %v6299_v7  ;;  %v5394_v41 = vld [vmem:[#allocation10 + $0x350] sm:$0xff]  ;;  %v5385_v4 = vld [vmem:[#allocation10 + $0x308] sm:$0xff]  ;;  %v2849_v36 = vperm.slane %v6377_v59, 0 }
 0x718   :  { %v2432_v56 = vmul.f32 0.5, %v2424_v13  ;;  %v2438_v21 = vmul.f32 %v2430_v54, %v6303_v33  ;;  %v2845_v7 = vpack.c.bf16 %v6371_v2, %v6373_v26  ;;  %v5399_v33 = vld [vmem:[#allocation10 + $0x378] sm:$0xff]  ;;  %v5413_v13 = vld [vmem:[#allocation10 + $0x3e8] sm:$0xff] }
 0x719   :  { %v2439_v17 = vmul.f32 %v2431_v44, %v6309_v57  ;;  %v5403_v54 = vld [vmem:[#allocation10 + $0x398] sm:$0xff] }
 0x71a   :  { %v5556_v25 = vpop.eup %5555  ;;  %v2440_v37 = vmul.f32 %v2432_v56, %v6313_v55  ;;  %v5393_v56 = vld [vmem:[#allocation10 + $0x348] sm:$0xff] }
 0x71b   :  { %v5558_v60 = vpop.eup %5557  ;;  %v2425_v0 = vadd.f32 1.0, %v5556_v25  ;;  %v2508_v48 = vpack.c.bf16 %v2439_v17, %v2435_v51  ;;  %v5404_v51 = vld [vmem:[#allocation10 + $0x3a0] sm:$0xff] }
 0x71c   :  { %v2426_v57 = vadd.f32 1.0, %v5558_v60  ;;  %v2509_v10 = vpack.c.bf16 %v2440_v37, %v2436_v58  ;;  %v5412_v58 = vld [vmem:[#allocation10 + $0x3e0] sm:$0xff]  ;;  %v2850_v37 = vperm.slane %v6377_v59, 1 }
 0x71d   :  { %v2433_v30 = vmul.f32 0.5, %v2425_v0  ;;  %2714 = vmatmul.bf16.vlgmr.msra.gmra.mxu0 %v2508_v48  ;;  %v5384_v48 = vld [vmem:[#allocation10 + $0x300] sm:$0xff] }
 0x71e   :  { %v2434_v55 = vmul.f32 0.5, %v2426_v57  ;;  %2728 = vmatmul.bf16.vlgmr.msra.gmra.mxu1 %v2509_v10  ;;  %3408 = vmatpush.bf16.msra.mxu0 %v5391_v61  ;;  %v5401_v61 = vld [vmem:[#allocation10 + $0x388] sm:$0xff] }
 0x71f   :  { %v2441_v15 = vmul.f32 %v2433_v30, %v6331_v39  ;;  %3422 = vmatpush.bf16.msra.mxu1 %v5399_v33  ;;  %v5390_v39 = vld [vmem:[#allocation10 + $0x330] sm:$0xff]  ;;  %v5409_v33 = vld [vmem:[#allocation10 + $0x3c8] sm:$0xff] }
 0x720   :  { %v2442_v1 = vmul.f32 %v2434_v55, %v6335_v27  ;;  %v5398_v27 = vld [vmem:[#allocation10 + $0x370] sm:$0xff] }
 0x721   :  { %v2510_v45 = vpack.c.bf16 %v2441_v15, %v2437_v12 }
 0x722   :  { %v2511_v16 = vpack.c.bf16 %v2442_v1, %v2438_v21  ;;  %3409 = vmatpush.bf16.msra.mxu0 %v5390_v39  ;;  %v5402_v1 = vld [vmem:[#allocation10 + $0x390] sm:$0xff] }
 0x723   :  { %2742 = vmatmul.bf16.vlgmr.msra.gmra.mxu2 %v2510_v45  ;;  %3423 = vmatpush.bf16.msra.mxu1 %v5398_v27 }
 0x724   :  { %2756 = vmatmul.bf16.vlgmr.msra.gmra.mxu3 %v2511_v16  ;;  %3436 = vmatpush.bf16.msra.mxu2 %v5407_v14  ;;  %v2852_v14 = vperm.slane %v6377_v59, 3 }
 0x725   :  { %3450 = vmatpush.bf16.msra.mxu3 %v5415_v62 }
 0x726   :  { %3410 = vmatpush.bf16.msra.mxu0 %v5389_v18 }
 0x727   :  { %3424 = vmatpush.bf16.msra.mxu1 %v5397_v40 }
 0x728   :  { %3437 = vmatpush.bf16.msra.mxu2 %v5406_v32  ;;  %v5408_v32 = vld [vmem:[#allocation10 + $0x3c0] sm:$0xff] }
 0x729   :  { %3451 = vmatpush.bf16.msra.mxu3 %v5414_v34 }
 0x72a   :  { %3411 = vmatpush.bf16.msra.mxu0 %v5388_v19 }
 0x72b   :  { %3425 = vmatpush.bf16.msra.mxu1 %v5396_v50 }
 0x72c   :  { %3438 = vmatpush.bf16.msra.mxu2 %v5405_v43 }
 0x72d   :  { %3025 = vmatmul.bf16.vlgmr.msrb.gmra.mxu0 %v2845_v7  ;;  %3452 = vmatpush.bf16.msra.mxu3 %v5413_v13 }
 0x72e   :  { %3039 = vmatmul.bf16.vlgmr.msrb.gmra.mxu1 %v2845_v7  ;;  %3412 = vmatpush.bf16.msra.mxu0 %v5387_v9 }
 0x72f   :  { %3426 = vmatpush.bf16.msra.mxu1 %v5395_v29  ;;  %v5400_v29 = vld [vmem:[#allocation10 + $0x380] sm:$0xff] }
 0x730   :  { %3439 = vmatpush.bf16.msra.mxu2 %v5404_v51 }
 0x731   :  { %3453 = vmatpush.bf16.msra.mxu3 %v5412_v58 }
 0x732   :  { %3413 = vmatpush.bf16.msra.mxu0 %v5386_v53 }
 0x733   :  { %3053 = vmatmul.bf16.vlgmr.msrb.gmra.mxu2 %v2845_v7  ;;  %3427 = vmatpush.bf16.msra.mxu1 %v5394_v41 }
 0x734   :  { %3067 = vmatmul.bf16.vlgmr.msrb.gmra.mxu3 %v2845_v7  ;;  %3440 = vmatpush.bf16.msra.mxu2 %v5403_v54 }
 0x735   :  { %3454 = vmatpush.bf16.msra.mxu3 %v5411_v6 }
 0x736   :  { %3414 = vmatpush.bf16.msra.mxu0 %v5385_v4 }
 0x737   :  { %3428 = vmatpush.bf16.msra.mxu1 %v5393_v56 }
 0x738   :  { %3441 = vmatpush.bf16.msra.mxu2 %v5402_v1 }
 0x73a   :  { %3415 = vmatpush.bf16.msra.mxu0 %v5384_v48 }
 0x73b   :  { %3429 = vmatpush.bf16.msra.mxu1 %v5392_v52 }
 0x73c   :  { %3442 = vmatpush.bf16.msra.mxu2 %v5401_v61 }
 0x740   :  { %3443 = vmatpush.bf16.msra.mxu2 %v5400_v29 }
 0x79a   :  { %v2715_v28 = vpop.f32.mrf.mxu0 }
 0x79b   :  { %v2729_v22 = vpop.f32.mrf.mxu1  ;;  %v2716_v49 = vadd.f32 %v5475_v24, %v2715_v28  ;;  %v2851_v28 = vperm.slane %v6377_v59, 2 }
 0x79d   :  { %v2730_v44 = vadd.f32 %v2729_v22, %v2716_v49 }
 0x7a2   :  { %v2717_v35 = vpop.f32.mrf.mxu0 }
 0x7a3   :  { %v2731_v5 = vpop.f32.mrf.mxu1  ;;  %v2718_v60 = vadd.f32 %v5475_v24, %v2717_v35 }
 0x7a5   :  { %v2732_v23 = vadd.f32 %v2731_v5, %v2718_v60 }
 0x7a6   :  { %v2743_v46 = vpop.f32.mrf.mxu2 }
 0x7a7   :  { %v2744_v17 = vadd.f32 %v2743_v46, %v2730_v44  ;;  %v2757_v25 = vpop.f32.mrf.mxu3 }
 0x7a9   :  { %v2758_v63 = vadd.f32 %v2757_v25, %v2744_v17 }
 0x7aa   :  { %v3026_v0 = vpop.f32.mrf.mxu0 }
 0x7ab   :  { %v6381_v57 = vadd.f32 %v3026_v0, %v2849_v36  ;;  %v3040_v10 = vpop.f32.mrf.mxu1  ;;  %v6384_v30 = vadd.f32 %v2758_v63, %v6251_v38  ;;  %v5410_v38 = vld [vmem:[#allocation10 + $0x3d0] sm:$0xff] }
 0x7ac   :  { %v6386_v55 = vadd.f32 %v3040_v10, %v2850_v37  ;;  %3455 = vmatpush.bf16.msra.mxu3 %v5410_v38 }
 0x7ad   :  { %v3073_v12 = vmul.f32 %v6381_v57, %v6381_v57  ;;  %2766 = vadd.xlane.f32.xlu0 %v6384_v30 }
 0x7ae   :  { %v3074_v15 = vmul.f32 %v6386_v55, %v6386_v55  ;;  %v2745_v21 = vpop.f32.mrf.mxu2 }
 0x7af   :  { %v3081_v47 = vmul.f32 %v3073_v12, %v6381_v57  ;;  %v2746_v45 = vadd.f32 %v2745_v21, %v2732_v23  ;;  %v2759_v3 = vpop.f32.mrf.mxu3 }
 0x7b0   :  { %v3082_v16 = vmul.f32 %v3074_v15, %v6386_v55  ;;  %3456 = vmatpush.bf16.msra.mxu3 %v5409_v33 }
 0x7b1   :  { %v3089_v20 = vmul.f32 0.044715, %v3081_v47  ;;  %v2760_v8 = vadd.f32 %v2759_v3, %v2746_v45 }
 0x7b2   :  { %v3090_v11 = vmul.f32 0.044715, %v3082_v16  ;;  %v3028_v7 = vpop.f32.mrf.mxu0 }
 0x7b3   :  { %v3097_v39 = vadd.f32 %v3089_v20, %v6381_v57  ;;  %v6396_v27 = vadd.f32 %v3028_v7, %v2849_v36  ;;  %v3042_v18 = vpop.f32.mrf.mxu1  ;;  %v6399_v40 = vadd.f32 %v2760_v8, %v6253_v31 }
 0x7b4   :  { %v3098_v19 = vadd.f32 %v3090_v11, %v6386_v55  ;;  %v6403_v50 = vadd.f32 %v3042_v18, %v2850_v37  ;;  %3457 = vmatpush.bf16.msra.mxu3 %v5408_v32 }
 0x7b5   :  { %v3105_v22 = vmul.f32 0.7978846, %v3097_v39  ;;  %v3077_v62 = vmul.f32 %v6396_v27, %v6396_v27  ;;  %2768 = vadd.xlane.f32.xlu1 %v6399_v40 }
 0x7b6   :  { %v3106_v24 = vmul.f32 0.7978846, %v3098_v19  ;;  %v3078_v31 = vmul.f32 %v6403_v50, %v6403_v50  ;;  %v3054_v9 = vpop.f32.mrf.mxu2 }
 0x7b7   :  { %v3085_v34 = vmul.f32 %v3077_v62, %v6396_v27  ;;  %v6412_v49 = vadd.f32 %v3054_v9, %v2851_v28  ;;  %v3068_v35 = vpop.f32.mrf.mxu3  ;;  %5559 = vtanh.f32 %v3105_v22 }
 0x7b8   :  { %v3086_v53 = vmul.f32 %v3078_v31, %v6403_v50  ;;  %v6415_v41 = vadd.f32 %v3068_v35, %v2852_v14  ;;  %5561 = vtanh.f32 %v3106_v24 }
 0x7b9   :  { %v3093_v43 = vmul.f32 0.044715, %v3085_v34  ;;  %v3075_v5 = vmul.f32 %v6412_v49, %v6412_v49 }
 0x7ba   :  { %v3094_v13 = vmul.f32 0.044715, %v3086_v53  ;;  %v3076_v59 = vmul.f32 %v6415_v41, %v6415_v41 }
 0x7bb   :  { %v3101_v44 = vadd.f32 %v3093_v43, %v6396_v27  ;;  %v3083_v46 = vmul.f32 %v3075_v5, %v6412_v49 }
 0x7bc   :  { %v3102_v4 = vadd.f32 %v3094_v13, %v6403_v50  ;;  %v3084_v56 = vmul.f32 %v3076_v59, %v6415_v41 }
 0x7bd   :  { %v3109_v51 = vmul.f32 0.7978846, %v3101_v44  ;;  %v3091_v17 = vmul.f32 0.044715, %v3083_v46  ;;  %v5560_v37 = vpop.eup %5559 }
 0x7be   :  { %v3110_v25 = vmul.f32 0.7978846, %v3102_v4  ;;  %v3092_v36 = vmul.f32 0.044715, %v3084_v56  ;;  %v3056_v58 = vpop.f32.mrf.mxu2  ;;  %v5562_v48 = vpop.eup %5561  ;;  %v3121_v23 = vadd.f32 1.0, %v5560_v37 }
 0x7bf   :  { %5563 = vtanh.f32 %v3109_v51  ;;  %v3099_v60 = vadd.f32 %v3091_v17, %v6412_v49  ;;  %v3057_v63 = vadd.f32 %v3056_v58, %v2851_v28  ;;  %v3070_v0 = vpop.f32.mrf.mxu3  ;;  %v3122_v21 = vadd.f32 1.0, %v5562_v48 }
 0x7c0   :  { %5565 = vtanh.f32 %v3110_v25  ;;  %v3100_v52 = vadd.f32 %v3092_v36, %v6415_v41  ;;  %v3071_v54 = vadd.f32 %v3070_v0, %v2852_v14  ;;  %v3129_v16 = vmul.f32 0.5, %v3121_v23 }
 0x7c1   :  { %v3107_v10 = vmul.f32 0.7978846, %v3099_v60  ;;  %v3079_v6 = vmul.f32 %v3057_v63, %v3057_v63  ;;  %v3130_v11 = vmul.f32 0.5, %v3122_v21 }
 0x7c2   :  { %v3108_v12 = vmul.f32 0.7978846, %v3100_v52  ;;  %v3080_v15 = vmul.f32 %v3071_v54, %v3071_v54  ;;  %v3137_v19 = vmul.f32 %v3129_v16, %v6381_v57 }
 0x7c3   :  { %v3087_v1 = vmul.f32 %v3079_v6, %v3057_v63  ;;  %5567 = vtanh.f32 %v3107_v10  ;;  %v3138_v24 = vmul.f32 %v3130_v11, %v6386_v55 }
 0x7c4   :  { %v3088_v38 = vmul.f32 %v3080_v15, %v3071_v54  ;;  %5569 = vtanh.f32 %v3108_v12 }
 0x7c5   :  { %v5564_v47 = vpop.eup %5563  ;;  %v3095_v45 = vmul.f32 0.044715, %v3087_v1 }
 0x7c6   :  { %v5566_v3 = vpop.eup %5565  ;;  %v3125_v20 = vadd.f32 1.0, %v5564_v47  ;;  %v3096_v8 = vmul.f32 0.044715, %v3088_v38 }
 0x7c7   :  { %v3126_v7 = vadd.f32 1.0, %v5566_v3  ;;  %v3103_v61 = vadd.f32 %v3095_v45, %v3057_v63 }
 0x7c8   :  { %v3133_v33 = vmul.f32 0.5, %v3125_v20  ;;  %v3104_v39 = vadd.f32 %v3096_v8, %v3071_v54  ;;  %v5423_v8 = vld [vmem:[#allocation11 + $0x38] sm:$0xff] }
 0x7c9   :  { %v3134_v18 = vmul.f32 0.5, %v3126_v7  ;;  %v3111_v28 = vmul.f32 0.7978846, %v3103_v61  ;;  %v5568_v62 = vpop.eup %5567  ;;  %3650 = vmatpush.bf16.msrb.mxu0 %v5423_v8  ;;  %v5421_v61 = vld [vmem:[#allocation11 + $0x28] sm:$0xff] }
 0x7ca   :  { %v3141_v14 = vmul.f32 %v3133_v33, %v6396_v27  ;;  %v3112_v22 = vmul.f32 0.7978846, %v3104_v39  ;;  %v5570_v9 = vpop.eup %5569  ;;  %v3123_v34 = vadd.f32 1.0, %v5568_v62  ;;  %v5420_v33 = vld [vmem:[#allocation11 + $0x20] sm:$0xff]  ;;  %v5419_v39 = vld [vmem:[#allocation11 + $0x18] sm:$0xff] }
 0x7cb   :  { %v3142_v31 = vmul.f32 %v3134_v18, %v6403_v50  ;;  %5571 = vtanh.f32 %v3111_v28  ;;  %v3124_v35 = vadd.f32 1.0, %v5570_v9 }
 0x7cc   :  { %5573 = vtanh.f32 %v3112_v22  ;;  %v3210_v29 = vpack.c.bf16 %v3141_v14, %v3137_v19  ;;  %v3131_v57 = vmul.f32 0.5, %v3123_v34  ;;  %v5417_v14 = vld [vmem:[#allocation11 + $0x8] sm:$0xff] }
 0x7cd   :  { %v3211_v32 = vpack.c.bf16 %v3142_v31, %v3138_v24  ;;  %v3132_v27 = vmul.f32 0.5, %v3124_v35  ;;  %v5416_v24 = vld [vmem:[#allocation11] sm:$0xff] }
 0x7ce   :  { %3416 = vmatmul.bf16.vlgmr.msra.gmra.mxu0 %v3210_v29  ;;  %v3139_v55 = vmul.f32 %v3131_v57, %v6412_v49  ;;  %v5476_v49 = vld [vmem:[#allocation14 + $0x17] ss:$0 sm:$0xff] }
 0x7cf   :  { %3430 = vmatmul.bf16.vlgmr.msra.gmra.mxu1 %v3211_v32  ;;  %v3140_v46 = vmul.f32 %v3132_v27, %v6415_v41 }
 0x7d1   :  { %v5572_v53 = vpop.eup %5571 }
 0x7d2   :  { %v5574_v43 = vpop.eup %5573  ;;  %v3127_v5 = vadd.f32 1.0, %v5572_v53 }
 0x7d3   :  { %v3128_v13 = vadd.f32 1.0, %v5574_v43 }
 0x7d4   :  { %v3135_v59 = vmul.f32 0.5, %v3127_v5 }
 0x7d5   :  { %v3136_v44 = vmul.f32 0.5, %v3128_v13 }
 0x7d6   :  { %v3143_v50 = vmul.f32 %v3135_v59, %v3057_v63 }
 0x7d7   :  { %v3144_v4 = vmul.f32 %v3136_v44, %v3071_v54 }
 0x7d8   :  { %v3212_v56 = vpack.c.bf16 %v3143_v50, %v3139_v55 }
 0x7d9   :  { %v3213_v51 = vpack.c.bf16 %v3144_v4, %v3140_v46  ;;  %v5477_v4 = vld [vmem:[#allocation14 + $0xa] ss:$0 sm:$0xff] }
 0x7da   :  { %3444 = vmatmul.bf16.vlgmr.msra.gmra.mxu2 %v3212_v56 }
 0x7db   :  { %3458 = vmatmul.bf16.vlgmr.msra.gmra.mxu3 %v3213_v51 }
 0x820   :  { %v2767_v17 = vpop.xlane.xlu0 %2766 }
 0x821   :  { %v2770_v25 = vmul.f32 %v2767_v17, %v5966_v42 }
 0x823   :  { %v6435_v36 = vsub.f32 %v6384_v30, %v2770_v25 }
 0x825   :  { %v2774_v58 = vmul.f32 %v6435_v36, %v6435_v36 }
 0x827   :  { %2776 = vadd.xlane.f32.xlu1 %v2774_v58  ;;  %v5478_v58 = vld [vmem:[#allocation14 + $0x12] ss:$0 sm:$0xff] }
 0x828   :  { %v2769_v10 = vpop.xlane.xlu1 %2768 }
 0x829   :  { %v2771_v12 = vmul.f32 %v2769_v10, %v5966_v42  ;;  %v5431_v10 = vld [vmem:[#allocation11 + $0x78] sm:$0xff] }
 0x82a   :  { %3664 = vmatpush.bf16.msrb.mxu1 %v5431_v10 }
 0x82b   :  { %v6442_v38 = vsub.f32 %v6399_v40, %v2771_v12  ;;  %v5428_v12 = vld [vmem:[#allocation11 + $0x60] sm:$0xff] }
 0x82d   :  { %v2775_v20 = vmul.f32 %v6442_v38, %v6442_v38 }
 0x84b   :  { %v3417_v37 = vpop.f32.mrf.mxu0 }
 0x84c   :  { %v3418_v60 = vadd.f32 %v5476_v49, %v3417_v37  ;;  %v3431_v63 = vpop.f32.mrf.mxu1 }
 0x84e   :  { %v3432_v41 = vadd.f32 %v3431_v63, %v3418_v60 }
 0x853   :  { %v3419_v0 = vpop.f32.mrf.mxu0 }
 0x854   :  { %v3420_v6 = vadd.f32 %v5476_v49, %v3419_v0  ;;  %v3433_v15 = vpop.f32.mrf.mxu1  ;;  %v5595_v0 = vld [vmem:[#allocation2] sm:$0xff] }
 0x856   :  { %v3434_v21 = vadd.f32 %v3433_v15, %v3420_v6  ;;  %v5430_v6 = vld [vmem:[#allocation11 + $0x70] sm:$0xff] }
 0x857   :  { %3665 = vmatpush.bf16.msrb.mxu1 %v5430_v6  ;;  %v5426_v15 = vld [vmem:[#allocation11 + $0x50] sm:$0xff] }
 0x85d   :  { %v3445_v48 = vpop.f32.mrf.mxu2 }
 0x85e   :  { %v3446_v52 = vadd.f32 %v3445_v48, %v3432_v41  ;;  %v3459_v54 = vpop.f32.mrf.mxu3 }
 0x860   :  { %v3460_v23 = vadd.f32 %v3459_v54, %v3446_v52  ;;  %v5596_v52 = vld [vmem:[#allocation2 + $0x8] sm:$0xff] }
 0x862   :  { %v3464_v30 = vadd.f32 %v3460_v23, %v6373_v26  ;;  %v5422_v26 = vld [vmem:[#allocation11 + $0x30] sm:$0xff]  ;;  %v5429_v23 = vld [vmem:[#allocation11 + $0x68] sm:$0xff] }
 0x863   :  { %3651 = vmatpush.bf16.msrb.mxu0 %v5422_v26  ;;  %3666 = vmatpush.bf16.msrb.mxu1 %v5429_v23 }
 0x864   :  { %3468 = vadd.xlane.f32.xlu2 %v3464_v30 }
 0x865   :  { %v3447_v1 = vpop.f32.mrf.mxu2 }
 0x866   :  { %v3448_v47 = vadd.f32 %v3447_v1, %v3434_v21  ;;  %v3461_v45 = vpop.f32.mrf.mxu3 }
 0x867   :  { %3652 = vmatpush.bf16.msrb.mxu0 %v5421_v61  ;;  %3667 = vmatpush.bf16.msrb.mxu1 %v5428_v12 }
 0x868   :  { %v3462_v3 = vadd.f32 %v3461_v45, %v3448_v47  ;;  %v5424_v45 = vld [vmem:[#allocation11 + $0x40] sm:$0xff] }
 0x86a   :  { %v3465_v16 = vadd.f32 %v3462_v3, %v6371_v2  ;;  %v5418_v2 = vld [vmem:[#allocation11 + $0x10] sm:$0xff] }
 0x86b   :  { %3653 = vmatpush.bf16.msrb.mxu0 %v5420_v33 }
 0x86c   :  { %3470 = vadd.xlane.f32.xlu0 %v3465_v16  ;;  %2778 = vadd.xlane.f32.xlu2 %v2775_v20 }
 0x86f   :  { %3654 = vmatpush.bf16.msrb.mxu0 %v5419_v39 }
 0x873   :  { %3655 = vmatpush.bf16.msrb.mxu0 %v5418_v2 }
 0x877   :  { %3656 = vmatpush.bf16.msrb.mxu0 %v5417_v14 }
 0x87b   :  { %3657 = vmatpush.bf16.msrb.mxu0 %v5416_v24 }
 0x89a   :  { %v2777_v11 = vpop.xlane.xlu1 %2776 }
 0x89b   :  { %v2780_v7 = vmul.f32 %v2777_v11, %v5966_v42 }
 0x89d   :  { %v2782_v40 = vadd.f32 1e-05, %v2780_v7 }
 0x89f   :  { %5575 = vrsqrt.f32 %v2782_v40  ;;  %vm2790_vm6 = vweird.f32 %v2782_v40 }
 0x8a5   :  { %v5576_v18 = vpop.eup %5575 }
 0x8a6   :  { %v2785_v22 = vmul.f32 %v5576_v18, %v2782_v40  ;;  %vm2791_vm5 = vweird.f32 %v5576_v18 }
 0x8a7   :  { %vm2792_vm7 = vmor %vm2790_vm6, %vm2791_vm5 }
 0x8a8   :  { %v2786_v9 = vmul.f32 %v5576_v18, %v2785_v22 }
 0x8aa   :  { %v2787_v53 = vmul.f32 0.5, %v2786_v9  ;;  %v5480_v9 = vld [vmem:[#allocation14 + $0x13] ss:$0 sm:$0xff] }
 0x8ac   :  { %v2788_v27 = vsub.f32 1.5, %v2787_v53 }
 0x8ae   :  { %v2789_v13 = vmul.f32 %v5576_v18, %v2788_v27  ;;  %v5598_v27 = vld [vmem:[#allocation5 + $0x8] sm:$0xff] }
 0x8b0   :  { %v2793_v55 = vsel %vm2792_vm7, %v5576_v18, %v2789_v13 }
 0x8b1   :  { %v2804_v56 = vmul.f32 %v2793_v55, %v6435_v36  ;;  %v5437_v55 = vld [vmem:[#allocation13 + $0x28] sm:$0xff] }
 0x8b3   :  { %v2807_v25 = vmul.f32 %v5477_v4, %v2804_v56  ;;  %v5435_v56 = vld [vmem:[#allocation13 + $0x18] sm:$0xff] }
 0x8b5   :  { %v2810_v63 = vadd.f32 %v5478_v58, %v2807_v25  ;;  %v5434_v25 = vld [vmem:[#allocation13 + $0x10] sm:$0xff] }
 0x8b7   :  { %v6461_v48 = vadd.f32 %v5595_v0, %v2810_v63  ;;  %v5432_v0 = vld [vmem:[#allocation13] sm:$0xff] }
 0x8d7   :  { %v3469_v28 = vpop.xlane.xlu2 %3468 }
 0x8d8   :  { %v3472_v19 = vmul.f32 %v3469_v28, %v5966_v42 }
 0x8da   :  { %v6449_v62 = vsub.f32 %v3464_v30, %v3472_v19  ;;  %v5427_v30 = vld [vmem:[#allocation11 + $0x58] sm:$0xff]  ;;  %v5479_v19 = vld [vmem:[#allocation14 + $0xb] ss:$0 sm:$0xff] }
 0x8db   :  { %3668 = vmatpush.bf16.msrb.mxu1 %v5427_v30 }
 0x8dc   :  { %v3476_v31 = vmul.f32 %v6449_v62, %v6449_v62 }
 0x8de   :  { %3478 = vadd.xlane.f32.xlu0 %v3476_v31 }
 0x8df   :  { %v3471_v29 = vpop.xlane.xlu0 %3470  ;;  %v2779_v32 = vpop.xlane.xlu2 %2778  ;;  %3669 = vmatpush.bf16.msrb.mxu1 %v5426_v15 }
 0x8e0   :  { %v3473_v34 = vmul.f32 %v3471_v29, %v5966_v42  ;;  %v2781_v35 = vmul.f32 %v2779_v32, %v5966_v42 }
 0x8e2   :  { %v6455_v43 = vsub.f32 %v3465_v16, %v3473_v34  ;;  %v2783_v57 = vadd.f32 1e-05, %v2781_v35 }
 0x8e4   :  { %5577 = vrsqrt.f32 %v2783_v57  ;;  %v3477_v5 = vmul.f32 %v6455_v43, %v6455_v43  ;;  %vm2800_vm9 = vweird.f32 %v2783_v57 }
 0x8e6   :  { %3480 = vadd.xlane.f32.xlu1 %v3477_v5 }
 0x8ea   :  { %v5578_v59 = vpop.eup %5577 }
 0x8eb   :  { %v2795_v44 = vmul.f32 %v5578_v59, %v2783_v57  ;;  %vm2801_vm8 = vweird.f32 %v5578_v59  ;;  %v5597_v57 = vld [vmem:[#allocation5] sm:$0xff] }
 0x8ec   :  { %vm2802_vm10 = vmor %vm2800_vm9, %vm2801_vm8 }
 0x8ed   :  { %v2796_v50 = vmul.f32 %v5578_v59, %v2795_v44  ;;  %v5438_v44 = vld [vmem:[#allocation13 + $0x30] sm:$0xff] }
 0x8ef   :  { %v2797_v46 = vmul.f32 0.5, %v2796_v50  ;;  %v5481_v50 = vld [vmem:[#allocation14 + $0x18] ss:$0 sm:$0xff] }
 0x8f1   :  { %v2798_v51 = vsub.f32 1.5, %v2797_v46  ;;  %v5436_v46 = vld [vmem:[#allocation13 + $0x20] sm:$0xff] }
 0x8f3   :  { %v2799_v17 = vmul.f32 %v5578_v59, %v2798_v51 }
 0x8f5   :  { %v2803_v37 = vsel %vm2802_vm10, %v5578_v59, %v2799_v17  ;;  %v5439_v59 = vld [vmem:[#allocation13 + $0x38] sm:$0xff] }
 0x8f6   :  { %v2805_v49 = vmul.f32 %v2803_v37, %v6442_v38  ;;  %v5425_v38 = vld [vmem:[#allocation11 + $0x48] sm:$0xff]  ;;  %3791 = vmatpush.bf16.msrb.mxu2 %v5439_v59 }
 0x8f7   :  { %3670 = vmatpush.bf16.msrb.mxu1 %v5425_v38 }
 0x8f8   :  { %v2808_v60 = vmul.f32 %v5477_v4, %v2805_v49  ;;  %v5433_v49 = vld [vmem:[#allocation13 + $0x8] sm:$0xff] }
 0x8fa   :  { %v2811_v41 = vadd.f32 %v5478_v58, %v2808_v60  ;;  %3792 = vmatpush.bf16.msrb.mxu2 %v5438_v44 }
 0x8fb   :  { %3671 = vmatpush.bf16.msrb.mxu1 %v5424_v45 }
 0x8fc   :  { %v6463_v54 = vadd.f32 %v5596_v52, %v2811_v41 }
 0x8fe   :  { %v3550_v36 = vpack.c.bf16 %v6463_v54, %v6461_v48  ;;  %3793 = vmatpush.bf16.msrb.mxu2 %v5437_v55 }
 0x900   :  { %3658 = vmatmul.bf16.vlgmr.msrb.gmra.mxu0 %v3550_v36 }
 0x902   :  { %3794 = vmatpush.bf16.msrb.mxu2 %v5436_v46 }
 0x906   :  { %3795 = vmatpush.bf16.msrb.mxu2 %v5435_v56 }
 0x90a   :  { %3796 = vmatpush.bf16.msrb.mxu2 %v5434_v25 }
 0x90e   :  { %3797 = vmatpush.bf16.msrb.mxu2 %v5433_v49 }
 0x912   :  { %3798 = vmatpush.bf16.msrb.mxu2 %v5432_v0 }
 0x951   :  { %v3479_v21 = vpop.xlane.xlu0 %3478 }
 0x952   :  { %v3482_v1 = vmul.f32 %v3479_v21, %v5966_v42 }
 0x954   :  { %v3484_v47 = vadd.f32 1e-05, %v3482_v1 }
 0x956   :  { %5579 = vrsqrt.f32 %v3484_v47  ;;  %vm3492_vm12 = vweird.f32 %v3484_v47 }
 0x959   :  { %v3481_v3 = vpop.xlane.xlu1 %3480 }
 0x95a   :  { %v3483_v16 = vmul.f32 %v3481_v3, %v5966_v42 }
 0x95c   :  { %v5580_v20 = vpop.eup %5579  ;;  %v3485_v8 = vadd.f32 1e-05, %v3483_v16 }
 0x95d   :  { %v3487_v26 = vmul.f32 %v5580_v20, %v3484_v47  ;;  %vm3493_vm11 = vweird.f32 %v5580_v20 }
 0x95e   :  { %5581 = vrsqrt.f32 %v3485_v8  ;;  %vm3494_vm13 = vmor %vm3492_vm12, %vm3493_vm11  ;;  %vm3502_vm15 = vweird.f32 %v3485_v8 }
 0x95f   :  { %v3488_v11 = vmul.f32 %v5580_v20, %v3487_v26 }
 0x961   :  { %v3489_v7 = vmul.f32 0.5, %v3488_v11 }
 0x963   :  { %v3490_v61 = vsub.f32 1.5, %v3489_v7 }
 0x964   :  { %v5582_v40 = vpop.eup %5581 }
 0x965   :  { %v3491_v33 = vmul.f32 %v5580_v20, %v3490_v61  ;;  %v3497_v39 = vmul.f32 %v5582_v40, %v3485_v8  ;;  %vm3503_vm14 = vweird.f32 %v5582_v40 }
 0x966   :  { %vm3504_vm0 = vmor %vm3502_vm15, %vm3503_vm14 }
 0x967   :  { %v3495_v2 = vsel %vm3494_vm13, %v5580_v20, %v3491_v33  ;;  %v3498_v18 = vmul.f32 %v5582_v40, %v3497_v39 }
 0x968   :  { %v3506_v14 = vmul.f32 %v3495_v2, %v6449_v62 }
 0x969   :  { %v3499_v28 = vmul.f32 0.5, %v3498_v18 }
 0x96a   :  { %v3509_v31 = vmul.f32 %v5479_v19, %v3506_v14 }
 0x96b   :  { %v3500_v22 = vsub.f32 1.5, %v3499_v28 }
 0x96c   :  { %v3512_v35 = vadd.f32 %v5480_v9, %v3509_v31 }
 0x96d   :  { %v3501_v24 = vmul.f32 %v5582_v40, %v3500_v22 }
 0x96e   :  { %v6471_v5 = vadd.f32 %v5597_v57, %v3512_v35 }
 0x96f   :  { %v3505_v29 = vsel %vm3504_vm0, %v5582_v40, %v3501_v24 }
 0x970   :  { %v3507_v32 = vmul.f32 %v3505_v29, %v6455_v43 }
 0x972   :  { %v3510_v34 = vmul.f32 %v5479_v19, %v3507_v32  ;;  %v5482_v32 = vld [vmem:[#allocation14 + $0x19] ss:$0 sm:$0xff] }
 0x974   :  { %v3513_v53 = vadd.f32 %v5480_v9, %v3510_v34 }
 0x976   :  { %v6473_v13 = vadd.f32 %v5598_v27, %v3513_v53 }
 0x978   :  { %v3551_v62 = vpack.c.bf16 %v6473_v13, %v6471_v5 }
 0x97a   :  { %3672 = vmatmul.bf16.vlgmr.msrb.gmra.mxu1 %v3551_v62 }
 0x97d   :  { %v3659_v43 = vpop.f32.mrf.mxu0 }
 0x97e   :  { %v3660_v4 = vadd.f32 %v5481_v50, %v3659_v43 }
 0x985   :  { %v3661_v37 = vpop.f32.mrf.mxu0 }
 0x986   :  { %v3662_v60 = vadd.f32 %v5481_v50, %v3661_v37 }
 0x9f7   :  { %v3673_v51 = vpop.f32.mrf.mxu1 }
 0x9f8   :  { %v3674_v17 = vadd.f32 %v3673_v51, %v3660_v4 }
 0x9fa   :  { %v5094_v58 = vmul.f32 -1.442695, %v3674_v17 }
 0x9fc   :  { %5583 = vpow2.f32 %v5094_v58 }
 0x9ff   :  { %v3675_v63 = vpop.f32.mrf.mxu1 }
 0xa00   :  { %v3676_v41 = vadd.f32 %v3675_v63, %v3662_v60 }
 0xa02   :  { %v5584_v52 = vpop.eup %5583  ;;  %v5095_v36 = vmul.f32 -1.442695, %v3676_v41  ;;  %v5483_v41 = vld [vmem:[#allocation14 + $0x1a] ss:$0 sm:$0xff] }
 0xa03   :  { %v3684_v10 = vadd.f32 1.0, %v5584_v52 }
 0xa04   :  { %5585 = vpow2.f32 %v5095_v36 }
 0xa05   :  { %5587 = vrcp.f32 %v3684_v10  ;;  %v3697_v1 = vand.u32 2147483648, %v3684_v10  ;;  %vm3691_vm2 = vweird.f32 %v3684_v10  ;;  %v3695_v47 = vand.u32 2147483647, %v3684_v10 }
 0xa07   :  { %v3698_v20 = vor.u32 1.1754944e-38, %v3697_v1  ;;  %vm3696_vm4 = vcmp.eq.f32.partialorder %v3695_v47, 8.507059e+37 }
 0xa0a   :  { %v5586_v6 = vpop.eup %5585 }
 0xa0b   :  { %v5588_v23 = vpop.eup %5587  ;;  %v3685_v12 = vadd.f32 1.0, %v5586_v6 }
 0xa0c   :  { %v3687_v30 = vmul.f32 %v5588_v23, %v3684_v10  ;;  %vm3692_vm1 = vweird.f32 %v5588_v23  ;;  %v5484_v10 = vld [vmem:[#allocation14 + $0x1b] ss:$0 sm:$0xff] }
 0xa0d   :  { %5589 = vrcp.f32 %v3685_v12  ;;  %vm3693_vm3 = vmor %vm3691_vm2, %vm3692_vm1  ;;  %v3712_v26 = vand.u32 2147483648, %v3685_v12  ;;  %v3710_v61 = vand.u32 2147483647, %v3685_v12  ;;  %vm3706_vm6 = vweird.f32 %v3685_v12 }
 0xa0e   :  { %v3688_v15 = vsub.f32 1.0, %v3687_v30 }
 0xa0f   :  { %v3713_v39 = vor.u32 1.1754944e-38, %v3712_v26  ;;  %vm3711_vm8 = vcmp.eq.f32.partialorder %v3710_v61, 8.507059e+37 }
 0xa10   :  { %v3689_v21 = vmul.f32 %v5588_v23, %v3688_v15 }
 0xa12   :  { %v3690_v38 = vadd.f32 %v5588_v23, %v3689_v21 }
 0xa13   :  { %v5590_v45 = vpop.eup %5589 }
 0xa14   :  { %v3702_v3 = vmul.f32 %v5590_v45, %v3685_v12  ;;  %v3694_v16 = vsel %vm3693_vm3, %v5588_v23, %v3690_v38  ;;  %vm3707_vm5 = vweird.f32 %v5590_v45 }
 0xa15   :  { %v3699_v11 = vsel %vm3696_vm4, %v3698_v20, %v3694_v16  ;;  %vm3708_vm7 = vmor %vm3706_vm6, %vm3707_vm5 }
 0xa16   :  { %v3703_v8 = vsub.f32 1.0, %v3702_v3  ;;  %v3718_v33 = vsub.f32 1.0, %v3699_v11  ;;  %v3716_v14 = vmul.f32 %v3699_v11, %v6461_v48 }
 0xa18   :  { %v3704_v7 = vmul.f32 %v5590_v45, %v3703_v8  ;;  %v3720_v19 = vmul.f32 %v3718_v33, %v6471_v5 }
 0xa1a   :  { %v3705_v40 = vadd.f32 %v5590_v45, %v3704_v7  ;;  %v3722_v31 = vadd.f32 %v3720_v19, %v3716_v14 }
 0xa1c   :  { %v3709_v2 = vsel %vm3708_vm7, %v5590_v45, %v3705_v40 }
 0xa1d   :  { %v3714_v18 = vsel %vm3711_vm8, %v3713_v39, %v3709_v2 }
 0xa1e   :  { %v3719_v28 = vsub.f32 1.0, %v3714_v18  ;;  %v3717_v22 = vmul.f32 %v3714_v18, %v6463_v54 }
 0xa20   :  { %v3721_v24 = vmul.f32 %v3719_v28, %v6473_v13 }
 0xa22   :  { %v3723_v9 = vadd.f32 %v3721_v24, %v3717_v22 }
 0xa24   :  { %v3740_v29 = vpack.c.bf16 %v3723_v9, %v3722_v31 }
 0xa26   :  { %3799 = vmatmul.bf16.vlgmr.msrb.gmra.mxu2 %v3740_v29 }
 0xaa9   :  { %v3800_v34 = vpop.f32.mrf.mxu2 }
 0xaaa   :  { %v3801_v35 = vadd.f32 %v5482_v32, %v3800_v34 }
 0xaac   :  { %3807 = vadd.xlane.f32.xlu2 %v3801_v35 }
 0xab1   :  { %v3802_v53 = vpop.f32.mrf.mxu2 }
 0xab2   :  { %v3803_v57 = vadd.f32 %v5482_v32, %v3802_v53 }
 0xab4   :  { %3809 = vadd.xlane.f32.xlu0 %v3803_v57 }
 0xb1f   :  { %v3808_v27 = vpop.xlane.xlu2 %3807 }
 0xb20   :  { %v3811_v5 = vmul.f32 %v3808_v27, %v5966_v42 }
 0xb22   :  { %v3813_v62 = vsub.f32 %v3801_v35, %v3811_v5 }
 0xb24   :  { %v3815_v48 = vmul.f32 %v3813_v62, %v3813_v62 }
 0xb26   :  { %3817 = vadd.xlane.f32.xlu1 %v3815_v48 }
 0xb27   :  { %v3810_v54 = vpop.xlane.xlu0 %3809 }
 0xb28   :  { %v3812_v13 = vmul.f32 %v3810_v54, %v5966_v42 }
 0xb2a   :  { %v3814_v59 = vsub.f32 %v3803_v57, %v3812_v13 }
 0xb2c   :  { %v3816_v44 = vmul.f32 %v3814_v59, %v3814_v59 }
 0xb2e   :  { %3819 = vadd.xlane.f32.xlu2 %v3816_v44 }
 0xb99   :  { %v3818_v55 = vpop.xlane.xlu1 %3817 }
 0xb9a   :  { %v3821_v43 = vmul.f32 %v3818_v55, %v5966_v42 }
 0xb9c   :  { %v3823_v50 = vadd.f32 1e-05, %v3821_v43 }
 0xb9e   :  { %5591 = vrsqrt.f32 %v3823_v50  ;;  %vm3831_vm10 = vweird.f32 %v3823_v50 }
 0xba1   :  { %v3820_v46 = vpop.xlane.xlu2 %3819 }
 0xba2   :  { %v3822_v4 = vmul.f32 %v3820_v46, %v5966_v42 }
 0xba4   :  { %v5592_v56 = vpop.eup %5591  ;;  %v3824_v51 = vadd.f32 1e-05, %v3822_v4 }
 0xba5   :  { %v3826_v17 = vmul.f32 %v5592_v56, %v3823_v50  ;;  %vm3832_vm9 = vweird.f32 %v5592_v56 }
 0xba6   :  { %5593 = vrsqrt.f32 %v3824_v51  ;;  %vm3833_vm11 = vmor %vm3831_vm10, %vm3832_vm9  ;;  %vm3841_vm13 = vweird.f32 %v3824_v51 }
 0xba7   :  { %v3827_v25 = vmul.f32 %v5592_v56, %v3826_v17 }
 0xba9   :  { %v3828_v58 = vmul.f32 0.5, %v3827_v25 }
 0xbab   :  { %v3829_v37 = vsub.f32 1.5, %v3828_v58 }
 0xbac   :  { %v5594_v49 = vpop.eup %5593 }
 0xbad   :  { %v3830_v60 = vmul.f32 %v5592_v56, %v3829_v37  ;;  %v3836_v63 = vmul.f32 %v5594_v49, %v3824_v51  ;;  %vm3842_vm12 = vweird.f32 %v5594_v49 }
 0xbae   :  { %vm3843_vm14 = vmor %vm3841_vm13, %vm3842_vm12 }
 0xbaf   :  { %v3834_v0 = vsel %vm3833_vm11, %v5592_v56, %v3830_v60  ;;  %v3837_v52 = vmul.f32 %v5594_v49, %v3836_v63 }
 0xbb0   :  { %v3845_v36 = vmul.f32 %v3834_v0, %v3813_v62 }
 0xbb1   :  { %v3838_v6 = vmul.f32 0.5, %v3837_v52 }
 0xbb2   :  { %v3848_v42 = vmul.f32 %v5483_v41, %v3845_v36 }
 0xbb3   :  { %v3839_v23 = vsub.f32 1.5, %v3838_v6 }
 0xbb4   :  { %v3851_v12 = vadd.f32 %v5484_v10, %v3848_v42 }
 0xbb5   :  { %v3840_v30 = vmul.f32 %v5594_v49, %v3839_v23 }
 0xbb6   :  { %3853 = vst [vmem:[#allocation17] sm:$0xff] %v3851_v12 }
 0xbb7   :  { %v3844_v15 = vsel %vm3843_vm14, %v5594_v49, %v3840_v30 }
 0xbb8   :  { %v3846_v21 = vmul.f32 %v3844_v15, %v3814_v59 }
 0xbba   :  { %v3849_v1 = vmul.f32 %v5483_v41, %v3846_v21 }
 0xbbc   :  { %v3852_v38 = vadd.f32 %v5484_v10, %v3849_v1 }
 0xbbe   :  { %3854 = vst [vmem:[#allocation17 + $0x8] sm:$0xff] %v3852_v38 }
 0xbbf   :  { %3867 = dma.vmem_to_hbm [thread:$0]  %s3860_s29, 256, %s3862_s13, [#allocation4], %s5852_s17, %s5852_s17, %s5853_s18  }
 0xbc0   :  { %5849 = dma.done.wait [#allocation4], 256  }
 0xbc1   :  { %5850 = vsyncadd [#allocation4], 4294967040 }
 0xbc2   :  { %3872 = vsyncpa [#allocation3], 1 }
 0xbc3   :  { %3873 = vsyncpa [#allocation6], 1 }
 0xbc4   :  { %3874 = vsyncpa [#allocation9], 1 }
 0xbc5   :  { %3875 = vsyncpa [#allocation12], 1 }
 0xbc6   :  { %3876 = vsyncpa [#allocation15], 1 }
 0xbc7   :  { %3877 = vsyncpa [#allocation4], 1 }

</bundles_post_ra>
